<compile_context>
chip_gen: v6e
topology: v6e:2x2x1
jax: 0.10.0
libtpu: 0.0.40
codegen_flags: <defaults>
</compile_context>

<pallas_src>
import functools

import jax
import jax.numpy as jnp
from jax import lax
from jax.experimental import pallas as pl
from jax.experimental.pallas import tpu as pltpu


def _round_up(v, m):
    return ((v + m - 1) // m) * m


def _make_kernel(TD, H, W, C_in, K_pad, N_pad):
    """Kernel for one (batch, depth-tile) grid step.

    refs = (slab_0 .. slab_{TD+1}, w_ref, o_ref)
      slab_r : (H+2, W+2, C_in)   padded ORIGINAL-resolution depth slice at
                                  padded depth j*TD + r               (VMEM)
      w_ref  : (K_pad, N_pad)     parity-collapsed weights + bias row (VMEM)
      o_ref  : (TD*H*W, N_pad)    parity-packed, lane-dense output    (VMEM)
    """
    K_core = 27 * C_in

    def kernel(*refs):
        slab_refs = refs[:TD + 2]
        w_ref, o_ref = refs[TD + 2], refs[TD + 3]

        wmat = w_ref[...]                                  # (K_pad, N_pad)
        dt = wmat.dtype

        # Hoisted per-slab 3x3 (kh, kw) tap blocks: each slab's (H*W, 9*C_in)
        # im2col block is built ONCE and reused by every output-depth pair
        # (kd = 0/1/2) that touches that slab.
        # TODO(synk): for small C_in, a (H+2, (W+2)*C_in) lane-folded slab
        # layout with pltpu.roll kw-shifts would raise lane utilization of the
        # slicing phase further.
        tap_blocks = []
        for s in range(TD + 2):
            sl = slab_refs[s][...]                         # (H+2, W+2, C_in)
            cols = [sl[kh:kh + H, kw:kw + W, :].reshape(H * W, C_in)
                    for kh in range(3) for kw in range(3)]
            tap_blocks.append(jnp.concatenate(cols, axis=1))   # (H*W, 9*C_in)

        # Bias pick-up column (ones) + zero pad up to the 128-aligned K.
        extra = [jnp.ones((H * W, 1), dtype=dt)]
        if K_pad - K_core - 1 > 0:
            extra.append(jnp.zeros((H * W, K_pad - K_core - 1), dtype=dt))

        # One big-M im2col: rows (td, h, w), cols ((kd, kh, kw), ci) + bias/pad.
        rows = [jnp.concatenate(
                    [tap_blocks[td], tap_blocks[td + 1], tap_blocks[td + 2]]
                    + extra, axis=1)
                for td in range(TD)]
        lhs = jnp.concatenate(rows, axis=0)                # (TD*H*W, K_pad)

        # Single MXU matmul per grid step (bias is row K_core of wmat).
        acc = jnp.dot(lhs, wmat, preferred_element_type=jnp.float32)
        o_ref[...] = acc.astype(o_ref.dtype)

    return kernel


def _packed_weights(w, b, K_pad, N_pad):
    """Fold the nearest-2x upsample into the 3x3x3 conv weights, append the
    bias row (picked up by the ones column in the im2col) and zero-pad to the
    MXU/lane-aligned (K_pad, N_pad).  Everything stays in float32.

    For output parity p (per axis) and conv tap k', the accessed padded
    ORIGINAL coordinate is base + (p + k' + 1)//2, so the 3 taps collapse onto
    3 padded slab positions per axis via the 0/1 matrix Mp[p, slab, k'].

    Rows: ((kd, kh, kw), ci), then bias row, then zeros.
    Cols: ((pd, ph, pw), co), then zeros.
    """
    C_in, C_out = w.shape[3], w.shape[4]
    Mp = jnp.array([[[1, 0, 0], [0, 1, 1], [0, 0, 0]],
                    [[0, 0, 0], [1, 1, 0], [0, 0, 1]]], dtype=w.dtype)
    Wfull = jnp.einsum('xad,ybe,zcf,defio->abcixyzo', Mp, Mp, Mp, w)
    Wmat = Wfull.reshape(27 * C_in, 8 * C_out)
    bias_row = jnp.tile(b.astype(w.dtype), 8).reshape(1, 8 * C_out)
    Wmat = jnp.concatenate([Wmat, bias_row], axis=0)       # (27*C_in+1, 8*C_out)
    return jnp.pad(Wmat, ((0, K_pad - Wmat.shape[0]), (0, N_pad - 8 * C_out)))


def upsample3d_forward(x, w, b, *, mxu_dtype=jnp.bfloat16):
    """UpSample3D forward: nearest-2x upsample + Conv3d(k=3, s=1, p=1).

    x : (N, C_in, D, H, W)      float32, PyTorch NCDHW convention
    w : (3, 3, 3, C_in, C_out)  conv weights (DHWIO layout)
    b : (C_out,)                bias
    returns (N, C_out, 2D, 2H, 2W)
    """
    N, C_in, D, H, W = x.shape
    C_out = w.shape[-1]

    K_pad = _round_up(27 * C_in + 1, 128)   # im2col + bias column, 128-aligned
    N_pad = _round_up(8 * C_out, 128)       # parity-packed output lanes

    # Depth tile: TD output-depth pairs per grid step.  Larger TD cuts the
    # depth-halo re-fetch overhead ((TD+2)/TD) and amortizes the per-step
    # cost; capped so the im2col stays comfortably inside VMEM (v7x: 64 MiB).
    # TODO(synk): add an H (row) tile with a 1-row halo for very large H*W.
    TD = 1
    for t in (16, 8, 4, 2, 1):
        if D % t == 0 and t * H * W * K_pad * 4 <= (8 << 20):
            TD = t
            break

    # --- glue at ORIGINAL resolution only: NCDHW -> NDHWC, cast, zero-pad ----
    # Cast before the pad so the padded full-volume copy moves bf16 bytes.
    # TODO(synk): fold the 1-voxel border into the kernel (index clamping +
    # masked taps) to remove this extra full-volume pad pass entirely.
    xt = jnp.transpose(x, (0, 2, 3, 4, 1)).astype(mxu_dtype)    # (N,D,H,W,C)
    xp = jnp.pad(xt, ((0, 0), (1, 1), (1, 1), (1, 1), (0, 0)))  # (N,D+2,H+2,W+2,C)

    w_big = _packed_weights(w, b, K_pad, N_pad).astype(mxu_dtype)

    # Grid step (n, j) needs padded depth slices j*TD + r, r = 0 .. TD+1.
    # xp is passed once per offset with a single-slice BlockSpec, so VMEM
    # residency is O(slab) and each slice is pipelined/double-buffered.
    # TODO(synk): replace with a manual rolling slab ring (pl.ANY +
    # pltpu.make_async_copy) to drop the (TD+2)/TD halo re-fetch to ~1x.
    slab_specs = [
        pl.BlockSpec((None, None, H + 2, W + 2, C_in),
                     lambda n, j, r=r: (n, j * TD + r, 0, 0, 0))
        for r in range(TD + 2)
    ]

    out_flat = pl.pallas_call(
        _make_kernel(TD, H, W, C_in, K_pad, N_pad),
        out_shape=jax.ShapeDtypeStruct((N, D * H * W, N_pad), x.dtype),
        grid=(N, D // TD),
        in_specs=slab_specs + [
            # TODO(synk): pipeline_mode=pl.Buffered(1) (constant block index)
            # to single-buffer the weights once channel counts are large.
            pl.BlockSpec((K_pad, N_pad), lambda n, j: (0, 0)),
        ],
        out_specs=pl.BlockSpec((None, TD * H * W, N_pad),
                               lambda n, j: (n, j, 0)),
        compiler_params=pltpu.CompilerParams(
            dimension_semantics=("parallel", "parallel"),
            vmem_limit_bytes=64 * 1024 * 1024),
    )(*([xp] * (TD + 2)), w_big)

    # Drop lane padding, then parity-packed -> NCDHW in the single transpose
    # the PyTorch output layout needed anyway (one fused XLA copy).
    y = out_flat[..., :8 * C_out].reshape(N, D, H, W, 2, 2, 2, C_out)
    y = jnp.transpose(y, (0, 7, 1, 4, 2, 5, 3, 6))   # (n,co,d,pd,h,ph,w,pw)
    return y.reshape(N, C_out, 2 * D, 2 * H, 2 * W)


def _reference_forward(x, w, b):
    """Pure-JAX reference (nearest 2x upsample + SAME 3x3x3 conv), float32."""
    xt = jnp.transpose(x, (0, 2, 3, 4, 1))
    xu = jnp.repeat(jnp.repeat(jnp.repeat(xt, 2, axis=1), 2, axis=2), 2, axis=3)
    out = lax.conv_general_dilated(
        xu, w, window_strides=(1, 1, 1), padding="SAME",
        dimension_numbers=("NDHWC", "DHWIO", "NDHWC"))
    out = out + b[None, None, None, None, :]
    return jnp.transpose(out, (0, 4, 1, 2, 3))


if __name__ == "__main__":
    key = jax.random.PRNGKey(0)
    k_x, k_w, k_b = jax.random.split(key, 3)

    N, C_in, C_out = 2, 4, 8
    D = H = W = 8
    KS = 3

    x = jax.random.normal(k_x, (N, C_in, D, H, W), dtype=jnp.float32)
    fan_in = C_in * KS * KS * KS
    bound = 1.0 / (fan_in ** 0.5)
    w = jax.random.uniform(k_w, (KS, KS, KS, C_in, C_out),
                           minval=-bound, maxval=bound, dtype=jnp.float32)
    b = jax.random.uniform(k_b, (C_out,),
                           minval=-bound, maxval=bound, dtype=jnp.float32)

    ref = jax.block_until_ready(_reference_forward(x, w, b))

    # f32 MXU operands: faithful to the module's float32 semantics.
    fwd_f32 = jax.jit(functools.partial(upsample3d_forward,
                                        mxu_dtype=jnp.float32))
    out_f32 = jax.block_until_ready(fwd_f32(x, w, b))
    assert out_f32.shape == (N, C_out, 2 * D, 2 * H, 2 * W), out_f32.shape
    assert jnp.allclose(out_f32, ref, atol=1e-4, rtol=1e-4), \
        float(jnp.max(jnp.abs(out_f32 - ref)))

    # Default path: bf16 MXU operands (per perf review for v5e/v6e/v7x), f32 acc.
    fwd_bf16 = jax.jit(functools.partial(upsample3d_forward,
                                         mxu_dtype=jnp.bfloat16))
    out_bf16 = jax.block_until_ready(fwd_bf16(x, w, b))
    assert out_bf16.shape == (N, C_out, 2 * D, 2 * H, 2 * W), out_bf16.shape
    assert jnp.allclose(out_bf16, ref, atol=3e-2, rtol=3e-2), \
        float(jnp.max(jnp.abs(out_bf16 - ref)))

    print("KERNEL_OK")
</pallas_src>

<mosaic_0001>
module attributes {stable_mosaic.version = 11 : i64} {
  func.func @kernel(%arg0: i32, %arg1: i32, %arg2: memref<1x1x10x10x4xf32, #tpu.memory_space<vmem>>, %arg3: memref<1x1x10x10x4xf32, #tpu.memory_space<vmem>>, %arg4: memref<1x1x10x10x4xf32, #tpu.memory_space<vmem>>, %arg5: memref<1x1x10x10x4xf32, #tpu.memory_space<vmem>>, %arg6: memref<1x1x10x10x4xf32, #tpu.memory_space<vmem>>, %arg7: memref<1x1x10x10x4xf32, #tpu.memory_space<vmem>>, %arg8: memref<1x1x10x10x4xf32, #tpu.memory_space<vmem>>, %arg9: memref<1x1x10x10x4xf32, #tpu.memory_space<vmem>>, %arg10: memref<1x1x10x10x4xf32, #tpu.memory_space<vmem>>, %arg11: memref<1x1x10x10x4xf32, #tpu.memory_space<vmem>>, %arg12: memref<128x128xf32, #tpu.memory_space<vmem>>, %arg13: memref<1x512x128xf32, #tpu.memory_space<vmem>>) attributes {dimension_semantics = [#tpu.dimension_semantics<parallel>, #tpu.dimension_semantics<parallel>], iteration_bounds = array<i64: 2, 1>, scalar_prefetch = 0 : i64, scratch_operands = 0 : i64, tpu.core_type = #tpu.core_type<tc>, window_params = [{transform_indices = @transform_0, window_bounds = array<i64: 1, 1, 10, 10, 4>}, {transform_indices = @transform_1, window_bounds = array<i64: 1, 1, 10, 10, 4>}, {transform_indices = @transform_2, window_bounds = array<i64: 1, 1, 10, 10, 4>}, {transform_indices = @transform_3, window_bounds = array<i64: 1, 1, 10, 10, 4>}, {transform_indices = @transform_4, window_bounds = array<i64: 1, 1, 10, 10, 4>}, {transform_indices = @transform_5, window_bounds = array<i64: 1, 1, 10, 10, 4>}, {transform_indices = @transform_6, window_bounds = array<i64: 1, 1, 10, 10, 4>}, {transform_indices = @transform_7, window_bounds = array<i64: 1, 1, 10, 10, 4>}, {transform_indices = @transform_8, window_bounds = array<i64: 1, 1, 10, 10, 4>}, {transform_indices = @transform_9, window_bounds = array<i64: 1, 1, 10, 10, 4>}, {pipeline_mode = #tpu.pipeline_mode<synchronous>, transform_indices = @transform_10, window_bounds = array<i64: 128, 128>}, {transform_indices = @transform_11, window_bounds = array<i64: 1, 512, 128>}]} {
    %c0 = arith.constant 0 : index
    %c0_0 = arith.constant 0 : index
    %0 = vector.load %arg12[%c0, %c0_0] : memref<128x128xf32, #tpu.memory_space<vmem>>, vector<128x128xf32>
    %c0_1 = arith.constant 0 : index
    %c0_2 = arith.constant 0 : index
    %c0_3 = arith.constant 0 : index
    %c0_4 = arith.constant 0 : index
    %c0_5 = arith.constant 0 : index
    %1 = vector.load %arg2[%c0_1, %c0_2, %c0_3, %c0_4, %c0_5] : memref<1x1x10x10x4xf32, #tpu.memory_space<vmem>>, vector<1x1x10x10x4xf32>
    %2 = vector.shape_cast %1 : vector<1x1x10x10x4xf32> to vector<10x10x4xf32>
    %3 = vector.extract_strided_slice %2 {offsets = [0, 0, 0], sizes = [8, 8, 4], strides = [1, 1, 1]} : vector<10x10x4xf32> to vector<8x8x4xf32>
    %4 = vector.shape_cast %3 : vector<8x8x4xf32> to vector<64x4xf32>
    %5 = vector.extract_strided_slice %2 {offsets = [0, 1, 0], sizes = [8, 8, 4], strides = [1, 1, 1]} : vector<10x10x4xf32> to vector<8x8x4xf32>
    %6 = vector.shape_cast %5 : vector<8x8x4xf32> to vector<64x4xf32>
    %7 = vector.extract_strided_slice %2 {offsets = [0, 2, 0], sizes = [8, 8, 4], strides = [1, 1, 1]} : vector<10x10x4xf32> to vector<8x8x4xf32>
    %8 = vector.shape_cast %7 : vector<8x8x4xf32> to vector<64x4xf32>
    %9 = vector.extract_strided_slice %2 {offsets = [1, 0, 0], sizes = [8, 8, 4], strides = [1, 1, 1]} : vector<10x10x4xf32> to vector<8x8x4xf32>
    %10 = vector.shape_cast %9 : vector<8x8x4xf32> to vector<64x4xf32>
    %11 = vector.extract_strided_slice %2 {offsets = [1, 1, 0], sizes = [8, 8, 4], strides = [1, 1, 1]} : vector<10x10x4xf32> to vector<8x8x4xf32>
    %12 = vector.shape_cast %11 : vector<8x8x4xf32> to vector<64x4xf32>
    %13 = vector.extract_strided_slice %2 {offsets = [1, 2, 0], sizes = [8, 8, 4], strides = [1, 1, 1]} : vector<10x10x4xf32> to vector<8x8x4xf32>
    %14 = vector.shape_cast %13 : vector<8x8x4xf32> to vector<64x4xf32>
    %15 = vector.extract_strided_slice %2 {offsets = [2, 0, 0], sizes = [8, 8, 4], strides = [1, 1, 1]} : vector<10x10x4xf32> to vector<8x8x4xf32>
    %16 = vector.shape_cast %15 : vector<8x8x4xf32> to vector<64x4xf32>
    %17 = vector.extract_strided_slice %2 {offsets = [2, 1, 0], sizes = [8, 8, 4], strides = [1, 1, 1]} : vector<10x10x4xf32> to vector<8x8x4xf32>
    %18 = vector.shape_cast %17 : vector<8x8x4xf32> to vector<64x4xf32>
    %19 = vector.extract_strided_slice %2 {offsets = [2, 2, 0], sizes = [8, 8, 4], strides = [1, 1, 1]} : vector<10x10x4xf32> to vector<8x8x4xf32>
    %20 = vector.shape_cast %19 : vector<8x8x4xf32> to vector<64x4xf32>
    %21 = tpu.concatenate %4, %6, %8, %10, %12, %14, %16, %18, %20 in 1 : vector<64x4xf32>, vector<64x4xf32>, vector<64x4xf32>, vector<64x4xf32>, vector<64x4xf32>, vector<64x4xf32>, vector<64x4xf32>, vector<64x4xf32>, vector<64x4xf32> -> vector<64x36xf32>
    %c0_6 = arith.constant 0 : index
    %c0_7 = arith.constant 0 : index
    %c0_8 = arith.constant 0 : index
    %c0_9 = arith.constant 0 : index
    %c0_10 = arith.constant 0 : index
    %22 = vector.load %arg3[%c0_6, %c0_7, %c0_8, %c0_9, %c0_10] : memref<1x1x10x10x4xf32, #tpu.memory_space<vmem>>, vector<1x1x10x10x4xf32>
    %23 = vector.shape_cast %22 : vector<1x1x10x10x4xf32> to vector<10x10x4xf32>
    %24 = vector.extract_strided_slice %23 {offsets = [0, 0, 0], sizes = [8, 8, 4], strides = [1, 1, 1]} : vector<10x10x4xf32> to vector<8x8x4xf32>
    %25 = vector.shape_cast %24 : vector<8x8x4xf32> to vector<64x4xf32>
    %26 = vector.extract_strided_slice %23 {offsets = [0, 1, 0], sizes = [8, 8, 4], strides = [1, 1, 1]} : vector<10x10x4xf32> to vector<8x8x4xf32>
    %27 = vector.shape_cast %26 : vector<8x8x4xf32> to vector<64x4xf32>
    %28 = vector.extract_strided_slice %23 {offsets = [0, 2, 0], sizes = [8, 8, 4], strides = [1, 1, 1]} : vector<10x10x4xf32> to vector<8x8x4xf32>
    %29 = vector.shape_cast %28 : vector<8x8x4xf32> to vector<64x4xf32>
    %30 = vector.extract_strided_slice %23 {offsets = [1, 0, 0], sizes = [8, 8, 4], strides = [1, 1, 1]} : vector<10x10x4xf32> to vector<8x8x4xf32>
    %31 = vector.shape_cast %30 : vector<8x8x4xf32> to vector<64x4xf32>
    %32 = vector.extract_strided_slice %23 {offsets = [1, 1, 0], sizes = [8, 8, 4], strides = [1, 1, 1]} : vector<10x10x4xf32> to vector<8x8x4xf32>
    %33 = vector.shape_cast %32 : vector<8x8x4xf32> to vector<64x4xf32>
    %34 = vector.extract_strided_slice %23 {offsets = [1, 2, 0], sizes = [8, 8, 4], strides = [1, 1, 1]} : vector<10x10x4xf32> to vector<8x8x4xf32>
    %35 = vector.shape_cast %34 : vector<8x8x4xf32> to vector<64x4xf32>
    %36 = vector.extract_strided_slice %23 {offsets = [2, 0, 0], sizes = [8, 8, 4], strides = [1, 1, 1]} : vector<10x10x4xf32> to vector<8x8x4xf32>
    %37 = vector.shape_cast %36 : vector<8x8x4xf32> to vector<64x4xf32>
    %38 = vector.extract_strided_slice %23 {offsets = [2, 1, 0], sizes = [8, 8, 4], strides = [1, 1, 1]} : vector<10x10x4xf32> to vector<8x8x4xf32>
    %39 = vector.shape_cast %38 : vector<8x8x4xf32> to vector<64x4xf32>
    %40 = vector.extract_strided_slice %23 {offsets = [2, 2, 0], sizes = [8, 8, 4], strides = [1, 1, 1]} : vector<10x10x4xf32> to vector<8x8x4xf32>
    %41 = vector.shape_cast %40 : vector<8x8x4xf32> to vector<64x4xf32>
    %42 = tpu.concatenate %25, %27, %29, %31, %33, %35, %37, %39, %41 in 1 : vector<64x4xf32>, vector<64x4xf32>, vector<64x4xf32>, vector<64x4xf32>, vector<64x4xf32>, vector<64x4xf32>, vector<64x4xf32>, vector<64x4xf32>, vector<64x4xf32> -> vector<64x36xf32>
    %c0_11 = arith.constant 0 : index
    %c0_12 = arith.constant 0 : index
    %c0_13 = arith.constant 0 : index
    %c0_14 = arith.constant 0 : index
    %c0_15 = arith.constant 0 : index
    %43 = vector.load %arg4[%c0_11, %c0_12, %c0_13, %c0_14, %c0_15] : memref<1x1x10x10x4xf32, #tpu.memory_space<vmem>>, vector<1x1x10x10x4xf32>
    %44 = vector.shape_cast %43 : vector<1x1x10x10x4xf32> to vector<10x10x4xf32>
    %45 = vector.extract_strided_slice %44 {offsets = [0, 0, 0], sizes = [8, 8, 4], strides = [1, 1, 1]} : vector<10x10x4xf32> to vector<8x8x4xf32>
    %46 = vector.shape_cast %45 : vector<8x8x4xf32> to vector<64x4xf32>
    %47 = vector.extract_strided_slice %44 {offsets = [0, 1, 0], sizes = [8, 8, 4], strides = [1, 1, 1]} : vector<10x10x4xf32> to vector<8x8x4xf32>
    %48 = vector.shape_cast %47 : vector<8x8x4xf32> to vector<64x4xf32>
    %49 = vector.extract_strided_slice %44 {offsets = [0, 2, 0], sizes = [8, 8, 4], strides = [1, 1, 1]} : vector<10x10x4xf32> to vector<8x8x4xf32>
    %50 = vector.shape_cast %49 : vector<8x8x4xf32> to vector<64x4xf32>
    %51 = vector.extract_strided_slice %44 {offsets = [1, 0, 0], sizes = [8, 8, 4], strides = [1, 1, 1]} : vector<10x10x4xf32> to vector<8x8x4xf32>
    %52 = vector.shape_cast %51 : vector<8x8x4xf32> to vector<64x4xf32>
    %53 = vector.extract_strided_slice %44 {offsets = [1, 1, 0], sizes = [8, 8, 4], strides = [1, 1, 1]} : vector<10x10x4xf32> to vector<8x8x4xf32>
    %54 = vector.shape_cast %53 : vector<8x8x4xf32> to vector<64x4xf32>
    %55 = vector.extract_strided_slice %44 {offsets = [1, 2, 0], sizes = [8, 8, 4], strides = [1, 1, 1]} : vector<10x10x4xf32> to vector<8x8x4xf32>
    %56 = vector.shape_cast %55 : vector<8x8x4xf32> to vector<64x4xf32>
    %57 = vector.extract_strided_slice %44 {offsets = [2, 0, 0], sizes = [8, 8, 4], strides = [1, 1, 1]} : vector<10x10x4xf32> to vector<8x8x4xf32>
    %58 = vector.shape_cast %57 : vector<8x8x4xf32> to vector<64x4xf32>
    %59 = vector.extract_strided_slice %44 {offsets = [2, 1, 0], sizes = [8, 8, 4], strides = [1, 1, 1]} : vector<10x10x4xf32> to vector<8x8x4xf32>
    %60 = vector.shape_cast %59 : vector<8x8x4xf32> to vector<64x4xf32>
    %61 = vector.extract_strided_slice %44 {offsets = [2, 2, 0], sizes = [8, 8, 4], strides = [1, 1, 1]} : vector<10x10x4xf32> to vector<8x8x4xf32>
    %62 = vector.shape_cast %61 : vector<8x8x4xf32> to vector<64x4xf32>
    %63 = tpu.concatenate %46, %48, %50, %52, %54, %56, %58, %60, %62 in 1 : vector<64x4xf32>, vector<64x4xf32>, vector<64x4xf32>, vector<64x4xf32>, vector<64x4xf32>, vector<64x4xf32>, vector<64x4xf32>, vector<64x4xf32>, vector<64x4xf32> -> vector<64x36xf32>
    %c0_16 = arith.constant 0 : index
    %c0_17 = arith.constant 0 : index
    %c0_18 = arith.constant 0 : index
    %c0_19 = arith.constant 0 : index
    %c0_20 = arith.constant 0 : index
    %64 = vector.load %arg5[%c0_16, %c0_17, %c0_18, %c0_19, %c0_20] : memref<1x1x10x10x4xf32, #tpu.memory_space<vmem>>, vector<1x1x10x10x4xf32>
    %65 = vector.shape_cast %64 : vector<1x1x10x10x4xf32> to vector<10x10x4xf32>
    %66 = vector.extract_strided_slice %65 {offsets = [0, 0, 0], sizes = [8, 8, 4], strides = [1, 1, 1]} : vector<10x10x4xf32> to vector<8x8x4xf32>
    %67 = vector.shape_cast %66 : vector<8x8x4xf32> to vector<64x4xf32>
    %68 = vector.extract_strided_slice %65 {offsets = [0, 1, 0], sizes = [8, 8, 4], strides = [1, 1, 1]} : vector<10x10x4xf32> to vector<8x8x4xf32>
    %69 = vector.shape_cast %68 : vector<8x8x4xf32> to vector<64x4xf32>
    %70 = vector.extract_strided_slice %65 {offsets = [0, 2, 0], sizes = [8, 8, 4], strides = [1, 1, 1]} : vector<10x10x4xf32> to vector<8x8x4xf32>
    %71 = vector.shape_cast %70 : vector<8x8x4xf32> to vector<64x4xf32>
    %72 = vector.extract_strided_slice %65 {offsets = [1, 0, 0], sizes = [8, 8, 4], strides = [1, 1, 1]} : vector<10x10x4xf32> to vector<8x8x4xf32>
    %73 = vector.shape_cast %72 : vector<8x8x4xf32> to vector<64x4xf32>
    %74 = vector.extract_strided_slice %65 {offsets = [1, 1, 0], sizes = [8, 8, 4], strides = [1, 1, 1]} : vector<10x10x4xf32> to vector<8x8x4xf32>
    %75 = vector.shape_cast %74 : vector<8x8x4xf32> to vector<64x4xf32>
    %76 = vector.extract_strided_slice %65 {offsets = [1, 2, 0], sizes = [8, 8, 4], strides = [1, 1, 1]} : vector<10x10x4xf32> to vector<8x8x4xf32>
    %77 = vector.shape_cast %76 : vector<8x8x4xf32> to vector<64x4xf32>
    %78 = vector.extract_strided_slice %65 {offsets = [2, 0, 0], sizes = [8, 8, 4], strides = [1, 1, 1]} : vector<10x10x4xf32> to vector<8x8x4xf32>
    %79 = vector.shape_cast %78 : vector<8x8x4xf32> to vector<64x4xf32>
    %80 = vector.extract_strided_slice %65 {offsets = [2, 1, 0], sizes = [8, 8, 4], strides = [1, 1, 1]} : vector<10x10x4xf32> to vector<8x8x4xf32>
    %81 = vector.shape_cast %80 : vector<8x8x4xf32> to vector<64x4xf32>
    %82 = vector.extract_strided_slice %65 {offsets = [2, 2, 0], sizes = [8, 8, 4], strides = [1, 1, 1]} : vector<10x10x4xf32> to vector<8x8x4xf32>
    %83 = vector.shape_cast %82 : vector<8x8x4xf32> to vector<64x4xf32>
    %84 = tpu.concatenate %67, %69, %71, %73, %75, %77, %79, %81, %83 in 1 : vector<64x4xf32>, vector<64x4xf32>, vector<64x4xf32>, vector<64x4xf32>, vector<64x4xf32>, vector<64x4xf32>, vector<64x4xf32>, vector<64x4xf32>, vector<64x4xf32> -> vector<64x36xf32>
    %c0_21 = arith.constant 0 : index
    %c0_22 = arith.constant 0 : index
    %c0_23 = arith.constant 0 : index
    %c0_24 = arith.constant 0 : index
    %c0_25 = arith.constant 0 : index
    %85 = vector.load %arg6[%c0_21, %c0_22, %c0_23, %c0_24, %c0_25] : memref<1x1x10x10x4xf32, #tpu.memory_space<vmem>>, vector<1x1x10x10x4xf32>
    %86 = vector.shape_cast %85 : vector<1x1x10x10x4xf32> to vector<10x10x4xf32>
    %87 = vector.extract_strided_slice %86 {offsets = [0, 0, 0], sizes = [8, 8, 4], strides = [1, 1, 1]} : vector<10x10x4xf32> to vector<8x8x4xf32>
    %88 = vector.shape_cast %87 : vector<8x8x4xf32> to vector<64x4xf32>
    %89 = vector.extract_strided_slice %86 {offsets = [0, 1, 0], sizes = [8, 8, 4], strides = [1, 1, 1]} : vector<10x10x4xf32> to vector<8x8x4xf32>
    %90 = vector.shape_cast %89 : vector<8x8x4xf32> to vector<64x4xf32>
    %91 = vector.extract_strided_slice %86 {offsets = [0, 2, 0], sizes = [8, 8, 4], strides = [1, 1, 1]} : vector<10x10x4xf32> to vector<8x8x4xf32>
    %92 = vector.shape_cast %91 : vector<8x8x4xf32> to vector<64x4xf32>
    %93 = vector.extract_strided_slice %86 {offsets = [1, 0, 0], sizes = [8, 8, 4], strides = [1, 1, 1]} : vector<10x10x4xf32> to vector<8x8x4xf32>
    %94 = vector.shape_cast %93 : vector<8x8x4xf32> to vector<64x4xf32>
    %95 = vector.extract_strided_slice %86 {offsets = [1, 1, 0], sizes = [8, 8, 4], strides = [1, 1, 1]} : vector<10x10x4xf32> to vector<8x8x4xf32>
    %96 = vector.shape_cast %95 : vector<8x8x4xf32> to vector<64x4xf32>
    %97 = vector.extract_strided_slice %86 {offsets = [1, 2, 0], sizes = [8, 8, 4], strides = [1, 1, 1]} : vector<10x10x4xf32> to vector<8x8x4xf32>
    %98 = vector.shape_cast %97 : vector<8x8x4xf32> to vector<64x4xf32>
    %99 = vector.extract_strided_slice %86 {offsets = [2, 0, 0], sizes = [8, 8, 4], strides = [1, 1, 1]} : vector<10x10x4xf32> to vector<8x8x4xf32>
    %100 = vector.shape_cast %99 : vector<8x8x4xf32> to vector<64x4xf32>
    %101 = vector.extract_strided_slice %86 {offsets = [2, 1, 0], sizes = [8, 8, 4], strides = [1, 1, 1]} : vector<10x10x4xf32> to vector<8x8x4xf32>
    %102 = vector.shape_cast %101 : vector<8x8x4xf32> to vector<64x4xf32>
    %103 = vector.extract_strided_slice %86 {offsets = [2, 2, 0], sizes = [8, 8, 4], strides = [1, 1, 1]} : vector<10x10x4xf32> to vector<8x8x4xf32>
    %104 = vector.shape_cast %103 : vector<8x8x4xf32> to vector<64x4xf32>
    %105 = tpu.concatenate %88, %90, %92, %94, %96, %98, %100, %102, %104 in 1 : vector<64x4xf32>, vector<64x4xf32>, vector<64x4xf32>, vector<64x4xf32>, vector<64x4xf32>, vector<64x4xf32>, vector<64x4xf32>, vector<64x4xf32>, vector<64x4xf32> -> vector<64x36xf32>
    %c0_26 = arith.constant 0 : index
    %c0_27 = arith.constant 0 : index
    %c0_28 = arith.constant 0 : index
    %c0_29 = arith.constant 0 : index
    %c0_30 = arith.constant 0 : index
    %106 = vector.load %arg7[%c0_26, %c0_27, %c0_28, %c0_29, %c0_30] : memref<1x1x10x10x4xf32, #tpu.memory_space<vmem>>, vector<1x1x10x10x4xf32>
    %107 = vector.shape_cast %106 : vector<1x1x10x10x4xf32> to vector<10x10x4xf32>
    %108 = vector.extract_strided_slice %107 {offsets = [0, 0, 0], sizes = [8, 8, 4], strides = [1, 1, 1]} : vector<10x10x4xf32> to vector<8x8x4xf32>
    %109 = vector.shape_cast %108 : vector<8x8x4xf32> to vector<64x4xf32>
    %110 = vector.extract_strided_slice %107 {offsets = [0, 1, 0], sizes = [8, 8, 4], strides = [1, 1, 1]} : vector<10x10x4xf32> to vector<8x8x4xf32>
    %111 = vector.shape_cast %110 : vector<8x8x4xf32> to vector<64x4xf32>
    %112 = vector.extract_strided_slice %107 {offsets = [0, 2, 0], sizes = [8, 8, 4], strides = [1, 1, 1]} : vector<10x10x4xf32> to vector<8x8x4xf32>
    %113 = vector.shape_cast %112 : vector<8x8x4xf32> to vector<64x4xf32>
    %114 = vector.extract_strided_slice %107 {offsets = [1, 0, 0], sizes = [8, 8, 4], strides = [1, 1, 1]} : vector<10x10x4xf32> to vector<8x8x4xf32>
    %115 = vector.shape_cast %114 : vector<8x8x4xf32> to vector<64x4xf32>
    %116 = vector.extract_strided_slice %107 {offsets = [1, 1, 0], sizes = [8, 8, 4], strides = [1, 1, 1]} : vector<10x10x4xf32> to vector<8x8x4xf32>
    %117 = vector.shape_cast %116 : vector<8x8x4xf32> to vector<64x4xf32>
    %118 = vector.extract_strided_slice %107 {offsets = [1, 2, 0], sizes = [8, 8, 4], strides = [1, 1, 1]} : vector<10x10x4xf32> to vector<8x8x4xf32>
    %119 = vector.shape_cast %118 : vector<8x8x4xf32> to vector<64x4xf32>
    %120 = vector.extract_strided_slice %107 {offsets = [2, 0, 0], sizes = [8, 8, 4], strides = [1, 1, 1]} : vector<10x10x4xf32> to vector<8x8x4xf32>
    %121 = vector.shape_cast %120 : vector<8x8x4xf32> to vector<64x4xf32>
    %122 = vector.extract_strided_slice %107 {offsets = [2, 1, 0], sizes = [8, 8, 4], strides = [1, 1, 1]} : vector<10x10x4xf32> to vector<8x8x4xf32>
    %123 = vector.shape_cast %122 : vector<8x8x4xf32> to vector<64x4xf32>
    %124 = vector.extract_strided_slice %107 {offsets = [2, 2, 0], sizes = [8, 8, 4], strides = [1, 1, 1]} : vector<10x10x4xf32> to vector<8x8x4xf32>
    %125 = vector.shape_cast %124 : vector<8x8x4xf32> to vector<64x4xf32>
    %126 = tpu.concatenate %109, %111, %113, %115, %117, %119, %121, %123, %125 in 1 : vector<64x4xf32>, vector<64x4xf32>, vector<64x4xf32>, vector<64x4xf32>, vector<64x4xf32>, vector<64x4xf32>, vector<64x4xf32>, vector<64x4xf32>, vector<64x4xf32> -> vector<64x36xf32>
    %c0_31 = arith.constant 0 : index
    %c0_32 = arith.constant 0 : index
    %c0_33 = arith.constant 0 : index
    %c0_34 = arith.constant 0 : index
    %c0_35 = arith.constant 0 : index
    %127 = vector.load %arg8[%c0_31, %c0_32, %c0_33, %c0_34, %c0_35] : memref<1x1x10x10x4xf32, #tpu.memory_space<vmem>>, vector<1x1x10x10x4xf32>
    %128 = vector.shape_cast %127 : vector<1x1x10x10x4xf32> to vector<10x10x4xf32>
    %129 = vector.extract_strided_slice %128 {offsets = [0, 0, 0], sizes = [8, 8, 4], strides = [1, 1, 1]} : vector<10x10x4xf32> to vector<8x8x4xf32>
    %130 = vector.shape_cast %129 : vector<8x8x4xf32> to vector<64x4xf32>
    %131 = vector.extract_strided_slice %128 {offsets = [0, 1, 0], sizes = [8, 8, 4], strides = [1, 1, 1]} : vector<10x10x4xf32> to vector<8x8x4xf32>
    %132 = vector.shape_cast %131 : vector<8x8x4xf32> to vector<64x4xf32>
    %133 = vector.extract_strided_slice %128 {offsets = [0, 2, 0], sizes = [8, 8, 4], strides = [1, 1, 1]} : vector<10x10x4xf32> to vector<8x8x4xf32>
    %134 = vector.shape_cast %133 : vector<8x8x4xf32> to vector<64x4xf32>
    %135 = vector.extract_strided_slice %128 {offsets = [1, 0, 0], sizes = [8, 8, 4], strides = [1, 1, 1]} : vector<10x10x4xf32> to vector<8x8x4xf32>
    %136 = vector.shape_cast %135 : vector<8x8x4xf32> to vector<64x4xf32>
    %137 = vector.extract_strided_slice %128 {offsets = [1, 1, 0], sizes = [8, 8, 4], strides = [1, 1, 1]} : vector<10x10x4xf32> to vector<8x8x4xf32>
    %138 = vector.shape_cast %137 : vector<8x8x4xf32> to vector<64x4xf32>
    %139 = vector.extract_strided_slice %128 {offsets = [1, 2, 0], sizes = [8, 8, 4], strides = [1, 1, 1]} : vector<10x10x4xf32> to vector<8x8x4xf32>
    %140 = vector.shape_cast %139 : vector<8x8x4xf32> to vector<64x4xf32>
    %141 = vector.extract_strided_slice %128 {offsets = [2, 0, 0], sizes = [8, 8, 4], strides = [1, 1, 1]} : vector<10x10x4xf32> to vector<8x8x4xf32>
    %142 = vector.shape_cast %141 : vector<8x8x4xf32> to vector<64x4xf32>
    %143 = vector.extract_strided_slice %128 {offsets = [2, 1, 0], sizes = [8, 8, 4], strides = [1, 1, 1]} : vector<10x10x4xf32> to vector<8x8x4xf32>
    %144 = vector.shape_cast %143 : vector<8x8x4xf32> to vector<64x4xf32>
    %145 = vector.extract_strided_slice %128 {offsets = [2, 2, 0], sizes = [8, 8, 4], strides = [1, 1, 1]} : vector<10x10x4xf32> to vector<8x8x4xf32>
    %146 = vector.shape_cast %145 : vector<8x8x4xf32> to vector<64x4xf32>
    %147 = tpu.concatenate %130, %132, %134, %136, %138, %140, %142, %144, %146 in 1 : vector<64x4xf32>, vector<64x4xf32>, vector<64x4xf32>, vector<64x4xf32>, vector<64x4xf32>, vector<64x4xf32>, vector<64x4xf32>, vector<64x4xf32>, vector<64x4xf32> -> vector<64x36xf32>
    %c0_36 = arith.constant 0 : index
    %c0_37 = arith.constant 0 : index
    %c0_38 = arith.constant 0 : index
    %c0_39 = arith.constant 0 : index
    %c0_40 = arith.constant 0 : index
    %148 = vector.load %arg9[%c0_36, %c0_37, %c0_38, %c0_39, %c0_40] : memref<1x1x10x10x4xf32, #tpu.memory_space<vmem>>, vector<1x1x10x10x4xf32>
    %149 = vector.shape_cast %148 : vector<1x1x10x10x4xf32> to vector<10x10x4xf32>
    %150 = vector.extract_strided_slice %149 {offsets = [0, 0, 0], sizes = [8, 8, 4], strides = [1, 1, 1]} : vector<10x10x4xf32> to vector<8x8x4xf32>
    %151 = vector.shape_cast %150 : vector<8x8x4xf32> to vector<64x4xf32>
    %152 = vector.extract_strided_slice %149 {offsets = [0, 1, 0], sizes = [8, 8, 4], strides = [1, 1, 1]} : vector<10x10x4xf32> to vector<8x8x4xf32>
    %153 = vector.shape_cast %152 : vector<8x8x4xf32> to vector<64x4xf32>
    %154 = vector.extract_strided_slice %149 {offsets = [0, 2, 0], sizes = [8, 8, 4], strides = [1, 1, 1]} : vector<10x10x4xf32> to vector<8x8x4xf32>
    %155 = vector.shape_cast %154 : vector<8x8x4xf32> to vector<64x4xf32>
    %156 = vector.extract_strided_slice %149 {offsets = [1, 0, 0], sizes = [8, 8, 4], strides = [1, 1, 1]} : vector<10x10x4xf32> to vector<8x8x4xf32>
    %157 = vector.shape_cast %156 : vector<8x8x4xf32> to vector<64x4xf32>
    %158 = vector.extract_strided_slice %149 {offsets = [1, 1, 0], sizes = [8, 8, 4], strides = [1, 1, 1]} : vector<10x10x4xf32> to vector<8x8x4xf32>
    %159 = vector.shape_cast %158 : vector<8x8x4xf32> to vector<64x4xf32>
    %160 = vector.extract_strided_slice %149 {offsets = [1, 2, 0], sizes = [8, 8, 4], strides = [1, 1, 1]} : vector<10x10x4xf32> to vector<8x8x4xf32>
    %161 = vector.shape_cast %160 : vector<8x8x4xf32> to vector<64x4xf32>
    %162 = vector.extract_strided_slice %149 {offsets = [2, 0, 0], sizes = [8, 8, 4], strides = [1, 1, 1]} : vector<10x10x4xf32> to vector<8x8x4xf32>
    %163 = vector.shape_cast %162 : vector<8x8x4xf32> to vector<64x4xf32>
    %164 = vector.extract_strided_slice %149 {offsets = [2, 1, 0], sizes = [8, 8, 4], strides = [1, 1, 1]} : vector<10x10x4xf32> to vector<8x8x4xf32>
    %165 = vector.shape_cast %164 : vector<8x8x4xf32> to vector<64x4xf32>
    %166 = vector.extract_strided_slice %149 {offsets = [2, 2, 0], sizes = [8, 8, 4], strides = [1, 1, 1]} : vector<10x10x4xf32> to vector<8x8x4xf32>
    %167 = vector.shape_cast %166 : vector<8x8x4xf32> to vector<64x4xf32>
    %168 = tpu.concatenate %151, %153, %155, %157, %159, %161, %163, %165, %167 in 1 : vector<64x4xf32>, vector<64x4xf32>, vector<64x4xf32>, vector<64x4xf32>, vector<64x4xf32>, vector<64x4xf32>, vector<64x4xf32>, vector<64x4xf32>, vector<64x4xf32> -> vector<64x36xf32>
    %c0_41 = arith.constant 0 : index
    %c0_42 = arith.constant 0 : index
    %c0_43 = arith.constant 0 : index
    %c0_44 = arith.constant 0 : index
    %c0_45 = arith.constant 0 : index
    %169 = vector.load %arg10[%c0_41, %c0_42, %c0_43, %c0_44, %c0_45] : memref<1x1x10x10x4xf32, #tpu.memory_space<vmem>>, vector<1x1x10x10x4xf32>
    %170 = vector.shape_cast %169 : vector<1x1x10x10x4xf32> to vector<10x10x4xf32>
    %171 = vector.extract_strided_slice %170 {offsets = [0, 0, 0], sizes = [8, 8, 4], strides = [1, 1, 1]} : vector<10x10x4xf32> to vector<8x8x4xf32>
    %172 = vector.shape_cast %171 : vector<8x8x4xf32> to vector<64x4xf32>
    %173 = vector.extract_strided_slice %170 {offsets = [0, 1, 0], sizes = [8, 8, 4], strides = [1, 1, 1]} : vector<10x10x4xf32> to vector<8x8x4xf32>
    %174 = vector.shape_cast %173 : vector<8x8x4xf32> to vector<64x4xf32>
    %175 = vector.extract_strided_slice %170 {offsets = [0, 2, 0], sizes = [8, 8, 4], strides = [1, 1, 1]} : vector<10x10x4xf32> to vector<8x8x4xf32>
    %176 = vector.shape_cast %175 : vector<8x8x4xf32> to vector<64x4xf32>
    %177 = vector.extract_strided_slice %170 {offsets = [1, 0, 0], sizes = [8, 8, 4], strides = [1, 1, 1]} : vector<10x10x4xf32> to vector<8x8x4xf32>
    %178 = vector.shape_cast %177 : vector<8x8x4xf32> to vector<64x4xf32>
    %179 = vector.extract_strided_slice %170 {offsets = [1, 1, 0], sizes = [8, 8, 4], strides = [1, 1, 1]} : vector<10x10x4xf32> to vector<8x8x4xf32>
    %180 = vector.shape_cast %179 : vector<8x8x4xf32> to vector<64x4xf32>
    %181 = vector.extract_strided_slice %170 {offsets = [1, 2, 0], sizes = [8, 8, 4], strides = [1, 1, 1]} : vector<10x10x4xf32> to vector<8x8x4xf32>
    %182 = vector.shape_cast %181 : vector<8x8x4xf32> to vector<64x4xf32>
    %183 = vector.extract_strided_slice %170 {offsets = [2, 0, 0], sizes = [8, 8, 4], strides = [1, 1, 1]} : vector<10x10x4xf32> to vector<8x8x4xf32>
    %184 = vector.shape_cast %183 : vector<8x8x4xf32> to vector<64x4xf32>
    %185 = vector.extract_strided_slice %170 {offsets = [2, 1, 0], sizes = [8, 8, 4], strides = [1, 1, 1]} : vector<10x10x4xf32> to vector<8x8x4xf32>
    %186 = vector.shape_cast %185 : vector<8x8x4xf32> to vector<64x4xf32>
    %187 = vector.extract_strided_slice %170 {offsets = [2, 2, 0], sizes = [8, 8, 4], strides = [1, 1, 1]} : vector<10x10x4xf32> to vector<8x8x4xf32>
    %188 = vector.shape_cast %187 : vector<8x8x4xf32> to vector<64x4xf32>
    %189 = tpu.concatenate %172, %174, %176, %178, %180, %182, %184, %186, %188 in 1 : vector<64x4xf32>, vector<64x4xf32>, vector<64x4xf32>, vector<64x4xf32>, vector<64x4xf32>, vector<64x4xf32>, vector<64x4xf32>, vector<64x4xf32>, vector<64x4xf32> -> vector<64x36xf32>
    %c0_46 = arith.constant 0 : index
    %c0_47 = arith.constant 0 : index
    %c0_48 = arith.constant 0 : index
    %c0_49 = arith.constant 0 : index
    %c0_50 = arith.constant 0 : index
    %190 = vector.load %arg11[%c0_46, %c0_47, %c0_48, %c0_49, %c0_50] : memref<1x1x10x10x4xf32, #tpu.memory_space<vmem>>, vector<1x1x10x10x4xf32>
    %191 = vector.shape_cast %190 : vector<1x1x10x10x4xf32> to vector<10x10x4xf32>
    %192 = vector.extract_strided_slice %191 {offsets = [0, 0, 0], sizes = [8, 8, 4], strides = [1, 1, 1]} : vector<10x10x4xf32> to vector<8x8x4xf32>
    %193 = vector.shape_cast %192 : vector<8x8x4xf32> to vector<64x4xf32>
    %194 = vector.extract_strided_slice %191 {offsets = [0, 1, 0], sizes = [8, 8, 4], strides = [1, 1, 1]} : vector<10x10x4xf32> to vector<8x8x4xf32>
    %195 = vector.shape_cast %194 : vector<8x8x4xf32> to vector<64x4xf32>
    %196 = vector.extract_strided_slice %191 {offsets = [0, 2, 0], sizes = [8, 8, 4], strides = [1, 1, 1]} : vector<10x10x4xf32> to vector<8x8x4xf32>
    %197 = vector.shape_cast %196 : vector<8x8x4xf32> to vector<64x4xf32>
    %198 = vector.extract_strided_slice %191 {offsets = [1, 0, 0], sizes = [8, 8, 4], strides = [1, 1, 1]} : vector<10x10x4xf32> to vector<8x8x4xf32>
    %199 = vector.shape_cast %198 : vector<8x8x4xf32> to vector<64x4xf32>
    %200 = vector.extract_strided_slice %191 {offsets = [1, 1, 0], sizes = [8, 8, 4], strides = [1, 1, 1]} : vector<10x10x4xf32> to vector<8x8x4xf32>
    %201 = vector.shape_cast %200 : vector<8x8x4xf32> to vector<64x4xf32>
    %202 = vector.extract_strided_slice %191 {offsets = [1, 2, 0], sizes = [8, 8, 4], strides = [1, 1, 1]} : vector<10x10x4xf32> to vector<8x8x4xf32>
    %203 = vector.shape_cast %202 : vector<8x8x4xf32> to vector<64x4xf32>
    %204 = vector.extract_strided_slice %191 {offsets = [2, 0, 0], sizes = [8, 8, 4], strides = [1, 1, 1]} : vector<10x10x4xf32> to vector<8x8x4xf32>
    %205 = vector.shape_cast %204 : vector<8x8x4xf32> to vector<64x4xf32>
    %206 = vector.extract_strided_slice %191 {offsets = [2, 1, 0], sizes = [8, 8, 4], strides = [1, 1, 1]} : vector<10x10x4xf32> to vector<8x8x4xf32>
    %207 = vector.shape_cast %206 : vector<8x8x4xf32> to vector<64x4xf32>
    %208 = vector.extract_strided_slice %191 {offsets = [2, 2, 0], sizes = [8, 8, 4], strides = [1, 1, 1]} : vector<10x10x4xf32> to vector<8x8x4xf32>
    %209 = vector.shape_cast %208 : vector<8x8x4xf32> to vector<64x4xf32>
    %210 = tpu.concatenate %193, %195, %197, %199, %201, %203, %205, %207, %209 in 1 : vector<64x4xf32>, vector<64x4xf32>, vector<64x4xf32>, vector<64x4xf32>, vector<64x4xf32>, vector<64x4xf32>, vector<64x4xf32>, vector<64x4xf32>, vector<64x4xf32> -> vector<64x36xf32>
    %cst = arith.constant 1.000000e+00 : f32
    %211 = vector.broadcast %cst : f32 to vector<64x1xf32>
    %cst_51 = arith.constant 0.000000e+00 : f32
    %212 = vector.broadcast %cst_51 : f32 to vector<64x19xf32>
    %213 = tpu.concatenate %21, %42, %63, %211, %212 in 1 : vector<64x36xf32>, vector<64x36xf32>, vector<64x36xf32>, vector<64x1xf32>, vector<64x19xf32> -> vector<64x128xf32>
    %214 = tpu.concatenate %42, %63, %84, %211, %212 in 1 : vector<64x36xf32>, vector<64x36xf32>, vector<64x36xf32>, vector<64x1xf32>, vector<64x19xf32> -> vector<64x128xf32>
    %215 = tpu.concatenate %63, %84, %105, %211, %212 in 1 : vector<64x36xf32>, vector<64x36xf32>, vector<64x36xf32>, vector<64x1xf32>, vector<64x19xf32> -> vector<64x128xf32>
    %216 = tpu.concatenate %84, %105, %126, %211, %212 in 1 : vector<64x36xf32>, vector<64x36xf32>, vector<64x36xf32>, vector<64x1xf32>, vector<64x19xf32> -> vector<64x128xf32>
    %217 = tpu.concatenate %105, %126, %147, %211, %212 in 1 : vector<64x36xf32>, vector<64x36xf32>, vector<64x36xf32>, vector<64x1xf32>, vector<64x19xf32> -> vector<64x128xf32>
    %218 = tpu.concatenate %126, %147, %168, %211, %212 in 1 : vector<64x36xf32>, vector<64x36xf32>, vector<64x36xf32>, vector<64x1xf32>, vector<64x19xf32> -> vector<64x128xf32>
    %219 = tpu.concatenate %147, %168, %189, %211, %212 in 1 : vector<64x36xf32>, vector<64x36xf32>, vector<64x36xf32>, vector<64x1xf32>, vector<64x19xf32> -> vector<64x128xf32>
    %220 = tpu.concatenate %168, %189, %210, %211, %212 in 1 : vector<64x36xf32>, vector<64x36xf32>, vector<64x36xf32>, vector<64x1xf32>, vector<64x19xf32> -> vector<64x128xf32>
    %221 = tpu.concatenate %213, %214, %215, %216, %217, %218, %219, %220 in 0 : vector<64x128xf32>, vector<64x128xf32>, vector<64x128xf32>, vector<64x128xf32>, vector<64x128xf32>, vector<64x128xf32>, vector<64x128xf32>, vector<64x128xf32> -> vector<512x128xf32>
    %cst_52 = arith.constant dense<0.000000e+00> : vector<512x128xf32>
    %222 = tpu.matmul %221, %0, %cst_52 {dimension_numbers = #tpu.dot_dimension_numbers<[1], [0], [0], [1], [0, 0, 1, 1], [], []>} : vector<512x128xf32>, vector<128x128xf32>, vector<512x128xf32> -> vector<512x128xf32>
    %c0_53 = arith.constant 0 : index
    %c0_54 = arith.constant 0 : index
    %c0_55 = arith.constant 0 : index
    %223 = vector.load %arg13[%c0_53, %c0_54, %c0_55] : memref<1x512x128xf32, #tpu.memory_space<vmem>>, vector<1x512x128xf32>
    %224 = vector.shape_cast %223 : vector<1x512x128xf32> to vector<512x128xf32>
    %225 = vector.shape_cast %222 : vector<512x128xf32> to vector<1x512x128xf32>
    tpu.vector_store %arg13[%c0_53, %c0_54, %c0_55], %225 {strides = array<i32>} : memref<1x512x128xf32, #tpu.memory_space<vmem>>, vector<1x512x128xf32>,
    return
  }
  func.func @transform_0(%arg0: i32, %arg1: i32) -> (i32, i32, i32, i32, i32) {
    %c8_i32 = arith.constant 8 : i32
    %0 = arith.muli %arg1, %c8_i32 : i32
    %c0_i32 = arith.constant 0 : i32
    %1 = arith.addi %0, %c0_i32 : i32
    %c0_i32_0 = arith.constant 0 : i32
    %c0_i32_1 = arith.constant 0 : i32
    %c0_i32_2 = arith.constant 0 : i32
    %c0_i32_3 = arith.constant 0 : i32
    return %arg0, %1, %c0_i32_0, %c0_i32_1, %c0_i32_2 : i32, i32, i32, i32, i32
  }
  func.func @transform_1(%arg0: i32, %arg1: i32) -> (i32, i32, i32, i32, i32) {
    %c8_i32 = arith.constant 8 : i32
    %0 = arith.muli %arg1, %c8_i32 : i32
    %c1_i32 = arith.constant 1 : i32
    %1 = arith.addi %0, %c1_i32 : i32
    %c0_i32 = arith.constant 0 : i32
    %c0_i32_0 = arith.constant 0 : i32
    %c0_i32_1 = arith.constant 0 : i32
    %c0_i32_2 = arith.constant 0 : i32
    return %arg0, %1, %c0_i32, %c0_i32_0, %c0_i32_1 : i32, i32, i32, i32, i32
  }
  func.func @transform_2(%arg0: i32, %arg1: i32) -> (i32, i32, i32, i32, i32) {
    %c8_i32 = arith.constant 8 : i32
    %0 = arith.muli %arg1, %c8_i32 : i32
    %c2_i32 = arith.constant 2 : i32
    %1 = arith.addi %0, %c2_i32 : i32
    %c0_i32 = arith.constant 0 : i32
    %c0_i32_0 = arith.constant 0 : i32
    %c0_i32_1 = arith.constant 0 : i32
    %c0_i32_2 = arith.constant 0 : i32
    return %arg0, %1, %c0_i32, %c0_i32_0, %c0_i32_1 : i32, i32, i32, i32, i32
  }
  func.func @transform_3(%arg0: i32, %arg1: i32) -> (i32, i32, i32, i32, i32) {
    %c8_i32 = arith.constant 8 : i32
    %0 = arith.muli %arg1, %c8_i32 : i32
    %c3_i32 = arith.constant 3 : i32
    %1 = arith.addi %0, %c3_i32 : i32
    %c0_i32 = arith.constant 0 : i32
    %c0_i32_0 = arith.constant 0 : i32
    %c0_i32_1 = arith.constant 0 : i32
    %c0_i32_2 = arith.constant 0 : i32
    return %arg0, %1, %c0_i32, %c0_i32_0, %c0_i32_1 : i32, i32, i32, i32, i32
  }
  func.func @transform_4(%arg0: i32, %arg1: i32) -> (i32, i32, i32, i32, i32) {
    %c8_i32 = arith.constant 8 : i32
    %0 = arith.muli %arg1, %c8_i32 : i32
    %c4_i32 = arith.constant 4 : i32
    %1 = arith.addi %0, %c4_i32 : i32
    %c0_i32 = arith.constant 0 : i32
    %c0_i32_0 = arith.constant 0 : i32
    %c0_i32_1 = arith.constant 0 : i32
    %c0_i32_2 = arith.constant 0 : i32
    return %arg0, %1, %c0_i32, %c0_i32_0, %c0_i32_1 : i32, i32, i32, i32, i32
  }
  func.func @transform_5(%arg0: i32, %arg1: i32) -> (i32, i32, i32, i32, i32) {
    %c8_i32 = arith.constant 8 : i32
    %0 = arith.muli %arg1, %c8_i32 : i32
    %c5_i32 = arith.constant 5 : i32
    %1 = arith.addi %0, %c5_i32 : i32
    %c0_i32 = arith.constant 0 : i32
    %c0_i32_0 = arith.constant 0 : i32
    %c0_i32_1 = arith.constant 0 : i32
    %c0_i32_2 = arith.constant 0 : i32
    return %arg0, %1, %c0_i32, %c0_i32_0, %c0_i32_1 : i32, i32, i32, i32, i32
  }
  func.func @transform_6(%arg0: i32, %arg1: i32) -> (i32, i32, i32, i32, i32) {
    %c8_i32 = arith.constant 8 : i32
    %0 = arith.muli %arg1, %c8_i32 : i32
    %c6_i32 = arith.constant 6 : i32
    %1 = arith.addi %0, %c6_i32 : i32
    %c0_i32 = arith.constant 0 : i32
    %c0_i32_0 = arith.constant 0 : i32
    %c0_i32_1 = arith.constant 0 : i32
    %c0_i32_2 = arith.constant 0 : i32
    return %arg0, %1, %c0_i32, %c0_i32_0, %c0_i32_1 : i32, i32, i32, i32, i32
  }
  func.func @transform_7(%arg0: i32, %arg1: i32) -> (i32, i32, i32, i32, i32) {
    %c8_i32 = arith.constant 8 : i32
    %0 = arith.muli %arg1, %c8_i32 : i32
    %c7_i32 = arith.constant 7 : i32
    %1 = arith.addi %0, %c7_i32 : i32
    %c0_i32 = arith.constant 0 : i32
    %c0_i32_0 = arith.constant 0 : i32
    %c0_i32_1 = arith.constant 0 : i32
    %c0_i32_2 = arith.constant 0 : i32
    return %arg0, %1, %c0_i32, %c0_i32_0, %c0_i32_1 : i32, i32, i32, i32, i32
  }
  func.func @transform_8(%arg0: i32, %arg1: i32) -> (i32, i32, i32, i32, i32) {
    %c8_i32 = arith.constant 8 : i32
    %0 = arith.muli %arg1, %c8_i32 : i32
    %c8_i32_0 = arith.constant 8 : i32
    %1 = arith.addi %0, %c8_i32_0 : i32
    %c0_i32 = arith.constant 0 : i32
    %c0_i32_1 = arith.constant 0 : i32
    %c0_i32_2 = arith.constant 0 : i32
    %c0_i32_3 = arith.constant 0 : i32
    return %arg0, %1, %c0_i32, %c0_i32_1, %c0_i32_2 : i32, i32, i32, i32, i32
  }
  func.func @transform_9(%arg0: i32, %arg1: i32) -> (i32, i32, i32, i32, i32) {
    %c8_i32 = arith.constant 8 : i32
    %0 = arith.muli %arg1, %c8_i32 : i32
    %c9_i32 = arith.constant 9 : i32
    %1 = arith.addi %0, %c9_i32 : i32
    %c0_i32 = arith.constant 0 : i32
    %c0_i32_0 = arith.constant 0 : i32
    %c0_i32_1 = arith.constant 0 : i32
    %c0_i32_2 = arith.constant 0 : i32
    return %arg0, %1, %c0_i32, %c0_i32_0, %c0_i32_1 : i32, i32, i32, i32, i32
  }
  func.func @transform_10(%arg0: i32, %arg1: i32) -> (i32, i32) {
    %c0_i32 = arith.constant 0 : i32
    %c0_i32_0 = arith.constant 0 : i32
    %c0_i32_1 = arith.constant 0 : i32
    return %c0_i32, %c0_i32_0 : i32, i32
  }
  func.func @transform_11(%arg0: i32, %arg1: i32) -> (i32, i32, i32) {
    %c0_i32 = arith.constant 0 : i32
    %c0_i32_0 = arith.constant 0 : i32
    return %arg0, %arg1, %c0_i32 : i32, i32, i32
  }
}

</mosaic_0001>

<bundles_post_ra>
// kernel: tile.8
= control target key start
LH: loop header
LB: loop body
LE: loop exit
PB: predicated region body
PF: predicated region fallthrough
CT: control target
= control target key end

     0   :  { %2 = vsyncpa [#allocation1], 0  ;;  %s42_s6 = smov [#allocation0]   ;;  %s59_s0 = inlined_call_operand.hbm [shape: f32[8], index: 0, kind: input, shape index: {}]   ;;  %s60_s1 = inlined_call_operand.vmem [shape: f32[8,8], index: 1, kind: output, shape index: {}]  }
   0x1   :  { %s9_s7 = sshll.u32 %s42_s6, 4  ;;  %s10_s7 = int_to_ptr.vmem [resolvable:$true] %s9_s7 }
   0x2   :  { %s28_s8 = scalar_lea.vmem %s10_s7, 16  ;;  %s32_s9 = scalar_lea.vmem %s10_s7, 32 }
   0x3   :  { %p29_p0 = scmp.ne.s32.totalorder %s10_s7, %s28_s8  ;;  %p33_p1 = scmp.lt.s32.totalorder %s10_s7, %s10_s7 }
   0x4   :  { %p34_p2 = scmp.lt.s32.totalorder %s32_s9, %s28_s8 }
   0x6   :  { %p35_p3 = por %p34_p2, %p33_p1 }
   0x8   :  { %p36_p4 = pnand %p35_p3, %p29_p0 }
   0xa   :  { %39 = shalt.err (!%p36_p4)
}
   0xb   :  { %12 = dma.hbm_to_vmem [thread:$0]  %s59_s0, 16, %s10_s7, [#allocation1]  }
   0xc   :  { %40 = dma.done.wait [#allocation1], 16  }
   0xd   :  { %41 = vsyncadd [#allocation1], 4294967280  ;;  %v16_v0 = vld [vmem:[#allocation0] ss:$0 sm:$0xff] }
   0xe   :  { %17 = vst [vmem:[%s60_s1] sm:$0xff] %v16_v0 }
   0xf   :  { %18 = vsyncpa [#allocation1], 1 }

// kernel: tile.9
= control target key start
LH: loop header
LB: loop body
LE: loop exit
PB: predicated region body
PF: predicated region fallthrough
CT: control target
= control target key end

     0   :  { %s69_s10 = smov 56   ;;  %s70_s11 = smov 40   ;;  %vm3_vm0 = vcmask 64512   ;;  %vm9_vm1 = vcmask 523712   ;;  %vm15_vm2 = vcmask 458112   ;;  %vm21_vm3 = vcmask 392512   ;;  %s113_s0 = inlined_call_operand.vmem [shape: f32[8,8], index: 0, kind: input, shape index: {}]   ;;  %s114_s1 = inlined_call_operand.vmem [shape: f32[1,64], index: 1, kind: output, shape index: {}]  }
   0x1   :  { %v55_v0 = vld [vmem:[%s113_s0 + $0x7] sm:$0x1]   ;;  %v57_v1 = vld [vmem:[%s113_s0 + $0x5] sm:$0x1]   ;;  %v56_v2 = vld [vmem:[%s113_s0 + $0x6] sm:$0x1]  }
   0x2   :  { %7 = vrot.lane.b32.xlu0 %v55_v0, %s69_s10  ;;  %19 = vrot.lane.b32.xlu1 %v57_v1, %s70_s11  ;;  %v58_v3 = vld [vmem:[%s113_s0 + $0x4] sm:$0x1]   ;;  %v2_v4 = vld [vmem:[%s113_s0] sm:$0x1]   ;;  %s71_s18 = smov 48   ;;  %s72_s19 = smov 32  }
   0x3   :  { %4 = vst.msk [vmem:[#allocation0] sm:$0x1] %vm3_vm0, %v2_v4   ;;  %v59_v5 = vld [vmem:[%s113_s0 + $0x3] sm:$0x1]   ;;  %v60_v6 = vld [vmem:[%s113_s0 + $0x2] sm:$0x1]  }
   0x4   :  { %s73_s24 = smov 24   ;;  %s74_s25 = smov 16   ;;  %v61_v7 = vld [vmem:[%s113_s0 + $0x1] sm:$0x1]   ;;  %vm27_vm4 = vcmask 326912   ;;  %vm33_vm5 = vcmask 261312  }
   0x5   :  { %s75_s0 = smov 8   ;;  %vm39_vm6 = vcmask 195712   ;;  %vm45_vm7 = vcmask 130112  }
   0x6   :  { %13 = vrot.lane.b32.xlu0 %v56_v2, %s71_s18  ;;  %25 = vrot.lane.b32.xlu1 %v58_v3, %s72_s19 }
   0xa   :  { %31 = vrot.lane.b32.xlu0 %v59_v5, %s73_s24  ;;  %37 = vrot.lane.b32.xlu1 %v60_v6, %s74_s25 }
   0xe   :  { %43 = vrot.lane.b32.xlu0 %v61_v7, %s75_s0 }
  0x74   :  { %v8_v8 = vpop.permute.xlu0 %7   ;;  %v20_v9 = vpop.permute.xlu1 %19  }
  0x75   :  { %10 = vst.msk [vmem:[#allocation0] sm:$0x1] %vm9_vm1, %v8_v8  }
  0x78   :  { %v14_v10 = vpop.permute.xlu0 %13   ;;  %v26_v11 = vpop.permute.xlu1 %25  }
  0x79   :  { %16 = vst.msk [vmem:[#allocation0] sm:$0x1] %vm15_vm2, %v14_v10  }
  0x7a   :  { %22 = vst.msk [vmem:[#allocation0] sm:$0x1] %vm21_vm3, %v20_v9  }
  0x7b   :  { %28 = vst.msk [vmem:[#allocation0] sm:$0x1] %vm27_vm4, %v26_v11  }
  0x7c   :  { %v32_v12 = vpop.permute.xlu0 %31   ;;  %v38_v13 = vpop.permute.xlu1 %37  }
  0x7d   :  { %34 = vst.msk [vmem:[#allocation0] sm:$0x1] %vm33_vm5, %v32_v12  }
  0x7e   :  { %40 = vst.msk [vmem:[#allocation0] sm:$0x1] %vm39_vm6, %v38_v13  }
  0x80   :  { %v44_v14 = vpop.permute.xlu0 %43  }
  0x81   :  { %46 = vst.msk [vmem:[#allocation0] sm:$0x1] %vm45_vm7, %v44_v14  }
  0x88   :  { %v51_v15 = vld [vmem:[#allocation0] sm:$0x1] }
  0x89   :  { %54 = vst [vmem:[%s114_s1] sm:$0x1] %v51_v15 }

// kernel: upsample3d_forward.1
= control target key start
LH: loop header
LB: loop body
LE: loop exit
PB: predicated region body
PF: predicated region fallthrough
CT: control target
= control target key end

     0   :  { %s6446_s17 = smov 0   ;;  %s6448_s18 = smov 0   ;;  %s12391_s0 = inlined_call_operand.vmem [shape: f32[2,10,10,10,4], index: 0, kind: input, shape index: {}, may-alias: {0,1,2,3,4,5,6,7,8,9}]   ;;  %s12392_s1 = inlined_call_operand.vmem [shape: f32[2,10,10,10,4], index: 1, kind: input, shape index: {}, may-alias: {0,1,2,3,4,5,6,7,8,9}]   ;;  %s12393_s2 = inlined_call_operand.vmem [shape: f32[2,10,10,10,4], index: 2, kind: input, shape index: {}, may-alias: {0,1,2,3,4,5,6,7,8,9}]   ;;  %s12394_s3 = inlined_call_operand.vmem [shape: f32[2,10,10,10,4], index: 3, kind: input, shape index: {}, may-alias: {0,1,2,3,4,5,6,7,8,9}]   ;;  %s12395_s4 = inlined_call_operand.vmem [shape: f32[2,10,10,10,4], index: 4, kind: input, shape index: {}, may-alias: {0,1,2,3,4,5,6,7,8,9}]   ;;  %s12396_s5 = inlined_call_operand.vmem [shape: f32[2,10,10,10,4], index: 5, kind: input, shape index: {}, may-alias: {0,1,2,3,4,5,6,7,8,9}]   ;;  %s12397_s6 = inlined_call_operand.vmem [shape: f32[2,10,10,10,4], index: 6, kind: input, shape index: {}, may-alias: {0,1,2,3,4,5,6,7,8,9}]   ;;  %s12398_s7 = inlined_call_operand.vmem [shape: f32[2,10,10,10,4], index: 7, kind: input, shape index: {}, may-alias: {0,1,2,3,4,5,6,7,8,9}]   ;;  %s12399_s8 = inlined_call_operand.vmem [shape: f32[2,10,10,10,4], index: 8, kind: input, shape index: {}, may-alias: {0,1,2,3,4,5,6,7,8,9}]   ;;  %s12400_s9 = inlined_call_operand.vmem [shape: f32[2,10,10,10,4], index: 9, kind: input, shape index: {}, may-alias: {0,1,2,3,4,5,6,7,8,9}]   ;;  %s12401_s10 = inlined_call_operand.vmem [shape: f32[128,128], index: 10, kind: input, shape index: {}]   ;;  %s12402_s11 = inlined_call_operand.vmem [shape: f32[2,512,128], index: 11, kind: output, shape index: {}]  }
   0x1   :  { %12451 = sst [smem:[#allocation530_spill]] %s12391_s0  ;;  %s6450_s19 = smov 0  }
   0x2   :  { %12452 = sst [smem:[#allocation531_spill]] %s12392_s1 }
   0x3   :  { %12453 = sst [smem:[#allocation532_spill]] %s12393_s2 }
   0x4   :  { %12454 = sst [smem:[#allocation533_spill]] %s12394_s3 }
   0x5   :  { %12455 = sst [smem:[#allocation534_spill]] %s12395_s4 }
   0x6   :  { %12456 = sst [smem:[#allocation535_spill]] %s12396_s5 }
   0x7   :  { %12457 = sst [smem:[#allocation536_spill]] %s12397_s6 }
   0x8 LB: > { %s33_s20 = sadd.s32 1, %s6370_s18  ;;  %p5897_p0 = scmp.ge.s32.totalorder %s6374_s19, 1  ;;  %s6374_s19 = sphi %s6450_s19, %s21_s19   ;;  %s6370_s18 = sphi %s6448_s18, %s13700_s18   ;;  %s6366_s17 = sphi %s6446_s17, %s13699_s17  }
   0x9   : > { %p35_p1 = scmp.ge.s32.totalorder %s33_s20, 2  ;;  %p577_p2 = scmp.lt.s32.totalorder %s6374_s19, 3 }
   0xb   : > { %s13702_s20 = smov (%p35_p1, %s33_s20), 0  ;;  %p578_p3 = pnand %p5897_p0, %p577_p2 }
   0xd   : > { %581 = sbr.rel (%p578_p3) target bundleno = 1916 (0x77c), region = 64 }
  0x12   : > { %p726_p4 = scmp.lt.s32.totalorder %s6366_s17, 1  ;;  %s12458_s0 = sld [smem:[#allocation530_spill]]  ;;  %vm915_vm0 = vcmask 1046528   ;;  %vm940_vm1 = vcmask 1045504   ;;  %vm1173_vm2 = vcmask 31744   ;;  %vm1182_vm3 = vcmask 64512  }
  0x13   : > { %s12413_s25 = smov 4   ;;  %s12411_s26 = smov 8   ;;  %vm1191_vm4 = vcmask 97280   ;;  %vm1200_vm5 = vcmask 130048   ;;  %vm1209_vm6 = vcmask 162816   ;;  %vm1218_vm7 = vcmask 195584  }
  0x14   : > { %s13704_s17 = smov (!%p726_p4, %s6366_s17), 1  ;;  %s12409_s27 = smov 12   ;;  %vm1227_vm8 = vcmask 228352   ;;  %vm1236_vm9 = vcmask 261120   ;;  %vm4513_vm10 = vcmask 293888   ;;  %vm4522_vm11 = vcmask 588800  }
  0x15   : > { %s6467_s21 = smul.u32 1600, %s13704_s17  ;;  %s12407_s28 = smov 16   ;;  %vm4531_vm12 = vcmask 883712   ;;  %vm4540_vm13 = vcmask 891904  }
  0x16   : > { %s12405_s29 = smov 20   ;;  %s12403_s30 = smov 24  }
  0x17   : > { %s6382_s12 = smov 28   ;;  %s6383_s13 = smov 32  }
  0x18   : > { %s6473_s24 = scalar_lea.vmem %s12458_s0, %s6467_s21  ;;  %s5977_s14 = sadd.s32 160, %s6467_s21 }
  0x19   : > { %v6476_v0 = vld [vmem:[%s6473_s24 + $0x20] sm:$0xff]  ;;  %v6479_v1 = vld [vmem:[%s6473_s24 + $0x28] sm:$0x3]  ;;  %v6486_v7 = vld [vmem:[%s6473_s24 + $0x30] sm:$0xff]  ;;  %s12461_s1 = sld [smem:[#allocation531_spill]]  ;;  %s5979_s23 = sadd.s32 320, %s6467_s21 }
  0x1a   : > { %v879_v2 = vld [vmem:[%s6473_s24] sm:$0xff]  ;;  %v922_v3 = vrot.slane %v6476_v0, 1  ;;  %v923_v4 = vrot.slane %v6479_v1, 1  ;;  %v880_v5 = vld [vmem:[%s6473_s24 + $0x8] sm:$0x3]  ;;  %v925_v10 = vrot.slane %v6486_v7, 1 }
  0x1b   : > { %v916_v6 = vrot.slane %v879_v2, 1  ;;  %v917_v8 = vrot.slane %v880_v5, 1  ;;  %v886_v9 = vld [vmem:[%s6473_s24 + $0x38] sm:$0x3]  ;;  %v6491_v11 = vld [vmem:[%s6473_s24 + $0x10] sm:$0xff]  ;;  %v6506_v20 = vld [vmem:[%s6473_s24 + $0x40] sm:$0xff] }
  0x1c   : > { %v6494_v12 = vld [vmem:[%s6473_s24 + $0x50] sm:$0xff]  ;;  %v6497_v13 = vsel %vm915_vm0, %v922_v3, %v923_v4  ;;  %v926_v14 = vrot.slane %v886_v9, 1  ;;  %v882_v15 = vld [vmem:[%s6473_s24 + $0x18] sm:$0x3]  ;;  %v919_v16 = vrot.slane %v6491_v11, 1  ;;  %v928_v26 = vrot.slane %v6506_v20, 1 }
  0x1d   : > { %v890_v17 = vld [vmem:[%s6473_s24 + $0x58] sm:$0x3]  ;;  %985 = vrot.lane.b32.xlu1 %v6497_v13, %s12413_s25  ;;  %v918_v18 = vsel %vm915_vm0, %v916_v6, %v917_v8  ;;  %v920_v19 = vrot.slane %v882_v15, 1  ;;  %v888_v21 = vld [vmem:[%s6473_s24 + $0x48] sm:$0x3]  ;;  %v931_v23 = vrot.slane %v6494_v12, 1 }
  0x1e   : > { %981 = vrot.lane.b32.xlu0 %v918_v18, %s12413_s25  ;;  %v6511_v22 = vsel %vm915_vm0, %v925_v10, %v926_v14  ;;  %v932_v24 = vrot.slane %v890_v17, 1  ;;  %v929_v27 = vrot.slane %v888_v21, 1  ;;  %v6519_v28 = vld [vmem:[%s6473_s24 + $0x70] sm:$0xff]  ;;  %v894_v29 = vld [vmem:[%s6473_s24 + $0x78] sm:$0x3]  ;;  %v6523_v30 = vld [vmem:[%s6473_s24 + $0x60] sm:$0xff] }
  0x1f   : > { %v6515_v25 = vsel %vm915_vm0, %v919_v16, %v920_v19  ;;  %v892_v31 = vld [vmem:[%s6473_s24 + $0x68] sm:$0x3]  ;;  %v937_v33 = vrot.slane %v6519_v28, 1  ;;  %v938_v34 = vrot.slane %v894_v29, 1  ;;  %v934_v36 = vrot.slane %v6523_v30, 1  ;;  %v897_v10 = vld [vmem:[%s6473_s24 + $0x90] sm:$0xff]  ;;  %s6685_s22 = scalar_lea.vmem %s12461_s1, %s5977_s14 }
  0x20   : > { %v6531_v32 = vsel %vm915_vm0, %v931_v23, %v932_v24  ;;  %v6535_v35 = vsel %vm915_vm0, %v928_v26, %v929_v27  ;;  %v935_v37 = vrot.slane %v892_v31, 1  ;;  %v944_v39 = vrot.slane %v6491_v11, 2  ;;  %v6694_v18 = vld [vmem:[%s6685_s22 + $0x10] sm:$0xff]  ;;  %v6697_v19 = vld [vmem:[%s6685_s22 + $0x18] sm:$0x3]  ;;  %s12524_s2 = sld [smem:[#allocation532_spill]] }
  0x21   : > { %987 = vrot.lane.b32.xlu1 %v6511_v22, %s12413_s25  ;;  %v6543_v38 = vsel %vm915_vm0, %v937_v33, %v938_v34  ;;  %v945_v40 = vrot.slane %v882_v15, 2  ;;  %v941_v42 = vrot.slane %v879_v2, 2  ;;  %v942_v43 = vrot.slane %v880_v5, 2  ;;  %v896_v2 = vld [vmem:[%s6473_s24 + $0x88] sm:$0x3]  ;;  %s12574_s3 = sld [smem:[#allocation533_spill]] }
  0x22   : > { %983 = vrot.lane.b32.xlu0 %v6515_v25, %s12413_s25  ;;  %v6547_v41 = vsel %vm915_vm0, %v934_v36, %v935_v37  ;;  %v950_v45 = vrot.slane %v6486_v7, 2  ;;  %v951_v46 = vrot.slane %v886_v9, 2  ;;  %v947_v48 = vrot.slane %v6476_v0, 2  ;;  %v6730_v33 = vld [vmem:[%s6685_s22 + $0x28] sm:$0x3]  ;;  %s5983_s14 = sadd.s32 640, %s6467_s21 }
  0x23   : > { %v946_v44 = vsel %vm940_vm1, %v944_v39, %v945_v40  ;;  %v943_v47 = vsel %vm940_vm1, %v941_v42, %v942_v43  ;;  %v948_v49 = vrot.slane %v6479_v1, 2  ;;  %v956_v51 = vrot.slane %v6494_v12, 2  ;;  %v895_v1 = vld [vmem:[%s6473_s24 + $0x80] sm:$0xff]  ;;  %v1256_v42 = vld [vmem:[%s6685_s22 + $0x58] sm:$0x3]  ;;  %s12637_s4 = sld [smem:[#allocation534_spill]] }
  0x24   : > { %v6561_v50 = vsel %vm940_vm1, %v950_v45, %v951_v46  ;;  %v957_v52 = vrot.slane %v890_v17, 2  ;;  %v953_v54 = vrot.slane %v6506_v20, 2  ;;  %v954_v55 = vrot.slane %v888_v21, 2  ;;  %v6702_v21 = vld [vmem:[%s6685_s22] sm:$0xff]  ;;  %v6754_v45 = vld [vmem:[%s6685_s22 + $0x48] sm:$0x3] }
  0x25   : > { %991 = vrot.lane.b32.xlu1 %v6531_v32, %s12413_s25  ;;  %v6565_v53 = vsel %vm940_vm1, %v947_v48, %v948_v49  ;;  %v962_v57 = vrot.slane %v6519_v28, 2  ;;  %v963_v58 = vrot.slane %v894_v29, 2  ;;  %v959_v60 = vrot.slane %v6523_v30, 2  ;;  %v6719_v29 = vld [vmem:[%s6685_s22 + $0x30] sm:$0xff]  ;;  %s5985_s15 = sadd.s32 800, %s6467_s21  ;;  %s12704_s5 = sld [smem:[#allocation535_spill]] }
  0x26   : > { %989 = vrot.lane.b32.xlu0 %v6535_v35, %s12413_s25  ;;  %v6573_v56 = vsel %vm940_vm1, %v956_v51, %v957_v52  ;;  %v6577_v59 = vsel %vm940_vm1, %v953_v54, %v954_v55  ;;  %v960_v61 = vrot.slane %v892_v31, 2  ;;  %v967_v3 = vrot.slane %v895_v1, 1  ;;  %v1260_v54 = vld [vmem:[%s6685_s22 + $0x78] sm:$0x3]  ;;  %s7059_s16 = scalar_lea.vmem %s12524_s2, %s5979_s23  ;;  %s5981_s23 = sadd.s32 480, %s6467_s21 }
  0x27   : > { %v6585_v62 = vsel %vm940_vm1, %v962_v57, %v963_v58  ;;  %v968_v4 = vrot.slane %v896_v2, 1  ;;  %v970_v6 = vrot.slane %v895_v1, 2  ;;  %v971_v8 = vrot.slane %v896_v2, 2  ;;  %v1258_v57 = vld [vmem:[%s6685_s22 + $0x68] sm:$0x3]  ;;  %s5987_s0 = sadd.s32 960, %s6467_s21 }
  0x28   : > { %v6588_v63 = vsel %vm940_vm1, %v959_v60, %v960_v61  ;;  %v978_v15 = vrot.slane %v897_v10, 2  ;;  %v1284_v24 = vrot.slane %v6694_v18, 1  ;;  %v1281_v27 = vrot.slane %v6702_v21, 1  ;;  %s12770_s6 = sld [smem:[#allocation536_spill]]  ;;  %s6384_s2 = smov 36  }
  0x29   : > { %995 = vrot.lane.b32.xlu1 %v6543_v38, %s12413_s25  ;;  %v969_v5 = vsel %vm915_vm0, %v967_v3, %v968_v4  ;;  %v972_v9 = vsel %vm940_vm1, %v970_v6, %v971_v8  ;;  %v1288_v40 = vrot.slane %v6730_v33, 1  ;;  %v1297_v48 = vrot.slane %v1256_v42, 1 }
  0x2a   : > { %993 = vrot.lane.b32.xlu0 %v6547_v41, %s12413_s25  ;;  %v1294_v52 = vrot.slane %v6754_v45, 1  ;;  %v1303_v60 = vrot.slane %v1260_v54, 1  ;;  %v1308_v4 = vrot.slane %v6694_v18, 2 }
  0x2d   : > { %1007 = vrot.lane.b32.xlu1 %v946_v44, %s12411_s26 }
  0x2e   : > { %1005 = vrot.lane.b32.xlu0 %v943_v47, %s12411_s26 }
  0x31   : > { %1011 = vrot.lane.b32.xlu1 %v6561_v50, %s12411_s26 }
  0x32   : > { %1009 = vrot.lane.b32.xlu0 %v6565_v53, %s12411_s26 }
  0x35   : > { %1015 = vrot.lane.b32.xlu1 %v6573_v56, %s12411_s26 }
  0x36   : > { %1013 = vrot.lane.b32.xlu0 %v6577_v59, %s12411_s26 }
  0x39   : > { %1019 = vrot.lane.b32.xlu1 %v6585_v62, %s12411_s26 }
  0x3a   : > { %1017 = vrot.lane.b32.xlu0 %v6588_v63, %s12411_s26 }
  0x3d   : > { %1031 = vrot.lane.b32.xlu1 %v6476_v0, %s12409_s27 }
  0x3e   : > { %1029 = vrot.lane.b32.xlu0 %v6491_v11, %s12409_s27 }
  0x41   : > { %1035 = vrot.lane.b32.xlu1 %v6506_v20, %s12409_s27 }
  0x42   : > { %1033 = vrot.lane.b32.xlu0 %v6486_v7, %s12409_s27 }
  0x45   : > { %1039 = vrot.lane.b32.xlu1 %v6523_v30, %s12409_s27 }
  0x46   : > { %1037 = vrot.lane.b32.xlu0 %v6494_v12, %s12409_s27 }
  0x49   : > { %1043 = vrot.lane.b32.xlu1 %v895_v1, %s12409_s27 }
  0x4a   : > { %1041 = vrot.lane.b32.xlu0 %v6519_v28, %s12409_s27 }
  0x4d   : > { %1055 = vrot.lane.b32.xlu1 %v6497_v13, %s12407_s28 }
  0x4e   : > { %1053 = vrot.lane.b32.xlu0 %v6515_v25, %s12407_s28  ;;  %v1285_v25 = vrot.slane %v6697_v19, 1 }
  0x50   : > { %v6735_v34 = vsel %vm915_vm0, %v1284_v24, %v1285_v25  ;;  %v1321_v25 = vrot.slane %v1256_v42, 2 }
  0x51   : > { %1059 = vrot.lane.b32.xlu1 %v6535_v35, %s12407_s28 }
  0x52   : > { %1057 = vrot.lane.b32.xlu0 %v6511_v22, %s12407_s28 }
  0x55   : > { %1063 = vrot.lane.b32.xlu1 %v6547_v41, %s12407_s28 }
  0x56   : > { %1061 = vrot.lane.b32.xlu0 %v6531_v32, %s12407_s28 }
  0x59   : > { %1067 = vrot.lane.b32.xlu1 %v969_v5, %s12407_s28 }
  0x5a   : > { %1065 = vrot.lane.b32.xlu0 %v6543_v38, %s12407_s28 }
  0x5d   : > { %1079 = vrot.lane.b32.xlu1 %v6565_v53, %s12405_s29 }
  0x5e   : > { %1077 = vrot.lane.b32.xlu0 %v946_v44, %s12405_s29  ;;  %v6751_v44 = vld [vmem:[%s6685_s22 + $0x40] sm:$0xff] }
  0x5f   : > { %v1293_v51 = vrot.slane %v6751_v44, 1 }
  0x61   : > { %1083 = vrot.lane.b32.xlu1 %v6577_v59, %s12405_s29 }
  0x62   : > { %1081 = vrot.lane.b32.xlu0 %v6561_v50, %s12405_s29 }
  0x65   : > { %1087 = vrot.lane.b32.xlu1 %v6588_v63, %s12405_s29 }
  0x66   : > { %1085 = vrot.lane.b32.xlu0 %v6573_v56, %s12405_s29 }
  0x69   : > { %1091 = vrot.lane.b32.xlu1 %v972_v9, %s12405_s29 }
  0x6a   : > { %1089 = vrot.lane.b32.xlu0 %v6585_v62, %s12405_s29 }
  0x6d   : > { %1103 = vrot.lane.b32.xlu1 %v6486_v7, %s12403_s30  ;;  %v975_v7 = vrot.slane %v897_v10, 1 }
  0x6e   : > { %1101 = vrot.lane.b32.xlu0 %v6476_v0, %s12403_s30  ;;  %v898_v0 = vld [vmem:[%s6473_s24 + $0x98] sm:$0x3] }
  0x6f   : > { %v976_v11 = vrot.slane %v898_v0, 1  ;;  %v979_v16 = vrot.slane %v898_v0, 2 }
  0x71   : > { %1107 = vrot.lane.b32.xlu1 %v6494_v12, %s12403_s30  ;;  %v977_v12 = vsel %vm915_vm0, %v975_v7, %v976_v11  ;;  %v980_v23 = vsel %vm940_vm1, %v978_v15, %v979_v16  ;;  %v1314_v11 = vrot.slane %v6719_v29, 2 }
  0x72   : > { %1105 = vrot.lane.b32.xlu0 %v6506_v20, %s12403_s30 }
  0x75   : > { %1111 = vrot.lane.b32.xlu1 %v6519_v28, %s12403_s30 }
  0x76   : > { %1109 = vrot.lane.b32.xlu0 %v6523_v30, %s12403_s30  ;;  %v6722_v30 = vld [vmem:[%s6685_s22 + $0x38] sm:$0x3] }
  0x77   : > { %v1291_v36 = vrot.slane %v6722_v30, 1 }
  0x79   : > { %1115 = vrot.lane.b32.xlu1 %v897_v10, %s12403_s30 }
  0x7a   : > { %1113 = vrot.lane.b32.xlu0 %v895_v1, %s12403_s30  ;;  %v1300_v1 = vrot.slane %v1258_v57, 1 }
  0x7d   : > { %1127 = vrot.lane.b32.xlu1 %v6511_v22, %s6382_s12  ;;  %v6705_v22 = vld [vmem:[%s6685_s22 + $0x8] sm:$0x3] }
  0x7e   : > { %1125 = vrot.lane.b32.xlu0 %v6497_v13, %s6382_s12  ;;  %v1282_v28 = vrot.slane %v6705_v22, 1  ;;  %v1306_v10 = vrot.slane %v6705_v22, 2 }
  0x81   : > { %1131 = vrot.lane.b32.xlu1 %v6531_v32, %s6382_s12  ;;  %v6727_v32 = vld [vmem:[%s6685_s22 + $0x20] sm:$0xff] }
  0x82   : > { %1129 = vrot.lane.b32.xlu0 %v6535_v35, %s6382_s12  ;;  %v1290_v35 = vrot.slane %v6719_v29, 1  ;;  %v1287_v39 = vrot.slane %v6727_v32, 1 }
  0x84   : > { %v6760_v46 = vsel %vm915_vm0, %v1290_v35, %v1291_v36 }
  0x85   : > { %1135 = vrot.lane.b32.xlu1 %v6543_v38, %s6382_s12  ;;  %v1283_v38 = vsel %vm915_vm0, %v1281_v27, %v1282_v28 }
  0x86   : > { %1133 = vrot.lane.b32.xlu0 %v6547_v41, %s6382_s12  ;;  %v6745_v41 = vld [vmem:[%s6685_s22 + $0x50] sm:$0xff] }
  0x87   : > { %v1296_v47 = vrot.slane %v6745_v41, 1  ;;  %v1320_v24 = vrot.slane %v6745_v41, 2 }
  0x89   : > { %1139 = vrot.lane.b32.xlu1 %v977_v12, %s6382_s12  ;;  %v6785_v58 = vsel %vm915_vm0, %v1296_v47, %v1297_v48  ;;  %v1315_v12 = vrot.slane %v6722_v30, 2  ;;  %v1317_v30 = vrot.slane %v6751_v44, 2  ;;  %v6851_v36 = vsel %vm940_vm1, %v1320_v24, %v1321_v25 }
  0x8a   : > { %1137 = vrot.lane.b32.xlu0 %v969_v5, %s6382_s12  ;;  %v1309_v5 = vrot.slane %v6697_v19, 2  ;;  %v1311_v19 = vrot.slane %v6727_v32, 2  ;;  %v1324_v47 = vrot.slane %v1258_v57, 2 }
  0x8c   : > { %v6819_v7 = vsel %vm940_vm1, %v1308_v4, %v1309_v5 }
  0x8d   : > { %1151 = vrot.lane.b32.xlu1 %v6561_v50, %s6383_s13  ;;  %v6766_v50 = vsel %vm915_vm0, %v1287_v39, %v1288_v40  ;;  %v1327_v39 = vrot.slane %v1260_v54, 2 }
  0x8e   : > { %1149 = vrot.lane.b32.xlu0 %v6565_v53, %s6383_s13  ;;  %v6771_v53 = vld [vmem:[%s6685_s22 + $0x70] sm:$0xff] }
  0x8f   : > { %v6678_v13 = vpop.permute.xlu1 %985 }
  0x90   : > { %12459 = vst [vmem:[#allocation2_spill] sm:$0xff] %v6678_v13  ;;  %v6680_v14 = vpop.permute.xlu0 %981 }
  0x91   : > { %12460 = vst [vmem:[#allocation3_spill] sm:$0xff] %v6680_v14  ;;  %1155 = vrot.lane.b32.xlu1 %v6573_v56, %s6383_s13  ;;  %v6777_v56 = vld [vmem:[%s6685_s22 + $0x60] sm:$0xff] }
  0x92   : > { %1153 = vrot.lane.b32.xlu0 %v6577_v59, %s6383_s13  ;;  %v1302_v59 = vrot.slane %v6771_v53, 1 }
  0x93   : > { %v6691_v17 = vpop.permute.xlu1 %987 }
  0x94   : > { %12462 = vst [vmem:[#allocation4_spill] sm:$0xff] %v6691_v17  ;;  %v6699_v20 = vpop.permute.xlu0 %983  ;;  %v6801_v3 = vsel %vm915_vm0, %v1302_v59, %v1303_v60 }
  0x95   : > { %12463 = vst [vmem:[#allocation5_spill] sm:$0xff] %v6699_v20  ;;  %1159 = vrot.lane.b32.xlu1 %v6585_v62, %s6383_s13  ;;  %v6791_v62 = vsel %vm915_vm0, %v1293_v51, %v1294_v52 }
  0x96   : > { %1157 = vrot.lane.b32.xlu0 %v6588_v63, %s6383_s13  ;;  %v1299_v63 = vrot.slane %v6777_v56, 1 }
  0x97   : > { %v6714_v26 = vpop.permute.xlu1 %991 }
  0x98   : > { %12464 = vst [vmem:[#allocation6_spill] sm:$0xff] %v6714_v26  ;;  %v6724_v31 = vpop.permute.xlu0 %989  ;;  %v6808_v8 = vsel %vm915_vm0, %v1299_v63, %v1300_v1 }
  0x99   : > { %12465 = vst [vmem:[#allocation7_spill] sm:$0xff] %v6724_v31  ;;  %1163 = vrot.lane.b32.xlu1 %v980_v23, %s6383_s13  ;;  %v6834_v23 = vsel %vm940_vm1, %v1314_v11, %v1315_v12  ;;  %v1616_v31 = vld [vmem:[%s7059_s16 + $0x78] sm:$0x3] }
  0x9a   : > { %1161 = vrot.lane.b32.xlu0 %v972_v9, %s6383_s13  ;;  %v1305_v9 = vrot.slane %v6702_v21, 2  ;;  %v1312_v21 = vrot.slane %v6730_v33, 2  ;;  %v1318_v33 = vrot.slane %v6754_v45, 2  ;;  %v1323_v45 = vrot.slane %v6777_v56, 2 }
  0x9b   : > { %v6739_v37 = vpop.permute.xlu1 %995 }
  0x9c   : > { %12466 = vst [vmem:[#allocation8_spill] sm:$0xff] %v6739_v37  ;;  %v6748_v43 = vpop.permute.xlu0 %993  ;;  %v1307_v16 = vsel %vm940_vm1, %v1305_v9, %v1306_v10  ;;  %v6840_v28 = vsel %vm940_vm1, %v1311_v19, %v1312_v21  ;;  %v6857_v42 = vsel %vm940_vm1, %v1317_v30, %v1318_v33  ;;  %v6872_v54 = vsel %vm940_vm1, %v1323_v45, %v1324_v47  ;;  %v1262_v19 = vld [vmem:[%s6685_s22 + $0x88] sm:$0x3] }
  0x9d   : > { %12467 = vst [vmem:[#allocation9_spill] sm:$0xff] %v6748_v43  ;;  %1347 = vrot.lane.b32.xlu1 %v6735_v34, %s12413_s25  ;;  %v1332_v25 = vrot.slane %v1262_v19, 1 }
  0x9e   : > { %1345 = vrot.lane.b32.xlu0 %v1283_v38, %s12413_s25  ;;  %v1326_v38 = vrot.slane %v6771_v53, 2 }
  0x9f   : > { %v6763_v49 = vpop.permute.xlu1 %1007 }
  0xa0   : > { %12468 = vst [vmem:[#allocation10_spill] sm:$0xff] %v6763_v49  ;;  %v6774_v55 = vpop.permute.xlu0 %1005  ;;  %v6867_v51 = vsel %vm940_vm1, %v1326_v38, %v1327_v39 }
  0xa1   : > { %12469 = vst [vmem:[#allocation11_spill] sm:$0xff] %v6774_v55  ;;  %1351 = vrot.lane.b32.xlu1 %v6760_v46, %s12413_s25 }
  0xa2   : > { %1349 = vrot.lane.b32.xlu0 %v6766_v50, %s12413_s25 }
  0xa3   : > { %v6788_v61 = vpop.permute.xlu1 %1011 }
  0xa4   : > { %12470 = vst [vmem:[#allocation12_spill] sm:$0xff] %v6788_v61  ;;  %v6794_v2 = vpop.permute.xlu0 %1009 }
  0xa5   : > { %12471 = vst [vmem:[#allocation13_spill] sm:$0xff] %v6794_v2  ;;  %1355 = vrot.lane.b32.xlu1 %v6785_v58, %s12413_s25 }
  0xa6   : > { %1353 = vrot.lane.b32.xlu0 %v6791_v62, %s12413_s25 }
  0xa7   : > { %v6805_v6 = vpop.permute.xlu1 %1015 }
  0xa8   : > { %12472 = vst [vmem:[#allocation14_spill] sm:$0xff] %v6805_v6  ;;  %v6812_v0 = vpop.permute.xlu0 %1013 }
  0xa9   : > { %12473 = vst [vmem:[#allocation15_spill] sm:$0xff] %v6812_v0  ;;  %1359 = vrot.lane.b32.xlu1 %v6801_v3, %s12413_s25 }
  0xaa   : > { %1357 = vrot.lane.b32.xlu0 %v6808_v8, %s12413_s25 }
  0xab   : > { %v6823_v15 = vpop.permute.xlu1 %1019 }
  0xac   : > { %12474 = vst [vmem:[#allocation16_spill] sm:$0xff] %v6823_v15  ;;  %v6828_v22 = vpop.permute.xlu0 %1017 }
  0xad   : > { %12475 = vst [vmem:[#allocation17_spill] sm:$0xff] %v6828_v22  ;;  %1371 = vrot.lane.b32.xlu1 %v6819_v7, %s12411_s26 }
  0xae   : > { %1369 = vrot.lane.b32.xlu0 %v1307_v16, %s12411_s26 }
  0xaf   : > { %v6837_v27 = vpop.permute.xlu1 %1031 }
  0xb0   : > { %12476 = vst [vmem:[#allocation18_spill] sm:$0xff] %v6837_v27  ;;  %v6844_v35 = vpop.permute.xlu0 %1029 }
  0xb1   : > { %12477 = vst [vmem:[#allocation19_spill] sm:$0xff] %v6844_v35  ;;  %1375 = vrot.lane.b32.xlu1 %v6834_v23, %s12411_s26 }
  0xb2   : > { %1373 = vrot.lane.b32.xlu0 %v6840_v28, %s12411_s26 }
  0xb3   : > { %v6854_v40 = vpop.permute.xlu1 %1035 }
  0xb4   : > { %12478 = vst [vmem:[#allocation20_spill] sm:$0xff] %v6854_v40  ;;  %v6860_v48 = vpop.permute.xlu0 %1033 }
  0xb5   : > { %12479 = vst [vmem:[#allocation21_spill] sm:$0xff] %v6860_v48  ;;  %1379 = vrot.lane.b32.xlu1 %v6851_v36, %s12411_s26 }
  0xb6   : > { %1377 = vrot.lane.b32.xlu0 %v6857_v42, %s12411_s26 }
  0xb7   : > { %v6869_v52 = vpop.permute.xlu1 %1039 }
  0xb8   : > { %12480 = vst [vmem:[#allocation22_spill] sm:$0xff] %v6869_v52  ;;  %v6874_v59 = vpop.permute.xlu0 %1037 }
  0xb9   : > { %12481 = vst [vmem:[#allocation23_spill] sm:$0xff] %v6874_v59  ;;  %1383 = vrot.lane.b32.xlu1 %v6867_v51, %s12411_s26 }
  0xba   : > { %1381 = vrot.lane.b32.xlu0 %v6872_v54, %s12411_s26 }
  0xbb   : > { %v6880_v57 = vpop.permute.xlu1 %1043 }
  0xbc   : > { %12482 = vst [vmem:[#allocation24_spill] sm:$0xff] %v6880_v57  ;;  %v6882_v60 = vpop.permute.xlu0 %1041 }
  0xbd   : > { %12483 = vst [vmem:[#allocation25_spill] sm:$0xff] %v6882_v60  ;;  %1395 = vrot.lane.b32.xlu1 %v6727_v32, %s12409_s27 }
  0xbe   : > { %1393 = vrot.lane.b32.xlu0 %v6694_v18, %s12409_s27  ;;  %v1261_v18 = vld [vmem:[%s6685_s22 + $0x80] sm:$0xff] }
  0xbf   : > { %v6888_v63 = vpop.permute.xlu1 %1055  ;;  %v1331_v24 = vrot.slane %v1261_v18, 1 }
  0xc0   : > { %12484 = vst [vmem:[#allocation26_spill] sm:$0xff] %v6888_v63  ;;  %v6890_v1 = vpop.permute.xlu0 %1053 }
  0xc1   : > { %12485 = vst [vmem:[#allocation27_spill] sm:$0xff] %v6890_v1  ;;  %1399 = vrot.lane.b32.xlu1 %v6751_v44, %s12409_s27 }
  0xc2   : > { %1397 = vrot.lane.b32.xlu0 %v6719_v29, %s12409_s27 }
  0xc3   : > { %v6896_v4 = vpop.permute.xlu1 %1059 }
  0xc4   : > { %12486 = vst [vmem:[#allocation28_spill] sm:$0xff] %v6896_v4  ;;  %v6898_v5 = vpop.permute.xlu0 %1057 }
  0xc5   : > { %12487 = vst [vmem:[#allocation29_spill] sm:$0xff] %v6898_v5  ;;  %1403 = vrot.lane.b32.xlu1 %v6777_v56, %s12409_s27 }
  0xc6   : > { %1401 = vrot.lane.b32.xlu0 %v6745_v41, %s12409_s27 }
  0xc7   : > { %v6905_v9 = vpop.permute.xlu1 %1063 }
  0xc8   : > { %12488 = vst [vmem:[#allocation30_spill] sm:$0xff] %v6905_v9  ;;  %v6907_v10 = vpop.permute.xlu0 %1061 }
  0xc9   : > { %12489 = vst [vmem:[#allocation31_spill] sm:$0xff] %v6907_v10  ;;  %1407 = vrot.lane.b32.xlu1 %v1261_v18, %s12409_s27 }
  0xca   : > { %1405 = vrot.lane.b32.xlu0 %v6771_v53, %s12409_s27 }
  0xcb   : > { %v6912_v11 = vpop.permute.xlu1 %1067 }
  0xcc   : > { %12490 = vst [vmem:[#allocation32_spill] sm:$0xff] %v6912_v11  ;;  %v6914_v12 = vpop.permute.xlu0 %1065  ;;  %v1334_v11 = vrot.slane %v1261_v18, 2 }
  0xcd   : > { %12491 = vst [vmem:[#allocation33_spill] sm:$0xff] %v6914_v12  ;;  %1419 = vrot.lane.b32.xlu1 %v6766_v50, %s12407_s28 }
  0xce   : > { %1417 = vrot.lane.b32.xlu0 %v6735_v34, %s12407_s28  ;;  %v1333_v34 = vsel %vm915_vm0, %v1331_v24, %v1332_v25 }
  0xcf   : > { %v6920_v16 = vpop.permute.xlu1 %1079 }
  0xd0   : > { %12492 = vst [vmem:[#allocation34_spill] sm:$0xff] %v6920_v16  ;;  %v6923_v21 = vpop.permute.xlu0 %1077 }
  0xd1   : > { %12493 = vst [vmem:[#allocation35_spill] sm:$0xff] %v6923_v21  ;;  %1423 = vrot.lane.b32.xlu1 %v6791_v62, %s12407_s28  ;;  %v1618_v21 = vld [vmem:[%s7059_s16 + $0x88] sm:$0x3] }
  0xd2   : > { %1421 = vrot.lane.b32.xlu0 %v6760_v46, %s12407_s28  ;;  %v1688_v63 = vrot.slane %v1618_v21, 1 }
  0xd3   : > { %v6929_v30 = vpop.permute.xlu1 %1083 }
  0xd4   : > { %12494 = vst [vmem:[#allocation36_spill] sm:$0xff] %v6929_v30  ;;  %v6931_v33 = vpop.permute.xlu0 %1081 }
  0xd5   : > { %12495 = vst [vmem:[#allocation37_spill] sm:$0xff] %v6931_v33  ;;  %1427 = vrot.lane.b32.xlu1 %v6808_v8, %s12407_s28 }
  0xd6   : > { %1425 = vrot.lane.b32.xlu0 %v6785_v58, %s12407_s28 }
  0xd7   : > { %v6938_v38 = vpop.permute.xlu1 %1087 }
  0xd8   : > { %12496 = vst [vmem:[#allocation38_spill] sm:$0xff] %v6938_v38  ;;  %v6940_v39 = vpop.permute.xlu0 %1085  ;;  %v7093_v38 = vld [vmem:[%s7059_s16 + $0x30] sm:$0xff] }
  0xd9   : > { %12497 = vst [vmem:[#allocation39_spill] sm:$0xff] %v6940_v39  ;;  %1431 = vrot.lane.b32.xlu1 %v1333_v34, %s12407_s28  ;;  %v7129_v39 = vld [vmem:[%s7059_s16 + $0x48] sm:$0x3] }
  0xda   : > { %1429 = vrot.lane.b32.xlu0 %v6801_v3, %s12407_s28  ;;  %v1650_v0 = vrot.slane %v7129_v39, 1 }
  0xdb   : > { %v6945_v45 = vpop.permute.xlu1 %1091 }
  0xdc   : > { %12498 = vst [vmem:[#allocation40_spill] sm:$0xff] %v6945_v45  ;;  %v6947_v47 = vpop.permute.xlu0 %1089  ;;  %v1335_v45 = vrot.slane %v1262_v19, 2 }
  0xdd   : > { %12499 = vst [vmem:[#allocation41_spill] sm:$0xff] %v6947_v47  ;;  %1443 = vrot.lane.b32.xlu1 %v6840_v28, %s12405_s29 }
  0xde   : > { %1441 = vrot.lane.b32.xlu0 %v6819_v7, %s12405_s29  ;;  %v6970_v7 = vsel %vm940_vm1, %v1334_v11, %v1335_v45 }
  0xdf   : > { %v6953_v24 = vpop.permute.xlu1 %1103 }
  0xe0   : > { %12500 = vst [vmem:[#allocation42_spill] sm:$0xff] %v6953_v24  ;;  %v6955_v25 = vpop.permute.xlu0 %1101 }
  0xe1   : > { %12501 = vst [vmem:[#allocation43_spill] sm:$0xff] %v6955_v25  ;;  %1447 = vrot.lane.b32.xlu1 %v6857_v42, %s12405_s29 }
  0xe2   : > { %1445 = vrot.lane.b32.xlu0 %v6834_v23, %s12405_s29 }
  0xe3   : > { %v6961_v57 = vpop.permute.xlu1 %1107 }
  0xe4   : > { %12502 = vst [vmem:[#allocation44_spill] sm:$0xff] %v6961_v57  ;;  %v6963_v15 = vpop.permute.xlu0 %1105  ;;  %v7146_v57 = vld [vmem:[%s7059_s16 + $0x70] sm:$0xff] }
  0xe5   : > { %12503 = vst [vmem:[#allocation45_spill] sm:$0xff] %v6963_v15  ;;  %1451 = vrot.lane.b32.xlu1 %v6872_v54, %s12405_s29 }
  0xe6   : > { %1449 = vrot.lane.b32.xlu0 %v6851_v36, %s12405_s29 }
  0xe7   : > { %v6972_v37 = vpop.permute.xlu1 %1111 }
  0xe8   : > { %12504 = vst [vmem:[#allocation46_spill] sm:$0xff] %v6972_v37  ;;  %v6974_v47 = vpop.permute.xlu0 %1109 }
  0xe9   : > { %12505 = vst [vmem:[#allocation47_spill] sm:$0xff] %v6974_v47  ;;  %1455 = vrot.lane.b32.xlu1 %v6970_v7, %s12405_s29 }
  0xea   : > { %1453 = vrot.lane.b32.xlu0 %v6867_v51, %s12405_s29 }
  0xeb   : > { %v6980_v19 = vpop.permute.xlu1 %1115 }
  0xec   : > { %12506 = vst [vmem:[#allocation48_spill] sm:$0xff] %v6980_v19  ;;  %v6982_v12 = vpop.permute.xlu0 %1113 }
  0xed   : > { %12507 = vst [vmem:[#allocation49_spill] sm:$0xff] %v6982_v12  ;;  %1467 = vrot.lane.b32.xlu1 %v6719_v29, %s12403_s30  ;;  %v1263_v29 = vld [vmem:[%s6685_s22 + $0x90] sm:$0xff] }
  0xee   : > { %1465 = vrot.lane.b32.xlu0 %v6727_v32, %s12403_s30 }
  0xef   : > { %v6988_v11 = vpop.permute.xlu1 %1127 }
  0xf0   : > { %12508 = vst [vmem:[#allocation50_spill] sm:$0xff] %v6988_v11  ;;  %v6990_v45 = vpop.permute.xlu0 %1125 }
  0xf1   : > { %12509 = vst [vmem:[#allocation51_spill] sm:$0xff] %v6990_v45  ;;  %1471 = vrot.lane.b32.xlu1 %v6745_v41, %s12403_s30 }
  0xf2   : > { %1469 = vrot.lane.b32.xlu0 %v6751_v44, %s12403_s30 }
  0xf3   : > { %v6996_v19 = vpop.permute.xlu1 %1131 }
  0xf4   : > { %12510 = vst [vmem:[#allocation52_spill] sm:$0xff] %v6996_v19  ;;  %v6998_v12 = vpop.permute.xlu0 %1129 }
  0xf5   : > { %12511 = vst [vmem:[#allocation53_spill] sm:$0xff] %v6998_v12  ;;  %1475 = vrot.lane.b32.xlu1 %v6771_v53, %s12403_s30 }
  0xf6   : > { %1473 = vrot.lane.b32.xlu0 %v6777_v56, %s12403_s30  ;;  %v1264_v56 = vld [vmem:[%s6685_s22 + $0x98] sm:$0x3] }
  0xf7   : > { %v7005_v32 = vpop.permute.xlu1 %1135 }
  0xf8   : > { %12512 = vst [vmem:[#allocation54_spill] sm:$0xff] %v7005_v32  ;;  %v7007_v60 = vpop.permute.xlu0 %1133 }
  0xf9   : > { %12513 = vst [vmem:[#allocation55_spill] sm:$0xff] %v7007_v60  ;;  %1479 = vrot.lane.b32.xlu1 %v1263_v29, %s12403_s30 }
  0xfa   : > { %1477 = vrot.lane.b32.xlu0 %v1261_v18, %s12403_s30  ;;  %v1339_v18 = vrot.slane %v1263_v29, 1 }
  0xfb   : > { %v7011_v41 = vpop.permute.xlu1 %1139 }
  0xfc   : > { %12514 = vst [vmem:[#allocation56_spill] sm:$0xff] %v7011_v41  ;;  %v7013_v44 = vpop.permute.xlu0 %1137  ;;  %v1340_v41 = vrot.slane %v1264_v56, 1 }
  0xfd   : > { %12515 = vst [vmem:[#allocation57_spill] sm:$0xff] %v7013_v44  ;;  %1491 = vrot.lane.b32.xlu1 %v6760_v46, %s6382_s12 }
  0xfe   : > { %1489 = vrot.lane.b32.xlu0 %v6766_v50, %s6382_s12  ;;  %v1341_v50 = vsel %vm915_vm0, %v1339_v18, %v1340_v41  ;;  %v7068_v41 = vld [vmem:[%s7059_s16 + $0x10] sm:$0xff]  ;;  %v7071_v18 = vld [vmem:[%s7059_s16 + $0x18] sm:$0x3] }
  0xff   : > { %v7019_v53 = vpop.permute.xlu1 %1151  ;;  %v1665_v15 = vrot.slane %v7071_v18, 2 }
 0x100   : > { %12516 = vst [vmem:[#allocation58_spill] sm:$0xff] %v7019_v53  ;;  %v7022_v32 = vpop.permute.xlu0 %1149 }
 0x101   : > { %12517 = vst [vmem:[#allocation59_spill] sm:$0xff] %v7022_v32  ;;  %1495 = vrot.lane.b32.xlu1 %v6785_v58, %s6382_s12 }
 0x102   : > { %1493 = vrot.lane.b32.xlu0 %v6791_v62, %s6382_s12 }
 0x103   : > { %v7028_v44 = vpop.permute.xlu1 %1155 }
 0x104   : > { %12518 = vst [vmem:[#allocation60_spill] sm:$0xff] %v7028_v44  ;;  %v7030_v46 = vpop.permute.xlu0 %1153 }
 0x105   : > { %12519 = vst [vmem:[#allocation61_spill] sm:$0xff] %v7030_v46  ;;  %1499 = vrot.lane.b32.xlu1 %v6801_v3, %s6382_s12 }
 0x106   : > { %1497 = vrot.lane.b32.xlu0 %v6808_v8, %s6382_s12 }
 0x107   : > { %v7037_v22 = vpop.permute.xlu1 %1159 }
 0x108   : > { %12520 = vst [vmem:[#allocation62_spill] sm:$0xff] %v7037_v22  ;;  %v7039_v58 = vpop.permute.xlu0 %1157 }
 0x109   : > { %12521 = vst [vmem:[#allocation63_spill] sm:$0xff] %v7039_v58  ;;  %1503 = vrot.lane.b32.xlu1 %v1341_v50, %s6382_s12  ;;  %v1646_v58 = vrot.slane %v7093_v38, 1 }
 0x10a   : > { %1501 = vrot.lane.b32.xlu0 %v1333_v34, %s6382_s12 }
 0x10b   : > { %v7043_v62 = vpop.permute.xlu1 %1163 }
 0x10c   : > { %12522 = vst [vmem:[#allocation64_spill] sm:$0xff] %v7043_v62  ;;  %v7045_v37 = vpop.permute.xlu0 %1161  ;;  %v7076_v62 = vld [vmem:[%s7059_s16] sm:$0xff] }
 0x10d   : > { %12523 = vst [vmem:[#allocation65_spill] sm:$0xff] %v7045_v37  ;;  %1515 = vrot.lane.b32.xlu1 %v6834_v23, %s6383_s13  ;;  %v1342_v23 = vrot.slane %v1263_v29, 2  ;;  %v1640_v29 = vrot.slane %v7068_v41, 1  ;;  %v1637_v22 = vrot.slane %v7076_v62, 1  ;;  %v1661_v17 = vrot.slane %v7076_v62, 2 }
 0x10e   : > { %1513 = vrot.lane.b32.xlu0 %v6840_v28, %s6383_s13  ;;  %v1343_v28 = vrot.slane %v1264_v56, 2  ;;  %v1641_v56 = vrot.slane %v7071_v18, 1  ;;  %v1670_v18 = vrot.slane %v7093_v38, 2 }
 0x10f   : > { %v7052_v3 = vpop.permute.xlu1 %1347 }
 0x110   : > { %v7054_v8 = vpop.permute.xlu0 %1345  ;;  %v7110_v9 = vsel %vm915_vm0, %v1640_v29, %v1641_v56  ;;  %v7126_v56 = vld [vmem:[%s7059_s16 + $0x40] sm:$0xff] }
 0x111   : > { %1519 = vrot.lane.b32.xlu1 %v6851_v36, %s6383_s13  ;;  %v7079_v36 = vld [vmem:[%s7059_s16 + $0x8] sm:$0x3]  ;;  %v1649_v19 = vrot.slane %v7126_v56, 1 }
 0x112   : > { %1517 = vrot.lane.b32.xlu0 %v6857_v42, %s6383_s13  ;;  %v1344_v42 = vsel %vm940_vm1, %v1342_v23, %v1343_v28  ;;  %v1638_v43 = vrot.slane %v7079_v36, 1  ;;  %v7101_v23 = vld [vmem:[%s7059_s16 + $0x20] sm:$0xff]  ;;  %v7104_v28 = vld [vmem:[%s7059_s16 + $0x28] sm:$0x3]  ;;  %v1662_v33 = vrot.slane %v7079_v36, 2 }
 0x113   : > { %v7065_v34 = vpop.permute.xlu1 %1351  ;;  %v1643_v47 = vrot.slane %v7101_v23, 1  ;;  %v1644_v26 = vrot.slane %v7104_v28, 1  ;;  %v7166_v46 = vsel %vm915_vm0, %v1649_v19, %v1650_v0  ;;  %v1667_v36 = vrot.slane %v7101_v23, 2 }
 0x114   : > { %12525 = vst [vmem:[#allocation66_spill] sm:$0xff] %v7065_v34  ;;  %v7073_v50 = vpop.permute.xlu0 %1349  ;;  %v1639_v6 = vsel %vm915_vm0, %v1637_v22, %v1638_v43  ;;  %v1663_v62 = vsel %vm940_vm1, %v1661_v17, %v1662_v33  ;;  %v1673_v33 = vrot.slane %v7126_v56, 2 }
 0x115   : > { %12526 = vst [vmem:[#allocation67_spill] sm:$0xff] %v7073_v50  ;;  %1523 = vrot.lane.b32.xlu1 %v6867_v51, %s6383_s13  ;;  %v7096_v51 = vld [vmem:[%s7059_s16 + $0x38] sm:$0x3]  ;;  %v7141_v59 = vsel %vm915_vm0, %v1643_v47, %v1644_v26  ;;  %v1658_v47 = vrot.slane %v7146_v57, 1 }
 0x116   : > { %1521 = vrot.lane.b32.xlu0 %v6872_v54, %s6383_s13  ;;  %v1647_v52 = vrot.slane %v7096_v51, 1 }
 0x117   : > { %v7088_v37 = vpop.permute.xlu1 %1355 }
 0x118   : > { %12527 = vst [vmem:[#allocation68_spill] sm:$0xff] %v7088_v37  ;;  %v7098_v54 = vpop.permute.xlu0 %1353  ;;  %v7135_v43 = vsel %vm915_vm0, %v1646_v58, %v1647_v52  ;;  %v1614_v52 = vld [vmem:[%s7059_s16 + $0x68] sm:$0x3]  ;;  %v1659_v58 = vrot.slane %v1616_v31, 1 }
 0x119   : > { %12528 = vst [vmem:[#allocation69_spill] sm:$0xff] %v7098_v54  ;;  %1527 = vrot.lane.b32.xlu1 %v1344_v42, %s6383_s13  ;;  %v7120_v42 = vld [vmem:[%s7059_s16 + $0x50] sm:$0xff]  ;;  %v1656_v12 = vrot.slane %v1614_v52, 1 }
 0x11a   : > { %1525 = vrot.lane.b32.xlu0 %v6970_v7, %s6383_s13  ;;  %v1612_v7 = vld [vmem:[%s7059_s16 + $0x58] sm:$0x3]  ;;  %v1652_v22 = vrot.slane %v7120_v42, 1 }
 0x11b   : > { %v7114_v60 = vpop.permute.xlu1 %1359  ;;  %v1653_v10 = vrot.slane %v1612_v7, 1 }
 0x11c   : > { %12529 = vst [vmem:[#allocation70_spill] sm:$0xff] %v7114_v60  ;;  %v7123_v29 = vpop.permute.xlu0 %1357 }
 0x11d   : > { %12530 = vst [vmem:[#allocation71_spill] sm:$0xff] %v7123_v29  ;;  %1703 = vrot.lane.b32.xlu1 %v7110_v9, %s12413_s25  ;;  %v7160_v26 = vsel %vm915_vm0, %v1652_v22, %v1653_v10  ;;  %v7176_v10 = vsel %vm915_vm0, %v1658_v47, %v1659_v58  ;;  %v1664_v22 = vrot.slane %v7068_v41, 2  ;;  %v1668_v58 = vrot.slane %v7104_v28, 2 }
 0x11e   : > { %1701 = vrot.lane.b32.xlu0 %v1639_v6, %s12413_s25  ;;  %v7152_v6 = vld [vmem:[%s7059_s16 + $0x60] sm:$0xff]  ;;  %v1674_v28 = vrot.slane %v7129_v39, 2 }
 0x11f   : > { %v7138_v44 = vpop.permute.xlu1 %1371  ;;  %v1655_v40 = vrot.slane %v7152_v6, 1  ;;  %v7194_v47 = vsel %vm940_vm1, %v1664_v22, %v1665_v15  ;;  %v1677_v22 = vrot.slane %v1612_v7, 2  ;;  %v7215_v17 = vsel %vm940_vm1, %v1667_v36, %v1668_v58 }
 0x120   : > { %v7149_v30 = vpop.permute.xlu0 %1369  ;;  %v1682_v7 = vrot.slane %v7146_v57, 2  ;;  %v7232_v36 = vsel %vm940_vm1, %v1673_v33, %v1674_v28  ;;  %v1679_v39 = vrot.slane %v7152_v6, 2  ;;  %v1680_v58 = vrot.slane %v1614_v52, 2 }
 0x121   : > { %1707 = vrot.lane.b32.xlu1 %v7135_v43, %s12413_s25  ;;  %v7183_v19 = vsel %vm915_vm0, %v1655_v40, %v1656_v12  ;;  %v1671_v40 = vrot.slane %v7096_v51, 2  ;;  %v1676_v51 = vrot.slane %v7120_v42, 2 }
 0x122   : > { %1705 = vrot.lane.b32.xlu0 %v7141_v59, %s12413_s25 }
 0x123   : > { %v7163_v4 = vpop.permute.xlu1 %1375  ;;  %v7209_v15 = vsel %vm940_vm1, %v1670_v18, %v1671_v40  ;;  %v7226_v18 = vsel %vm940_vm1, %v1676_v51, %v1677_v22  ;;  %v1683_v40 = vrot.slane %v1616_v31, 2  ;;  %v7247_v22 = vsel %vm940_vm1, %v1679_v39, %v1680_v58 }
 0x124   : > { %12531 = vst [vmem:[#allocation72_spill] sm:$0xff] %v7163_v4  ;;  %v7169_v61 = vpop.permute.xlu0 %1373 }
 0x125   : > { %12532 = vst [vmem:[#allocation73_spill] sm:$0xff] %v7169_v61  ;;  %1711 = vrot.lane.b32.xlu1 %v7160_v26, %s12413_s25  ;;  %v7242_v51 = vsel %vm940_vm1, %v1682_v7, %v1683_v40 }
 0x126   : > { %1709 = vrot.lane.b32.xlu0 %v7166_v46, %s12413_s25 }
 0x127   : > { %v7180_v0 = vpop.permute.xlu1 %1379 }
 0x128   : > { %12533 = vst [vmem:[#allocation74_spill] sm:$0xff] %v7180_v0  ;;  %v7187_v5 = vpop.permute.xlu0 %1377 }
 0x129   : > { %12534 = vst [vmem:[#allocation75_spill] sm:$0xff] %v7187_v5  ;;  %1715 = vrot.lane.b32.xlu1 %v7176_v10, %s12413_s25 }
 0x12a   : > { %1713 = vrot.lane.b32.xlu0 %v7183_v19, %s12413_s25 }
 0x12b   : > { %v7198_v12 = vpop.permute.xlu1 %1383 }
 0x12c   : > { %12535 = vst [vmem:[#allocation76_spill] sm:$0xff] %v7198_v12  ;;  %v7203_v48 = vpop.permute.xlu0 %1381 }
 0x12d   : > { %12536 = vst [vmem:[#allocation77_spill] sm:$0xff] %v7203_v48  ;;  %1727 = vrot.lane.b32.xlu1 %v7194_v47, %s12411_s26 }
 0x12e   : > { %1725 = vrot.lane.b32.xlu0 %v1663_v62, %s12411_s26 }
 0x12f   : > { %v7212_v2 = vpop.permute.xlu1 %1395 }
 0x130   : > { %v7219_v13 = vpop.permute.xlu0 %1393 }
 0x131   : > { %1731 = vrot.lane.b32.xlu1 %v7209_v15, %s12411_s26 }
 0x132   : > { %1729 = vrot.lane.b32.xlu0 %v7215_v17, %s12411_s26 }
 0x133   : > { %v7229_v62 = vpop.permute.xlu1 %1399 }
 0x134   : > { %12537 = vst [vmem:[#allocation78_spill] sm:$0xff] %v7229_v62  ;;  %v7235_v32 = vpop.permute.xlu0 %1397 }
 0x135   : > { %12538 = vst [vmem:[#allocation79_spill] sm:$0xff] %v7235_v32  ;;  %1735 = vrot.lane.b32.xlu1 %v7226_v18, %s12411_s26 }
 0x136   : > { %1733 = vrot.lane.b32.xlu0 %v7232_v36, %s12411_s26 }
 0x137   : > { %v7244_v31 = vpop.permute.xlu1 %1403 }
 0x138   : > { %12539 = vst [vmem:[#allocation80_spill] sm:$0xff] %v7244_v31  ;;  %v7249_v33 = vpop.permute.xlu0 %1401 }
 0x139   : > { %12540 = vst [vmem:[#allocation81_spill] sm:$0xff] %v7249_v33  ;;  %1739 = vrot.lane.b32.xlu1 %v7242_v51, %s12411_s26 }
 0x13a   : > { %1737 = vrot.lane.b32.xlu0 %v7247_v22, %s12411_s26 }
 0x13b   : > { %v7255_v52 = vpop.permute.xlu1 %1407 }
 0x13c   : > { %12541 = vst [vmem:[#allocation82_spill] sm:$0xff] %v7255_v52  ;;  %v7257_v28 = vpop.permute.xlu0 %1405 }
 0x13d   : > { %12542 = vst [vmem:[#allocation83_spill] sm:$0xff] %v7257_v28  ;;  %1751 = vrot.lane.b32.xlu1 %v7101_v23, %s12409_s27 }
 0x13e   : > { %1749 = vrot.lane.b32.xlu0 %v7068_v41, %s12409_s27  ;;  %v1617_v41 = vld [vmem:[%s7059_s16 + $0x80] sm:$0xff] }
 0x13f   : > { %v7263_v7 = vpop.permute.xlu1 %1419  ;;  %v1687_v1 = vrot.slane %v1617_v41, 1 }
 0x140   : > { %v7265_v40 = vpop.permute.xlu0 %1417 }
 0x141   : > { %1755 = vrot.lane.b32.xlu1 %v7126_v56, %s12409_s27 }
 0x142   : > { %1753 = vrot.lane.b32.xlu0 %v7093_v38, %s12409_s27 }
 0x143   : > { %v7271_v39 = vpop.permute.xlu1 %1423 }
 0x144   : > { %12543 = vst [vmem:[#allocation84_spill] sm:$0xff] %v7271_v39  ;;  %v7273_v58 = vpop.permute.xlu0 %1421 }
 0x145   : > { %12544 = vst [vmem:[#allocation85_spill] sm:$0xff] %v7273_v58  ;;  %1759 = vrot.lane.b32.xlu1 %v7152_v6, %s12409_s27 }
 0x146   : > { %1757 = vrot.lane.b32.xlu0 %v7120_v42, %s12409_s27 }
 0x147   : > { %v7280_v53 = vpop.permute.xlu1 %1427 }
 0x148   : > { %12545 = vst [vmem:[#allocation86_spill] sm:$0xff] %v7280_v53  ;;  %v7282_v45 = vpop.permute.xlu0 %1425 }
 0x149   : > { %12546 = vst [vmem:[#allocation87_spill] sm:$0xff] %v7282_v45  ;;  %1763 = vrot.lane.b32.xlu1 %v1617_v41, %s12409_s27 }
 0x14a   : > { %1761 = vrot.lane.b32.xlu0 %v7146_v57, %s12409_s27 }
 0x14b   : > { %v7287_v11 = vpop.permute.xlu1 %1431 }
 0x14c   : > { %12547 = vst [vmem:[#allocation88_spill] sm:$0xff] %v7287_v11  ;;  %v7289_v25 = vpop.permute.xlu0 %1429  ;;  %v1690_v11 = vrot.slane %v1617_v41, 2 }
 0x14d   : > { %12548 = vst [vmem:[#allocation89_spill] sm:$0xff] %v7289_v25  ;;  %1775 = vrot.lane.b32.xlu1 %v7141_v59, %s12407_s28 }
 0x14e   : > { %1773 = vrot.lane.b32.xlu0 %v7110_v9, %s12407_s28  ;;  %v1689_v9 = vsel %vm915_vm0, %v1687_v1, %v1688_v63 }
 0x14f   : > { %v7295_v24 = vpop.permute.xlu1 %1443 }
 0x150   : > { %v7298_v16 = vpop.permute.xlu0 %1441 }
 0x151   : > { %1779 = vrot.lane.b32.xlu1 %v7166_v46, %s12407_s28 }
 0x152   : > { %1777 = vrot.lane.b32.xlu0 %v7135_v43, %s12407_s28 }
 0x153   : > { %v7304_v35 = vpop.permute.xlu1 %1447 }
 0x154   : > { %12549 = vst [vmem:[#allocation90_spill] sm:$0xff] %v7304_v35  ;;  %v7306_v27 = vpop.permute.xlu0 %1445 }
 0x155   : > { %12550 = vst [vmem:[#allocation91_spill] sm:$0xff] %v7306_v27  ;;  %1783 = vrot.lane.b32.xlu1 %v7183_v19, %s12407_s28 }
 0x156   : > { %1781 = vrot.lane.b32.xlu0 %v7160_v26, %s12407_s28 }
 0x157   : > { %v7313_v55 = vpop.permute.xlu1 %1451 }
 0x158   : > { %12551 = vst [vmem:[#allocation92_spill] sm:$0xff] %v7313_v55  ;;  %v7315_v49 = vpop.permute.xlu0 %1449 }
 0x159   : > { %12552 = vst [vmem:[#allocation93_spill] sm:$0xff] %v7315_v49  ;;  %1787 = vrot.lane.b32.xlu1 %v1689_v9, %s12407_s28 }
 0x15a   : > { %1785 = vrot.lane.b32.xlu0 %v7176_v10, %s12407_s28 }
 0x15b   : > { %v7320_v20 = vpop.permute.xlu1 %1455 }
 0x15c   : > { %12553 = vst [vmem:[#allocation94_spill] sm:$0xff] %v7320_v20  ;;  %v7322_v14 = vpop.permute.xlu0 %1453  ;;  %v1691_v20 = vrot.slane %v1618_v21, 2 }
 0x15d   : > { %12554 = vst [vmem:[#allocation95_spill] sm:$0xff] %v7322_v14  ;;  %1799 = vrot.lane.b32.xlu1 %v7215_v17, %s12405_s29 }
 0x15e   : > { %1797 = vrot.lane.b32.xlu0 %v7194_v47, %s12405_s29  ;;  %v7345_v47 = vsel %vm940_vm1, %v1690_v11, %v1691_v20 }
 0x15f   : > { %v7328_v63 = vpop.permute.xlu1 %1467 }
 0x160   : > { %v7330_v1 = vpop.permute.xlu0 %1465 }
 0x161   : > { %1803 = vrot.lane.b32.xlu1 %v7232_v36, %s12405_s29 }
 0x162   : > { %1801 = vrot.lane.b32.xlu0 %v7209_v15, %s12405_s29 }
 0x163   : > { %v7336_v52 = vpop.permute.xlu1 %1471 }
 0x164   : > { %12555 = vst [vmem:[#allocation96_spill] sm:$0xff] %v7336_v52  ;;  %v7338_v12 = vpop.permute.xlu0 %1469 }
 0x165   : > { %12556 = vst [vmem:[#allocation97_spill] sm:$0xff] %v7338_v12  ;;  %1807 = vrot.lane.b32.xlu1 %v7247_v22, %s12405_s29 }
 0x166   : > { %1805 = vrot.lane.b32.xlu0 %v7226_v18, %s12405_s29 }
 0x167   : > { %v7347_v14 = vpop.permute.xlu1 %1475 }
 0x168   : > { %12557 = vst [vmem:[#allocation98_spill] sm:$0xff] %v7347_v14  ;;  %v7349_v60 = vpop.permute.xlu0 %1473 }
 0x169   : > { %12558 = vst [vmem:[#allocation99_spill] sm:$0xff] %v7349_v60  ;;  %1811 = vrot.lane.b32.xlu1 %v7345_v47, %s12405_s29 }
 0x16a   : > { %1809 = vrot.lane.b32.xlu0 %v7242_v51, %s12405_s29 }
 0x16b   : > { %v7355_v21 = vpop.permute.xlu1 %1479 }
 0x16c   : > { %12559 = vst [vmem:[#allocation100_spill] sm:$0xff] %v7355_v21  ;;  %v7357_v25 = vpop.permute.xlu0 %1477 }
 0x16d   : > { %12560 = vst [vmem:[#allocation101_spill] sm:$0xff] %v7357_v25  ;;  %1823 = vrot.lane.b32.xlu1 %v7093_v38, %s12403_s30  ;;  %v1619_v38 = vld [vmem:[%s7059_s16 + $0x90] sm:$0xff] }
 0x16e   : > { %1821 = vrot.lane.b32.xlu0 %v7101_v23, %s12403_s30 }
 0x16f   : > { %v7363_v20 = vpop.permute.xlu1 %1491 }
 0x170   : > { %v7365_v11 = vpop.permute.xlu0 %1489 }
 0x171   : > { %1827 = vrot.lane.b32.xlu1 %v7120_v42, %s12403_s30 }
 0x172   : > { %1825 = vrot.lane.b32.xlu0 %v7126_v56, %s12403_s30 }
 0x173   : > { %v7371_v21 = vpop.permute.xlu1 %1495 }
 0x174   : > { %12561 = vst [vmem:[#allocation102_spill] sm:$0xff] %v7371_v21  ;;  %v7373_v25 = vpop.permute.xlu0 %1493 }
 0x175   : > { %12562 = vst [vmem:[#allocation103_spill] sm:$0xff] %v7373_v25  ;;  %1831 = vrot.lane.b32.xlu1 %v7146_v57, %s12403_s30 }
 0x176   : > { %1829 = vrot.lane.b32.xlu0 %v7152_v6, %s12403_s30  ;;  %v1620_v6 = vld [vmem:[%s7059_s16 + $0x98] sm:$0x3] }
 0x177   : > { %v7380_v23 = vpop.permute.xlu1 %1499 }
 0x178   : > { %12563 = vst [vmem:[#allocation104_spill] sm:$0xff] %v7380_v23  ;;  %v7382_v28 = vpop.permute.xlu0 %1497 }
 0x179   : > { %12564 = vst [vmem:[#allocation105_spill] sm:$0xff] %v7382_v28  ;;  %1835 = vrot.lane.b32.xlu1 %v1619_v38, %s12403_s30 }
 0x17a   : > { %1833 = vrot.lane.b32.xlu0 %v1617_v41, %s12403_s30  ;;  %v1695_v41 = vrot.slane %v1619_v38, 1  ;;  %s7434_s30 = scalar_lea.vmem %s12574_s3, %s5981_s23  ;;  %s12618_s23 = smov 24  }
 0x17b   : > { %v7386_v42 = vpop.permute.xlu1 %1503  ;;  %v7468_v55 = vld [vmem:[%s7434_s30 + $0x30] sm:$0xff]  ;;  %v7504_v49 = vld [vmem:[%s7434_s30 + $0x48] sm:$0x3]  ;;  %v1972_v5 = vld [vmem:[%s7434_s30 + $0x78] sm:$0x3]  ;;  %s8559_s3 = scalar_lea.vmem %s12770_s6, %s5987_s0  ;;  %s5989_s0 = sadd.s32 1120, %s6467_s21 }
 0x17c   : > { %12565 = vst [vmem:[#allocation106_spill] sm:$0xff] %v7386_v42  ;;  %v7388_v56 = vpop.permute.xlu0 %1501  ;;  %v1696_v42 = vrot.slane %v1620_v6, 1  ;;  %v2006_v45 = vrot.slane %v7504_v49, 1  ;;  %v7521_v33 = vld [vmem:[%s7434_s30 + $0x70] sm:$0xff] }
 0x17d   : > { %12566 = vst [vmem:[#allocation107_spill] sm:$0xff] %v7388_v56  ;;  %1847 = vrot.lane.b32.xlu1 %v7135_v43, %s6382_s12 }
 0x17e   : > { %1845 = vrot.lane.b32.xlu0 %v7141_v59, %s6382_s12  ;;  %v1697_v59 = vsel %vm915_vm0, %v1695_v41, %v1696_v42  ;;  %v7443_v42 = vld [vmem:[%s7434_s30 + $0x10] sm:$0xff]  ;;  %v7446_v41 = vld [vmem:[%s7434_s30 + $0x18] sm:$0x3] }
 0x17f   : > { %v7394_v57 = vpop.permute.xlu1 %1515 }
 0x180   : > { %v7397_v48 = vpop.permute.xlu0 %1513 }
 0x181   : > { %1851 = vrot.lane.b32.xlu1 %v7160_v26, %s6382_s12 }
 0x182   : > { %1849 = vrot.lane.b32.xlu0 %v7166_v46, %s6382_s12 }
 0x183   : > { %v7403_v56 = vpop.permute.xlu1 %1519 }
 0x184   : > { %12567 = vst [vmem:[#allocation108_spill] sm:$0xff] %v7403_v56  ;;  %v7405_v43 = vpop.permute.xlu0 %1517 }
 0x185   : > { %12568 = vst [vmem:[#allocation109_spill] sm:$0xff] %v7405_v43  ;;  %1855 = vrot.lane.b32.xlu1 %v7176_v10, %s6382_s12 }
 0x186   : > { %1853 = vrot.lane.b32.xlu0 %v7183_v19, %s6382_s12 }
 0x187   : > { %v7412_v29 = vpop.permute.xlu1 %1523 }
 0x188   : > { %12569 = vst [vmem:[#allocation110_spill] sm:$0xff] %v7412_v29  ;;  %v7414_v26 = vpop.permute.xlu0 %1521 }
 0x189   : > { %12570 = vst [vmem:[#allocation111_spill] sm:$0xff] %v7414_v26  ;;  %1859 = vrot.lane.b32.xlu1 %v1697_v59, %s6382_s12  ;;  %v2002_v26 = vrot.slane %v7468_v55, 1 }
 0x18a   : > { %1857 = vrot.lane.b32.xlu0 %v1689_v9, %s6382_s12 }
 0x18b   : > { %v7418_v46 = vpop.permute.xlu1 %1527 }
 0x18c   : > { %12571 = vst [vmem:[#allocation112_spill] sm:$0xff] %v7418_v46  ;;  %v7420_v23 = vpop.permute.xlu0 %1525  ;;  %v7451_v46 = vld [vmem:[%s7434_s30] sm:$0xff] }
 0x18d   : > { %12572 = vst [vmem:[#allocation113_spill] sm:$0xff] %v7420_v23  ;;  %1871 = vrot.lane.b32.xlu1 %v7209_v15, %s6383_s13  ;;  %v1698_v15 = vrot.slane %v1619_v38, 2  ;;  %v1996_v38 = vrot.slane %v7443_v42, 1  ;;  %v1993_v29 = vrot.slane %v7451_v46, 1  ;;  %v2017_v43 = vrot.slane %v7451_v46, 2 }
 0x18e   : > { %1869 = vrot.lane.b32.xlu0 %v7215_v17, %s6383_s13  ;;  %v1699_v17 = vrot.slane %v1620_v6, 2  ;;  %v1997_v6 = vrot.slane %v7446_v41, 1 }
 0x18f   : > { %v7427_v10 = vpop.permute.xlu1 %1703 }
 0x190   : > { %12573 = vst [vmem:[#allocation114_spill] sm:$0xff] %v7427_v10  ;;  %v7429_v19 = vpop.permute.xlu0 %1701 }
 0x191   : > { %1875 = vrot.lane.b32.xlu1 %v7226_v18, %s6383_s13  ;;  %v7454_v18 = vld [vmem:[%s7434_s30 + $0x8] sm:$0x3] }
 0x192   : > { %1873 = vrot.lane.b32.xlu0 %v7232_v36, %s6383_s13  ;;  %v1700_v36 = vsel %vm940_vm1, %v1698_v15, %v1699_v17  ;;  %v1994_v14 = vrot.slane %v7454_v18, 1  ;;  %v7476_v15 = vld [vmem:[%s7434_s30 + $0x20] sm:$0xff]  ;;  %v7479_v17 = vld [vmem:[%s7434_s30 + $0x28] sm:$0x3]  ;;  %v2018_v39 = vrot.slane %v7454_v18, 2 }
 0x193   : > { %v7440_v9 = vpop.permute.xlu1 %1707  ;;  %v1999_v60 = vrot.slane %v7476_v15, 1  ;;  %v2000_v0 = vrot.slane %v7479_v17, 1  ;;  %v2023_v18 = vrot.slane %v7476_v15, 2 }
 0x194   : > { %12575 = vst [vmem:[#allocation115_spill] sm:$0xff] %v7440_v9  ;;  %v7448_v59 = vpop.permute.xlu0 %1705  ;;  %v1995_v31 = vsel %vm915_vm0, %v1993_v29, %v1994_v14  ;;  %v2019_v46 = vsel %vm940_vm1, %v2017_v43, %v2018_v39 }
 0x195   : > { %12576 = vst [vmem:[#allocation116_spill] sm:$0xff] %v7448_v59  ;;  %1879 = vrot.lane.b32.xlu1 %v7242_v51, %s6383_s13  ;;  %v7471_v51 = vld [vmem:[%s7434_s30 + $0x38] sm:$0x3] }
 0x196   : > { %1877 = vrot.lane.b32.xlu0 %v7247_v22, %s6383_s13  ;;  %v2003_v53 = vrot.slane %v7471_v51, 1 }
 0x197   : > { %v7463_v23 = vpop.permute.xlu1 %1711 }
 0x198   : > { %12577 = vst [vmem:[#allocation117_spill] sm:$0xff] %v7463_v23  ;;  %v7473_v22 = vpop.permute.xlu0 %1709  ;;  %v7485_v23 = vsel %vm915_vm0, %v1996_v38, %v1997_v6  ;;  %v7501_v6 = vld [vmem:[%s7434_s30 + $0x40] sm:$0xff]  ;;  %v7510_v14 = vsel %vm915_vm0, %v2002_v26, %v2003_v53  ;;  %v1970_v53 = vld [vmem:[%s7434_s30 + $0x68] sm:$0x3]  ;;  %v2015_v26 = vrot.slane %v1972_v5, 1 }
 0x199   : > { %12578 = vst [vmem:[#allocation118_spill] sm:$0xff] %v7473_v22  ;;  %1883 = vrot.lane.b32.xlu1 %v1700_v36, %s6383_s13  ;;  %v7495_v36 = vld [vmem:[%s7434_s30 + $0x50] sm:$0xff]  ;;  %v2005_v22 = vrot.slane %v7501_v6, 1  ;;  %v2012_v52 = vrot.slane %v1970_v53, 1  ;;  %v2029_v43 = vrot.slane %v7501_v6, 2 }
 0x19a   : > { %1881 = vrot.lane.b32.xlu0 %v7345_v47, %s6383_s13  ;;  %v1968_v47 = vld [vmem:[%s7434_s30 + $0x58] sm:$0x3]  ;;  %v2008_v29 = vrot.slane %v7495_v36, 1 }
 0x19b   : > { %v7489_v28 = vpop.permute.xlu1 %1715  ;;  %v7541_v56 = vsel %vm915_vm0, %v2005_v22, %v2006_v45 }
 0x19c   : > { %12579 = vst [vmem:[#allocation119_spill] sm:$0xff] %v7489_v28  ;;  %v7498_v38 = vpop.permute.xlu0 %1713  ;;  %v2009_v28 = vrot.slane %v1968_v47, 1 }
 0x19d   : > { %12580 = vst [vmem:[#allocation120_spill] sm:$0xff] %v7498_v38  ;;  %2059 = vrot.lane.b32.xlu1 %v7485_v23, %s12413_s25  ;;  %v7516_v38 = vsel %vm915_vm0, %v1999_v60, %v2000_v0  ;;  %v2014_v0 = vrot.slane %v7521_v33, 1 }
 0x19e   : > { %2057 = vrot.lane.b32.xlu0 %v1995_v31, %s12413_s25  ;;  %v7527_v31 = vld [vmem:[%s7434_s30 + $0x60] sm:$0xff]  ;;  %v7535_v60 = vsel %vm915_vm0, %v2008_v29, %v2009_v28  ;;  %v2020_v29 = vrot.slane %v7443_v42, 2 }
 0x19f   : > { %v7513_v37 = vpop.permute.xlu1 %1727  ;;  %v2011_v21 = vrot.slane %v7527_v31, 1  ;;  %v7551_v28 = vsel %vm915_vm0, %v2014_v0, %v2015_v26  ;;  %v2024_v26 = vrot.slane %v7479_v17, 2  ;;  %v2030_v17 = vrot.slane %v7504_v49, 2 }
 0x1a0   : > { %12581 = vst [vmem:[#allocation121_spill] sm:$0xff] %v7513_v37  ;;  %v7524_v54 = vpop.permute.xlu0 %1725  ;;  %v2035_v49 = vrot.slane %v7527_v31, 2 }
 0x1a1   : > { %2063 = vrot.lane.b32.xlu1 %v7510_v14, %s12413_s25  ;;  %v7558_v22 = vsel %vm915_vm0, %v2011_v21, %v2012_v52  ;;  %v2027_v52 = vrot.slane %v7471_v51, 2  ;;  %v2032_v51 = vrot.slane %v7495_v36, 2  ;;  %v7590_v39 = vsel %vm940_vm1, %v2023_v18, %v2024_v26 }
 0x1a2   : > { %2061 = vrot.lane.b32.xlu0 %v7516_v38, %s12413_s25  ;;  %v7607_v18 = vsel %vm940_vm1, %v2029_v43, %v2030_v17  ;;  %v2036_v26 = vrot.slane %v1970_v53, 2 }
 0x1a3   : > { %v7538_v9 = vpop.permute.xlu1 %1731 }
 0x1a4   : > { %12582 = vst [vmem:[#allocation122_spill] sm:$0xff] %v7538_v9  ;;  %v7544_v35 = vpop.permute.xlu0 %1729  ;;  %v2021_v9 = vrot.slane %v7446_v41, 2  ;;  %v2026_v41 = vrot.slane %v7468_v55, 2 }
 0x1a5   : > { %12583 = vst [vmem:[#allocation123_spill] sm:$0xff] %v7544_v35  ;;  %2067 = vrot.lane.b32.xlu1 %v7535_v60, %s12413_s25 }
 0x1a6   : > { %2065 = vrot.lane.b32.xlu0 %v7541_v56, %s12413_s25  ;;  %v7569_v0 = vsel %vm940_vm1, %v2020_v29, %v2021_v9  ;;  %v7584_v9 = vsel %vm940_vm1, %v2026_v41, %v2027_v52  ;;  %v2033_v29 = vrot.slane %v1968_v47, 2  ;;  %v2038_v47 = vrot.slane %v7521_v33, 2 }
 0x1a7   : > { %v7555_v45 = vpop.permute.xlu1 %1735  ;;  %v2039_v52 = vrot.slane %v1972_v5, 2 }
 0x1a8   : > { %12584 = vst [vmem:[#allocation124_spill] sm:$0xff] %v7555_v45  ;;  %v7562_v25 = vpop.permute.xlu0 %1733  ;;  %v7601_v41 = vsel %vm940_vm1, %v2032_v51, %v2033_v29  ;;  %v7622_v29 = vsel %vm940_vm1, %v2035_v49, %v2036_v26 }
 0x1a9   : > { %12585 = vst [vmem:[#allocation125_spill] sm:$0xff] %v7562_v25  ;;  %2071 = vrot.lane.b32.xlu1 %v7551_v28, %s12413_s25  ;;  %v7617_v51 = vsel %vm940_vm1, %v2038_v47, %v2039_v52 }
 0x1aa   : > { %2069 = vrot.lane.b32.xlu0 %v7558_v22, %s12413_s25 }
 0x1ab   : > { %v7573_v21 = vpop.permute.xlu1 %1739 }
 0x1ac   : > { %12586 = vst [vmem:[#allocation126_spill] sm:$0xff] %v7573_v21  ;;  %v7578_v45 = vpop.permute.xlu0 %1737 }
 0x1ad   : > { %12587 = vst [vmem:[#allocation127_spill] sm:$0xff] %v7578_v45  ;;  %2083 = vrot.lane.b32.xlu1 %v7569_v0, %s12411_s26 }
 0x1ae   : > { %2081 = vrot.lane.b32.xlu0 %v2019_v46, %s12411_s26 }
 0x1af   : > { %v7587_v21 = vpop.permute.xlu1 %1751 }
 0x1b0   : > { %12588 = vst [vmem:[#allocation128_spill] sm:$0xff] %v7587_v21  ;;  %v7594_v45 = vpop.permute.xlu0 %1749 }
 0x1b1   : > { %2087 = vrot.lane.b32.xlu1 %v7584_v9, %s12411_s26 }
 0x1b2   : > { %2085 = vrot.lane.b32.xlu0 %v7590_v39, %s12411_s26 }
 0x1b3   : > { %v7604_v46 = vpop.permute.xlu1 %1755 }
 0x1b4   : > { %12589 = vst [vmem:[#allocation129_spill] sm:$0xff] %v7604_v46  ;;  %v7610_v25 = vpop.permute.xlu0 %1753 }
 0x1b5   : > { %12590 = vst [vmem:[#allocation130_spill] sm:$0xff] %v7610_v25  ;;  %2091 = vrot.lane.b32.xlu1 %v7601_v41, %s12411_s26 }
 0x1b6   : > { %2089 = vrot.lane.b32.xlu0 %v7607_v18, %s12411_s26 }
 0x1b7   : > { %v7619_v5 = vpop.permute.xlu1 %1759 }
 0x1b8   : > { %12591 = vst [vmem:[#allocation131_spill] sm:$0xff] %v7619_v5  ;;  %v7624_v43 = vpop.permute.xlu0 %1757 }
 0x1b9   : > { %12592 = vst [vmem:[#allocation132_spill] sm:$0xff] %v7624_v43  ;;  %2095 = vrot.lane.b32.xlu1 %v7617_v51, %s12411_s26 }
 0x1ba   : > { %2093 = vrot.lane.b32.xlu0 %v7622_v29, %s12411_s26 }
 0x1bb   : > { %v7630_v53 = vpop.permute.xlu1 %1763 }
 0x1bc   : > { %12593 = vst [vmem:[#allocation133_spill] sm:$0xff] %v7630_v53  ;;  %v7632_v17 = vpop.permute.xlu0 %1761 }
 0x1bd   : > { %12594 = vst [vmem:[#allocation134_spill] sm:$0xff] %v7632_v17  ;;  %2107 = vrot.lane.b32.xlu1 %v7476_v15, %s12409_s27 }
 0x1be   : > { %2105 = vrot.lane.b32.xlu0 %v7443_v42, %s12409_s27  ;;  %v1973_v42 = vld [vmem:[%s7434_s30 + $0x80] sm:$0xff] }
 0x1bf   : > { %v7638_v47 = vpop.permute.xlu1 %1775 }
 0x1c0   : > { %12595 = vst [vmem:[#allocation135_spill] sm:$0xff] %v7638_v47  ;;  %v7640_v52 = vpop.permute.xlu0 %1773 }
 0x1c1   : > { %2111 = vrot.lane.b32.xlu1 %v7501_v6, %s12409_s27 }
 0x1c2   : > { %2109 = vrot.lane.b32.xlu0 %v7468_v55, %s12409_s27 }
 0x1c3   : > { %v7646_v49 = vpop.permute.xlu1 %1779 }
 0x1c4   : > { %12596 = vst [vmem:[#allocation136_spill] sm:$0xff] %v7646_v49  ;;  %v7648_v26 = vpop.permute.xlu0 %1777 }
 0x1c5   : > { %12597 = vst [vmem:[#allocation137_spill] sm:$0xff] %v7648_v26  ;;  %2115 = vrot.lane.b32.xlu1 %v7527_v31, %s12409_s27 }
 0x1c6   : > { %2113 = vrot.lane.b32.xlu0 %v7495_v36, %s12409_s27 }
 0x1c7   : > { %v7655_v53 = vpop.permute.xlu1 %1783 }
 0x1c8   : > { %12598 = vst [vmem:[#allocation138_spill] sm:$0xff] %v7655_v53  ;;  %v7657_v17 = vpop.permute.xlu0 %1781  ;;  %v1974_v53 = vld [vmem:[%s7434_s30 + $0x88] sm:$0x3] }
 0x1c9   : > { %12599 = vst [vmem:[#allocation139_spill] sm:$0xff] %v7657_v17  ;;  %2119 = vrot.lane.b32.xlu1 %v1973_v42, %s12409_s27  ;;  %v2043_v17 = vrot.slane %v1973_v42, 1 }
 0x1ca   : > { %2117 = vrot.lane.b32.xlu0 %v7521_v33, %s12409_s27 }
 0x1cb   : > { %v7662_v5 = vpop.permute.xlu1 %1787 }
 0x1cc   : > { %12600 = vst [vmem:[#allocation140_spill] sm:$0xff] %v7662_v5  ;;  %v7664_v43 = vpop.permute.xlu0 %1785  ;;  %v2044_v5 = vrot.slane %v1974_v53, 1 }
 0x1cd   : > { %12601 = vst [vmem:[#allocation141_spill] sm:$0xff] %v7664_v43  ;;  %2131 = vrot.lane.b32.xlu1 %v7516_v38, %s12407_s28 }
 0x1ce   : > { %2129 = vrot.lane.b32.xlu0 %v7485_v23, %s12407_s28  ;;  %v2045_v23 = vsel %vm915_vm0, %v2043_v17, %v2044_v5 }
 0x1cf   : > { %v7670_v49 = vpop.permute.xlu1 %1799 }
 0x1d0   : > { %12602 = vst [vmem:[#allocation142_spill] sm:$0xff] %v7670_v49  ;;  %v7673_v46 = vpop.permute.xlu0 %1797 }
 0x1d1   : > { %12603 = vst [vmem:[#allocation143_spill] sm:$0xff] %v7673_v46  ;;  %2135 = vrot.lane.b32.xlu1 %v7541_v56, %s12407_s28 }
 0x1d2   : > { %2133 = vrot.lane.b32.xlu0 %v7510_v14, %s12407_s28 }
 0x1d3   : > { %v7679_v43 = vpop.permute.xlu1 %1803 }
 0x1d4   : > { %12604 = vst [vmem:[#allocation144_spill] sm:$0xff] %v7679_v43  ;;  %v7681_v26 = vpop.permute.xlu0 %1801 }
 0x1d5   : > { %12605 = vst [vmem:[#allocation145_spill] sm:$0xff] %v7681_v26  ;;  %2139 = vrot.lane.b32.xlu1 %v7558_v22, %s12407_s28 }
 0x1d6   : > { %2137 = vrot.lane.b32.xlu0 %v7535_v60, %s12407_s28 }
 0x1d7   : > { %v7688_v62 = vpop.permute.xlu1 %1807 }
 0x1d8   : > { %12606 = vst [vmem:[#allocation146_spill] sm:$0xff] %v7688_v62  ;;  %v7690_v25 = vpop.permute.xlu0 %1805  ;;  %v2046_v62 = vrot.slane %v1973_v42, 2 }
 0x1d9   : > { %12607 = vst [vmem:[#allocation147_spill] sm:$0xff] %v7690_v25  ;;  %2143 = vrot.lane.b32.xlu1 %v2045_v23, %s12407_s28 }
 0x1da   : > { %2141 = vrot.lane.b32.xlu0 %v7551_v28, %s12407_s28  ;;  %s7809_s28 = scalar_lea.vmem %s12637_s4, %s5983_s14  ;;  %s12677_s14 = smov 20  }
 0x1db   : > { %v7695_v43 = vpop.permute.xlu1 %1811  ;;  %v7896_v27 = vld [vmem:[%s7809_s28 + $0x70] sm:$0xff]  ;;  %v2328_v34 = vld [vmem:[%s7809_s28 + $0x78] sm:$0x3]  ;;  %s8934_s4 = scalar_lea.vmem %s12398_s7, %s5989_s0  ;;  %s5991_s0 = sadd.s32 1280, %s6467_s21 }
 0x1dc   : > { %12608 = vst [vmem:[#allocation148_spill] sm:$0xff] %v7695_v43  ;;  %v7697_v26 = vpop.permute.xlu0 %1809  ;;  %v2047_v43 = vrot.slane %v1974_v53, 2 }
 0x1dd   : > { %12609 = vst [vmem:[#allocation149_spill] sm:$0xff] %v7697_v26  ;;  %2155 = vrot.lane.b32.xlu1 %v7590_v39, %s12405_s29 }
 0x1de   : > { %2153 = vrot.lane.b32.xlu0 %v7569_v0, %s12405_s29  ;;  %v7720_v0 = vsel %vm940_vm1, %v2046_v62, %v2047_v43 }
 0x1df   : > { %v7703_v5 = vpop.permute.xlu1 %1823 }
 0x1e0   : > { %12610 = vst [vmem:[#allocation150_spill] sm:$0xff] %v7703_v5  ;;  %v7705_v17 = vpop.permute.xlu0 %1821 }
 0x1e1   : > { %12611 = vst [vmem:[#allocation151_spill] sm:$0xff] %v7705_v17  ;;  %2159 = vrot.lane.b32.xlu1 %v7607_v18, %s12405_s29 }
 0x1e2   : > { %2157 = vrot.lane.b32.xlu0 %v7584_v9, %s12405_s29 }
 0x1e3   : > { %v7711_v25 = vpop.permute.xlu1 %1827 }
 0x1e4   : > { %12612 = vst [vmem:[#allocation152_spill] sm:$0xff] %v7711_v25  ;;  %v7713_v26 = vpop.permute.xlu0 %1825 }
 0x1e5   : > { %12613 = vst [vmem:[#allocation153_spill] sm:$0xff] %v7713_v26  ;;  %2163 = vrot.lane.b32.xlu1 %v7622_v29, %s12405_s29 }
 0x1e6   : > { %2161 = vrot.lane.b32.xlu0 %v7601_v41, %s12405_s29 }
 0x1e7   : > { %v7722_v12 = vpop.permute.xlu1 %1831 }
 0x1e8   : > { %12614 = vst [vmem:[#allocation154_spill] sm:$0xff] %v7722_v12  ;;  %v7724_v4 = vpop.permute.xlu0 %1829 }
 0x1e9   : > { %12615 = vst [vmem:[#allocation155_spill] sm:$0xff] %v7724_v4  ;;  %2167 = vrot.lane.b32.xlu1 %v7720_v0, %s12405_s29 }
 0x1ea   : > { %2165 = vrot.lane.b32.xlu0 %v7617_v51, %s12405_s29  ;;  %s12668_s29 = smov 16  }
 0x1eb   : > { %v7730_v53 = vpop.permute.xlu1 %1835 }
 0x1ec   : > { %12616 = vst [vmem:[#allocation156_spill] sm:$0xff] %v7730_v53  ;;  %v7732_v25 = vpop.permute.xlu0 %1833 }
 0x1ed   : > { %12617 = vst [vmem:[#allocation157_spill] sm:$0xff] %v7732_v25  ;;  %2179 = vrot.lane.b32.xlu1 %v7468_v55, %s12618_s23  ;;  %v1975_v55 = vld [vmem:[%s7434_s30 + $0x90] sm:$0xff] }
 0x1ee   : > { %2177 = vrot.lane.b32.xlu0 %v7476_v15, %s12618_s23 }
 0x1ef   : > { %v7738_v62 = vpop.permute.xlu1 %1847 }
 0x1f0   : > { %12619 = vst [vmem:[#allocation158_spill] sm:$0xff] %v7738_v62  ;;  %v7740_v43 = vpop.permute.xlu0 %1845 }
 0x1f1   : > { %12620 = vst [vmem:[#allocation159_spill] sm:$0xff] %v7740_v43  ;;  %2183 = vrot.lane.b32.xlu1 %v7495_v36, %s12618_s23  ;;  %v9021_v43 = vld [vmem:[%s8934_s4 + $0x70] sm:$0xff] }
 0x1f2   : > { %2181 = vrot.lane.b32.xlu0 %v7501_v6, %s12618_s23 }
 0x1f3   : > { %v7746_v53 = vpop.permute.xlu1 %1851 }
 0x1f4   : > { %12621 = vst [vmem:[#allocation160_spill] sm:$0xff] %v7746_v53  ;;  %v7748_v25 = vpop.permute.xlu0 %1849 }
 0x1f5   : > { %12622 = vst [vmem:[#allocation161_spill] sm:$0xff] %v7748_v25  ;;  %2187 = vrot.lane.b32.xlu1 %v7521_v33, %s12618_s23 }
 0x1f6   : > { %2185 = vrot.lane.b32.xlu0 %v7527_v31, %s12618_s23  ;;  %v1976_v31 = vld [vmem:[%s7434_s30 + $0x98] sm:$0x3] }
 0x1f7   : > { %v7755_v15 = vpop.permute.xlu1 %1855 }
 0x1f8   : > { %12623 = vst [vmem:[#allocation162_spill] sm:$0xff] %v7755_v15  ;;  %v7757_v12 = vpop.permute.xlu0 %1853 }
 0x1f9   : > { %12624 = vst [vmem:[#allocation163_spill] sm:$0xff] %v7757_v12  ;;  %2191 = vrot.lane.b32.xlu1 %v1975_v55, %s12618_s23 }
 0x1fa   : > { %2189 = vrot.lane.b32.xlu0 %v1973_v42, %s12618_s23  ;;  %v2051_v42 = vrot.slane %v1975_v55, 1 }
 0x1fb   : > { %v7761_v36 = vpop.permute.xlu1 %1859 }
 0x1fc   : > { %12625 = vst [vmem:[#allocation164_spill] sm:$0xff] %v7761_v36  ;;  %v7763_v6 = vpop.permute.xlu0 %1857  ;;  %v2052_v36 = vrot.slane %v1976_v31, 1 }
 0x1fd   : > { %12626 = vst [vmem:[#allocation165_spill] sm:$0xff] %v7763_v6  ;;  %2203 = vrot.lane.b32.xlu1 %v7510_v14, %s6382_s12 }
 0x1fe   : > { %2201 = vrot.lane.b32.xlu0 %v7516_v38, %s6382_s12  ;;  %v2053_v38 = vsel %vm915_vm0, %v2051_v42, %v2052_v36  ;;  %v7818_v36 = vld [vmem:[%s7809_s28 + $0x10] sm:$0xff]  ;;  %v7821_v42 = vld [vmem:[%s7809_s28 + $0x18] sm:$0x3] }
 0x1ff   : > { %v7769_v33 = vpop.permute.xlu1 %1871 }
 0x200   : > { %12627 = vst [vmem:[#allocation166_spill] sm:$0xff] %v7769_v33  ;;  %v7772_v15 = vpop.permute.xlu0 %1869 }
 0x201   : > { %12628 = vst [vmem:[#allocation167_spill] sm:$0xff] %v7772_v15  ;;  %2207 = vrot.lane.b32.xlu1 %v7535_v60, %s6382_s12 }
 0x202   : > { %2205 = vrot.lane.b32.xlu0 %v7541_v56, %s6382_s12 }
 0x203   : > { %v7778_v6 = vpop.permute.xlu1 %1875 }
 0x204   : > { %12629 = vst [vmem:[#allocation168_spill] sm:$0xff] %v7778_v6  ;;  %v7780_v14 = vpop.permute.xlu0 %1873 }
 0x205   : > { %12630 = vst [vmem:[#allocation169_spill] sm:$0xff] %v7780_v14  ;;  %2211 = vrot.lane.b32.xlu1 %v7551_v28, %s6382_s12  ;;  %v7879_v14 = vld [vmem:[%s7809_s28 + $0x48] sm:$0x3] }
 0x206   : > { %2209 = vrot.lane.b32.xlu0 %v7558_v22, %s6382_s12  ;;  %v2362_v35 = vrot.slane %v7879_v14, 1 }
 0x207   : > { %v7787_v12 = vpop.permute.xlu1 %1879 }
 0x208   : > { %12631 = vst [vmem:[#allocation170_spill] sm:$0xff] %v7787_v12  ;;  %v7789_v60 = vpop.permute.xlu0 %1877 }
 0x209   : > { %12632 = vst [vmem:[#allocation171_spill] sm:$0xff] %v7789_v60  ;;  %2215 = vrot.lane.b32.xlu1 %v2053_v38, %s6382_s12 }
 0x20a   : > { %2213 = vrot.lane.b32.xlu0 %v2045_v23, %s6382_s12 }
 0x20b   : > { %v7793_v56 = vpop.permute.xlu1 %1883 }
 0x20c   : > { %12633 = vst [vmem:[#allocation172_spill] sm:$0xff] %v7793_v56  ;;  %v7795_v4 = vpop.permute.xlu0 %1881  ;;  %v7843_v56 = vld [vmem:[%s7809_s28 + $0x30] sm:$0xff] }
 0x20d   : > { %12634 = vst [vmem:[#allocation173_spill] sm:$0xff] %v7795_v4  ;;  %2227 = vrot.lane.b32.xlu1 %v7584_v9, %s6383_s13  ;;  %v2054_v9 = vrot.slane %v1975_v55, 2  ;;  %v2352_v55 = vrot.slane %v7818_v36, 1  ;;  %v2358_v4 = vrot.slane %v7843_v56, 1 }
 0x20e   : > { %2225 = vrot.lane.b32.xlu0 %v7590_v39, %s6383_s13  ;;  %v2055_v39 = vrot.slane %v1976_v31, 2  ;;  %v2353_v31 = vrot.slane %v7821_v42, 1 }
 0x20f   : > { %v7802_v28 = vpop.permute.xlu1 %2059 }
 0x210   : > { %12635 = vst [vmem:[#allocation174_spill] sm:$0xff] %v7802_v28  ;;  %v7804_v22 = vpop.permute.xlu0 %2057  ;;  %v7826_v28 = vld [vmem:[%s7809_s28] sm:$0xff] }
 0x211   : > { %12636 = vst [vmem:[#allocation175_spill] sm:$0xff] %v7804_v22  ;;  %2231 = vrot.lane.b32.xlu1 %v7601_v41, %s6383_s13  ;;  %v7829_v41 = vld [vmem:[%s7809_s28 + $0x8] sm:$0x3] }
 0x212   : > { %2229 = vrot.lane.b32.xlu0 %v7607_v18, %s6383_s13  ;;  %v2056_v18 = vsel %vm940_vm1, %v2054_v9, %v2055_v39  ;;  %v2350_v22 = vrot.slane %v7829_v41, 1  ;;  %v7851_v9 = vld [vmem:[%s7809_s28 + $0x20] sm:$0xff]  ;;  %v7854_v39 = vld [vmem:[%s7809_s28 + $0x28] sm:$0x3]  ;;  %v2374_v50 = vrot.slane %v7829_v41, 2 }
 0x213   : > { %v7815_v23 = vpop.permute.xlu1 %2063  ;;  %v2355_v6 = vrot.slane %v7851_v9, 1  ;;  %v2356_v53 = vrot.slane %v7854_v39, 1  ;;  %v2379_v41 = vrot.slane %v7851_v9, 2 }
 0x214   : > { %12638 = vst [vmem:[#allocation176_spill] sm:$0xff] %v7815_v23  ;;  %v7823_v38 = vpop.permute.xlu0 %2061 }
 0x215   : > { %12639 = vst [vmem:[#allocation177_spill] sm:$0xff] %v7823_v38  ;;  %2235 = vrot.lane.b32.xlu1 %v7617_v51, %s6383_s13  ;;  %v2349_v38 = vrot.slane %v7826_v28, 1  ;;  %v7846_v51 = vld [vmem:[%s7809_s28 + $0x38] sm:$0x3] }
 0x216   : > { %2233 = vrot.lane.b32.xlu0 %v7622_v29, %s6383_s13  ;;  %v2359_v12 = vrot.slane %v7846_v51, 1 }
 0x217   : > { %v7838_v23 = vpop.permute.xlu1 %2067 }
 0x218   : > { %12640 = vst [vmem:[#allocation178_spill] sm:$0xff] %v7838_v23  ;;  %v7848_v29 = vpop.permute.xlu0 %2065  ;;  %v7860_v23 = vsel %vm915_vm0, %v2352_v55, %v2353_v31  ;;  %v7876_v31 = vld [vmem:[%s7809_s28 + $0x40] sm:$0xff] }
 0x219   : > { %12641 = vst [vmem:[#allocation179_spill] sm:$0xff] %v7848_v29  ;;  %2239 = vrot.lane.b32.xlu1 %v2056_v18, %s6383_s13  ;;  %v2351_v29 = vsel %vm915_vm0, %v2349_v38, %v2350_v22  ;;  %v7870_v18 = vld [vmem:[%s7809_s28 + $0x50] sm:$0xff]  ;;  %v7885_v22 = vsel %vm915_vm0, %v2358_v4, %v2359_v12  ;;  %v2361_v26 = vrot.slane %v7876_v31, 1  ;;  %v2326_v4 = vld [vmem:[%s7809_s28 + $0x68] sm:$0x3] }
 0x21a   : > { %2237 = vrot.lane.b32.xlu0 %v7720_v0, %s6383_s13  ;;  %v2324_v0 = vld [vmem:[%s7809_s28 + $0x58] sm:$0x3]  ;;  %v2364_v38 = vrot.slane %v7870_v18, 1  ;;  %v2368_v32 = vrot.slane %v2326_v4, 1 }
 0x21b   : > { %v7864_v60 = vpop.permute.xlu1 %2071  ;;  %v7916_v58 = vsel %vm915_vm0, %v2361_v26, %v2362_v35 }
 0x21c   : > { %12642 = vst [vmem:[#allocation180_spill] sm:$0xff] %v7864_v60  ;;  %v7873_v55 = vpop.permute.xlu0 %2069  ;;  %v2365_v60 = vrot.slane %v2324_v0, 1 }
 0x21d   : > { %12643 = vst [vmem:[#allocation181_spill] sm:$0xff] %v7873_v55  ;;  %2415 = vrot.lane.b32.xlu1 %v7860_v23, %s12413_s25  ;;  %v7891_v55 = vsel %vm915_vm0, %v2355_v6, %v2356_v53  ;;  %v2370_v53 = vrot.slane %v7896_v27, 1  ;;  %v2371_v6 = vrot.slane %v2328_v34, 1 }
 0x21e   : > { %2413 = vrot.lane.b32.xlu0 %v2351_v29, %s12413_s25  ;;  %v7902_v29 = vld [vmem:[%s7809_s28 + $0x60] sm:$0xff]  ;;  %v7910_v12 = vsel %vm915_vm0, %v2364_v38, %v2365_v60  ;;  %v2376_v38 = vrot.slane %v7818_v36, 2 }
 0x21f   : > { %v7888_v25 = vpop.permute.xlu1 %2083  ;;  %v7926_v60 = vsel %vm915_vm0, %v2370_v53, %v2371_v6  ;;  %v2380_v6 = vrot.slane %v7854_v39, 2  ;;  %v2386_v39 = vrot.slane %v7879_v14, 2  ;;  %v2391_v14 = vrot.slane %v7902_v29, 2 }
 0x220   : > { %12644 = vst [vmem:[#allocation182_spill] sm:$0xff] %v7888_v25  ;;  %v7899_v59 = vpop.permute.xlu0 %2081 }
 0x221   : > { %12645 = vst [vmem:[#allocation183_spill] sm:$0xff] %v7899_v59  ;;  %2419 = vrot.lane.b32.xlu1 %v7885_v22, %s12413_s25  ;;  %v2367_v59 = vrot.slane %v7902_v29, 1 }
 0x222   : > { %2417 = vrot.lane.b32.xlu0 %v7891_v55, %s12413_s25 }
 0x223   : > { %v7913_v25 = vpop.permute.xlu1 %2087  ;;  %v7933_v26 = vsel %vm915_vm0, %v2367_v59, %v2368_v32  ;;  %v2383_v32 = vrot.slane %v7846_v51, 2  ;;  %v2388_v51 = vrot.slane %v7870_v18, 2 }
 0x224   : > { %12646 = vst [vmem:[#allocation184_spill] sm:$0xff] %v7913_v25  ;;  %v7919_v61 = vpop.permute.xlu0 %2085  ;;  %v2377_v25 = vrot.slane %v7821_v42, 2  ;;  %v2382_v42 = vrot.slane %v7843_v56, 2 }
 0x225   : > { %12647 = vst [vmem:[#allocation185_spill] sm:$0xff] %v7919_v61  ;;  %2423 = vrot.lane.b32.xlu1 %v7910_v12, %s12413_s25  ;;  %v2373_v61 = vrot.slane %v7826_v28, 2 }
 0x226   : > { %2421 = vrot.lane.b32.xlu0 %v7916_v58, %s12413_s25  ;;  %v7944_v53 = vsel %vm940_vm1, %v2376_v38, %v2377_v25  ;;  %v7959_v25 = vsel %vm940_vm1, %v2382_v42, %v2383_v32  ;;  %v2389_v38 = vrot.slane %v2324_v0, 2  ;;  %v2394_v0 = vrot.slane %v7896_v27, 2 }
 0x227   : > { %v7930_v35 = vpop.permute.xlu1 %2091  ;;  %v2375_v28 = vsel %vm940_vm1, %v2373_v61, %v2374_v50  ;;  %v7965_v61 = vsel %vm940_vm1, %v2379_v41, %v2380_v6  ;;  %v2385_v50 = vrot.slane %v7876_v31, 2  ;;  %v2395_v32 = vrot.slane %v2328_v34, 2 }
 0x228   : > { %12648 = vst [vmem:[#allocation186_spill] sm:$0xff] %v7930_v35  ;;  %v7937_v33 = vpop.permute.xlu0 %2089  ;;  %v7976_v42 = vsel %vm940_vm1, %v2388_v51, %v2389_v38  ;;  %v2392_v6 = vrot.slane %v2326_v4, 2 }
 0x229   : > { %12649 = vst [vmem:[#allocation187_spill] sm:$0xff] %v7937_v33  ;;  %2427 = vrot.lane.b32.xlu1 %v7926_v60, %s12413_s25  ;;  %v7982_v41 = vsel %vm940_vm1, %v2385_v50, %v2386_v39  ;;  %v7992_v51 = vsel %vm940_vm1, %v2394_v0, %v2395_v32 }
 0x22a   : > { %2425 = vrot.lane.b32.xlu0 %v7933_v26, %s12413_s25  ;;  %v7997_v38 = vsel %vm940_vm1, %v2391_v14, %v2392_v6  ;;  %s8184_s25 = scalar_lea.vmem %s12704_s5, %s5985_s15  ;;  %s12729_s15 = smov 12  }
 0x22b   : > { %v7948_v59 = vpop.permute.xlu1 %2095  ;;  %s9309_s5 = scalar_lea.vmem %s12399_s8, %s5991_s0  ;;  %s5993_s0 = sadd.s32 1440, %s6467_s21 }
 0x22c   : > { %12650 = vst [vmem:[#allocation188_spill] sm:$0xff] %v7948_v59  ;;  %v7953_v35 = vpop.permute.xlu0 %2093  ;;  %s9684_s6 = scalar_lea.vmem %s12400_s9, %s5993_s0 }
 0x22d   : > { %12651 = vst [vmem:[#allocation189_spill] sm:$0xff] %v7953_v35  ;;  %2439 = vrot.lane.b32.xlu1 %v7944_v53, %s12411_s26 }
 0x22e   : > { %2437 = vrot.lane.b32.xlu0 %v2375_v28, %s12411_s26 }
 0x22f   : > { %v7962_v59 = vpop.permute.xlu1 %2107 }
 0x230   : > { %12652 = vst [vmem:[#allocation190_spill] sm:$0xff] %v7962_v59  ;;  %v7969_v35 = vpop.permute.xlu0 %2105  ;;  %v2684_v59 = vld [vmem:[%s8184_s25 + $0x78] sm:$0x3] }
 0x231   : > { %12653 = vst [vmem:[#allocation191_spill] sm:$0xff] %v7969_v35  ;;  %2443 = vrot.lane.b32.xlu1 %v7959_v25, %s12411_s26 }
 0x232   : > { %2441 = vrot.lane.b32.xlu0 %v7965_v61, %s12411_s26 }
 0x233   : > { %v7979_v28 = vpop.permute.xlu1 %2111 }
 0x234   : > { %12654 = vst [vmem:[#allocation192_spill] sm:$0xff] %v7979_v28  ;;  %v7985_v33 = vpop.permute.xlu0 %2109 }
 0x235   : > { %12655 = vst [vmem:[#allocation193_spill] sm:$0xff] %v7985_v33  ;;  %2447 = vrot.lane.b32.xlu1 %v7976_v42, %s12411_s26 }
 0x236   : > { %2445 = vrot.lane.b32.xlu0 %v7982_v41, %s12411_s26 }
 0x237   : > { %v7994_v34 = vpop.permute.xlu1 %2115 }
 0x238   : > { %12656 = vst [vmem:[#allocation194_spill] sm:$0xff] %v7994_v34  ;;  %v7999_v50 = vpop.permute.xlu0 %2113 }
 0x239   : > { %12657 = vst [vmem:[#allocation195_spill] sm:$0xff] %v7999_v50  ;;  %2451 = vrot.lane.b32.xlu1 %v7992_v51, %s12411_s26 }
 0x23a   : > { %2449 = vrot.lane.b32.xlu0 %v7997_v38, %s12411_s26  ;;  %s12711_s26 = smov 4  }
 0x23b   : > { %v8005_v4 = vpop.permute.xlu1 %2119 }
 0x23c   : > { %12658 = vst [vmem:[#allocation196_spill] sm:$0xff] %v8005_v4  ;;  %v8007_v39 = vpop.permute.xlu0 %2117 }
 0x23d   : > { %12659 = vst [vmem:[#allocation197_spill] sm:$0xff] %v8007_v39  ;;  %2463 = vrot.lane.b32.xlu1 %v7851_v9, %s12409_s27 }
 0x23e   : > { %2461 = vrot.lane.b32.xlu0 %v7818_v36, %s12409_s27  ;;  %v2329_v36 = vld [vmem:[%s7809_s28 + $0x80] sm:$0xff] }
 0x23f   : > { %v8013_v0 = vpop.permute.xlu1 %2131 }
 0x240   : > { %12660 = vst [vmem:[#allocation198_spill] sm:$0xff] %v8013_v0  ;;  %v8015_v32 = vpop.permute.xlu0 %2129 }
 0x241   : > { %12661 = vst [vmem:[#allocation199_spill] sm:$0xff] %v8015_v32  ;;  %2467 = vrot.lane.b32.xlu1 %v7876_v31, %s12409_s27 }
 0x242   : > { %2465 = vrot.lane.b32.xlu0 %v7843_v56, %s12409_s27 }
 0x243   : > { %v8021_v14 = vpop.permute.xlu1 %2135 }
 0x244   : > { %12662 = vst [vmem:[#allocation200_spill] sm:$0xff] %v8021_v14  ;;  %v8023_v6 = vpop.permute.xlu0 %2133 }
 0x245   : > { %12663 = vst [vmem:[#allocation201_spill] sm:$0xff] %v8023_v6  ;;  %2471 = vrot.lane.b32.xlu1 %v7902_v29, %s12409_s27 }
 0x246   : > { %2469 = vrot.lane.b32.xlu0 %v7870_v18, %s12409_s27 }
 0x247   : > { %v8030_v4 = vpop.permute.xlu1 %2139 }
 0x248   : > { %12664 = vst [vmem:[#allocation202_spill] sm:$0xff] %v8030_v4  ;;  %v8032_v39 = vpop.permute.xlu0 %2137  ;;  %v2330_v4 = vld [vmem:[%s7809_s28 + $0x88] sm:$0x3] }
 0x249   : > { %12665 = vst [vmem:[#allocation203_spill] sm:$0xff] %v8032_v39  ;;  %2475 = vrot.lane.b32.xlu1 %v2329_v36, %s12409_s27  ;;  %v2399_v39 = vrot.slane %v2329_v36, 1 }
 0x24a   : > { %2473 = vrot.lane.b32.xlu0 %v7896_v27, %s12409_s27  ;;  %s12720_s27 = smov 8  }
 0x24b   : > { %v8037_v34 = vpop.permute.xlu1 %2143 }
 0x24c   : > { %12666 = vst [vmem:[#allocation204_spill] sm:$0xff] %v8037_v34  ;;  %v8039_v50 = vpop.permute.xlu0 %2141  ;;  %v2400_v34 = vrot.slane %v2330_v4, 1 }
 0x24d   : > { %12667 = vst [vmem:[#allocation205_spill] sm:$0xff] %v8039_v50  ;;  %2487 = vrot.lane.b32.xlu1 %v7891_v55, %s12668_s29 }
 0x24e   : > { %2485 = vrot.lane.b32.xlu0 %v7860_v23, %s12668_s29  ;;  %v2401_v23 = vsel %vm915_vm0, %v2399_v39, %v2400_v34 }
 0x24f   : > { %v8045_v14 = vpop.permute.xlu1 %2155 }
 0x250   : > { %12669 = vst [vmem:[#allocation206_spill] sm:$0xff] %v8045_v14  ;;  %v8048_v28 = vpop.permute.xlu0 %2153 }
 0x251   : > { %12670 = vst [vmem:[#allocation207_spill] sm:$0xff] %v8048_v28  ;;  %2491 = vrot.lane.b32.xlu1 %v7916_v58, %s12668_s29 }
 0x252   : > { %2489 = vrot.lane.b32.xlu0 %v7885_v22, %s12668_s29 }
 0x253   : > { %v8054_v50 = vpop.permute.xlu1 %2159 }
 0x254   : > { %12671 = vst [vmem:[#allocation208_spill] sm:$0xff] %v8054_v50  ;;  %v8056_v6 = vpop.permute.xlu0 %2157 }
 0x255   : > { %12672 = vst [vmem:[#allocation209_spill] sm:$0xff] %v8056_v6  ;;  %2495 = vrot.lane.b32.xlu1 %v7933_v26, %s12668_s29 }
 0x256   : > { %2493 = vrot.lane.b32.xlu0 %v7910_v12, %s12668_s29 }
 0x257   : > { %v8063_v33 = vpop.permute.xlu1 %2163 }
 0x258   : > { %12673 = vst [vmem:[#allocation210_spill] sm:$0xff] %v8063_v33  ;;  %v8065_v14 = vpop.permute.xlu0 %2161  ;;  %v2402_v33 = vrot.slane %v2329_v36, 2 }
 0x259   : > { %12674 = vst [vmem:[#allocation211_spill] sm:$0xff] %v8065_v14  ;;  %2499 = vrot.lane.b32.xlu1 %v2401_v23, %s12668_s29 }
 0x25a   : > { %2497 = vrot.lane.b32.xlu0 %v7926_v60, %s12668_s29 }
 0x25b   : > { %v8070_v50 = vpop.permute.xlu1 %2167 }
 0x25c   : > { %12675 = vst [vmem:[#allocation212_spill] sm:$0xff] %v8070_v50  ;;  %v8072_v6 = vpop.permute.xlu0 %2165  ;;  %v2403_v50 = vrot.slane %v2330_v4, 2 }
 0x25d   : > { %12676 = vst [vmem:[#allocation213_spill] sm:$0xff] %v8072_v6  ;;  %2511 = vrot.lane.b32.xlu1 %v7965_v61, %s12677_s14 }
 0x25e   : > { %2509 = vrot.lane.b32.xlu0 %v7944_v53, %s12677_s14  ;;  %v8095_v53 = vsel %vm940_vm1, %v2402_v33, %v2403_v50 }
 0x25f   : > { %v8078_v34 = vpop.permute.xlu1 %2179 }
 0x260   : > { %12678 = vst [vmem:[#allocation214_spill] sm:$0xff] %v8078_v34  ;;  %v8080_v39 = vpop.permute.xlu0 %2177 }
 0x261   : > { %12679 = vst [vmem:[#allocation215_spill] sm:$0xff] %v8080_v39  ;;  %2515 = vrot.lane.b32.xlu1 %v7982_v41, %s12677_s14 }
 0x262   : > { %2513 = vrot.lane.b32.xlu0 %v7959_v25, %s12677_s14 }
 0x263   : > { %v8086_v14 = vpop.permute.xlu1 %2183 }
 0x264   : > { %12680 = vst [vmem:[#allocation216_spill] sm:$0xff] %v8086_v14  ;;  %v8088_v6 = vpop.permute.xlu0 %2181 }
 0x265   : > { %12681 = vst [vmem:[#allocation217_spill] sm:$0xff] %v8088_v6  ;;  %2519 = vrot.lane.b32.xlu1 %v7997_v38, %s12677_s14 }
 0x266   : > { %2517 = vrot.lane.b32.xlu0 %v7976_v42, %s12677_s14 }
 0x267   : > { %v8097_v34 = vpop.permute.xlu1 %2187 }
 0x268   : > { %12682 = vst [vmem:[#allocation218_spill] sm:$0xff] %v8097_v34  ;;  %v8099_v0 = vpop.permute.xlu0 %2185 }
 0x269   : > { %12683 = vst [vmem:[#allocation219_spill] sm:$0xff] %v8099_v0  ;;  %2523 = vrot.lane.b32.xlu1 %v8095_v53, %s12677_s14 }
 0x26a   : > { %2521 = vrot.lane.b32.xlu0 %v7992_v51, %s12677_s14 }
 0x26b   : > { %v8105_v4 = vpop.permute.xlu1 %2191 }
 0x26c   : > { %12684 = vst [vmem:[#allocation220_spill] sm:$0xff] %v8105_v4  ;;  %v8107_v14 = vpop.permute.xlu0 %2189 }
 0x26d   : > { %12685 = vst [vmem:[#allocation221_spill] sm:$0xff] %v8107_v14  ;;  %2535 = vrot.lane.b32.xlu1 %v7843_v56, %s12618_s23  ;;  %v2331_v56 = vld [vmem:[%s7809_s28 + $0x90] sm:$0xff] }
 0x26e   : > { %2533 = vrot.lane.b32.xlu0 %v7851_v9, %s12618_s23 }
 0x26f   : > { %v8113_v33 = vpop.permute.xlu1 %2203 }
 0x270   : > { %12686 = vst [vmem:[#allocation222_spill] sm:$0xff] %v8113_v33  ;;  %v8115_v50 = vpop.permute.xlu0 %2201  ;;  %v8271_v33 = vld [vmem:[%s8184_s25 + $0x70] sm:$0xff] }
 0x271   : > { %12687 = vst [vmem:[#allocation223_spill] sm:$0xff] %v8115_v50  ;;  %2539 = vrot.lane.b32.xlu1 %v7870_v18, %s12618_s23 }
 0x272   : > { %2537 = vrot.lane.b32.xlu0 %v7876_v31, %s12618_s23 }
 0x273   : > { %v8121_v4 = vpop.permute.xlu1 %2207 }
 0x274   : > { %12688 = vst [vmem:[#allocation224_spill] sm:$0xff] %v8121_v4  ;;  %v8123_v14 = vpop.permute.xlu0 %2205 }
 0x275   : > { %12689 = vst [vmem:[#allocation225_spill] sm:$0xff] %v8123_v14  ;;  %2543 = vrot.lane.b32.xlu1 %v7896_v27, %s12618_s23 }
 0x276   : > { %2541 = vrot.lane.b32.xlu0 %v7902_v29, %s12618_s23  ;;  %v2332_v29 = vld [vmem:[%s7809_s28 + $0x98] sm:$0x3] }
 0x277   : > { %v8130_v9 = vpop.permute.xlu1 %2211 }
 0x278   : > { %12690 = vst [vmem:[#allocation226_spill] sm:$0xff] %v8130_v9  ;;  %v8132_v34 = vpop.permute.xlu0 %2209 }
 0x279   : > { %12691 = vst [vmem:[#allocation227_spill] sm:$0xff] %v8132_v34  ;;  %2547 = vrot.lane.b32.xlu1 %v2331_v56, %s12618_s23 }
 0x27a   : > { %2545 = vrot.lane.b32.xlu0 %v2329_v36, %s12618_s23  ;;  %v2407_v36 = vrot.slane %v2331_v56, 1 }
 0x27b   : > { %v8136_v18 = vpop.permute.xlu1 %2215 }
 0x27c   : > { %12692 = vst [vmem:[#allocation228_spill] sm:$0xff] %v8136_v18  ;;  %v8138_v31 = vpop.permute.xlu0 %2213  ;;  %v2408_v18 = vrot.slane %v2332_v29, 1 }
 0x27d   : > { %12693 = vst [vmem:[#allocation229_spill] sm:$0xff] %v8138_v31  ;;  %2559 = vrot.lane.b32.xlu1 %v7885_v22, %s6382_s12 }
 0x27e   : > { %2557 = vrot.lane.b32.xlu0 %v7891_v55, %s6382_s12  ;;  %v2409_v55 = vsel %vm915_vm0, %v2407_v36, %v2408_v18  ;;  %v8193_v18 = vld [vmem:[%s8184_s25 + $0x10] sm:$0xff]  ;;  %v8196_v36 = vld [vmem:[%s8184_s25 + $0x18] sm:$0x3] }
 0x27f   : > { %v8144_v27 = vpop.permute.xlu1 %2227 }
 0x280   : > { %12694 = vst [vmem:[#allocation230_spill] sm:$0xff] %v8144_v27  ;;  %v8147_v9 = vpop.permute.xlu0 %2225 }
 0x281   : > { %12695 = vst [vmem:[#allocation231_spill] sm:$0xff] %v8147_v9  ;;  %2563 = vrot.lane.b32.xlu1 %v7910_v12, %s6382_s12 }
 0x282   : > { %2561 = vrot.lane.b32.xlu0 %v7916_v58, %s6382_s12 }
 0x283   : > { %v8153_v31 = vpop.permute.xlu1 %2231 }
 0x284   : > { %12696 = vst [vmem:[#allocation232_spill] sm:$0xff] %v8153_v31  ;;  %v8155_v22 = vpop.permute.xlu0 %2229 }
 0x285   : > { %12697 = vst [vmem:[#allocation233_spill] sm:$0xff] %v8155_v22  ;;  %2567 = vrot.lane.b32.xlu1 %v7926_v60, %s6382_s12  ;;  %v8254_v22 = vld [vmem:[%s8184_s25 + $0x48] sm:$0x3] }
 0x286   : > { %2565 = vrot.lane.b32.xlu0 %v7933_v26, %s6382_s12  ;;  %v2718_v27 = vrot.slane %v8254_v22, 1 }
 0x287   : > { %v8162_v34 = vpop.permute.xlu1 %2235 }
 0x288   : > { %12698 = vst [vmem:[#allocation234_spill] sm:$0xff] %v8162_v34  ;;  %v8164_v12 = vpop.permute.xlu0 %2233 }
 0x289   : > { %12699 = vst [vmem:[#allocation235_spill] sm:$0xff] %v8164_v12  ;;  %2571 = vrot.lane.b32.xlu1 %v2409_v55, %s6382_s12 }
 0x28a   : > { %2569 = vrot.lane.b32.xlu0 %v2401_v23, %s6382_s12 }
 0x28b   : > { %v8168_v58 = vpop.permute.xlu1 %2239 }
 0x28c   : > { %12700 = vst [vmem:[#allocation236_spill] sm:$0xff] %v8168_v58  ;;  %v8170_v0 = vpop.permute.xlu0 %2237  ;;  %v8201_v58 = vld [vmem:[%s8184_s25] sm:$0xff] }
 0x28d   : > { %12701 = vst [vmem:[#allocation237_spill] sm:$0xff] %v8170_v0  ;;  %2583 = vrot.lane.b32.xlu1 %v7959_v25, %s6383_s13  ;;  %v2410_v25 = vrot.slane %v2331_v56, 2  ;;  %v2708_v56 = vrot.slane %v8193_v18, 1  ;;  %v8218_v0 = vld [vmem:[%s8184_s25 + $0x30] sm:$0xff] }
 0x28e   : > { %2581 = vrot.lane.b32.xlu0 %v7965_v61, %s6383_s13  ;;  %v2411_v61 = vrot.slane %v2332_v29, 2  ;;  %v2709_v29 = vrot.slane %v8196_v36, 1 }
 0x28f   : > { %v8177_v60 = vpop.permute.xlu1 %2415 }
 0x290   : > { %12702 = vst [vmem:[#allocation238_spill] sm:$0xff] %v8177_v60  ;;  %v8179_v26 = vpop.permute.xlu0 %2413 }
 0x291   : > { %12703 = vst [vmem:[#allocation239_spill] sm:$0xff] %v8179_v26  ;;  %2587 = vrot.lane.b32.xlu1 %v7976_v42, %s6383_s13  ;;  %v8204_v42 = vld [vmem:[%s8184_s25 + $0x8] sm:$0x3]  ;;  %v2714_v26 = vrot.slane %v8218_v0, 1 }
 0x292   : > { %2585 = vrot.lane.b32.xlu0 %v7982_v41, %s6383_s13  ;;  %v2412_v41 = vsel %vm940_vm1, %v2410_v25, %v2411_v61  ;;  %v2706_v60 = vrot.slane %v8204_v42, 1  ;;  %v8226_v25 = vld [vmem:[%s8184_s25 + $0x20] sm:$0xff]  ;;  %v8229_v61 = vld [vmem:[%s8184_s25 + $0x28] sm:$0x3]  ;;  %v2730_v32 = vrot.slane %v8204_v42, 2 }
 0x293   : > { %v8190_v23 = vpop.permute.xlu1 %2419  ;;  %v2711_v31 = vrot.slane %v8226_v25, 1  ;;  %v2712_v4 = vrot.slane %v8229_v61, 1  ;;  %v2735_v42 = vrot.slane %v8226_v25, 2 }
 0x294   : > { %12705 = vst [vmem:[#allocation240_spill] sm:$0xff] %v8190_v23  ;;  %v8198_v55 = vpop.permute.xlu0 %2417 }
 0x295   : > { %12706 = vst [vmem:[#allocation241_spill] sm:$0xff] %v8198_v55  ;;  %2591 = vrot.lane.b32.xlu1 %v7992_v51, %s6383_s13  ;;  %v2705_v55 = vrot.slane %v8201_v58, 1  ;;  %v8221_v51 = vld [vmem:[%s8184_s25 + $0x38] sm:$0x3] }
 0x296   : > { %2589 = vrot.lane.b32.xlu0 %v7997_v38, %s6383_s13  ;;  %v2715_v34 = vrot.slane %v8221_v51, 1 }
 0x297   : > { %v8213_v23 = vpop.permute.xlu1 %2423 }
 0x298   : > { %12707 = vst [vmem:[#allocation242_spill] sm:$0xff] %v8213_v23  ;;  %v8223_v38 = vpop.permute.xlu0 %2421  ;;  %v8235_v23 = vsel %vm915_vm0, %v2708_v56, %v2709_v29  ;;  %v8251_v29 = vld [vmem:[%s8184_s25 + $0x40] sm:$0xff] }
 0x299   : > { %12708 = vst [vmem:[#allocation243_spill] sm:$0xff] %v8223_v38  ;;  %2595 = vrot.lane.b32.xlu1 %v2412_v41, %s6383_s13  ;;  %v2707_v38 = vsel %vm915_vm0, %v2705_v55, %v2706_v60  ;;  %v8245_v41 = vld [vmem:[%s8184_s25 + $0x50] sm:$0xff]  ;;  %v8260_v60 = vsel %vm915_vm0, %v2714_v26, %v2715_v34  ;;  %v2717_v6 = vrot.slane %v8251_v29, 1  ;;  %v2682_v34 = vld [vmem:[%s8184_s25 + $0x68] sm:$0x3]  ;;  %v2727_v26 = vrot.slane %v2684_v59, 1 }
 0x29a   : > { %2593 = vrot.lane.b32.xlu0 %v8095_v53, %s6383_s13  ;;  %v2680_v53 = vld [vmem:[%s8184_s25 + $0x58] sm:$0x3]  ;;  %v2720_v55 = vrot.slane %v8245_v41, 1  ;;  %v2724_v39 = vrot.slane %v2682_v34, 1 }
 0x29b   : > { %v8239_v12 = vpop.permute.xlu1 %2427  ;;  %v8291_v50 = vsel %vm915_vm0, %v2717_v6, %v2718_v27 }
 0x29c   : > { %12709 = vst [vmem:[#allocation244_spill] sm:$0xff] %v8239_v12  ;;  %v8248_v56 = vpop.permute.xlu0 %2425  ;;  %v2721_v12 = vrot.slane %v2680_v53, 1 }
 0x29d   : > { %12710 = vst [vmem:[#allocation245_spill] sm:$0xff] %v8248_v56  ;;  %2771 = vrot.lane.b32.xlu1 %v8235_v23, %s12711_s26  ;;  %v8266_v56 = vsel %vm915_vm0, %v2711_v31, %v2712_v4  ;;  %v2726_v31 = vrot.slane %v8271_v33, 1 }
 0x29e   : > { %2769 = vrot.lane.b32.xlu0 %v2707_v38, %s12711_s26  ;;  %v8277_v38 = vld [vmem:[%s8184_s25 + $0x60] sm:$0xff]  ;;  %v8285_v4 = vsel %vm915_vm0, %v2720_v55, %v2721_v12  ;;  %v2732_v55 = vrot.slane %v8193_v18, 2 }
 0x29f   : > { %v8263_v14 = vpop.permute.xlu1 %2439  ;;  %v8301_v12 = vsel %vm915_vm0, %v2726_v31, %v2727_v26  ;;  %v2736_v26 = vrot.slane %v8229_v61, 2  ;;  %v2742_v61 = vrot.slane %v8254_v22, 2  ;;  %v2747_v22 = vrot.slane %v8277_v38, 2 }
 0x2a0   : > { %12712 = vst [vmem:[#allocation246_spill] sm:$0xff] %v8263_v14  ;;  %v8274_v9 = vpop.permute.xlu0 %2437 }
 0x2a1   : > { %12713 = vst [vmem:[#allocation247_spill] sm:$0xff] %v8274_v9  ;;  %2775 = vrot.lane.b32.xlu1 %v8260_v60, %s12711_s26  ;;  %v2723_v9 = vrot.slane %v8277_v38, 1 }
 0x2a2   : > { %2773 = vrot.lane.b32.xlu0 %v8266_v56, %s12711_s26 }
 0x2a3   : > { %v8288_v14 = vpop.permute.xlu1 %2443  ;;  %v8308_v27 = vsel %vm915_vm0, %v2723_v9, %v2724_v39  ;;  %v2739_v39 = vrot.slane %v8221_v51, 2  ;;  %v2744_v51 = vrot.slane %v8245_v41, 2 }
 0x2a4   : > { %12714 = vst [vmem:[#allocation248_spill] sm:$0xff] %v8288_v14  ;;  %v8294_v28 = vpop.permute.xlu0 %2441  ;;  %v2733_v14 = vrot.slane %v8196_v36, 2  ;;  %v2738_v36 = vrot.slane %v8218_v0, 2 }
 0x2a5   : > { %12715 = vst [vmem:[#allocation249_spill] sm:$0xff] %v8294_v28  ;;  %2779 = vrot.lane.b32.xlu1 %v8285_v4, %s12711_s26  ;;  %v2729_v28 = vrot.slane %v8201_v58, 2 }
 0x2a6   : > { %2777 = vrot.lane.b32.xlu0 %v8291_v50, %s12711_s26  ;;  %v8319_v31 = vsel %vm940_vm1, %v2732_v55, %v2733_v14  ;;  %v8334_v14 = vsel %vm940_vm1, %v2738_v36, %v2739_v39  ;;  %v2745_v55 = vrot.slane %v2680_v53, 2  ;;  %v2750_v53 = vrot.slane %v8271_v33, 2 }
 0x2a7   : > { %v8305_v6 = vpop.permute.xlu1 %2447  ;;  %v2731_v58 = vsel %vm940_vm1, %v2729_v28, %v2730_v32  ;;  %v8340_v28 = vsel %vm940_vm1, %v2735_v42, %v2736_v26  ;;  %v2741_v32 = vrot.slane %v8251_v29, 2  ;;  %v2751_v39 = vrot.slane %v2684_v59, 2 }
 0x2a8   : > { %12716 = vst [vmem:[#allocation250_spill] sm:$0xff] %v8305_v6  ;;  %v8312_v35 = vpop.permute.xlu0 %2445  ;;  %v8351_v36 = vsel %vm940_vm1, %v2744_v51, %v2745_v55  ;;  %v2748_v26 = vrot.slane %v2682_v34, 2 }
 0x2a9   : > { %12717 = vst [vmem:[#allocation251_spill] sm:$0xff] %v8312_v35  ;;  %2783 = vrot.lane.b32.xlu1 %v8301_v12, %s12711_s26  ;;  %v8357_v42 = vsel %vm940_vm1, %v2741_v32, %v2742_v61  ;;  %v8367_v51 = vsel %vm940_vm1, %v2750_v53, %v2751_v39 }
 0x2aa   : > { %2781 = vrot.lane.b32.xlu0 %v8308_v27, %s12711_s26  ;;  %v8372_v55 = vsel %vm940_vm1, %v2747_v22, %v2748_v26 }
 0x2ab   : > { %v8323_v9 = vpop.permute.xlu1 %2451 }
 0x2ac   : > { %12718 = vst [vmem:[#allocation252_spill] sm:$0xff] %v8323_v9  ;;  %v8328_v6 = vpop.permute.xlu0 %2449 }
 0x2ad   : > { %12719 = vst [vmem:[#allocation253_spill] sm:$0xff] %v8328_v6  ;;  %2795 = vrot.lane.b32.xlu1 %v8319_v31, %s12720_s27 }
 0x2ae   : > { %2793 = vrot.lane.b32.xlu0 %v2731_v58, %s12720_s27 }
 0x2af   : > { %v8337_v9 = vpop.permute.xlu1 %2463 }
 0x2b0   : > { %12721 = vst [vmem:[#allocation254_spill] sm:$0xff] %v8337_v9  ;;  %v8344_v6 = vpop.permute.xlu0 %2461 }
 0x2b1   : > { %12722 = vst [vmem:[#allocation255_spill] sm:$0xff] %v8344_v6  ;;  %2799 = vrot.lane.b32.xlu1 %v8334_v14, %s12720_s27 }
 0x2b2   : > { %2797 = vrot.lane.b32.xlu0 %v8340_v28, %s12720_s27 }
 0x2b3   : > { %v8354_v58 = vpop.permute.xlu1 %2467 }
 0x2b4   : > { %12723 = vst [vmem:[#allocation256_spill] sm:$0xff] %v8354_v58  ;;  %v8360_v35 = vpop.permute.xlu0 %2465 }
 0x2b5   : > { %12724 = vst [vmem:[#allocation257_spill] sm:$0xff] %v8360_v35  ;;  %2803 = vrot.lane.b32.xlu1 %v8351_v36, %s12720_s27 }
 0x2b6   : > { %2801 = vrot.lane.b32.xlu0 %v8357_v42, %s12720_s27 }
 0x2b7   : > { %v8369_v59 = vpop.permute.xlu1 %2471 }
 0x2b8   : > { %12725 = vst [vmem:[#allocation258_spill] sm:$0xff] %v8369_v59  ;;  %v8374_v32 = vpop.permute.xlu0 %2469 }
 0x2b9   : > { %12726 = vst [vmem:[#allocation259_spill] sm:$0xff] %v8374_v32  ;;  %2807 = vrot.lane.b32.xlu1 %v8367_v51, %s12720_s27 }
 0x2ba   : > { %2805 = vrot.lane.b32.xlu0 %v8372_v55, %s12720_s27 }
 0x2bb   : > { %v8380_v34 = vpop.permute.xlu1 %2475 }
 0x2bc   : > { %12727 = vst [vmem:[#allocation260_spill] sm:$0xff] %v8380_v34  ;;  %v8382_v61 = vpop.permute.xlu0 %2473 }
 0x2bd   : > { %12728 = vst [vmem:[#allocation261_spill] sm:$0xff] %v8382_v61  ;;  %2819 = vrot.lane.b32.xlu1 %v8226_v25, %s12729_s15 }
 0x2be   : > { %2817 = vrot.lane.b32.xlu0 %v8193_v18, %s12729_s15  ;;  %v2685_v18 = vld [vmem:[%s8184_s25 + $0x80] sm:$0xff] }
 0x2bf   : > { %v8388_v53 = vpop.permute.xlu1 %2487 }
 0x2c0   : > { %12730 = vst [vmem:[#allocation262_spill] sm:$0xff] %v8388_v53  ;;  %v8390_v39 = vpop.permute.xlu0 %2485 }
 0x2c1   : > { %12731 = vst [vmem:[#allocation263_spill] sm:$0xff] %v8390_v39  ;;  %2823 = vrot.lane.b32.xlu1 %v8251_v29, %s12729_s15 }
 0x2c2   : > { %2821 = vrot.lane.b32.xlu0 %v8218_v0, %s12729_s15 }
 0x2c3   : > { %v8396_v22 = vpop.permute.xlu1 %2491 }
 0x2c4   : > { %12732 = vst [vmem:[#allocation264_spill] sm:$0xff] %v8396_v22  ;;  %v8398_v26 = vpop.permute.xlu0 %2489 }
 0x2c5   : > { %12733 = vst [vmem:[#allocation265_spill] sm:$0xff] %v8398_v26  ;;  %2827 = vrot.lane.b32.xlu1 %v8277_v38, %s12729_s15 }
 0x2c6   : > { %2825 = vrot.lane.b32.xlu0 %v8245_v41, %s12729_s15 }
 0x2c7   : > { %v8405_v34 = vpop.permute.xlu1 %2495 }
 0x2c8   : > { %12734 = vst [vmem:[#allocation266_spill] sm:$0xff] %v8405_v34  ;;  %v8407_v61 = vpop.permute.xlu0 %2493  ;;  %v2686_v34 = vld [vmem:[%s8184_s25 + $0x88] sm:$0x3] }
 0x2c9   : > { %12735 = vst [vmem:[#allocation267_spill] sm:$0xff] %v8407_v61  ;;  %2831 = vrot.lane.b32.xlu1 %v2685_v18, %s12729_s15  ;;  %v2755_v61 = vrot.slane %v2685_v18, 1 }
 0x2ca   : > { %2829 = vrot.lane.b32.xlu0 %v8271_v33, %s12729_s15 }
 0x2cb   : > { %v8412_v59 = vpop.permute.xlu1 %2499 }
 0x2cc   : > { %12736 = vst [vmem:[#allocation268_spill] sm:$0xff] %v8412_v59  ;;  %v8414_v32 = vpop.permute.xlu0 %2497  ;;  %v2756_v59 = vrot.slane %v2686_v34, 1 }
 0x2cd   : > { %12737 = vst [vmem:[#allocation269_spill] sm:$0xff] %v8414_v32  ;;  %2843 = vrot.lane.b32.xlu1 %v8266_v56, %s12668_s29 }
 0x2ce   : > { %2841 = vrot.lane.b32.xlu0 %v8235_v23, %s12668_s29  ;;  %v2757_v23 = vsel %vm915_vm0, %v2755_v61, %v2756_v59 }
 0x2cf   : > { %v8420_v22 = vpop.permute.xlu1 %2511 }
 0x2d0   : > { %12738 = vst [vmem:[#allocation270_spill] sm:$0xff] %v8420_v22  ;;  %v8423_v58 = vpop.permute.xlu0 %2509 }
 0x2d1   : > { %12739 = vst [vmem:[#allocation271_spill] sm:$0xff] %v8423_v58  ;;  %2847 = vrot.lane.b32.xlu1 %v8291_v50, %s12668_s29 }
 0x2d2   : > { %2845 = vrot.lane.b32.xlu0 %v8260_v60, %s12668_s29 }
 0x2d3   : > { %v8429_v32 = vpop.permute.xlu1 %2515 }
 0x2d4   : > { %12740 = vst [vmem:[#allocation272_spill] sm:$0xff] %v8429_v32  ;;  %v8431_v26 = vpop.permute.xlu0 %2513 }
 0x2d5   : > { %12741 = vst [vmem:[#allocation273_spill] sm:$0xff] %v8431_v26  ;;  %2851 = vrot.lane.b32.xlu1 %v8308_v27, %s12668_s29 }
 0x2d6   : > { %2849 = vrot.lane.b32.xlu0 %v8285_v4, %s12668_s29 }
 0x2d7   : > { %v8438_v35 = vpop.permute.xlu1 %2519 }
 0x2d8   : > { %12742 = vst [vmem:[#allocation274_spill] sm:$0xff] %v8438_v35  ;;  %v8440_v22 = vpop.permute.xlu0 %2517  ;;  %v2758_v35 = vrot.slane %v2685_v18, 2 }
 0x2d9   : > { %12743 = vst [vmem:[#allocation275_spill] sm:$0xff] %v8440_v22  ;;  %2855 = vrot.lane.b32.xlu1 %v2757_v23, %s12668_s29 }
 0x2da   : > { %2853 = vrot.lane.b32.xlu0 %v8301_v12, %s12668_s29 }
 0x2db   : > { %v8445_v32 = vpop.permute.xlu1 %2523 }
 0x2dc   : > { %12744 = vst [vmem:[#allocation276_spill] sm:$0xff] %v8445_v32  ;;  %v8447_v26 = vpop.permute.xlu0 %2521  ;;  %v2759_v32 = vrot.slane %v2686_v34, 2 }
 0x2dd   : > { %12745 = vst [vmem:[#allocation277_spill] sm:$0xff] %v8447_v26  ;;  %2867 = vrot.lane.b32.xlu1 %v8340_v28, %s12677_s14 }
 0x2de   : > { %2865 = vrot.lane.b32.xlu0 %v8319_v31, %s12677_s14  ;;  %v8470_v31 = vsel %vm940_vm1, %v2758_v35, %v2759_v32 }
 0x2df   : > { %v8453_v59 = vpop.permute.xlu1 %2535 }
 0x2e0   : > { %12746 = vst [vmem:[#allocation278_spill] sm:$0xff] %v8453_v59  ;;  %v8455_v61 = vpop.permute.xlu0 %2533 }
 0x2e1   : > { %12747 = vst [vmem:[#allocation279_spill] sm:$0xff] %v8455_v61  ;;  %2871 = vrot.lane.b32.xlu1 %v8357_v42, %s12677_s14 }
 0x2e2   : > { %2869 = vrot.lane.b32.xlu0 %v8334_v14, %s12677_s14 }
 0x2e3   : > { %v8461_v22 = vpop.permute.xlu1 %2539 }
 0x2e4   : > { %12748 = vst [vmem:[#allocation280_spill] sm:$0xff] %v8461_v22  ;;  %v8463_v26 = vpop.permute.xlu0 %2537 }
 0x2e5   : > { %12749 = vst [vmem:[#allocation281_spill] sm:$0xff] %v8463_v26  ;;  %2875 = vrot.lane.b32.xlu1 %v8372_v55, %s12677_s14 }
 0x2e6   : > { %2873 = vrot.lane.b32.xlu0 %v8351_v36, %s12677_s14 }
 0x2e7   : > { %v8472_v59 = vpop.permute.xlu1 %2543 }
 0x2e8   : > { %12750 = vst [vmem:[#allocation282_spill] sm:$0xff] %v8472_v59  ;;  %v8474_v53 = vpop.permute.xlu0 %2541 }
 0x2e9   : > { %12751 = vst [vmem:[#allocation283_spill] sm:$0xff] %v8474_v53  ;;  %2879 = vrot.lane.b32.xlu1 %v8470_v31, %s12677_s14 }
 0x2ea   : > { %2877 = vrot.lane.b32.xlu0 %v8367_v51, %s12677_s14 }
 0x2eb   : > { %v8480_v34 = vpop.permute.xlu1 %2547 }
 0x2ec   : > { %12752 = vst [vmem:[#allocation284_spill] sm:$0xff] %v8480_v34  ;;  %v8482_v22 = vpop.permute.xlu0 %2545 }
 0x2ed   : > { %12753 = vst [vmem:[#allocation285_spill] sm:$0xff] %v8482_v22  ;;  %2891 = vrot.lane.b32.xlu1 %v8218_v0, %s12618_s23  ;;  %v2687_v0 = vld [vmem:[%s8184_s25 + $0x90] sm:$0xff] }
 0x2ee   : > { %2889 = vrot.lane.b32.xlu0 %v8226_v25, %s12618_s23 }
 0x2ef   : > { %v8488_v35 = vpop.permute.xlu1 %2559 }
 0x2f0   : > { %12754 = vst [vmem:[#allocation286_spill] sm:$0xff] %v8488_v35  ;;  %v8490_v32 = vpop.permute.xlu0 %2557 }
 0x2f1   : > { %12755 = vst [vmem:[#allocation287_spill] sm:$0xff] %v8490_v32  ;;  %2895 = vrot.lane.b32.xlu1 %v8245_v41, %s12618_s23 }
 0x2f2   : > { %2893 = vrot.lane.b32.xlu0 %v8251_v29, %s12618_s23 }
 0x2f3   : > { %v8496_v34 = vpop.permute.xlu1 %2563 }
 0x2f4   : > { %12756 = vst [vmem:[#allocation288_spill] sm:$0xff] %v8496_v34  ;;  %v8498_v22 = vpop.permute.xlu0 %2561 }
 0x2f5   : > { %12757 = vst [vmem:[#allocation289_spill] sm:$0xff] %v8498_v22  ;;  %2899 = vrot.lane.b32.xlu1 %v8271_v33, %s12618_s23 }
 0x2f6   : > { %2897 = vrot.lane.b32.xlu0 %v8277_v38, %s12618_s23  ;;  %v2688_v38 = vld [vmem:[%s8184_s25 + $0x98] sm:$0x3] }
 0x2f7   : > { %v8505_v25 = vpop.permute.xlu1 %2567 }
 0x2f8   : > { %12758 = vst [vmem:[#allocation290_spill] sm:$0xff] %v8505_v25  ;;  %v8507_v59 = vpop.permute.xlu0 %2565 }
 0x2f9   : > { %12759 = vst [vmem:[#allocation291_spill] sm:$0xff] %v8507_v59  ;;  %2903 = vrot.lane.b32.xlu1 %v2687_v0, %s12618_s23 }
 0x2fa   : > { %2901 = vrot.lane.b32.xlu0 %v2685_v18, %s12618_s23  ;;  %v2763_v18 = vrot.slane %v2687_v0, 1 }
 0x2fb   : > { %v8511_v41 = vpop.permute.xlu1 %2571 }
 0x2fc   : > { %12760 = vst [vmem:[#allocation292_spill] sm:$0xff] %v8511_v41  ;;  %v8513_v29 = vpop.permute.xlu0 %2569  ;;  %v2764_v41 = vrot.slane %v2688_v38, 1 }
 0x2fd   : > { %12761 = vst [vmem:[#allocation293_spill] sm:$0xff] %v8513_v29  ;;  %2915 = vrot.lane.b32.xlu1 %v8260_v60, %s6382_s12 }
 0x2fe   : > { %2913 = vrot.lane.b32.xlu0 %v8266_v56, %s6382_s12  ;;  %v2765_v56 = vsel %vm915_vm0, %v2763_v18, %v2764_v41  ;;  %v8568_v41 = vld [vmem:[%s8559_s3 + $0x10] sm:$0xff]  ;;  %v8571_v18 = vld [vmem:[%s8559_s3 + $0x18] sm:$0x3] }
 0x2ff   : > { %v8519_v33 = vpop.permute.xlu1 %2583 }
 0x300   : > { %12762 = vst [vmem:[#allocation294_spill] sm:$0xff] %v8519_v33  ;;  %v8522_v25 = vpop.permute.xlu0 %2581 }
 0x301   : > { %12763 = vst [vmem:[#allocation295_spill] sm:$0xff] %v8522_v25  ;;  %2919 = vrot.lane.b32.xlu1 %v8285_v4, %s6382_s12  ;;  %v8629_v25 = vld [vmem:[%s8559_s3 + $0x48] sm:$0x3] }
 0x302   : > { %2917 = vrot.lane.b32.xlu0 %v8291_v50, %s6382_s12  ;;  %v3074_v6 = vrot.slane %v8629_v25, 1 }
 0x303   : > { %v8528_v29 = vpop.permute.xlu1 %2587 }
 0x304   : > { %12764 = vst [vmem:[#allocation296_spill] sm:$0xff] %v8528_v29  ;;  %v8530_v60 = vpop.permute.xlu0 %2585  ;;  %v8593_v29 = vld [vmem:[%s8559_s3 + $0x30] sm:$0xff] }
 0x305   : > { %12765 = vst [vmem:[#allocation297_spill] sm:$0xff] %v8530_v60  ;;  %2923 = vrot.lane.b32.xlu1 %v8301_v12, %s6382_s12  ;;  %v3070_v60 = vrot.slane %v8593_v29, 1 }
 0x306   : > { %2921 = vrot.lane.b32.xlu0 %v8308_v27, %s6382_s12 }
 0x307   : > { %v8537_v59 = vpop.permute.xlu1 %2591 }
 0x308   : > { %12766 = vst [vmem:[#allocation298_spill] sm:$0xff] %v8537_v59  ;;  %v8539_v4 = vpop.permute.xlu0 %2589 }
 0x309   : > { %12767 = vst [vmem:[#allocation299_spill] sm:$0xff] %v8539_v4  ;;  %2927 = vrot.lane.b32.xlu1 %v2765_v56, %s6382_s12 }
 0x30a   : > { %2925 = vrot.lane.b32.xlu0 %v2757_v23, %s6382_s12 }
 0x30b   : > { %v8543_v50 = vpop.permute.xlu1 %2595 }
 0x30c   : > { %12768 = vst [vmem:[#allocation300_spill] sm:$0xff] %v8543_v50  ;;  %v8545_v53 = vpop.permute.xlu0 %2593  ;;  %v8576_v50 = vld [vmem:[%s8559_s3] sm:$0xff] }
 0x30d   : > { %12769 = vst [vmem:[#allocation301_spill] sm:$0xff] %v8545_v53  ;;  %2939 = vrot.lane.b32.xlu1 %v8334_v14, %s6383_s13  ;;  %v2766_v14 = vrot.slane %v2687_v0, 2  ;;  %v3064_v0 = vrot.slane %v8568_v41, 1  ;;  %v3061_v59 = vrot.slane %v8576_v50, 1 }
 0x30e   : > { %2937 = vrot.lane.b32.xlu0 %v8340_v28, %s6383_s13  ;;  %v2767_v28 = vrot.slane %v2688_v38, 2  ;;  %v3065_v38 = vrot.slane %v8571_v18, 1 }
 0x30f   : > { %v8552_v12 = vpop.permute.xlu1 %2771 }
 0x310   : > { %v8554_v27 = vpop.permute.xlu0 %2769  ;;  %v8610_v34 = vsel %vm915_vm0, %v3064_v0, %v3065_v38  ;;  %v8626_v38 = vld [vmem:[%s8559_s3 + $0x40] sm:$0xff] }
 0x311   : > { %2943 = vrot.lane.b32.xlu1 %v8351_v36, %s6383_s13  ;;  %v8579_v36 = vld [vmem:[%s8559_s3 + $0x8] sm:$0x3]  ;;  %v3073_v39 = vrot.slane %v8626_v38, 1 }
 0x312   : > { %2941 = vrot.lane.b32.xlu0 %v8357_v42, %s6383_s13  ;;  %v2768_v42 = vsel %vm940_vm1, %v2766_v14, %v2767_v28  ;;  %v3062_v4 = vrot.slane %v8579_v36, 1  ;;  %v8601_v14 = vld [vmem:[%s8559_s3 + $0x20] sm:$0xff]  ;;  %v8604_v28 = vld [vmem:[%s8559_s3 + $0x28] sm:$0x3]  ;;  %v3086_v49 = vrot.slane %v8579_v36, 2 }
 0x313   : > { %v8565_v23 = vpop.permute.xlu1 %2775  ;;  %v3067_v35 = vrot.slane %v8601_v14, 1  ;;  %v3068_v9 = vrot.slane %v8604_v28, 1  ;;  %v3091_v36 = vrot.slane %v8601_v14, 2 }
 0x314   : > { %12771 = vst [vmem:[#allocation302_spill] sm:$0xff] %v8565_v23  ;;  %v8573_v56 = vpop.permute.xlu0 %2773  ;;  %v3063_v33 = vsel %vm915_vm0, %v3061_v59, %v3062_v4  ;;  %v8666_v23 = vsel %vm915_vm0, %v3073_v39, %v3074_v6 }
 0x315   : > { %12772 = vst [vmem:[#allocation303_spill] sm:$0xff] %v8573_v56  ;;  %2947 = vrot.lane.b32.xlu1 %v8367_v51, %s6383_s13  ;;  %v8596_v51 = vld [vmem:[%s8559_s3 + $0x38] sm:$0x3]  ;;  %v8641_v58 = vsel %vm915_vm0, %v3067_v35, %v3068_v9 }
 0x316   : > { %2945 = vrot.lane.b32.xlu0 %v8372_v55, %s6383_s13  ;;  %v3071_v22 = vrot.slane %v8596_v51, 1 }
 0x317   : > { %v8588_v53 = vpop.permute.xlu1 %2779 }
 0x318   : > { %12773 = vst [vmem:[#allocation304_spill] sm:$0xff] %v8588_v53  ;;  %v8598_v55 = vpop.permute.xlu0 %2777  ;;  %v8635_v59 = vsel %vm915_vm0, %v3070_v60, %v3071_v22  ;;  %v3038_v22 = vld [vmem:[%s8559_s3 + $0x68] sm:$0x3] }
 0x319   : > { %12774 = vst [vmem:[#allocation305_spill] sm:$0xff] %v8598_v55  ;;  %2951 = vrot.lane.b32.xlu1 %v2768_v42, %s6383_s13  ;;  %v8620_v42 = vld [vmem:[%s8559_s3 + $0x50] sm:$0xff]  ;;  %v3080_v62 = vrot.slane %v3038_v22, 1 }
 0x31a   : > { %2949 = vrot.lane.b32.xlu0 %v8470_v31, %s6383_s13  ;;  %v3036_v31 = vld [vmem:[%s8559_s3 + $0x58] sm:$0x3]  ;;  %v3076_v4 = vrot.slane %v8620_v42, 1 }
 0x31b   : > { %v8614_v26 = vpop.permute.xlu1 %2783  ;;  %v3077_v32 = vrot.slane %v3036_v31, 1 }
 0x31c   : > { %12775 = vst [vmem:[#allocation306_spill] sm:$0xff] %v8614_v26  ;;  %v8623_v0 = vpop.permute.xlu0 %2781  ;;  %v8646_v26 = vld [vmem:[%s8559_s3 + $0x70] sm:$0xff] }
 0x31d   : > { %12776 = vst [vmem:[#allocation307_spill] sm:$0xff] %v8623_v0  ;;  %3127 = vrot.lane.b32.xlu1 %v8610_v34, %s12711_s26  ;;  %v3040_v0 = vld [vmem:[%s8559_s3 + $0x78] sm:$0x3]  ;;  %v8660_v9 = vsel %vm915_vm0, %v3076_v4, %v3077_v32  ;;  %v3082_v35 = vrot.slane %v8646_v26, 1  ;;  %v3088_v4 = vrot.slane %v8568_v41, 2 }
 0x31e   : > { %3125 = vrot.lane.b32.xlu0 %v3063_v33, %s12711_s26  ;;  %v8652_v33 = vld [vmem:[%s8559_s3 + $0x60] sm:$0xff]  ;;  %v3083_v60 = vrot.slane %v3040_v0, 1 }
 0x31f   : > { %v8638_v61 = vpop.permute.xlu1 %2795  ;;  %v3079_v56 = vrot.slane %v8652_v33, 1 }
 0x320   : > { %v8649_v53 = vpop.permute.xlu0 %2793  ;;  %v8676_v32 = vsel %vm915_vm0, %v3082_v35, %v3083_v60  ;;  %v3092_v60 = vrot.slane %v8604_v28, 2  ;;  %v3098_v28 = vrot.slane %v8629_v25, 2  ;;  %v3103_v25 = vrot.slane %v8652_v33, 2 }
 0x321   : > { %3131 = vrot.lane.b32.xlu1 %v8635_v59, %s12711_s26  ;;  %v8683_v39 = vsel %vm915_vm0, %v3079_v56, %v3080_v62  ;;  %v3095_v62 = vrot.slane %v8596_v51, 2  ;;  %v3100_v51 = vrot.slane %v8620_v42, 2 }
 0x322   : > { %3129 = vrot.lane.b32.xlu0 %v8641_v58, %s12711_s26 }
 0x323   : > { %v8663_v55 = vpop.permute.xlu1 %2799 }
 0x324   : > { %12777 = vst [vmem:[#allocation308_spill] sm:$0xff] %v8663_v55  ;;  %v8669_v5 = vpop.permute.xlu0 %2797  ;;  %v3089_v55 = vrot.slane %v8571_v18, 2  ;;  %v3094_v18 = vrot.slane %v8593_v29, 2 }
 0x325   : > { %12778 = vst [vmem:[#allocation309_spill] sm:$0xff] %v8669_v5  ;;  %3135 = vrot.lane.b32.xlu1 %v8660_v9, %s12711_s26  ;;  %v3085_v5 = vrot.slane %v8576_v50, 2 }
 0x326   : > { %3133 = vrot.lane.b32.xlu0 %v8666_v23, %s12711_s26  ;;  %v8694_v35 = vsel %vm940_vm1, %v3088_v4, %v3089_v55  ;;  %v8709_v55 = vsel %vm940_vm1, %v3094_v18, %v3095_v62  ;;  %v3101_v4 = vrot.slane %v3036_v31, 2  ;;  %v3106_v31 = vrot.slane %v8646_v26, 2 }
 0x327   : > { %v8680_v6 = vpop.permute.xlu1 %2803  ;;  %v3087_v50 = vsel %vm940_vm1, %v3085_v5, %v3086_v49  ;;  %v8715_v49 = vsel %vm940_vm1, %v3091_v36, %v3092_v60  ;;  %v3097_v5 = vrot.slane %v8626_v38, 2  ;;  %v3107_v62 = vrot.slane %v3040_v0, 2 }
 0x328   : > { %12779 = vst [vmem:[#allocation310_spill] sm:$0xff] %v8680_v6  ;;  %v8687_v47 = vpop.permute.xlu0 %2801  ;;  %v8726_v18 = vsel %vm940_vm1, %v3100_v51, %v3101_v4  ;;  %v3104_v60 = vrot.slane %v3038_v22, 2 }
 0x329   : > { %12780 = vst [vmem:[#allocation311_spill] sm:$0xff] %v8687_v47  ;;  %3139 = vrot.lane.b32.xlu1 %v8676_v32, %s12711_s26  ;;  %v8732_v36 = vsel %vm940_vm1, %v3097_v5, %v3098_v28  ;;  %v8742_v51 = vsel %vm940_vm1, %v3106_v31, %v3107_v62 }
 0x32a   : > { %3137 = vrot.lane.b32.xlu0 %v8683_v39, %s12711_s26  ;;  %v8747_v4 = vsel %vm940_vm1, %v3103_v25, %v3104_v60 }
 0x32b   : > { %v8698_v56 = vpop.permute.xlu1 %2807 }
 0x32c   : > { %12781 = vst [vmem:[#allocation312_spill] sm:$0xff] %v8698_v56  ;;  %v8703_v6 = vpop.permute.xlu0 %2805 }
 0x32d   : > { %12782 = vst [vmem:[#allocation313_spill] sm:$0xff] %v8703_v6  ;;  %3151 = vrot.lane.b32.xlu1 %v8694_v35, %s12720_s27 }
 0x32e   : > { %3149 = vrot.lane.b32.xlu0 %v3087_v50, %s12720_s27 }
 0x32f   : > { %v8712_v56 = vpop.permute.xlu1 %2819 }
 0x330   : > { %v8719_v6 = vpop.permute.xlu0 %2817 }
 0x331   : > { %3155 = vrot.lane.b32.xlu1 %v8709_v55, %s12720_s27 }
 0x332   : > { %3153 = vrot.lane.b32.xlu0 %v8715_v49, %s12720_s27 }
 0x333   : > { %v8729_v50 = vpop.permute.xlu1 %2823 }
 0x334   : > { %12783 = vst [vmem:[#allocation314_spill] sm:$0xff] %v8729_v50  ;;  %v8735_v47 = vpop.permute.xlu0 %2821 }
 0x335   : > { %12784 = vst [vmem:[#allocation315_spill] sm:$0xff] %v8735_v47  ;;  %3159 = vrot.lane.b32.xlu1 %v8726_v18, %s12720_s27 }
 0x336   : > { %3157 = vrot.lane.b32.xlu0 %v8732_v36, %s12720_s27 }
 0x337   : > { %v8744_v0 = vpop.permute.xlu1 %2827 }
 0x338   : > { %12785 = vst [vmem:[#allocation316_spill] sm:$0xff] %v8744_v0  ;;  %v8749_v5 = vpop.permute.xlu0 %2825 }
 0x339   : > { %12786 = vst [vmem:[#allocation317_spill] sm:$0xff] %v8749_v5  ;;  %3163 = vrot.lane.b32.xlu1 %v8742_v51, %s12720_s27 }
 0x33a   : > { %3161 = vrot.lane.b32.xlu0 %v8747_v4, %s12720_s27 }
 0x33b   : > { %v8755_v22 = vpop.permute.xlu1 %2831 }
 0x33c   : > { %12787 = vst [vmem:[#allocation318_spill] sm:$0xff] %v8755_v22  ;;  %v8757_v28 = vpop.permute.xlu0 %2829 }
 0x33d   : > { %12788 = vst [vmem:[#allocation319_spill] sm:$0xff] %v8757_v28  ;;  %3175 = vrot.lane.b32.xlu1 %v8601_v14, %s12729_s15 }
 0x33e   : > { %3173 = vrot.lane.b32.xlu0 %v8568_v41, %s12729_s15  ;;  %v3041_v41 = vld [vmem:[%s8559_s3 + $0x80] sm:$0xff] }
 0x33f   : > { %v8763_v31 = vpop.permute.xlu1 %2843 }
 0x340   : > { %12789 = vst [vmem:[#allocation320_spill] sm:$0xff] %v8763_v31  ;;  %v8765_v62 = vpop.permute.xlu0 %2841 }
 0x341   : > { %3179 = vrot.lane.b32.xlu1 %v8626_v38, %s12729_s15 }
 0x342   : > { %3177 = vrot.lane.b32.xlu0 %v8593_v29, %s12729_s15 }
 0x343   : > { %v8771_v25 = vpop.permute.xlu1 %2847 }
 0x344   : > { %12790 = vst [vmem:[#allocation321_spill] sm:$0xff] %v8771_v25  ;;  %v8773_v60 = vpop.permute.xlu0 %2845 }
 0x345   : > { %12791 = vst [vmem:[#allocation322_spill] sm:$0xff] %v8773_v60  ;;  %3183 = vrot.lane.b32.xlu1 %v8652_v33, %s12729_s15 }
 0x346   : > { %3181 = vrot.lane.b32.xlu0 %v8620_v42, %s12729_s15 }
 0x347   : > { %v8780_v22 = vpop.permute.xlu1 %2851 }
 0x348   : > { %12792 = vst [vmem:[#allocation323_spill] sm:$0xff] %v8780_v22  ;;  %v8782_v28 = vpop.permute.xlu0 %2849  ;;  %v3042_v22 = vld [vmem:[%s8559_s3 + $0x88] sm:$0x3] }
 0x349   : > { %12793 = vst [vmem:[#allocation324_spill] sm:$0xff] %v8782_v28  ;;  %3187 = vrot.lane.b32.xlu1 %v3041_v41, %s12729_s15  ;;  %v3111_v28 = vrot.slane %v3041_v41, 1 }
 0x34a   : > { %3185 = vrot.lane.b32.xlu0 %v8646_v26, %s12729_s15 }
 0x34b   : > { %v8787_v0 = vpop.permute.xlu1 %2855 }
 0x34c   : > { %12794 = vst [vmem:[#allocation325_spill] sm:$0xff] %v8787_v0  ;;  %v8789_v5 = vpop.permute.xlu0 %2853  ;;  %v3112_v0 = vrot.slane %v3042_v22, 1 }
 0x34d   : > { %12795 = vst [vmem:[#allocation326_spill] sm:$0xff] %v8789_v5  ;;  %3199 = vrot.lane.b32.xlu1 %v8641_v58, %s12668_s29 }
 0x34e   : > { %3197 = vrot.lane.b32.xlu0 %v8610_v34, %s12668_s29  ;;  %v3113_v34 = vsel %vm915_vm0, %v3111_v28, %v3112_v0 }
 0x34f   : > { %v8795_v25 = vpop.permute.xlu1 %2867 }
 0x350   : > { %12796 = vst [vmem:[#allocation327_spill] sm:$0xff] %v8795_v25  ;;  %v8798_v50 = vpop.permute.xlu0 %2865 }
 0x351   : > { %3203 = vrot.lane.b32.xlu1 %v8666_v23, %s12668_s29 }
 0x352   : > { %3201 = vrot.lane.b32.xlu0 %v8635_v59, %s12668_s29 }
 0x353   : > { %v8804_v5 = vpop.permute.xlu1 %2871 }
 0x354   : > { %12797 = vst [vmem:[#allocation328_spill] sm:$0xff] %v8804_v5  ;;  %v8806_v60 = vpop.permute.xlu0 %2869 }
 0x355   : > { %12798 = vst [vmem:[#allocation329_spill] sm:$0xff] %v8806_v60  ;;  %3207 = vrot.lane.b32.xlu1 %v8683_v39, %s12668_s29 }
 0x356   : > { %3205 = vrot.lane.b32.xlu0 %v8660_v9, %s12668_s29 }
 0x357   : > { %v8813_v47 = vpop.permute.xlu1 %2875 }
 0x358   : > { %12799 = vst [vmem:[#allocation330_spill] sm:$0xff] %v8813_v47  ;;  %v8815_v21 = vpop.permute.xlu0 %2873  ;;  %v3114_v47 = vrot.slane %v3041_v41, 2 }
 0x359   : > { %12800 = vst [vmem:[#allocation331_spill] sm:$0xff] %v8815_v21  ;;  %3211 = vrot.lane.b32.xlu1 %v3113_v34, %s12668_s29 }
 0x35a   : > { %3209 = vrot.lane.b32.xlu0 %v8676_v32, %s12668_s29 }
 0x35b   : > { %v8820_v5 = vpop.permute.xlu1 %2879 }
 0x35c   : > { %12801 = vst [vmem:[#allocation332_spill] sm:$0xff] %v8820_v5  ;;  %v8822_v60 = vpop.permute.xlu0 %2877  ;;  %v3115_v5 = vrot.slane %v3042_v22, 2 }
 0x35d   : > { %12802 = vst [vmem:[#allocation333_spill] sm:$0xff] %v8822_v60  ;;  %3223 = vrot.lane.b32.xlu1 %v8715_v49, %s12677_s14 }
 0x35e   : > { %3221 = vrot.lane.b32.xlu0 %v8694_v35, %s12677_s14  ;;  %v8845_v35 = vsel %vm940_vm1, %v3114_v47, %v3115_v5 }
 0x35f   : > { %v8828_v0 = vpop.permute.xlu1 %2891 }
 0x360   : > { %12803 = vst [vmem:[#allocation334_spill] sm:$0xff] %v8828_v0  ;;  %v8830_v28 = vpop.permute.xlu0 %2889 }
 0x361   : > { %3227 = vrot.lane.b32.xlu1 %v8732_v36, %s12677_s14 }
 0x362   : > { %3225 = vrot.lane.b32.xlu0 %v8709_v55, %s12677_s14 }
 0x363   : > { %v8836_v21 = vpop.permute.xlu1 %2895 }
 0x364   : > { %12804 = vst [vmem:[#allocation335_spill] sm:$0xff] %v8836_v21  ;;  %v8838_v60 = vpop.permute.xlu0 %2893 }
 0x365   : > { %12805 = vst [vmem:[#allocation336_spill] sm:$0xff] %v8838_v60  ;;  %3231 = vrot.lane.b32.xlu1 %v8747_v4, %s12677_s14  ;;  %v9004_v60 = vld [vmem:[%s8934_s4 + $0x48] sm:$0x3] }
 0x366   : > { %3229 = vrot.lane.b32.xlu0 %v8726_v18, %s12677_s14 }
 0x367   : > { %v8847_v37 = vpop.permute.xlu1 %2899 }
 0x368   : > { %12806 = vst [vmem:[#allocation337_spill] sm:$0xff] %v8847_v37  ;;  %v8849_v15 = vpop.permute.xlu0 %2897 }
 0x369   : > { %12807 = vst [vmem:[#allocation338_spill] sm:$0xff] %v8849_v15  ;;  %3235 = vrot.lane.b32.xlu1 %v8845_v35, %s12677_s14 }
 0x36a   : > { %3233 = vrot.lane.b32.xlu0 %v8742_v51, %s12677_s14 }
 0x36b   : > { %v8855_v22 = vpop.permute.xlu1 %2903 }
 0x36c   : > { %12808 = vst [vmem:[#allocation339_spill] sm:$0xff] %v8855_v22  ;;  %v8857_v21 = vpop.permute.xlu0 %2901 }
 0x36d   : > { %12809 = vst [vmem:[#allocation340_spill] sm:$0xff] %v8857_v21  ;;  %3247 = vrot.lane.b32.xlu1 %v8593_v29, %s12618_s23  ;;  %v3043_v29 = vld [vmem:[%s8559_s3 + $0x90] sm:$0xff] }
 0x36e   : > { %3245 = vrot.lane.b32.xlu0 %v8601_v14, %s12618_s23 }
 0x36f   : > { %v8863_v47 = vpop.permute.xlu1 %2915 }
 0x370   : > { %12810 = vst [vmem:[#allocation341_spill] sm:$0xff] %v8863_v47  ;;  %v8865_v5 = vpop.permute.xlu0 %2913  ;;  %v3396_v47 = vld [vmem:[%s8934_s4 + $0x78] sm:$0x3] }
 0x371   : > { %3251 = vrot.lane.b32.xlu1 %v8620_v42, %s12618_s23 }
 0x372   : > { %3249 = vrot.lane.b32.xlu0 %v8626_v38, %s12618_s23 }
 0x373   : > { %v8871_v22 = vpop.permute.xlu1 %2919 }
 0x374   : > { %12811 = vst [vmem:[#allocation342_spill] sm:$0xff] %v8871_v22  ;;  %v8873_v21 = vpop.permute.xlu0 %2917 }
 0x375   : > { %12812 = vst [vmem:[#allocation343_spill] sm:$0xff] %v8873_v21  ;;  %3255 = vrot.lane.b32.xlu1 %v8646_v26, %s12618_s23 }
 0x376   : > { %3253 = vrot.lane.b32.xlu0 %v8652_v33, %s12618_s23  ;;  %v3044_v33 = vld [vmem:[%s8559_s3 + $0x98] sm:$0x3] }
 0x377   : > { %v8880_v14 = vpop.permute.xlu1 %2923 }
 0x378   : > { %12813 = vst [vmem:[#allocation344_spill] sm:$0xff] %v8880_v14  ;;  %v8882_v37 = vpop.permute.xlu0 %2921 }
 0x379   : > { %12814 = vst [vmem:[#allocation345_spill] sm:$0xff] %v8882_v37  ;;  %3259 = vrot.lane.b32.xlu1 %v3043_v29, %s12618_s23 }
 0x37a   : > { %3257 = vrot.lane.b32.xlu0 %v3041_v41, %s12618_s23  ;;  %v3119_v41 = vrot.slane %v3043_v29, 1 }
 0x37b   : > { %v8886_v42 = vpop.permute.xlu1 %2927 }
 0x37c   : > { %12815 = vst [vmem:[#allocation346_spill] sm:$0xff] %v8886_v42  ;;  %v8888_v38 = vpop.permute.xlu0 %2925  ;;  %v3120_v42 = vrot.slane %v3044_v33, 1 }
 0x37d   : > { %12816 = vst [vmem:[#allocation347_spill] sm:$0xff] %v8888_v38  ;;  %3271 = vrot.lane.b32.xlu1 %v8635_v59, %s6382_s12 }
 0x37e   : > { %3269 = vrot.lane.b32.xlu0 %v8641_v58, %s6382_s12  ;;  %v3121_v58 = vsel %vm915_vm0, %v3119_v41, %v3120_v42  ;;  %v8943_v42 = vld [vmem:[%s8934_s4 + $0x10] sm:$0xff]  ;;  %v8946_v41 = vld [vmem:[%s8934_s4 + $0x18] sm:$0x3] }
 0x37f   : > { %v8894_v26 = vpop.permute.xlu1 %2939 }
 0x380   : > { %12817 = vst [vmem:[#allocation348_spill] sm:$0xff] %v8894_v26  ;;  %v8897_v14 = vpop.permute.xlu0 %2937  ;;  %v3430_v26 = vrot.slane %v9004_v60, 1 }
 0x381   : > { %3275 = vrot.lane.b32.xlu1 %v8660_v9, %s6382_s12 }
 0x382   : > { %3273 = vrot.lane.b32.xlu0 %v8666_v23, %s6382_s12 }
 0x383   : > { %v8903_v38 = vpop.permute.xlu1 %2943 }
 0x384   : > { %12818 = vst [vmem:[#allocation349_spill] sm:$0xff] %v8903_v38  ;;  %v8905_v59 = vpop.permute.xlu0 %2941  ;;  %v8968_v38 = vld [vmem:[%s8934_s4 + $0x30] sm:$0xff] }
 0x385   : > { %12819 = vst [vmem:[#allocation350_spill] sm:$0xff] %v8905_v59  ;;  %3279 = vrot.lane.b32.xlu1 %v8676_v32, %s6382_s12  ;;  %v3426_v22 = vrot.slane %v8968_v38, 1 }
 0x386   : > { %3277 = vrot.lane.b32.xlu0 %v8683_v39, %s6382_s12 }
 0x387   : > { %v8912_v37 = vpop.permute.xlu1 %2947 }
 0x388   : > { %12820 = vst [vmem:[#allocation351_spill] sm:$0xff] %v8912_v37  ;;  %v8914_v9 = vpop.permute.xlu0 %2945 }
 0x389   : > { %12821 = vst [vmem:[#allocation352_spill] sm:$0xff] %v8914_v9  ;;  %3283 = vrot.lane.b32.xlu1 %v3121_v58, %s6382_s12 }
 0x38a   : > { %3281 = vrot.lane.b32.xlu0 %v3113_v34, %s6382_s12 }
 0x38b   : > { %v8918_v23 = vpop.permute.xlu1 %2951 }
 0x38c   : > { %12822 = vst [vmem:[#allocation353_spill] sm:$0xff] %v8918_v23  ;;  %v8920_v15 = vpop.permute.xlu0 %2949  ;;  %v8951_v23 = vld [vmem:[%s8934_s4] sm:$0xff] }
 0x38d   : > { %12823 = vst [vmem:[#allocation354_spill] sm:$0xff] %v8920_v15  ;;  %3295 = vrot.lane.b32.xlu1 %v8709_v55, %s6383_s13  ;;  %v3122_v55 = vrot.slane %v3043_v29, 2  ;;  %v3420_v29 = vrot.slane %v8943_v42, 1  ;;  %v3417_v37 = vrot.slane %v8951_v23, 1 }
 0x38e   : > { %3293 = vrot.lane.b32.xlu0 %v8715_v49, %s6383_s13  ;;  %v3123_v49 = vrot.slane %v3044_v33, 2  ;;  %v3421_v33 = vrot.slane %v8946_v41, 1 }
 0x38f   : > { %v8927_v32 = vpop.permute.xlu1 %3127 }
 0x390   : > { %12824 = vst [vmem:[#allocation355_spill] sm:$0xff] %v8927_v32  ;;  %v8929_v39 = vpop.permute.xlu0 %3125 }
 0x391   : > { %12825 = vst [vmem:[#allocation356_spill] sm:$0xff] %v8929_v39  ;;  %3299 = vrot.lane.b32.xlu1 %v8726_v18, %s6383_s13  ;;  %v8954_v18 = vld [vmem:[%s8934_s4 + $0x8] sm:$0x3] }
 0x392   : > { %3297 = vrot.lane.b32.xlu0 %v8732_v36, %s6383_s13  ;;  %v3124_v36 = vsel %vm940_vm1, %v3122_v55, %v3123_v49  ;;  %v3418_v9 = vrot.slane %v8954_v18, 1  ;;  %v8976_v55 = vld [vmem:[%s8934_s4 + $0x20] sm:$0xff]  ;;  %v8979_v49 = vld [vmem:[%s8934_s4 + $0x28] sm:$0x3]  ;;  %v3442_v46 = vrot.slane %v8954_v18, 2 }
 0x393   : > { %v8940_v34 = vpop.permute.xlu1 %3131  ;;  %v3423_v59 = vrot.slane %v8976_v55, 1  ;;  %v3424_v21 = vrot.slane %v8979_v49, 1  ;;  %v3447_v18 = vrot.slane %v8976_v55, 2 }
 0x394   : > { %12826 = vst [vmem:[#allocation357_spill] sm:$0xff] %v8940_v34  ;;  %v8948_v58 = vpop.permute.xlu0 %3129 }
 0x395   : > { %12827 = vst [vmem:[#allocation358_spill] sm:$0xff] %v8948_v58  ;;  %3303 = vrot.lane.b32.xlu1 %v8742_v51, %s6383_s13  ;;  %v8971_v51 = vld [vmem:[%s8934_s4 + $0x38] sm:$0x3] }
 0x396   : > { %3301 = vrot.lane.b32.xlu0 %v8747_v4, %s6383_s13  ;;  %v3427_v34 = vrot.slane %v8971_v51, 1 }
 0x397   : > { %v8963_v15 = vpop.permute.xlu1 %3135 }
 0x398   : > { %12828 = vst [vmem:[#allocation359_spill] sm:$0xff] %v8963_v15  ;;  %v8973_v4 = vpop.permute.xlu0 %3133  ;;  %v8985_v15 = vsel %vm915_vm0, %v3420_v29, %v3421_v33  ;;  %v9001_v33 = vld [vmem:[%s8934_s4 + $0x40] sm:$0xff] }
 0x399   : > { %12829 = vst [vmem:[#allocation360_spill] sm:$0xff] %v8973_v4  ;;  %3307 = vrot.lane.b32.xlu1 %v3124_v36, %s6383_s13  ;;  %v3419_v4 = vsel %vm915_vm0, %v3417_v37, %v3418_v9  ;;  %v8995_v36 = vld [vmem:[%s8934_s4 + $0x50] sm:$0xff]  ;;  %v9010_v37 = vsel %vm915_vm0, %v3426_v22, %v3427_v34  ;;  %v3429_v10 = vrot.slane %v9001_v33, 1  ;;  %v3394_v22 = vld [vmem:[%s8934_s4 + $0x68] sm:$0x3]  ;;  %v3439_v34 = vrot.slane %v3396_v47, 1 }
 0x39a   : > { %3305 = vrot.lane.b32.xlu0 %v8845_v35, %s6383_s13  ;;  %v3392_v35 = vld [vmem:[%s8934_s4 + $0x58] sm:$0x3]  ;;  %v3432_v9 = vrot.slane %v8995_v36, 1  ;;  %v3436_v0 = vrot.slane %v3394_v22, 1 }
 0x39b   : > { %v8989_v58 = vpop.permute.xlu1 %3139  ;;  %v9041_v39 = vsel %vm915_vm0, %v3429_v10, %v3430_v26 }
 0x39c   : > { %12830 = vst [vmem:[#allocation361_spill] sm:$0xff] %v8989_v58  ;;  %v8998_v29 = vpop.permute.xlu0 %3137  ;;  %v3433_v58 = vrot.slane %v3392_v35, 1 }
 0x39d   : > { %12831 = vst [vmem:[#allocation362_spill] sm:$0xff] %v8998_v29  ;;  %3483 = vrot.lane.b32.xlu1 %v8985_v15, %s12711_s26  ;;  %v9016_v29 = vsel %vm915_vm0, %v3423_v59, %v3424_v21  ;;  %v3438_v59 = vrot.slane %v9021_v43, 1 }
 0x39e   : > { %3481 = vrot.lane.b32.xlu0 %v3419_v4, %s12711_s26  ;;  %v9027_v4 = vld [vmem:[%s8934_s4 + $0x60] sm:$0xff]  ;;  %v9035_v21 = vsel %vm915_vm0, %v3432_v9, %v3433_v58  ;;  %v3444_v9 = vrot.slane %v8943_v42, 2 }
 0x39f   : > { %v9013_v32 = vpop.permute.xlu1 %3151  ;;  %v9051_v58 = vsel %vm915_vm0, %v3438_v59, %v3439_v34  ;;  %v3448_v34 = vrot.slane %v8979_v49, 2  ;;  %v3454_v49 = vrot.slane %v9004_v60, 2  ;;  %v3459_v60 = vrot.slane %v9027_v4, 2 }
 0x3a0   : > { %12832 = vst [vmem:[#allocation363_spill] sm:$0xff] %v9013_v32  ;;  %v9024_v17 = vpop.permute.xlu0 %3149 }
 0x3a1   : > { %12833 = vst [vmem:[#allocation364_spill] sm:$0xff] %v9024_v17  ;;  %3487 = vrot.lane.b32.xlu1 %v9010_v37, %s12711_s26  ;;  %v3435_v17 = vrot.slane %v9027_v4, 1 }
 0x3a2   : > { %3485 = vrot.lane.b32.xlu0 %v9016_v29, %s12711_s26 }
 0x3a3   : > { %v9038_v32 = vpop.permute.xlu1 %3155  ;;  %v9058_v26 = vsel %vm915_vm0, %v3435_v17, %v3436_v0  ;;  %v3451_v17 = vrot.slane %v8971_v51, 2  ;;  %v3456_v51 = vrot.slane %v8995_v36, 2 }
 0x3a4   : > { %12834 = vst [vmem:[#allocation365_spill] sm:$0xff] %v9038_v32  ;;  %v9044_v25 = vpop.permute.xlu0 %3153  ;;  %v3445_v32 = vrot.slane %v8946_v41, 2  ;;  %v3450_v41 = vrot.slane %v8968_v38, 2 }
 0x3a5   : > { %12835 = vst [vmem:[#allocation366_spill] sm:$0xff] %v9044_v25  ;;  %3491 = vrot.lane.b32.xlu1 %v9035_v21, %s12711_s26  ;;  %v3441_v25 = vrot.slane %v8951_v23, 2 }
 0x3a6   : > { %3489 = vrot.lane.b32.xlu0 %v9041_v39, %s12711_s26  ;;  %v9069_v59 = vsel %vm940_vm1, %v3444_v9, %v3445_v32  ;;  %v9084_v32 = vsel %vm940_vm1, %v3450_v41, %v3451_v17  ;;  %v3457_v9 = vrot.slane %v3392_v35, 2  ;;  %v3462_v35 = vrot.slane %v9021_v43, 2 }
 0x3a7   : > { %v9055_v10 = vpop.permute.xlu1 %3159  ;;  %v3443_v23 = vsel %vm940_vm1, %v3441_v25, %v3442_v46  ;;  %v9090_v46 = vsel %vm940_vm1, %v3447_v18, %v3448_v34  ;;  %v3453_v25 = vrot.slane %v9001_v33, 2  ;;  %v3463_v17 = vrot.slane %v3396_v47, 2 }
 0x3a8   : > { %12836 = vst [vmem:[#allocation367_spill] sm:$0xff] %v9055_v10  ;;  %v9062_v31 = vpop.permute.xlu0 %3157  ;;  %v9101_v41 = vsel %vm940_vm1, %v3456_v51, %v3457_v9  ;;  %v3460_v34 = vrot.slane %v3394_v22, 2 }
 0x3a9   : > { %12837 = vst [vmem:[#allocation368_spill] sm:$0xff] %v9062_v31  ;;  %3495 = vrot.lane.b32.xlu1 %v9051_v58, %s12711_s26  ;;  %v9107_v18 = vsel %vm940_vm1, %v3453_v25, %v3454_v49  ;;  %v9117_v51 = vsel %vm940_vm1, %v3462_v35, %v3463_v17 }
 0x3aa   : > { %3493 = vrot.lane.b32.xlu0 %v9058_v26, %s12711_s26  ;;  %v9122_v9 = vsel %vm940_vm1, %v3459_v60, %v3460_v34 }
 0x3ab   : > { %v9073_v0 = vpop.permute.xlu1 %3163 }
 0x3ac   : > { %12838 = vst [vmem:[#allocation369_spill] sm:$0xff] %v9073_v0  ;;  %v9078_v10 = vpop.permute.xlu0 %3161 }
 0x3ad   : > { %12839 = vst [vmem:[#allocation370_spill] sm:$0xff] %v9078_v10  ;;  %3507 = vrot.lane.b32.xlu1 %v9069_v59, %s12720_s27 }
 0x3ae   : > { %3505 = vrot.lane.b32.xlu0 %v3443_v23, %s12720_s27 }
 0x3af   : > { %v9087_v0 = vpop.permute.xlu1 %3175 }
 0x3b0   : > { %12840 = vst [vmem:[#allocation371_spill] sm:$0xff] %v9087_v0  ;;  %v9094_v10 = vpop.permute.xlu0 %3173  ;;  %v3752_v0 = vld [vmem:[%s9309_s5 + $0x78] sm:$0x3] }
 0x3b1   : > { %12841 = vst [vmem:[#allocation372_spill] sm:$0xff] %v9094_v10  ;;  %3511 = vrot.lane.b32.xlu1 %v9084_v32, %s12720_s27 }
 0x3b2   : > { %3509 = vrot.lane.b32.xlu0 %v9090_v46, %s12720_s27 }
 0x3b3   : > { %v9104_v23 = vpop.permute.xlu1 %3179 }
 0x3b4   : > { %12842 = vst [vmem:[#allocation373_spill] sm:$0xff] %v9104_v23  ;;  %v9110_v31 = vpop.permute.xlu0 %3177 }
 0x3b5   : > { %12843 = vst [vmem:[#allocation374_spill] sm:$0xff] %v9110_v31  ;;  %3515 = vrot.lane.b32.xlu1 %v9101_v41, %s12720_s27 }
 0x3b6   : > { %3513 = vrot.lane.b32.xlu0 %v9107_v18, %s12720_s27 }
 0x3b7   : > { %v9119_v47 = vpop.permute.xlu1 %3183 }
 0x3b8   : > { %12844 = vst [vmem:[#allocation375_spill] sm:$0xff] %v9119_v47  ;;  %v9124_v25 = vpop.permute.xlu0 %3181 }
 0x3b9   : > { %12845 = vst [vmem:[#allocation376_spill] sm:$0xff] %v9124_v25  ;;  %3519 = vrot.lane.b32.xlu1 %v9117_v51, %s12720_s27 }
 0x3ba   : > { %3517 = vrot.lane.b32.xlu0 %v9122_v9, %s12720_s27 }
 0x3bb   : > { %v9130_v22 = vpop.permute.xlu1 %3187 }
 0x3bc   : > { %12846 = vst [vmem:[#allocation377_spill] sm:$0xff] %v9130_v22  ;;  %v9132_v49 = vpop.permute.xlu0 %3185 }
 0x3bd   : > { %12847 = vst [vmem:[#allocation378_spill] sm:$0xff] %v9132_v49  ;;  %3531 = vrot.lane.b32.xlu1 %v8976_v55, %s12729_s15 }
 0x3be   : > { %3529 = vrot.lane.b32.xlu0 %v8943_v42, %s12729_s15  ;;  %v3397_v42 = vld [vmem:[%s8934_s4 + $0x80] sm:$0xff] }
 0x3bf   : > { %v9138_v35 = vpop.permute.xlu1 %3199 }
 0x3c0   : > { %12848 = vst [vmem:[#allocation379_spill] sm:$0xff] %v9138_v35  ;;  %v9140_v17 = vpop.permute.xlu0 %3197 }
 0x3c1   : > { %12849 = vst [vmem:[#allocation380_spill] sm:$0xff] %v9140_v17  ;;  %3535 = vrot.lane.b32.xlu1 %v9001_v33, %s12729_s15 }
 0x3c2   : > { %3533 = vrot.lane.b32.xlu0 %v8968_v38, %s12729_s15 }
 0x3c3   : > { %v9146_v60 = vpop.permute.xlu1 %3203 }
 0x3c4   : > { %12850 = vst [vmem:[#allocation381_spill] sm:$0xff] %v9146_v60  ;;  %v9148_v34 = vpop.permute.xlu0 %3201 }
 0x3c5   : > { %12851 = vst [vmem:[#allocation382_spill] sm:$0xff] %v9148_v34  ;;  %3539 = vrot.lane.b32.xlu1 %v9027_v4, %s12729_s15 }
 0x3c6   : > { %3537 = vrot.lane.b32.xlu0 %v8995_v36, %s12729_s15 }
 0x3c7   : > { %v9155_v22 = vpop.permute.xlu1 %3207 }
 0x3c8   : > { %12852 = vst [vmem:[#allocation383_spill] sm:$0xff] %v9155_v22  ;;  %v9157_v49 = vpop.permute.xlu0 %3205  ;;  %v3398_v22 = vld [vmem:[%s8934_s4 + $0x88] sm:$0x3] }
 0x3c9   : > { %12853 = vst [vmem:[#allocation384_spill] sm:$0xff] %v9157_v49  ;;  %3543 = vrot.lane.b32.xlu1 %v3397_v42, %s12729_s15  ;;  %v3467_v49 = vrot.slane %v3397_v42, 1 }
 0x3ca   : > { %3541 = vrot.lane.b32.xlu0 %v9021_v43, %s12729_s15 }
 0x3cb   : > { %v9162_v47 = vpop.permute.xlu1 %3211 }
 0x3cc   : > { %12854 = vst [vmem:[#allocation385_spill] sm:$0xff] %v9162_v47  ;;  %v9164_v25 = vpop.permute.xlu0 %3209  ;;  %v3468_v47 = vrot.slane %v3398_v22, 1 }
 0x3cd   : > { %12855 = vst [vmem:[#allocation386_spill] sm:$0xff] %v9164_v25  ;;  %3555 = vrot.lane.b32.xlu1 %v9016_v29, %s12668_s29 }
 0x3ce   : > { %3553 = vrot.lane.b32.xlu0 %v8985_v15, %s12668_s29  ;;  %v3469_v15 = vsel %vm915_vm0, %v3467_v49, %v3468_v47 }
 0x3cf   : > { %v9170_v60 = vpop.permute.xlu1 %3223 }
 0x3d0   : > { %12856 = vst [vmem:[#allocation387_spill] sm:$0xff] %v9170_v60  ;;  %v9173_v23 = vpop.permute.xlu0 %3221 }
 0x3d1   : > { %12857 = vst [vmem:[#allocation388_spill] sm:$0xff] %v9173_v23  ;;  %3559 = vrot.lane.b32.xlu1 %v9041_v39, %s12668_s29 }
 0x3d2   : > { %3557 = vrot.lane.b32.xlu0 %v9010_v37, %s12668_s29 }
 0x3d3   : > { %v9179_v25 = vpop.permute.xlu1 %3227 }
 0x3d4   : > { %12858 = vst [vmem:[#allocation389_spill] sm:$0xff] %v9179_v25  ;;  %v9181_v34 = vpop.permute.xlu0 %3225 }
 0x3d5   : > { %12859 = vst [vmem:[#allocation390_spill] sm:$0xff] %v9181_v34  ;;  %3563 = vrot.lane.b32.xlu1 %v9058_v26, %s12668_s29 }
 0x3d6   : > { %3561 = vrot.lane.b32.xlu0 %v9035_v21, %s12668_s29 }
 0x3d7   : > { %v9188_v31 = vpop.permute.xlu1 %3231 }
 0x3d8   : > { %12860 = vst [vmem:[#allocation391_spill] sm:$0xff] %v9188_v31  ;;  %v9190_v60 = vpop.permute.xlu0 %3229  ;;  %v3470_v31 = vrot.slane %v3397_v42, 2 }
 0x3d9   : > { %12861 = vst [vmem:[#allocation392_spill] sm:$0xff] %v9190_v60  ;;  %3567 = vrot.lane.b32.xlu1 %v3469_v15, %s12668_s29 }
 0x3da   : > { %3565 = vrot.lane.b32.xlu0 %v9051_v58, %s12668_s29 }
 0x3db   : > { %v9195_v25 = vpop.permute.xlu1 %3235 }
 0x3dc   : > { %12862 = vst [vmem:[#allocation393_spill] sm:$0xff] %v9195_v25  ;;  %v9197_v34 = vpop.permute.xlu0 %3233  ;;  %v3471_v25 = vrot.slane %v3398_v22, 2 }
 0x3dd   : > { %12863 = vst [vmem:[#allocation394_spill] sm:$0xff] %v9197_v34  ;;  %3579 = vrot.lane.b32.xlu1 %v9090_v46, %s12677_s14 }
 0x3de   : > { %3577 = vrot.lane.b32.xlu0 %v9069_v59, %s12677_s14  ;;  %v9220_v59 = vsel %vm940_vm1, %v3470_v31, %v3471_v25 }
 0x3df   : > { %v9203_v47 = vpop.permute.xlu1 %3247 }
 0x3e0   : > { %12864 = vst [vmem:[#allocation395_spill] sm:$0xff] %v9203_v47  ;;  %v9205_v49 = vpop.permute.xlu0 %3245 }
 0x3e1   : > { %12865 = vst [vmem:[#allocation396_spill] sm:$0xff] %v9205_v49  ;;  %3583 = vrot.lane.b32.xlu1 %v9107_v18, %s12677_s14 }
 0x3e2   : > { %3581 = vrot.lane.b32.xlu0 %v9084_v32, %s12677_s14 }
 0x3e3   : > { %v9211_v60 = vpop.permute.xlu1 %3251 }
 0x3e4   : > { %12866 = vst [vmem:[#allocation397_spill] sm:$0xff] %v9211_v60  ;;  %v9213_v34 = vpop.permute.xlu0 %3249 }
 0x3e5   : > { %12867 = vst [vmem:[#allocation398_spill] sm:$0xff] %v9213_v34  ;;  %3587 = vrot.lane.b32.xlu1 %v9122_v9, %s12677_s14 }
 0x3e6   : > { %3585 = vrot.lane.b32.xlu0 %v9101_v41, %s12677_s14 }
 0x3e7   : > { %v9222_v47 = vpop.permute.xlu1 %3255 }
 0x3e8   : > { %12868 = vst [vmem:[#allocation399_spill] sm:$0xff] %v9222_v47  ;;  %v9224_v35 = vpop.permute.xlu0 %3253 }
 0x3e9   : > { %12869 = vst [vmem:[#allocation400_spill] sm:$0xff] %v9224_v35  ;;  %3591 = vrot.lane.b32.xlu1 %v9220_v59, %s12677_s14 }
 0x3ea   : > { %3589 = vrot.lane.b32.xlu0 %v9117_v51, %s12677_s14 }
 0x3eb   : > { %v9230_v22 = vpop.permute.xlu1 %3259 }
 0x3ec   : > { %12870 = vst [vmem:[#allocation401_spill] sm:$0xff] %v9230_v22  ;;  %v9232_v60 = vpop.permute.xlu0 %3257 }
 0x3ed   : > { %12871 = vst [vmem:[#allocation402_spill] sm:$0xff] %v9232_v60  ;;  %3603 = vrot.lane.b32.xlu1 %v8968_v38, %s12618_s23  ;;  %v3399_v38 = vld [vmem:[%s8934_s4 + $0x90] sm:$0xff] }
 0x3ee   : > { %3601 = vrot.lane.b32.xlu0 %v8976_v55, %s12618_s23 }
 0x3ef   : > { %v9238_v31 = vpop.permute.xlu1 %3271 }
 0x3f0   : > { %12872 = vst [vmem:[#allocation403_spill] sm:$0xff] %v9238_v31  ;;  %v9240_v25 = vpop.permute.xlu0 %3269  ;;  %v9396_v31 = vld [vmem:[%s9309_s5 + $0x70] sm:$0xff] }
 0x3f1   : > { %12873 = vst [vmem:[#allocation404_spill] sm:$0xff] %v9240_v25  ;;  %3607 = vrot.lane.b32.xlu1 %v8995_v36, %s12618_s23 }
 0x3f2   : > { %3605 = vrot.lane.b32.xlu0 %v9001_v33, %s12618_s23 }
 0x3f3   : > { %v9246_v22 = vpop.permute.xlu1 %3275 }
 0x3f4   : > { %12874 = vst [vmem:[#allocation405_spill] sm:$0xff] %v9246_v22  ;;  %v9248_v60 = vpop.permute.xlu0 %3273 }
 0x3f5   : > { %12875 = vst [vmem:[#allocation406_spill] sm:$0xff] %v9248_v60  ;;  %3611 = vrot.lane.b32.xlu1 %v9021_v43, %s12618_s23 }
 0x3f6   : > { %3609 = vrot.lane.b32.xlu0 %v9027_v4, %s12618_s23  ;;  %v3400_v4 = vld [vmem:[%s8934_s4 + $0x98] sm:$0x3] }
 0x3f7   : > { %v9255_v55 = vpop.permute.xlu1 %3279 }
 0x3f8   : > { %12876 = vst [vmem:[#allocation407_spill] sm:$0xff] %v9255_v55  ;;  %v9257_v47 = vpop.permute.xlu0 %3277 }
 0x3f9   : > { %12877 = vst [vmem:[#allocation408_spill] sm:$0xff] %v9257_v47  ;;  %3615 = vrot.lane.b32.xlu1 %v3399_v38, %s12618_s23 }
 0x3fa   : > { %3613 = vrot.lane.b32.xlu0 %v3397_v42, %s12618_s23  ;;  %v3475_v42 = vrot.slane %v3399_v38, 1 }
 0x3fb   : > { %v9261_v36 = vpop.permute.xlu1 %3283 }
 0x3fc   : > { %12878 = vst [vmem:[#allocation409_spill] sm:$0xff] %v9261_v36  ;;  %v9263_v33 = vpop.permute.xlu0 %3281  ;;  %v3476_v36 = vrot.slane %v3400_v4, 1 }
 0x3fd   : > { %12879 = vst [vmem:[#allocation410_spill] sm:$0xff] %v9263_v33  ;;  %3627 = vrot.lane.b32.xlu1 %v9010_v37, %s6382_s12 }
 0x3fe   : > { %3625 = vrot.lane.b32.xlu0 %v9016_v29, %s6382_s12  ;;  %v3477_v29 = vsel %vm915_vm0, %v3475_v42, %v3476_v36  ;;  %v9318_v36 = vld [vmem:[%s9309_s5 + $0x10] sm:$0xff]  ;;  %v9321_v42 = vld [vmem:[%s9309_s5 + $0x18] sm:$0x3] }
 0x3ff   : > { %v9269_v43 = vpop.permute.xlu1 %3295 }
 0x400   : > { %12880 = vst [vmem:[#allocation411_spill] sm:$0xff] %v9269_v43  ;;  %v9272_v55 = vpop.permute.xlu0 %3293 }
 0x401   : > { %12881 = vst [vmem:[#allocation412_spill] sm:$0xff] %v9272_v55  ;;  %3631 = vrot.lane.b32.xlu1 %v9035_v21, %s6382_s12 }
 0x402   : > { %3629 = vrot.lane.b32.xlu0 %v9041_v39, %s6382_s12 }
 0x403   : > { %v9278_v33 = vpop.permute.xlu1 %3299 }
 0x404   : > { %12882 = vst [vmem:[#allocation413_spill] sm:$0xff] %v9278_v33  ;;  %v9280_v37 = vpop.permute.xlu0 %3297 }
 0x405   : > { %12883 = vst [vmem:[#allocation414_spill] sm:$0xff] %v9280_v37  ;;  %3635 = vrot.lane.b32.xlu1 %v9051_v58, %s6382_s12  ;;  %v9379_v37 = vld [vmem:[%s9309_s5 + $0x48] sm:$0x3] }
 0x406   : > { %3633 = vrot.lane.b32.xlu0 %v9058_v26, %s6382_s12  ;;  %v3786_v43 = vrot.slane %v9379_v37, 1 }
 0x407   : > { %v9287_v47 = vpop.permute.xlu1 %3303 }
 0x408   : > { %12884 = vst [vmem:[#allocation415_spill] sm:$0xff] %v9287_v47  ;;  %v9289_v21 = vpop.permute.xlu0 %3301 }
 0x409   : > { %12885 = vst [vmem:[#allocation416_spill] sm:$0xff] %v9289_v21  ;;  %3639 = vrot.lane.b32.xlu1 %v3477_v29, %s6382_s12 }
 0x40a   : > { %3637 = vrot.lane.b32.xlu0 %v3469_v15, %s6382_s12 }
 0x40b   : > { %v9293_v39 = vpop.permute.xlu1 %3307 }
 0x40c   : > { %12886 = vst [vmem:[#allocation417_spill] sm:$0xff] %v9293_v39  ;;  %v9295_v35 = vpop.permute.xlu0 %3305  ;;  %v9343_v39 = vld [vmem:[%s9309_s5 + $0x30] sm:$0xff] }
 0x40d   : > { %12887 = vst [vmem:[#allocation418_spill] sm:$0xff] %v9295_v35  ;;  %3651 = vrot.lane.b32.xlu1 %v9084_v32, %s6383_s13  ;;  %v3478_v32 = vrot.slane %v3399_v38, 2  ;;  %v3776_v38 = vrot.slane %v9318_v36, 1  ;;  %v3782_v35 = vrot.slane %v9343_v39, 1 }
 0x40e   : > { %3649 = vrot.lane.b32.xlu0 %v9090_v46, %s6383_s13  ;;  %v3479_v46 = vrot.slane %v3400_v4, 2  ;;  %v3777_v4 = vrot.slane %v9321_v42, 1 }
 0x40f   : > { %v9302_v58 = vpop.permute.xlu1 %3483 }
 0x410   : > { %12888 = vst [vmem:[#allocation419_spill] sm:$0xff] %v9302_v58  ;;  %v9304_v26 = vpop.permute.xlu0 %3481  ;;  %v9326_v58 = vld [vmem:[%s9309_s5] sm:$0xff] }
 0x411   : > { %12889 = vst [vmem:[#allocation420_spill] sm:$0xff] %v9304_v26  ;;  %3655 = vrot.lane.b32.xlu1 %v9101_v41, %s6383_s13  ;;  %v9329_v41 = vld [vmem:[%s9309_s5 + $0x8] sm:$0x3] }
 0x412   : > { %3653 = vrot.lane.b32.xlu0 %v9107_v18, %s6383_s13  ;;  %v3480_v18 = vsel %vm940_vm1, %v3478_v32, %v3479_v46  ;;  %v3774_v26 = vrot.slane %v9329_v41, 1  ;;  %v9351_v32 = vld [vmem:[%s9309_s5 + $0x20] sm:$0xff]  ;;  %v9354_v46 = vld [vmem:[%s9309_s5 + $0x28] sm:$0x3]  ;;  %v3798_v17 = vrot.slane %v9329_v41, 2 }
 0x413   : > { %v9315_v15 = vpop.permute.xlu1 %3487  ;;  %v3779_v33 = vrot.slane %v9351_v32, 1  ;;  %v3780_v22 = vrot.slane %v9354_v46, 1  ;;  %v3803_v41 = vrot.slane %v9351_v32, 2 }
 0x414   : > { %12890 = vst [vmem:[#allocation421_spill] sm:$0xff] %v9315_v15  ;;  %v9323_v29 = vpop.permute.xlu0 %3485 }
 0x415   : > { %12891 = vst [vmem:[#allocation422_spill] sm:$0xff] %v9323_v29  ;;  %3659 = vrot.lane.b32.xlu1 %v9117_v51, %s6383_s13  ;;  %v3773_v29 = vrot.slane %v9326_v58, 1  ;;  %v9346_v51 = vld [vmem:[%s9309_s5 + $0x38] sm:$0x3] }
 0x416   : > { %3657 = vrot.lane.b32.xlu0 %v9122_v9, %s6383_s13  ;;  %v3783_v47 = vrot.slane %v9346_v51, 1 }
 0x417   : > { %v9338_v15 = vpop.permute.xlu1 %3491 }
 0x418   : > { %12892 = vst [vmem:[#allocation423_spill] sm:$0xff] %v9338_v15  ;;  %v9348_v9 = vpop.permute.xlu0 %3489  ;;  %v9360_v15 = vsel %vm915_vm0, %v3776_v38, %v3777_v4  ;;  %v9376_v4 = vld [vmem:[%s9309_s5 + $0x40] sm:$0xff] }
 0x419   : > { %12893 = vst [vmem:[#allocation424_spill] sm:$0xff] %v9348_v9  ;;  %3663 = vrot.lane.b32.xlu1 %v3480_v18, %s6383_s13  ;;  %v3775_v9 = vsel %vm915_vm0, %v3773_v29, %v3774_v26  ;;  %v9370_v18 = vld [vmem:[%s9309_s5 + $0x50] sm:$0xff]  ;;  %v9385_v26 = vsel %vm915_vm0, %v3782_v35, %v3783_v47  ;;  %v3785_v34 = vrot.slane %v9376_v4, 1  ;;  %v3750_v35 = vld [vmem:[%s9309_s5 + $0x68] sm:$0x3] }
 0x41a   : > { %3661 = vrot.lane.b32.xlu0 %v9220_v59, %s6383_s13  ;;  %v3748_v59 = vld [vmem:[%s9309_s5 + $0x58] sm:$0x3]  ;;  %v3788_v29 = vrot.slane %v9370_v18, 1  ;;  %v3792_v49 = vrot.slane %v3750_v35, 1 }
 0x41b   : > { %v9364_v21 = vpop.permute.xlu1 %3495  ;;  %v9416_v25 = vsel %vm915_vm0, %v3785_v34, %v3786_v43 }
 0x41c   : > { %12894 = vst [vmem:[#allocation425_spill] sm:$0xff] %v9364_v21  ;;  %v9373_v38 = vpop.permute.xlu0 %3493  ;;  %v3789_v21 = vrot.slane %v3748_v59, 1 }
 0x41d   : > { %12895 = vst [vmem:[#allocation426_spill] sm:$0xff] %v9373_v38  ;;  %3839 = vrot.lane.b32.xlu1 %v9360_v15, %s12711_s26  ;;  %v9391_v38 = vsel %vm915_vm0, %v3779_v33, %v3780_v22  ;;  %v3794_v22 = vrot.slane %v9396_v31, 1  ;;  %v3795_v33 = vrot.slane %v3752_v0, 1 }
 0x41e   : > { %3837 = vrot.lane.b32.xlu0 %v3775_v9, %s12711_s26  ;;  %v9402_v9 = vld [vmem:[%s9309_s5 + $0x60] sm:$0xff]  ;;  %v9410_v47 = vsel %vm915_vm0, %v3788_v29, %v3789_v21  ;;  %v3800_v29 = vrot.slane %v9318_v36, 2 }
 0x41f   : > { %v9388_v60 = vpop.permute.xlu1 %3507  ;;  %v9426_v21 = vsel %vm915_vm0, %v3794_v22, %v3795_v33  ;;  %v3804_v33 = vrot.slane %v9354_v46, 2  ;;  %v3810_v46 = vrot.slane %v9379_v37, 2  ;;  %v3815_v37 = vrot.slane %v9402_v9, 2 }
 0x420   : > { %12896 = vst [vmem:[#allocation427_spill] sm:$0xff] %v9388_v60  ;;  %v9399_v55 = vpop.permute.xlu0 %3505 }
 0x421   : > { %12897 = vst [vmem:[#allocation428_spill] sm:$0xff] %v9399_v55  ;;  %3843 = vrot.lane.b32.xlu1 %v9385_v26, %s12711_s26  ;;  %v3791_v55 = vrot.slane %v9402_v9, 1 }
 0x422   : > { %3841 = vrot.lane.b32.xlu0 %v9391_v38, %s12711_s26 }
 0x423   : > { %v9413_v60 = vpop.permute.xlu1 %3511  ;;  %v9433_v43 = vsel %vm915_vm0, %v3791_v55, %v3792_v49  ;;  %v3807_v49 = vrot.slane %v9346_v51, 2  ;;  %v3812_v51 = vrot.slane %v9370_v18, 2 }
 0x424   : > { %12898 = vst [vmem:[#allocation429_spill] sm:$0xff] %v9413_v60  ;;  %v9419_v23 = vpop.permute.xlu0 %3509  ;;  %v3801_v60 = vrot.slane %v9321_v42, 2  ;;  %v3806_v42 = vrot.slane %v9343_v39, 2 }
 0x425   : > { %12899 = vst [vmem:[#allocation430_spill] sm:$0xff] %v9419_v23  ;;  %3847 = vrot.lane.b32.xlu1 %v9410_v47, %s12711_s26  ;;  %v3797_v23 = vrot.slane %v9326_v58, 2 }
 0x426   : > { %3845 = vrot.lane.b32.xlu0 %v9416_v25, %s12711_s26  ;;  %v9444_v22 = vsel %vm940_vm1, %v3800_v29, %v3801_v60  ;;  %v9459_v60 = vsel %vm940_vm1, %v3806_v42, %v3807_v49  ;;  %v3813_v29 = vrot.slane %v3748_v59, 2  ;;  %v3818_v59 = vrot.slane %v9396_v31, 2 }
 0x427   : > { %v9430_v34 = vpop.permute.xlu1 %3515  ;;  %v3799_v58 = vsel %vm940_vm1, %v3797_v23, %v3798_v17  ;;  %v9465_v23 = vsel %vm940_vm1, %v3803_v41, %v3804_v33  ;;  %v3809_v17 = vrot.slane %v9376_v4, 2  ;;  %v3819_v49 = vrot.slane %v3752_v0, 2 }
 0x428   : > { %12900 = vst [vmem:[#allocation431_spill] sm:$0xff] %v9430_v34  ;;  %v9437_v10 = vpop.permute.xlu0 %3513  ;;  %v9476_v42 = vsel %vm940_vm1, %v3812_v51, %v3813_v29  ;;  %v3816_v33 = vrot.slane %v3750_v35, 2 }
 0x429   : > { %12901 = vst [vmem:[#allocation432_spill] sm:$0xff] %v9437_v10  ;;  %3851 = vrot.lane.b32.xlu1 %v9426_v21, %s12711_s26  ;;  %v9482_v41 = vsel %vm940_vm1, %v3809_v17, %v3810_v46  ;;  %v9492_v51 = vsel %vm940_vm1, %v3818_v59, %v3819_v49 }
 0x42a   : > { %3849 = vrot.lane.b32.xlu0 %v9433_v43, %s12711_s26  ;;  %v9497_v29 = vsel %vm940_vm1, %v3815_v37, %v3816_v33 }
 0x42b   : > { %v9448_v55 = vpop.permute.xlu1 %3519 }
 0x42c   : > { %12902 = vst [vmem:[#allocation433_spill] sm:$0xff] %v9448_v55  ;;  %v9453_v34 = vpop.permute.xlu0 %3517 }
 0x42d   : > { %12903 = vst [vmem:[#allocation434_spill] sm:$0xff] %v9453_v34  ;;  %3863 = vrot.lane.b32.xlu1 %v9444_v22, %s12720_s27 }
 0x42e   : > { %3861 = vrot.lane.b32.xlu0 %v3799_v58, %s12720_s27 }
 0x42f   : > { %v9462_v55 = vpop.permute.xlu1 %3531 }
 0x430   : > { %12904 = vst [vmem:[#allocation435_spill] sm:$0xff] %v9462_v55  ;;  %v9469_v34 = vpop.permute.xlu0 %3529 }
 0x431   : > { %12905 = vst [vmem:[#allocation436_spill] sm:$0xff] %v9469_v34  ;;  %3867 = vrot.lane.b32.xlu1 %v9459_v60, %s12720_s27 }
 0x432   : > { %3865 = vrot.lane.b32.xlu0 %v9465_v23, %s12720_s27 }
 0x433   : > { %v9479_v58 = vpop.permute.xlu1 %3535 }
 0x434   : > { %12906 = vst [vmem:[#allocation437_spill] sm:$0xff] %v9479_v58  ;;  %v9485_v10 = vpop.permute.xlu0 %3533 }
 0x435   : > { %12907 = vst [vmem:[#allocation438_spill] sm:$0xff] %v9485_v10  ;;  %3871 = vrot.lane.b32.xlu1 %v9476_v42, %s12720_s27 }
 0x436   : > { %3869 = vrot.lane.b32.xlu0 %v9482_v41, %s12720_s27 }
 0x437   : > { %v9494_v0 = vpop.permute.xlu1 %3539 }
 0x438   : > { %12908 = vst [vmem:[#allocation439_spill] sm:$0xff] %v9494_v0  ;;  %v9499_v17 = vpop.permute.xlu0 %3537 }
 0x439   : > { %12909 = vst [vmem:[#allocation440_spill] sm:$0xff] %v9499_v17  ;;  %3875 = vrot.lane.b32.xlu1 %v9492_v51, %s12720_s27 }
 0x43a   : > { %3873 = vrot.lane.b32.xlu0 %v9497_v29, %s12720_s27 }
 0x43b   : > { %v9505_v35 = vpop.permute.xlu1 %3543 }
 0x43c   : > { %12910 = vst [vmem:[#allocation441_spill] sm:$0xff] %v9505_v35  ;;  %v9507_v46 = vpop.permute.xlu0 %3541 }
 0x43d   : > { %12911 = vst [vmem:[#allocation442_spill] sm:$0xff] %v9507_v46  ;;  %3887 = vrot.lane.b32.xlu1 %v9351_v32, %s12729_s15 }
 0x43e   : > { %3885 = vrot.lane.b32.xlu0 %v9318_v36, %s12729_s15  ;;  %v3753_v36 = vld [vmem:[%s9309_s5 + $0x80] sm:$0xff] }
 0x43f   : > { %v9513_v59 = vpop.permute.xlu1 %3555 }
 0x440   : > { %12912 = vst [vmem:[#allocation443_spill] sm:$0xff] %v9513_v59  ;;  %v9515_v49 = vpop.permute.xlu0 %3553 }
 0x441   : > { %12913 = vst [vmem:[#allocation444_spill] sm:$0xff] %v9515_v49  ;;  %3891 = vrot.lane.b32.xlu1 %v9376_v4, %s12729_s15 }
 0x442   : > { %3889 = vrot.lane.b32.xlu0 %v9343_v39, %s12729_s15 }
 0x443   : > { %v9521_v37 = vpop.permute.xlu1 %3559 }
 0x444   : > { %12914 = vst [vmem:[#allocation445_spill] sm:$0xff] %v9521_v37  ;;  %v9523_v33 = vpop.permute.xlu0 %3557 }
 0x445   : > { %12915 = vst [vmem:[#allocation446_spill] sm:$0xff] %v9523_v33  ;;  %3895 = vrot.lane.b32.xlu1 %v9402_v9, %s12729_s15 }
 0x446   : > { %3893 = vrot.lane.b32.xlu0 %v9370_v18, %s12729_s15 }
 0x447   : > { %v9530_v35 = vpop.permute.xlu1 %3563 }
 0x448   : > { %12916 = vst [vmem:[#allocation447_spill] sm:$0xff] %v9530_v35  ;;  %v9532_v46 = vpop.permute.xlu0 %3561  ;;  %v3754_v35 = vld [vmem:[%s9309_s5 + $0x88] sm:$0x3] }
 0x449   : > { %12917 = vst [vmem:[#allocation448_spill] sm:$0xff] %v9532_v46  ;;  %3899 = vrot.lane.b32.xlu1 %v3753_v36, %s12729_s15  ;;  %v3823_v46 = vrot.slane %v3753_v36, 1 }
 0x44a   : > { %3897 = vrot.lane.b32.xlu0 %v9396_v31, %s12729_s15 }
 0x44b   : > { %v9537_v0 = vpop.permute.xlu1 %3567 }
 0x44c   : > { %12918 = vst [vmem:[#allocation449_spill] sm:$0xff] %v9537_v0  ;;  %v9539_v17 = vpop.permute.xlu0 %3565  ;;  %v3824_v0 = vrot.slane %v3754_v35, 1 }
 0x44d   : > { %12919 = vst [vmem:[#allocation450_spill] sm:$0xff] %v9539_v17  ;;  %3911 = vrot.lane.b32.xlu1 %v9391_v38, %s12668_s29 }
 0x44e   : > { %3909 = vrot.lane.b32.xlu0 %v9360_v15, %s12668_s29  ;;  %v3825_v15 = vsel %vm915_vm0, %v3823_v46, %v3824_v0 }
 0x44f   : > { %v9545_v37 = vpop.permute.xlu1 %3579 }
 0x450   : > { %12920 = vst [vmem:[#allocation451_spill] sm:$0xff] %v9545_v37  ;;  %v9548_v58 = vpop.permute.xlu0 %3577 }
 0x451   : > { %12921 = vst [vmem:[#allocation452_spill] sm:$0xff] %v9548_v58  ;;  %3915 = vrot.lane.b32.xlu1 %v9416_v25, %s12668_s29 }
 0x452   : > { %3913 = vrot.lane.b32.xlu0 %v9385_v26, %s12668_s29 }
 0x453   : > { %v9554_v17 = vpop.permute.xlu1 %3583 }
 0x454   : > { %12922 = vst [vmem:[#allocation453_spill] sm:$0xff] %v9554_v17  ;;  %v9556_v33 = vpop.permute.xlu0 %3581 }
 0x455   : > { %12923 = vst [vmem:[#allocation454_spill] sm:$0xff] %v9556_v33  ;;  %3919 = vrot.lane.b32.xlu1 %v9433_v43, %s12668_s29 }
 0x456   : > { %3917 = vrot.lane.b32.xlu0 %v9410_v47, %s12668_s29 }
 0x457   : > { %v9563_v10 = vpop.permute.xlu1 %3587 }
 0x458   : > { %12924 = vst [vmem:[#allocation455_spill] sm:$0xff] %v9563_v10  ;;  %v9565_v37 = vpop.permute.xlu0 %3585  ;;  %v3826_v10 = vrot.slane %v3753_v36, 2 }
 0x459   : > { %12925 = vst [vmem:[#allocation456_spill] sm:$0xff] %v9565_v37  ;;  %3923 = vrot.lane.b32.xlu1 %v3825_v15, %s12668_s29 }
 0x45a   : > { %3921 = vrot.lane.b32.xlu0 %v9426_v21, %s12668_s29 }
 0x45b   : > { %v9570_v17 = vpop.permute.xlu1 %3591 }
 0x45c   : > { %12926 = vst [vmem:[#allocation457_spill] sm:$0xff] %v9570_v17  ;;  %v9572_v33 = vpop.permute.xlu0 %3589  ;;  %v3827_v17 = vrot.slane %v3754_v35, 2 }
 0x45d   : > { %12927 = vst [vmem:[#allocation458_spill] sm:$0xff] %v9572_v33  ;;  %3935 = vrot.lane.b32.xlu1 %v9465_v23, %s12677_s14 }
 0x45e   : > { %3933 = vrot.lane.b32.xlu0 %v9444_v22, %s12677_s14  ;;  %v9595_v22 = vsel %vm940_vm1, %v3826_v10, %v3827_v17 }
 0x45f   : > { %v9578_v0 = vpop.permute.xlu1 %3603 }
 0x460   : > { %12928 = vst [vmem:[#allocation459_spill] sm:$0xff] %v9578_v0  ;;  %v9580_v46 = vpop.permute.xlu0 %3601 }
 0x461   : > { %12929 = vst [vmem:[#allocation460_spill] sm:$0xff] %v9580_v46  ;;  %3939 = vrot.lane.b32.xlu1 %v9482_v41, %s12677_s14 }
 0x462   : > { %3937 = vrot.lane.b32.xlu0 %v9459_v60, %s12677_s14 }
 0x463   : > { %v9586_v37 = vpop.permute.xlu1 %3607 }
 0x464   : > { %12930 = vst [vmem:[#allocation461_spill] sm:$0xff] %v9586_v37  ;;  %v9588_v33 = vpop.permute.xlu0 %3605 }
 0x465   : > { %12931 = vst [vmem:[#allocation462_spill] sm:$0xff] %v9588_v33  ;;  %3943 = vrot.lane.b32.xlu1 %v9497_v29, %s12677_s14 }
 0x466   : > { %3941 = vrot.lane.b32.xlu0 %v9476_v42, %s12677_s14 }
 0x467   : > { %v9597_v0 = vpop.permute.xlu1 %3611 }
 0x468   : > { %12932 = vst [vmem:[#allocation463_spill] sm:$0xff] %v9597_v0  ;;  %v9599_v59 = vpop.permute.xlu0 %3609 }
 0x469   : > { %12933 = vst [vmem:[#allocation464_spill] sm:$0xff] %v9599_v59  ;;  %3947 = vrot.lane.b32.xlu1 %v9595_v22, %s12677_s14 }
 0x46a   : > { %3945 = vrot.lane.b32.xlu0 %v9492_v51, %s12677_s14 }
 0x46b   : > { %v9605_v35 = vpop.permute.xlu1 %3615 }
 0x46c   : > { %12934 = vst [vmem:[#allocation465_spill] sm:$0xff] %v9605_v35  ;;  %v9607_v37 = vpop.permute.xlu0 %3613 }
 0x46d   : > { %12935 = vst [vmem:[#allocation466_spill] sm:$0xff] %v9607_v37  ;;  %3959 = vrot.lane.b32.xlu1 %v9343_v39, %s12618_s23  ;;  %v3755_v39 = vld [vmem:[%s9309_s5 + $0x90] sm:$0xff] }
 0x46e   : > { %3957 = vrot.lane.b32.xlu0 %v9351_v32, %s12618_s23 }
 0x46f   : > { %v9613_v10 = vpop.permute.xlu1 %3627 }
 0x470   : > { %12936 = vst [vmem:[#allocation467_spill] sm:$0xff] %v9613_v10  ;;  %v9615_v17 = vpop.permute.xlu0 %3625  ;;  %v9771_v10 = vld [vmem:[%s9684_s6 + $0x70] sm:$0xff] }
 0x471   : > { %12937 = vst [vmem:[#allocation468_spill] sm:$0xff] %v9615_v17  ;;  %3963 = vrot.lane.b32.xlu1 %v9370_v18, %s12618_s23 }
 0x472   : > { %3961 = vrot.lane.b32.xlu0 %v9376_v4, %s12618_s23 }
 0x473   : > { %v9621_v35 = vpop.permute.xlu1 %3631 }
 0x474   : > { %12938 = vst [vmem:[#allocation469_spill] sm:$0xff] %v9621_v35  ;;  %v9623_v37 = vpop.permute.xlu0 %3629 }
 0x475   : > { %12939 = vst [vmem:[#allocation470_spill] sm:$0xff] %v9623_v37  ;;  %3967 = vrot.lane.b32.xlu1 %v9396_v31, %s12618_s23 }
 0x476   : > { %3965 = vrot.lane.b32.xlu0 %v9402_v9, %s12618_s23  ;;  %v3756_v9 = vld [vmem:[%s9309_s5 + $0x98] sm:$0x3] }
 0x477   : > { %v9630_v32 = vpop.permute.xlu1 %3635 }
 0x478   : > { %12940 = vst [vmem:[#allocation471_spill] sm:$0xff] %v9630_v32  ;;  %v9632_v0 = vpop.permute.xlu0 %3633 }
 0x479   : > { %12941 = vst [vmem:[#allocation472_spill] sm:$0xff] %v9632_v0  ;;  %3971 = vrot.lane.b32.xlu1 %v3755_v39, %s12618_s23 }
 0x47a   : > { %3969 = vrot.lane.b32.xlu0 %v3753_v36, %s12618_s23  ;;  %v3831_v36 = vrot.slane %v3755_v39, 1 }
 0x47b   : > { %v9636_v18 = vpop.permute.xlu1 %3639 }
 0x47c   : > { %12942 = vst [vmem:[#allocation473_spill] sm:$0xff] %v9636_v18  ;;  %v9638_v4 = vpop.permute.xlu0 %3637  ;;  %v3832_v18 = vrot.slane %v3756_v9, 1 }
 0x47d   : > { %12943 = vst [vmem:[#allocation474_spill] sm:$0xff] %v9638_v4  ;;  %3983 = vrot.lane.b32.xlu1 %v9385_v26, %s6382_s12 }
 0x47e   : > { %3981 = vrot.lane.b32.xlu0 %v9391_v38, %s6382_s12  ;;  %v3833_v38 = vsel %vm915_vm0, %v3831_v36, %v3832_v18  ;;  %v9693_v18 = vld [vmem:[%s9684_s6 + $0x10] sm:$0xff]  ;;  %v9696_v36 = vld [vmem:[%s9684_s6 + $0x18] sm:$0x3] }
 0x47f   : > { %v9644_v31 = vpop.permute.xlu1 %3651 }
 0x480   : > { %12944 = vst [vmem:[#allocation475_spill] sm:$0xff] %v9644_v31  ;;  %v9647_v32 = vpop.permute.xlu0 %3649 }
 0x481   : > { %12945 = vst [vmem:[#allocation476_spill] sm:$0xff] %v9647_v32  ;;  %3987 = vrot.lane.b32.xlu1 %v9410_v47, %s6382_s12  ;;  %v4108_v32 = vld [vmem:[%s9684_s6 + $0x78] sm:$0x3] }
 0x482   : > { %3985 = vrot.lane.b32.xlu0 %v9416_v25, %s6382_s12 }
 0x483   : > { %v9653_v4 = vpop.permute.xlu1 %3655 }
 0x484   : > { %12946 = vst [vmem:[#allocation477_spill] sm:$0xff] %v9653_v4  ;;  %v9655_v26 = vpop.permute.xlu0 %3653 }
 0x485   : > { %12947 = vst [vmem:[#allocation478_spill] sm:$0xff] %v9655_v26  ;;  %3991 = vrot.lane.b32.xlu1 %v9426_v21, %s6382_s12  ;;  %v9754_v26 = vld [vmem:[%s9684_s6 + $0x48] sm:$0x3] }
 0x486   : > { %3989 = vrot.lane.b32.xlu0 %v9433_v43, %s6382_s12  ;;  %v4142_v31 = vrot.slane %v9754_v26, 1 }
 0x487   : > { %v9662_v0 = vpop.permute.xlu1 %3659 }
 0x488   : > { %12948 = vst [vmem:[#allocation479_spill] sm:$0xff] %v9662_v0  ;;  %v9664_v47 = vpop.permute.xlu0 %3657 }
 0x489   : > { %12949 = vst [vmem:[#allocation480_spill] sm:$0xff] %v9664_v47  ;;  %3995 = vrot.lane.b32.xlu1 %v3833_v38, %s6382_s12 }
 0x48a   : > { %3993 = vrot.lane.b32.xlu0 %v3825_v15, %s6382_s12 }
 0x48b   : > { %v9668_v25 = vpop.permute.xlu1 %3663 }
 0x48c   : > { %12950 = vst [vmem:[#allocation481_spill] sm:$0xff] %v9668_v25  ;;  %v9670_v59 = vpop.permute.xlu0 %3661  ;;  %v9718_v25 = vld [vmem:[%s9684_s6 + $0x30] sm:$0xff] }
 0x48d   : > { %12951 = vst [vmem:[#allocation482_spill] sm:$0xff] %v9670_v59  ;;  %4007 = vrot.lane.b32.xlu1 %v9459_v60, %s6383_s13  ;;  %v3834_v60 = vrot.slane %v3755_v39, 2  ;;  %v4132_v39 = vrot.slane %v9693_v18, 1  ;;  %v4138_v59 = vrot.slane %v9718_v25, 1 }
 0x48e   : > { %4005 = vrot.lane.b32.xlu0 %v9465_v23, %s6383_s13  ;;  %v3835_v23 = vrot.slane %v3756_v9, 2  ;;  %v4133_v9 = vrot.slane %v9696_v36, 1 }
 0x48f   : > { %v9677_v21 = vpop.permute.xlu1 %3839 }
 0x490   : > { %12952 = vst [vmem:[#allocation483_spill] sm:$0xff] %v9677_v21  ;;  %v9679_v43 = vpop.permute.xlu0 %3837  ;;  %v9701_v21 = vld [vmem:[%s9684_s6] sm:$0xff] }
 0x491   : > { %12953 = vst [vmem:[#allocation484_spill] sm:$0xff] %v9679_v43  ;;  %4011 = vrot.lane.b32.xlu1 %v9476_v42, %s6383_s13  ;;  %v9704_v42 = vld [vmem:[%s9684_s6 + $0x8] sm:$0x3] }
 0x492   : > { %4009 = vrot.lane.b32.xlu0 %v9482_v41, %s6383_s13  ;;  %v3836_v41 = vsel %vm940_vm1, %v3834_v60, %v3835_v23  ;;  %v4130_v43 = vrot.slane %v9704_v42, 1  ;;  %v9726_v60 = vld [vmem:[%s9684_s6 + $0x20] sm:$0xff]  ;;  %v9729_v23 = vld [vmem:[%s9684_s6 + $0x28] sm:$0x3]  ;;  %v4154_v49 = vrot.slane %v9704_v42, 2 }
 0x493   : > { %v9690_v15 = vpop.permute.xlu1 %3843  ;;  %v4135_v4 = vrot.slane %v9726_v60, 1  ;;  %v4136_v35 = vrot.slane %v9729_v23, 1  ;;  %v4160_v42 = vrot.slane %v9729_v23, 2  ;;  %v4166_v23 = vrot.slane %v9754_v26, 2 }
 0x494   : > { %12954 = vst [vmem:[#allocation485_spill] sm:$0xff] %v9690_v15  ;;  %v9698_v38 = vpop.permute.xlu0 %3841 }
 0x495   : > { %12955 = vst [vmem:[#allocation486_spill] sm:$0xff] %v9698_v38  ;;  %4015 = vrot.lane.b32.xlu1 %v9492_v51, %s6383_s13  ;;  %v4129_v38 = vrot.slane %v9701_v21, 1  ;;  %v9721_v51 = vld [vmem:[%s9684_s6 + $0x38] sm:$0x3] }
 0x496   : > { %4013 = vrot.lane.b32.xlu0 %v9497_v29, %s6383_s13  ;;  %v4139_v0 = vrot.slane %v9721_v51, 1 }
 0x497   : > { %v9713_v15 = vpop.permute.xlu1 %3847 }
 0x498   : > { %12956 = vst [vmem:[#allocation487_spill] sm:$0xff] %v9713_v15  ;;  %v9723_v29 = vpop.permute.xlu0 %3845  ;;  %v9735_v15 = vsel %vm915_vm0, %v4132_v39, %v4133_v9  ;;  %v9751_v9 = vld [vmem:[%s9684_s6 + $0x40] sm:$0xff] }
 0x499   : > { %12957 = vst [vmem:[#allocation488_spill] sm:$0xff] %v9723_v29  ;;  %4019 = vrot.lane.b32.xlu1 %v3836_v41, %s6383_s13  ;;  %v4131_v29 = vsel %vm915_vm0, %v4129_v38, %v4130_v43  ;;  %v9745_v41 = vld [vmem:[%s9684_s6 + $0x50] sm:$0xff]  ;;  %v9760_v43 = vsel %vm915_vm0, %v4138_v59, %v4139_v0  ;;  %v4141_v33 = vrot.slane %v9751_v9, 1  ;;  %v4106_v59 = vld [vmem:[%s9684_s6 + $0x68] sm:$0x3] }
 0x49a   : > { %4017 = vrot.lane.b32.xlu0 %v9595_v22, %s6383_s13  ;;  %v4104_v22 = vld [vmem:[%s9684_s6 + $0x58] sm:$0x3]  ;;  %v4144_v38 = vrot.slane %v9745_v41, 1  ;;  %v4148_v46 = vrot.slane %v4106_v59, 1 }
 0x49b   : > { %v9739_v47 = vpop.permute.xlu1 %3851  ;;  %v9791_v55 = vsel %vm915_vm0, %v4141_v33, %v4142_v31 }
 0x49c   : > { %12958 = vst [vmem:[#allocation489_spill] sm:$0xff] %v9739_v47  ;;  %v9748_v39 = vpop.permute.xlu0 %3849  ;;  %v4145_v47 = vrot.slane %v4104_v22, 1 }
 0x49d   : > { %12959 = vst [vmem:[#allocation490_spill] sm:$0xff] %v9748_v39  ;;  %4195 = vrot.lane.b32.xlu1 %v9735_v15, %s12711_s26  ;;  %v9766_v39 = vsel %vm915_vm0, %v4135_v4, %v4136_v35  ;;  %v4150_v35 = vrot.slane %v9771_v10, 1  ;;  %v4151_v4 = vrot.slane %v4108_v32, 1 }
 0x49e   : > { %4193 = vrot.lane.b32.xlu0 %v4131_v29, %s12711_s26  ;;  %v9777_v29 = vld [vmem:[%s9684_s6 + $0x60] sm:$0xff]  ;;  %v9785_v0 = vsel %vm915_vm0, %v4144_v38, %v4145_v47  ;;  %v4156_v38 = vrot.slane %v9693_v18, 2 }
 0x49f   : > { %v9763_v37 = vpop.permute.xlu1 %3863  ;;  %v9801_v47 = vsel %vm915_vm0, %v4150_v35, %v4151_v4  ;;  %v4163_v4 = vrot.slane %v9721_v51, 2  ;;  %v4169_v51 = vrot.slane %v4104_v22, 2  ;;  %v4174_v22 = vrot.slane %v9771_v10, 2 }
 0x4a0   : > { %12960 = vst [vmem:[#allocation491_spill] sm:$0xff] %v9763_v37  ;;  %v9774_v17 = vpop.permute.xlu0 %3861  ;;  %v4171_v26 = vrot.slane %v9777_v29, 2 }
 0x4a1   : > { %12961 = vst [vmem:[#allocation492_spill] sm:$0xff] %v9774_v17  ;;  %4199 = vrot.lane.b32.xlu1 %v9760_v43, %s12711_s26  ;;  %v4147_v17 = vrot.slane %v9777_v29, 1 }
 0x4a2   : > { %4197 = vrot.lane.b32.xlu0 %v9766_v39, %s12711_s26 }
 0x4a3   : > { %v9788_v37 = vpop.permute.xlu1 %3867  ;;  %v9808_v31 = vsel %vm915_vm0, %v4147_v17, %v4148_v46 }
 0x4a4   : > { %12962 = vst [vmem:[#allocation493_spill] sm:$0xff] %v9788_v37  ;;  %v9794_v58 = vpop.permute.xlu0 %3865  ;;  %v4157_v37 = vrot.slane %v9696_v36, 2  ;;  %v4162_v36 = vrot.slane %v9718_v25, 2 }
 0x4a5   : > { %12963 = vst [vmem:[#allocation494_spill] sm:$0xff] %v9794_v58  ;;  %4203 = vrot.lane.b32.xlu1 %v9785_v0, %s12711_s26  ;;  %v4153_v58 = vrot.slane %v9701_v21, 2  ;;  %v4159_v21 = vrot.slane %v9726_v60, 2 }
 0x4a6   : > { %4201 = vrot.lane.b32.xlu0 %v9791_v55, %s12711_s26  ;;  %v4158_v35 = vsel %vm940_vm1, %v4156_v38, %v4157_v37  ;;  %v9831_v37 = vsel %vm940_vm1, %v4162_v36, %v4163_v4  ;;  %v4168_v38 = vrot.slane %v9745_v41, 2  ;;  %v4175_v4 = vrot.slane %v4108_v32, 2 }
 0x4a7   : > { %v9805_v33 = vpop.permute.xlu1 %3871  ;;  %v4155_v17 = vsel %vm940_vm1, %v4153_v58, %v4154_v49  ;;  %v4161_v58 = vsel %vm940_vm1, %v4159_v21, %v4160_v42  ;;  %v4165_v49 = vrot.slane %v9751_v9, 2  ;;  %v4172_v42 = vrot.slane %v4106_v59, 2 }
 0x4a8   : > { %12964 = vst [vmem:[#allocation495_spill] sm:$0xff] %v9805_v33  ;;  %v9812_v34 = vpop.permute.xlu0 %3869  ;;  %v9845_v36 = vsel %vm940_vm1, %v4168_v38, %v4169_v51  ;;  %v9861_v38 = vsel %vm940_vm1, %v4174_v22, %v4175_v4 }
 0x4a9   : > { %12965 = vst [vmem:[#allocation496_spill] sm:$0xff] %v9812_v34  ;;  %4207 = vrot.lane.b32.xlu1 %v9801_v47, %s12711_s26  ;;  %v9851_v21 = vsel %vm940_vm1, %v4165_v49, %v4166_v23  ;;  %v9866_v51 = vsel %vm940_vm1, %v4171_v26, %v4172_v42 }
 0x4aa   : > { %4205 = vrot.lane.b32.xlu0 %v9808_v31, %s12711_s26  ;;  %s6385_s26 = smov 72  }
 0x4ab   : > { %v9821_v46 = vpop.permute.xlu1 %3875 }
 0x4ac   : > { %12966 = vst [vmem:[#allocation497_spill] sm:$0xff] %v9821_v46  ;;  %v9826_v33 = vpop.permute.xlu0 %3873 }
 0x4ad   : > { %12967 = vst [vmem:[#allocation498_spill] sm:$0xff] %v9826_v33  ;;  %4219 = vrot.lane.b32.xlu1 %v4158_v35, %s12720_s27 }
 0x4ae   : > { %4217 = vrot.lane.b32.xlu0 %v4155_v17, %s12720_s27 }
 0x4af   : > { %v9834_v34 = vpop.permute.xlu1 %3887 }
 0x4b0   : > { %v9839_v46 = vpop.permute.xlu0 %3885 }
 0x4b1   : > { %4223 = vrot.lane.b32.xlu1 %v9831_v37, %s12720_s27 }
 0x4b2   : > { %4221 = vrot.lane.b32.xlu0 %v4161_v58, %s12720_s27 }
 0x4b3   : > { %v9848_v17 = vpop.permute.xlu1 %3891 }
 0x4b4   : > { %v9854_v33 = vpop.permute.xlu0 %3889 }
 0x4b5   : > { %4227 = vrot.lane.b32.xlu1 %v9845_v36, %s12720_s27 }
 0x4b6   : > { %4225 = vrot.lane.b32.xlu0 %v9851_v21, %s12720_s27 }
 0x4b7   : > { %v9863_v32 = vpop.permute.xlu1 %3895 }
 0x4b8   : > { %12968 = vst [vmem:[#allocation499_spill] sm:$0xff] %v9863_v32  ;;  %v9868_v49 = vpop.permute.xlu0 %3893 }
 0x4b9   : > { %12969 = vst [vmem:[#allocation500_spill] sm:$0xff] %v9868_v49  ;;  %4231 = vrot.lane.b32.xlu1 %v9861_v38, %s12720_s27 }
 0x4ba   : > { %4229 = vrot.lane.b32.xlu0 %v9866_v51, %s12720_s27 }
 0x4bb   : > { %v9874_v59 = vpop.permute.xlu1 %3899 }
 0x4bc   : > { %12970 = vst [vmem:[#allocation501_spill] sm:$0xff] %v9874_v59  ;;  %v9876_v23 = vpop.permute.xlu0 %3897 }
 0x4bd   : > { %12971 = vst [vmem:[#allocation502_spill] sm:$0xff] %v9876_v23  ;;  %4243 = vrot.lane.b32.xlu1 %v9726_v60, %s12729_s15 }
 0x4be   : > { %4241 = vrot.lane.b32.xlu0 %v9693_v18, %s12729_s15  ;;  %v9899_v18 = vld [vmem:[%s9684_s6 + $0x80] sm:$0xff] }
 0x4bf   : > { %v9882_v22 = vpop.permute.xlu1 %3911 }
 0x4c0   : > { %v9884_v4 = vpop.permute.xlu0 %3909 }
 0x4c1   : > { %4247 = vrot.lane.b32.xlu1 %v9751_v9, %s12729_s15 }
 0x4c2   : > { %4245 = vrot.lane.b32.xlu0 %v9718_v25, %s12729_s15 }
 0x4c3   : > { %v9890_v26 = vpop.permute.xlu1 %3915 }
 0x4c4   : > { %12972 = vst [vmem:[#allocation503_spill] sm:$0xff] %v9890_v26  ;;  %v9892_v42 = vpop.permute.xlu0 %3913 }
 0x4c5   : > { %4251 = vrot.lane.b32.xlu1 %v9777_v29, %s12729_s15 }
 0x4c6   : > { %4249 = vrot.lane.b32.xlu0 %v9745_v41, %s12729_s15 }
 0x4c7   : > { %v9901_v59 = vpop.permute.xlu1 %3919 }
 0x4c8   : > { %12973 = vst [vmem:[#allocation504_spill] sm:$0xff] %v9901_v59  ;;  %v9903_v23 = vpop.permute.xlu0 %3917 }
 0x4c9   : > { %12974 = vst [vmem:[#allocation505_spill] sm:$0xff] %v9903_v23  ;;  %4255 = vrot.lane.b32.xlu1 %v9899_v18, %s12729_s15 }
 0x4ca   : > { %4253 = vrot.lane.b32.xlu0 %v9771_v10, %s12729_s15 }
 0x4cb   : > { %v9909_v32 = vpop.permute.xlu1 %3923 }
 0x4cc   : > { %12975 = vst [vmem:[#allocation506_spill] sm:$0xff] %v9909_v32  ;;  %v9911_v49 = vpop.permute.xlu0 %3921 }
 0x4cd   : > { %12976 = vst [vmem:[#allocation507_spill] sm:$0xff] %v9911_v49  ;;  %4267 = vrot.lane.b32.xlu1 %v9766_v39, %s12668_s29 }
 0x4ce   : > { %4265 = vrot.lane.b32.xlu0 %v9735_v15, %s12668_s29 }
 0x4cf   : > { %v9917_v26 = vpop.permute.xlu1 %3935 }
 0x4d0   : > { %v9919_v59 = vpop.permute.xlu0 %3933 }
 0x4d1   : > { %4289 = vrot.lane.b32.xlu1 %v4158_v35, %s12677_s14 }
 0x4d2   : > { %4269 = vrot.lane.b32.xlu0 %v9760_v43, %s12668_s29 }
 0x4d3   : > { %v9924_v23 = vpop.permute.xlu1 %3939 }
 0x4d4   : > { %12977 = vst [vmem:[#allocation508_spill] sm:$0xff] %v9924_v23  ;;  %v9926_v32 = vpop.permute.xlu0 %3937 }
 0x4d5   : > { %4313 = vrot.lane.b32.xlu1 %v9726_v60, %s12618_s23 }
 0x4d6   : > { %4291 = vrot.lane.b32.xlu0 %v4161_v58, %s12677_s14 }
 0x4d7   : > { %v9931_v49 = vpop.permute.xlu1 %3943 }
 0x4d8   : > { %12978 = vst [vmem:[#allocation509_spill] sm:$0xff] %v9931_v49  ;;  %v9933_v15 = vpop.permute.xlu0 %3941 }
 0x4d9   : > { %12979 = vst [vmem:[#allocation510_spill] sm:$0xff] %v9933_v15  ;;  %4337 = vrot.lane.b32.xlu1 %v9766_v39, %s6382_s12 }
 0x4da   : > { %4315 = vrot.lane.b32.xlu0 %v9718_v25, %s12618_s23 }
 0x4db   : > { %v9939_v35 = vpop.permute.xlu1 %3947 }
 0x4dc   : > { %12980 = vst [vmem:[#allocation511_spill] sm:$0xff] %v9939_v35  ;;  %v9941_v23 = vpop.permute.xlu0 %3945 }
 0x4dd   : > { %12981 = vst [vmem:[#allocation512_spill] sm:$0xff] %v9941_v23  ;;  %4361 = vrot.lane.b32.xlu1 %v4161_v58, %s6383_s13 }
 0x4de   : > { %4339 = vrot.lane.b32.xlu0 %v9760_v43, %s6382_s12 }
 0x4df   : > { %v9946_v60 = vpop.permute.xlu1 %3959 }
 0x4e0   : > { %v9948_v49 = vpop.permute.xlu0 %3957 }
 0x4e1   : > { %4293 = vrot.lane.b32.xlu1 %v9831_v37, %s12677_s14 }
 0x4e2   : > { %4271 = vrot.lane.b32.xlu0 %v9791_v55, %s12668_s29 }
 0x4e3   : > { %v9954_v25 = vpop.permute.xlu1 %3963 }
 0x4e4   : > { %12982 = vst [vmem:[#allocation513_spill] sm:$0xff] %v9954_v25  ;;  %v9956_v39 = vpop.permute.xlu0 %3961 }
 0x4e5   : > { %4295 = vrot.lane.b32.xlu1 %v9851_v21, %s12677_s14 }
 0x4e6   : > { %4363 = vrot.lane.b32.xlu0 %v9831_v37, %s6383_s13 }
 0x4e7   : > { %v9962_v43 = vpop.permute.xlu1 %3967 }
 0x4e8   : > { %12983 = vst [vmem:[#allocation514_spill] sm:$0xff] %v9962_v43  ;;  %v9964_v58 = vpop.permute.xlu0 %3965 }
 0x4e9   : > { %12984 = vst [vmem:[#allocation515_spill] sm:$0xff] %v9964_v58  ;;  %4319 = vrot.lane.b32.xlu1 %v9745_v41, %s12618_s23 }
 0x4ea   : > { %4317 = vrot.lane.b32.xlu0 %v9751_v9, %s12618_s23 }
 0x4eb   : > { %v9970_v35 = vpop.permute.xlu1 %3971 }
 0x4ec   : > { %12985 = vst [vmem:[#allocation516_spill] sm:$0xff] %v9970_v35  ;;  %v9972_v23 = vpop.permute.xlu0 %3969 }
 0x4ed   : > { %12986 = vst [vmem:[#allocation517_spill] sm:$0xff] %v9972_v23  ;;  %4273 = vrot.lane.b32.xlu1 %v9785_v0, %s12668_s29 }
 0x4ee   : > { %4341 = vrot.lane.b32.xlu0 %v9791_v55, %s6382_s12 }
 0x4ef   : > { %v9978_v37 = vpop.permute.xlu1 %3983 }
 0x4f0   : > { %v9980_v43 = vpop.permute.xlu0 %3981 }
 0x4f1   : > { %4365 = vrot.lane.b32.xlu1 %v9851_v21, %s6383_s13 }
 0x4f2   : > { %4343 = vrot.lane.b32.xlu0 %v9785_v0, %s6382_s12  ;;  %v878_v0 = vld [vmem:[%s12401_s10 + $0x78] sm:$0xff] }
 0x4f3   : > { %v9986_v41 = vpop.permute.xlu1 %3987  ;;  %6075 = vmatprep.subr.mxu0 %v878_v0  ;;  %6203 = vmatprep.subr.mxu1 %v878_v0 }
 0x4f4   : > { %12987 = vst [vmem:[#allocation518_spill] sm:$0xff] %v9986_v41  ;;  %v9988_v9 = vpop.permute.xlu0 %3985  ;;  %6076 = vmatpush3.msra.mxu0 %v878_v0  ;;  %6219 = vmatpush3.msra.mxu1 %v878_v0  ;;  %v4179_v0 = vrot.slane %v9899_v18, 1  ;;  %v4182_v41 = vrot.slane %v9899_v18, 2 }
 0x4f5   : > { %12988 = vst [vmem:[#allocation519_spill] sm:$0xff] %v9988_v9  ;;  %4297 = vrot.lane.b32.xlu1 %v9845_v36, %s12677_s14 }
 0x4f6   : > { %4275 = vrot.lane.b32.xlu0 %v9808_v31, %s12668_s29 }
 0x4f7   : > { %v9994_v55 = vpop.permute.xlu1 %3991 }
 0x4f8   : > { %12989 = vst [vmem:[#allocation520_spill] sm:$0xff] %v9994_v55  ;;  %v9996_v35 = vpop.permute.xlu0 %3989  ;;  %v877_v55 = vld [vmem:[%s12401_s10 + $0x70] sm:$0xff] }
 0x4f9   : > { %12990 = vst [vmem:[#allocation521_spill] sm:$0xff] %v9996_v35  ;;  %4299 = vrot.lane.b32.xlu1 %v9866_v51, %s12677_s14  ;;  %6077 = vmatprep.subr.mxu0 %v877_v55  ;;  %v4110_v35 = vld [vmem:[%s9684_s6 + $0x88] sm:$0x3] }
 0x4fa   : > { %4367 = vrot.lane.b32.xlu0 %v9845_v36, %s6383_s13  ;;  %6078 = vmatpush3.msra.mxu0 %v877_v55  ;;  %v876_v36 = vld [vmem:[%s12401_s10 + $0x68] sm:$0xff]  ;;  %v4180_v15 = vrot.slane %v4110_v35, 1 }
 0x4fb   : > { %v10005_v21 = vpop.permute.xlu1 %3995  ;;  %6079 = vmatprep.subr.mxu0 %v876_v36  ;;  %6204 = vmatprep.subr.mxu1 %v877_v55 }
 0x4fc   : > { %12991 = vst [vmem:[#allocation522_spill] sm:$0xff] %v10005_v21  ;;  %v10007_v23 = vpop.permute.xlu0 %3993  ;;  %6080 = vmatpush3.msra.mxu0 %v876_v36  ;;  %6220 = vmatpush3.msra.mxu1 %v877_v55 }
 0x4fd   : > { %12992 = vst [vmem:[#allocation523_spill] sm:$0xff] %v10007_v23  ;;  %4323 = vrot.lane.b32.xlu1 %v9771_v10, %s12618_s23  ;;  %v875_v10 = vld [vmem:[%s12401_s10 + $0x60] sm:$0xff]  ;;  %6205 = vmatprep.subr.mxu1 %v876_v36 }
 0x4fe   : > { %4321 = vrot.lane.b32.xlu0 %v9777_v29, %s12618_s23  ;;  %6081 = vmatprep.subr.mxu0 %v875_v10  ;;  %v874_v29 = vld [vmem:[%s12401_s10 + $0x58] sm:$0xff] }
 0x4ff   : > { %v10019_v21 = vpop.permute.xlu1 %4007  ;;  %6082 = vmatpush3.msra.mxu0 %v875_v10  ;;  %6221 = vmatpush3.msra.mxu1 %v876_v36  ;;  %v872_v36 = vld [vmem:[%s12401_s10 + $0x48] sm:$0xff] }
 0x500   : > { %v10021_v23 = vpop.permute.xlu0 %4005  ;;  %6083 = vmatprep.subr.mxu0 %v874_v29  ;;  %6206 = vmatprep.subr.mxu1 %v875_v10 }
 0x501   : > { %4277 = vrot.lane.b32.xlu1 %v9801_v47, %s12668_s29  ;;  %6084 = vmatpush3.msra.mxu0 %v874_v29 }
 0x502   : > { %4345 = vrot.lane.b32.xlu0 %v9808_v31, %s6382_s12  ;;  %v873_v31 = vld [vmem:[%s12401_s10 + $0x50] sm:$0xff]  ;;  %6222 = vmatpush3.msra.mxu1 %v875_v10 }
 0x503   : > { %v10035_v58 = vpop.permute.xlu1 %4011  ;;  %6085 = vmatprep.subr.mxu0 %v873_v31  ;;  %6207 = vmatprep.subr.mxu1 %v874_v29 }
 0x504   : > { %12993 = vst [vmem:[#allocation524_spill] sm:$0xff] %v10035_v58  ;;  %v10037_v55 = vpop.permute.xlu0 %4009  ;;  %v4183_v58 = vrot.slane %v4110_v35, 2  ;;  %6086 = vmatpush3.msra.mxu0 %v873_v31  ;;  %v6272_v35 = vld [vmem:[%s6685_s22] sm:$0xff]  ;;  %6223 = vmatpush3.msra.mxu1 %v874_v29 }
 0x505   : > { %12994 = vst [vmem:[#allocation525_spill] sm:$0xff] %v10037_v55  ;;  %4369 = vrot.lane.b32.xlu1 %v9866_v51, %s6383_s13  ;;  %v10053_v55 = vsel %vm915_vm0, %v4179_v0, %v4180_v15  ;;  %6087 = vmatprep.subr.mxu0 %v872_v36  ;;  %v1537_v9 = vsel %vm1173_vm2, %v6272_v35, %v7054_v8  ;;  %v6273_v29 = vld [vmem:[%s8184_s25] sm:$0xff] }
 0x506   : > { %4347 = vrot.lane.b32.xlu0 %v9801_v47, %s6382_s12  ;;  %v871_v47 = vld [vmem:[%s12401_s10 + $0x40] sm:$0xff]  ;;  %v1545_v15 = vsel %vm1182_vm3, %v1537_v9, %v7149_v30  ;;  %v10070_v10 = vsel %vm940_vm1, %v4182_v41, %v4183_v58  ;;  %6088 = vmatpush3.msra.mxu0 %v872_v36  ;;  %v870_v30 = vld [vmem:[%s12401_s10 + $0x38] sm:$0xff]  ;;  %v869_v41 = vld [vmem:[%s12401_s10 + $0x30] sm:$0xff] }
 0x507   : > { %v10050_v25 = vpop.permute.xlu1 %4015  ;;  %v1553_v0 = vsel %vm1191_vm4, %v1545_v15, %v7219_v13  ;;  %6208 = vmatprep.subr.mxu1 %v873_v31  ;;  %6089 = vmatprep.subr.mxu0 %v871_v47 }
 0x508   : > { %v10055_v51 = vpop.permute.xlu0 %4013  ;;  %v1561_v9 = vsel %vm1200_vm5, %v1553_v0, %v7265_v40  ;;  %6224 = vmatpush3.msra.mxu1 %v873_v31  ;;  %6090 = vmatpush3.msra.mxu0 %v871_v47  ;;  %v2961_v31 = vsel %vm1173_vm2, %v6273_v29, %v8554_v27 }
 0x509   : > { %4301 = vrot.lane.b32.xlu1 %v9861_v38, %s12677_s14  ;;  %v1569_v13 = vsel %vm1209_vm6, %v1561_v9, %v7298_v16  ;;  %6209 = vmatprep.subr.mxu1 %v872_v36  ;;  %v2969_v35 = vsel %vm1182_vm3, %v2961_v31, %v8649_v53  ;;  %v868_v53 = vld [vmem:[%s12401_s10 + $0x28] sm:$0xff] }
 0x50a   : > { %4279 = vrot.lane.b32.xlu0 %v10053_v55, %s12668_s29  ;;  %v1577_v40 = vsel %vm1218_vm7, %v1569_v13, %v7330_v1  ;;  %6091 = vmatprep.subr.mxu0 %v870_v30  ;;  %v6274_v1 = vld [vmem:[%s6685_s22 + $0x10] sm:$0xff]  ;;  %v2977_v0 = vsel %vm1191_vm4, %v2969_v35, %v8719_v6 }
 0x50b   : > { %v10074_v8 = vpop.permute.xlu1 %4019  ;;  %v1585_v16 = vsel %vm1227_vm8, %v1577_v40, %v7365_v11  ;;  %6225 = vmatpush3.msra.mxu1 %v872_v36  ;;  %6092 = vmatpush3.msra.mxu0 %v870_v30  ;;  %v1538_v27 = vsel %vm1173_vm2, %v6274_v1, %v7052_v3  ;;  %v2985_v3 = vsel %vm1200_vm5, %v2977_v0, %v8765_v62  ;;  %v6276_v40 = vld [vmem:[%s8184_s25 + $0x10] sm:$0xff]  ;;  %v13002_v0 = vld [vmem:[#allocation327_spill] sm:$0xff] }
 0x50c   : > { %v10081_v58 = vpop.permute.xlu0 %4017  ;;  %6210 = vmatprep.subr.mxu1 %v871_v47  ;;  %6093 = vmatprep.subr.mxu0 %v869_v41  ;;  %v1546_v36 = vsel %vm1182_vm3, %v1538_v27, %v7138_v44  ;;  %v2993_v6 = vsel %vm1209_vm6, %v2985_v3, %v8798_v50  ;;  %v10130_v44 = vld [vmem:[%s9684_s6 + $0x90] sm:$0xff]  ;;  %v2962_v29 = vsel %vm1173_vm2, %v6276_v40, %v8552_v12  ;;  %v6277_v3 = vld [vmem:[%s8559_s3] sm:$0xff] }
 0x50d   : > { %4303 = vrot.lane.b32.xlu1 %v10070_v10, %s12677_s14  ;;  %6226 = vmatpush3.msra.mxu1 %v871_v47  ;;  %v3001_v47 = vsel %vm1218_vm7, %v2993_v6, %v8830_v28  ;;  %v2970_v12 = vsel %vm1182_vm3, %v2962_v29, %v8638_v61  ;;  %v12999_v35 = vld [vmem:[#allocation320_spill] sm:$0xff] }
 0x50e   : > { %4371 = vrot.lane.b32.xlu0 %v9861_v38, %s6383_s13  ;;  %v10108_v38 = vsel %vm1236_vm9, %v1585_v16, %v7397_v48  ;;  %v1554_v48 = vsel %vm1191_vm4, %v1546_v36, %v7212_v2  ;;  %6094 = vmatpush3.msra.mxu0 %v869_v41  ;;  %v867_v2 = vld [vmem:[%s12401_s10 + $0x20] sm:$0xff]  ;;  %v2978_v16 = vsel %vm1191_vm4, %v2970_v12, %v8712_v56  ;;  %v865_v56 = vld [vmem:[%s12401_s10 + $0x10] sm:$0xff] }
 0x50f   : > { %v10101_v15 = vpop.permute.xlu1 %4195  ;;  %v1562_v62 = vsel %vm1200_vm5, %v1554_v48, %v7263_v7  ;;  %6211 = vmatprep.subr.mxu1 %v870_v30  ;;  %6095 = vmatprep.subr.mxu0 %v868_v53  ;;  %v6275_v7 = vld [vmem:[%s7059_s16] sm:$0xff]  ;;  %v13004_v48 = vld [vmem:[#allocation356_spill] sm:$0xff] }
 0x510   : > { %12995 = vst [vmem:[#allocation526_spill] sm:$0xff] %v10101_v15  ;;  %v10112_v11 = vpop.permute.xlu0 %4193  ;;  %v1570_v50 = vsel %vm1209_vm6, %v1562_v62, %v7295_v24  ;;  %6227 = vmatpush3.msra.mxu1 %v870_v30  ;;  %6096 = vmatpush3.msra.mxu0 %v868_v53  ;;  %v1893_v28 = vsel %vm1173_vm2, %v6275_v7, %v7429_v19  ;;  %v866_v24 = vld [vmem:[%s12401_s10 + $0x18] sm:$0xff]  ;;  %v4187_v62 = vrot.slane %v10130_v44, 1  ;;  %v13010_v12 = vld [vmem:[#allocation348_spill] sm:$0xff] }
 0x511   : > { %4457 = vrot.lane.b32.xlu1 %v10108_v38, %s6384_s2  ;;  %6212 = vmatprep.subr.mxu1 %v869_v41  ;;  %v1578_v19 = vsel %vm1218_vm7, %v1570_v50, %v7328_v63  ;;  %v3317_v6 = vsel %vm1173_vm2, %v6277_v3, %v13004_v48  ;;  %v13005_v50 = vld [vmem:[#allocation151_spill] sm:$0xff]  ;;  %v13018_v48 = vld [vmem:[#allocation388_spill] sm:$0xff] }
 0x512   : > { %4325 = vrot.lane.b32.xlu0 %v9899_v18, %s12618_s23  ;;  %v3009_v18 = vsel %vm1227_vm8, %v3001_v47, %v8865_v5  ;;  %v1901_v5 = vsel %vm1182_vm3, %v1893_v28, %v7524_v54  ;;  %6097 = vmatprep.subr.mxu0 %v867_v2  ;;  %v10179_v54 = vld [vmem:[%s9684_s6 + $0x98] sm:$0x3]  ;;  %v13007_v28 = vld [vmem:[#allocation364_spill] sm:$0xff] }
 0x513   : > { %v10136_v9 = vpop.permute.xlu1 %4199  ;;  %v10155_v31 = vsel %vm1236_vm9, %v3009_v18, %v8897_v14  ;;  %v1586_v14 = vsel %vm1227_vm8, %v1578_v19, %v7363_v20  ;;  %v1909_v30 = vsel %vm1191_vm4, %v1901_v5, %v7594_v45  ;;  %6228 = vmatpush3.msra.mxu1 %v869_v41  ;;  %6098 = vmatpush3.msra.mxu0 %v867_v2  ;;  %v13001_v41 = vld [vmem:[#allocation143_spill] sm:$0xff]  ;;  %v4188_v47 = vrot.slane %v10179_v54, 1 }
 0x514   : > { %12996 = vst [vmem:[#allocation527_spill] sm:$0xff] %v10136_v9  ;;  %v10145_v13 = vpop.permute.xlu0 %4197  ;;  %v10183_v61 = vsel %vm1236_vm9, %v1586_v14, %v7394_v57  ;;  %v1917_v20 = vsel %vm1200_vm5, %v1909_v30, %v7640_v52  ;;  %v2986_v45 = vsel %vm1200_vm5, %v2978_v16, %v12999_v35  ;;  %6213 = vmatprep.subr.mxu1 %v868_v53  ;;  %v13003_v52 = vld [vmem:[#allocation334_spill] sm:$0xff]  ;;  %v13009_v19 = vld [vmem:[#allocation159_spill] sm:$0xff]  ;;  %v13011_v30 = vld [vmem:[#allocation372_spill] sm:$0xff] }
 0x515   : > { %12997 = vst [vmem:[#allocation528_spill] sm:$0xff] %v10145_v13  ;;  %4327 = vrot.lane.b32.xlu1 %v10130_v44, %s12618_s23  ;;  %6099 = vmatprep.subr.mxu0 %v866_v24  ;;  %v1925_v27 = vsel %vm1209_vm6, %v1917_v20, %v13001_v41  ;;  %v2994_v57 = vsel %vm1209_vm6, %v2986_v45, %v13002_v0  ;;  %v6278_v35 = vld [vmem:[%s7059_s16 + $0x10] sm:$0xff]  ;;  %v13013_v45 = vld [vmem:[#allocation114_spill] sm:$0xff]  ;;  %v13146_v9 = vld [vmem:[#allocation139_spill] sm:$0xff] }
 0x516   : > { %4813 = vrot.lane.b32.xlu0 %v10155_v31, %s6384_s2  ;;  %6229 = vmatpush3.msra.mxu1 %v868_v53  ;;  %v3002_v36 = vsel %vm1218_vm7, %v2994_v57, %v13003_v52  ;;  %v1933_v18 = vsel %vm1218_vm7, %v1925_v27, %v13005_v50  ;;  %v13006_v53 = vld [vmem:[#allocation341_spill] sm:$0xff]  ;;  %v3325_v40 = vsel %vm1182_vm3, %v3317_v6, %v13007_v28  ;;  %v13014_v27 = vld [vmem:[#allocation167_spill] sm:$0xff]  ;;  %v13016_v57 = vld [vmem:[#allocation380_spill] sm:$0xff] }
 0x517   : > { %v10176_v63 = vpop.permute.xlu1 %4203  ;;  %6100 = vmatpush3.msra.mxu0 %v866_v24  ;;  %v3010_v7 = vsel %vm1227_vm8, %v3002_v36, %v13006_v53  ;;  %6214 = vmatprep.subr.mxu1 %v867_v2  ;;  %v1941_v5 = vsel %vm1227_vm8, %v1933_v18, %v13009_v19  ;;  %v3333_v16 = vsel %vm1191_vm4, %v3325_v40, %v13011_v30  ;;  %v13017_v36 = vld [vmem:[#allocation121_spill] sm:$0xff]  ;;  %v13019_v18 = vld [vmem:[#allocation128_spill] sm:$0xff]  ;;  %v13022_v19 = vld [vmem:[#allocation135_spill] sm:$0xff] }
 0x518   : > { %12998 = vst [vmem:[#allocation529_spill] sm:$0xff] %v10176_v63  ;;  %v10189_v1 = vpop.permute.xlu0 %4201  ;;  %6101 = vmatprep.subr.mxu0 %v865_v56  ;;  %v10224_v14 = vsel %vm1236_vm9, %v3010_v7, %v13010_v12  ;;  %6230 = vmatpush3.msra.mxu1 %v867_v2  ;;  %v1894_v41 = vsel %vm1173_vm2, %v6278_v35, %v13013_v45  ;;  %v863_v2 = vld [vmem:[%s12401_s10] sm:$0xff]  ;;  %v13020_v7 = vld [vmem:[#allocation396_spill] sm:$0xff]  ;;  %v13186_v13 = vld [vmem:[#allocation383_spill] sm:$0xff] }
 0x519   : > { %13000 = vst [vmem:[#allocation320_spill] sm:$0xff] %v10189_v1  ;;  %4459 = vrot.lane.b32.xlu1 %v10183_v61, %s6384_s2  ;;  %6102 = vmatpush3.msra.mxu0 %v865_v56  ;;  %v10235_v0 = vsel %vm1236_vm9, %v1941_v5, %v13014_v27  ;;  %v3341_v52 = vsel %vm1200_vm5, %v3333_v16, %v13016_v57  ;;  %v13023_v12 = vld [vmem:[#allocation404_spill] sm:$0xff]  ;;  %v13029_v57 = vld [vmem:[#allocation355_spill] sm:$0xff] }
 0x51a   : > { %4349 = vrot.lane.b32.xlu0 %v10053_v55, %s6382_s12  ;;  %v864_v55 = vld [vmem:[%s12401_s10 + $0x8] sm:$0xff]  ;;  %13015 = vst [vmem:[#allocation334_spill] sm:$0xff] %v10235_v0  ;;  %6215 = vmatprep.subr.mxu1 %v866_v24  ;;  %v1902_v3 = vsel %vm1182_vm3, %v1894_v41, %v13017_v36  ;;  %v3349_v6 = vsel %vm1209_vm6, %v3341_v52, %v13018_v48  ;;  %v13026_v35 = vld [vmem:[#allocation412_spill] sm:$0xff]  ;;  %v4190_v36 = vrot.slane %v10130_v44, 2  ;;  %v13030_v48 = vld [vmem:[#allocation158_spill] sm:$0xff] }
 0x51b   : > { %v10215_v29 = vpop.permute.xlu1 %4207  ;;  %v4189_v50 = vsel %vm915_vm0, %v4187_v62, %v4188_v47  ;;  %6103 = vmatprep.subr.mxu0 %v864_v55  ;;  %v1910_v53 = vsel %vm1191_vm4, %v1902_v3, %v13019_v18  ;;  %v3357_v28 = vsel %vm1218_vm7, %v3349_v6, %v13020_v7  ;;  %6231 = vmatpush3.msra.mxu1 %v866_v24  ;;  %v13025_v62 = vld [vmem:[#allocation142_spill] sm:$0xff]  ;;  %v6279_v27 = vld [vmem:[%s8559_s3 + $0x10] sm:$0xff]  ;;  %v4191_v3 = vrot.slane %v10179_v54, 2  ;;  %v13031_v6 = vld [vmem:[#allocation363_spill] sm:$0xff] }
 0x51c   : > { %13008 = vst [vmem:[#allocation143_spill] sm:$0xff] %v10215_v29  ;;  %v10228_v20 = vpop.permute.xlu0 %4205  ;;  %6104 = vmatpush3.msra.mxu0 %v864_v55  ;;  %v1918_v5 = vsel %vm1200_vm5, %v1910_v53, %v13022_v19  ;;  %v3365_v30 = vsel %vm1227_vm8, %v3357_v28, %v13023_v12  ;;  %6216 = vmatprep.subr.mxu1 %v865_v56  ;;  %v13028_v24 = vld [vmem:[#allocation150_spill] sm:$0xff]  ;;  %v13035_v44 = vld [vmem:[#allocation371_spill] sm:$0xff] }
 0x51d   : > { %13012 = vst [vmem:[#allocation327_spill] sm:$0xff] %v10228_v20  ;;  %4815 = vrot.lane.b32.xlu1 %v10224_v14, %s6384_s2  ;;  %6105 = vmatprep.subr.mxu0 %v863_v2  ;;  %v1926_v47 = vsel %vm1209_vm6, %v1918_v5, %v13025_v62  ;;  %v10267_v45 = vsel %vm1236_vm9, %v3365_v30, %v13026_v35  ;;  %v13033_v53 = vld [vmem:[#allocation166_spill] sm:$0xff]  ;;  %v13037_v5 = vld [vmem:[#allocation67_spill] sm:$0xff] }
 0x51e   : > { %4489 = vrot.lane.b32.xlu0 %v10235_v0, %s6385_s26  ;;  %13027 = vst [vmem:[#allocation341_spill] sm:$0xff] %v10267_v45  ;;  %6232 = vmatpush3.msra.mxu1 %v865_v56  ;;  %v1934_v41 = vsel %vm1218_vm7, %v1926_v47, %v13028_v24  ;;  %v3318_v52 = vsel %vm1173_vm2, %v6279_v27, %v13029_v57  ;;  %v6280_v54 = vld [vmem:[%s6685_s22 + $0x20] sm:$0xff]  ;;  %v13038_v62 = vld [vmem:[#allocation303_spill] sm:$0xff] }
 0x51f   : > { %v10255_v40 = vpop.permute.xlu1 %4219  ;;  %6106 = vmatpush3.msra.mxu0 %v863_v2  ;;  %v1942_v56 = vsel %vm1227_vm8, %v1934_v41, %v13030_v48  ;;  %6217 = vmatprep.subr.mxu1 %v864_v55  ;;  %v1539_v12 = vsel %vm1173_vm2, %v6280_v54, %v13037_v5  ;;  %v6281_v30 = vld [vmem:[%s8184_s25 + $0x20] sm:$0xff]  ;;  %v13039_v35 = vld [vmem:[#allocation379_spill] sm:$0xff]  ;;  %v13040_v41 = vld [vmem:[#allocation309_spill] sm:$0xff] }
 0x520   : > { %13021 = vst [vmem:[#allocation356_spill] sm:$0xff] %v10255_v40  ;;  %v10261_v16 = vpop.permute.xlu0 %4217  ;;  %v10287_v7 = vsel %vm1236_vm9, %v1942_v56, %v13033_v53  ;;  %6233 = vmatpush3.msra.mxu1 %v864_v55  ;;  %v2963_v47 = vsel %vm1173_vm2, %v6281_v30, %v13038_v62  ;;  %v13041_v55 = vld [vmem:[#allocation387_spill] sm:$0xff]  ;;  %v13042_v48 = vld [vmem:[#allocation73_spill] sm:$0xff]  ;;  %v13047_v30 = vld [vmem:[#allocation322_spill] sm:$0xff] }
 0x521   : > { %13024 = vst [vmem:[#allocation151_spill] sm:$0xff] %v10261_v16  ;;  %4351 = vrot.lane.b32.xlu1 %v4189_v50, %s6382_s12  ;;  %v3326_v50 = vsel %vm1182_vm3, %v3318_v52, %v13031_v6  ;;  %13034 = vst [vmem:[#allocation159_spill] sm:$0xff] %v10287_v7  ;;  %6218 = vmatprep.subr.mxu1 %v863_v2  ;;  %v2971_v27 = vsel %vm1182_vm3, %v2963_v47, %v13040_v41  ;;  %v13043_v6 = vld [vmem:[#allocation315_spill] sm:$0xff]  ;;  %v6282_v47 = vld [vmem:[%s7059_s16 + $0x20] sm:$0xff] }
 0x522   : > { %4845 = vrot.lane.b32.xlu0 %v10267_v45, %s6385_s26  ;;  %v3334_v28 = vsel %vm1191_vm4, %v3326_v50, %v13035_v44  ;;  %v4192_v52 = vsel %vm940_vm1, %v4190_v36, %v4191_v3  ;;  %6234 = vmatpush3.msra.mxu1 %v863_v2  ;;  %v1547_v56 = vsel %vm1182_vm3, %v1539_v12, %v13042_v48  ;;  %v13044_v53 = vld [vmem:[#allocation395_spill] sm:$0xff]  ;;  %v13050_v12 = vld [vmem:[#allocation85_spill] sm:$0xff]  ;;  %v6283_v48 = vld [vmem:[%s6685_s22 + $0x30] sm:$0xff] }
 0x523   : > { %v10283_v18 = vpop.permute.xlu1 %4223  ;;  %v3342_v24 = vsel %vm1200_vm5, %v3334_v28, %v13039_v35  ;;  %v2979_v50 = vsel %vm1191_vm4, %v2971_v27, %v13043_v6  ;;  %v13046_v54 = vld [vmem:[#allocation79_spill] sm:$0xff]  ;;  %v13051_v35 = vld [vmem:[#allocation116_spill] sm:$0xff]  ;;  %v13052_v41 = vld [vmem:[#allocation329_spill] sm:$0xff] }
 0x524   : > { %13032 = vst [vmem:[#allocation364_spill] sm:$0xff] %v10283_v18  ;;  %v10291_v19 = vpop.permute.xlu0 %4221  ;;  %v3350_v57 = vsel %vm1209_vm6, %v3342_v24, %v13041_v55  ;;  %v1555_v5 = vsel %vm1191_vm4, %v1547_v56, %v13046_v54  ;;  %v13048_v36 = vld [vmem:[#allocation403_spill] sm:$0xff]  ;;  %v1895_v24 = vsel %vm1173_vm2, %v6282_v47, %v13051_v35  ;;  %v13055_v56 = vld [vmem:[#allocation66_spill] sm:$0xff] }
 0x525   : > { %13036 = vst [vmem:[#allocation348_spill] sm:$0xff] %v10291_v19  ;;  %4491 = vrot.lane.b32.xlu1 %v10287_v7, %s6385_s26  ;;  %v3358_v44 = vsel %vm1218_vm7, %v3350_v57, %v13044_v53  ;;  %v1563_v62 = vsel %vm1200_vm5, %v1555_v5, %v13050_v12  ;;  %v13053_v55 = vld [vmem:[#allocation411_spill] sm:$0xff]  ;;  %v1540_v6 = vsel %vm1173_vm2, %v6283_v48, %v13055_v56  ;;  %v13058_v5 = vld [vmem:[#allocation336_spill] sm:$0xff]  ;;  %v13061_v12 = vld [vmem:[#allocation130_spill] sm:$0xff] }
 0x526   : > { %4373 = vrot.lane.b32.xlu0 %v10070_v10, %s6383_s13  ;;  %v2987_v10 = vsel %vm1200_vm5, %v2979_v50, %v13047_v30  ;;  %v3366_v2 = vsel %vm1227_vm8, %v3358_v44, %v13048_v36  ;;  %v13056_v50 = vld [vmem:[#allocation91_spill] sm:$0xff]  ;;  %v13060_v36 = vld [vmem:[#allocation97_spill] sm:$0xff]  ;;  %v6321_v16 = vld [vmem:[%s8934_s4 + $0x60] sm:$0xff] }
 0x527   : > { %v10316_v28 = vpop.permute.xlu1 %4227  ;;  %v2995_v27 = vsel %vm1209_vm6, %v2987_v10, %v13052_v41  ;;  %v10335_v57 = vsel %vm1236_vm9, %v3366_v2, %v13053_v55  ;;  %v1571_v53 = vsel %vm1209_vm6, %v1563_v62, %v13056_v50  ;;  %v13057_v44 = vld [vmem:[#allocation123_spill] sm:$0xff]  ;;  %v13059_v10 = vld [vmem:[#allocation72_spill] sm:$0xff]  ;;  %v13064_v41 = vld [vmem:[#allocation78_spill] sm:$0xff] }
 0x528   : > { %13045 = vst [vmem:[#allocation372_spill] sm:$0xff] %v10316_v28  ;;  %v10324_v3 = vpop.permute.xlu0 %4225  ;;  %13054 = vst [vmem:[#allocation167_spill] sm:$0xff] %v10335_v57  ;;  %v1903_v54 = vsel %vm1182_vm3, %v1895_v24, %v13057_v44  ;;  %v3003_v30 = vsel %vm1218_vm7, %v2995_v27, %v13058_v5  ;;  %v1579_v2 = vsel %vm1218_vm7, %v1571_v53, %v13060_v36  ;;  %v13062_v62 = vld [vmem:[#allocation343_spill] sm:$0xff]  ;;  %v13066_v56 = vld [vmem:[#allocation137_spill] sm:$0xff] }
 0x529   : > { %13049 = vst [vmem:[#allocation114_spill] sm:$0xff] %v10324_v3  ;;  %4375 = vrot.lane.b32.xlu1 %v4192_v52, %s6383_s13  ;;  %v1548_v52 = vsel %vm1182_vm3, %v1540_v6, %v13059_v10  ;;  %v1911_v47 = vsel %vm1191_vm4, %v1903_v54, %v13061_v12  ;;  %v3011_v35 = vsel %vm1227_vm8, %v3003_v30, %v13062_v62  ;;  %v13065_v55 = vld [vmem:[#allocation103_spill] sm:$0xff]  ;;  %v13067_v50 = vld [vmem:[#allocation350_spill] sm:$0xff]  ;;  %v13070_v54 = vld [vmem:[#allocation84_spill] sm:$0xff] }
 0x52a   : > { %4847 = vrot.lane.b32.xlu0 %v10335_v57, %s6385_s26  ;;  %v1556_v27 = vsel %vm1191_vm4, %v1548_v52, %v13064_v41  ;;  %v1587_v48 = vsel %vm1227_vm8, %v1579_v2, %v13065_v55  ;;  %v1919_v6 = vsel %vm1200_vm5, %v1911_v47, %v13066_v56  ;;  %v10367_v53 = vsel %vm1236_vm9, %v3011_v35, %v13067_v50  ;;  %v13071_v30 = vld [vmem:[#allocation109_spill] sm:$0xff]  ;;  %v6284_v2 = vld [vmem:[%s8559_s3 + $0x20] sm:$0xff]  ;;  %v6285_v55 = vld [vmem:[%s8184_s25 + $0x30] sm:$0xff] }
 0x52b   : > { %v10357_v24 = vpop.permute.xlu1 %4231  ;;  %13068 = vst [vmem:[#allocation121_spill] sm:$0xff] %v10367_v53  ;;  %v1564_v5 = vsel %vm1200_vm5, %v1556_v27, %v13070_v54  ;;  %v10375_v10 = vsel %vm1236_vm9, %v1587_v48, %v13071_v30  ;;  %v13073_v52 = vld [vmem:[#allocation145_spill] sm:$0xff]  ;;  %v13074_v12 = vld [vmem:[#allocation358_spill] sm:$0xff]  ;;  %v13079_v54 = vld [vmem:[#allocation96_spill] sm:$0xff] }
 0x52c   : > { %13063 = vst [vmem:[#allocation380_spill] sm:$0xff] %v10357_v24  ;;  %v10369_v44 = vpop.permute.xlu0 %4229  ;;  %13072 = vst [vmem:[#allocation128_spill] sm:$0xff] %v10375_v10  ;;  %v1927_v36 = vsel %vm1209_vm6, %v1919_v6, %v13073_v52  ;;  %v3319_v47 = vsel %vm1173_vm2, %v6284_v2, %v13074_v12  ;;  %v13075_v62 = vld [vmem:[#allocation90_spill] sm:$0xff]  ;;  %v13076_v41 = vld [vmem:[#allocation153_spill] sm:$0xff] }
 0x52d   : > { %13069 = vst [vmem:[#allocation388_spill] sm:$0xff] %v10369_v44  ;;  %4817 = vrot.lane.b32.xlu1 %v10367_v53, %s6384_s2  ;;  %v1572_v35 = vsel %vm1209_vm6, %v1564_v5, %v13075_v62  ;;  %v1935_v27 = vsel %vm1218_vm7, %v1927_v36, %v13076_v41  ;;  %v13077_v56 = vld [vmem:[#allocation302_spill] sm:$0xff]  ;;  %v13080_v52 = vld [vmem:[#allocation161_spill] sm:$0xff]  ;;  %v13081_v2 = vld [vmem:[#allocation308_spill] sm:$0xff] }
 0x52e   : > { %v2964_v48 = vsel %vm1173_vm2, %v6285_v55, %v13077_v56  ;;  %v13078_v50 = vld [vmem:[#allocation366_spill] sm:$0xff]  ;;  %4461 = vrot.lane.b32.xlu0 %v10375_v10, %s6384_s2  ;;  %v1580_v30 = vsel %vm1218_vm7, %v1572_v35, %v13079_v54  ;;  %v1943_v5 = vsel %vm1227_vm8, %v1935_v27, %v13080_v52  ;;  %v13085_v56 = vld [vmem:[#allocation169_spill] sm:$0xff]  ;;  %v13394_v40 = vld [vmem:[#allocation447_spill] sm:$0xff] }
 0x52f   : > { %v3327_v6 = vsel %vm1182_vm3, %v3319_v47, %v13078_v50  ;;  %v2972_v36 = vsel %vm1182_vm3, %v2964_v48, %v13081_v2  ;;  %v13082_v12 = vld [vmem:[#allocation374_spill] sm:$0xff]  ;;  %v10403_v41 = vpop.permute.xlu1 %4243  ;;  %v10409_v50 = vsel %vm1236_vm9, %v1943_v5, %v13085_v56  ;;  %v13090_v48 = vld [vmem:[#allocation108_spill] sm:$0xff]  ;;  %v13092_v2 = vld [vmem:[#allocation321_spill] sm:$0xff] }
 0x530   : > { %v3335_v62 = vsel %vm1191_vm4, %v3327_v6, %v13082_v12  ;;  %13083 = vst [vmem:[#allocation396_spill] sm:$0xff] %v10403_v41  ;;  %v13084_v55 = vld [vmem:[#allocation102_spill] sm:$0xff]  ;;  %13086 = vst [vmem:[#allocation135_spill] sm:$0xff] %v10409_v50  ;;  %v10415_v52 = vpop.permute.xlu0 %4241  ;;  %v13106_v28 = vld [vmem:[#allocation381_spill] sm:$0xff] }
 0x531   : > { %v1588_v47 = vsel %vm1227_vm8, %v1580_v30, %v13084_v55  ;;  %v13087_v35 = vld [vmem:[#allocation314_spill] sm:$0xff]  ;;  %13089 = vst [vmem:[#allocation404_spill] sm:$0xff] %v10415_v52  ;;  %v6286_v30 = vld [vmem:[%s8559_s3 + $0x30] sm:$0xff]  ;;  %v13093_v55 = vld [vmem:[#allocation357_spill] sm:$0xff]  ;;  %4493 = vrot.lane.b32.xlu1 %v10409_v50, %s6385_s26 }
 0x532   : > { %v2980_v54 = vsel %vm1191_vm4, %v2972_v36, %v13087_v35  ;;  %v13088_v24 = vld [vmem:[#allocation382_spill] sm:$0xff]  ;;  %v10419_v6 = vsel %vm1236_vm9, %v1588_v47, %v13090_v48  ;;  %v3320_v5 = vsel %vm1173_vm2, %v6286_v30, %v13093_v55  ;;  %v13095_v36 = vld [vmem:[#allocation115_spill] sm:$0xff]  ;;  %v13096_v35 = vld [vmem:[#allocation328_spill] sm:$0xff] }
 0x533   : > { %v3343_v27 = vsel %vm1200_vm5, %v3335_v62, %v13088_v24  ;;  %13091 = vst [vmem:[#allocation142_spill] sm:$0xff] %v10419_v6  ;;  %v2988_v12 = vsel %vm1200_vm5, %v2980_v54, %v13092_v2  ;;  %v13094_v56 = vld [vmem:[#allocation390_spill] sm:$0xff]  ;;  %v6287_v24 = vld [vmem:[%s7059_s16 + $0x30] sm:$0xff]  ;;  %v13097_v48 = vld [vmem:[#allocation365_spill] sm:$0xff]  ;;  %4463 = vrot.lane.b32.xlu0 %v10419_v6, %s6384_s2 }
 0x534   : > { %v3351_v29 = vsel %vm1209_vm6, %v3343_v27, %v13094_v56  ;;  %v1896_v62 = vsel %vm1173_vm2, %v6287_v24, %v13095_v36  ;;  %v2996_v47 = vsel %vm1209_vm6, %v2988_v12, %v13096_v35  ;;  %v3328_v54 = vsel %vm1182_vm3, %v3320_v5, %v13097_v48  ;;  %v13098_v2 = vld [vmem:[#allocation398_spill] sm:$0xff]  ;;  %v13100_v56 = vld [vmem:[#allocation335_spill] sm:$0xff]  ;;  %v13101_v36 = vld [vmem:[#allocation373_spill] sm:$0xff]  ;;  %v10449_v5 = vpop.permute.xlu1 %4247 }
 0x535   : > { %v3359_v30 = vsel %vm1218_vm7, %v3351_v29, %v13098_v2  ;;  %v13099_v27 = vld [vmem:[#allocation122_spill] sm:$0xff]  ;;  %v3004_v24 = vsel %vm1218_vm7, %v2996_v47, %v13100_v56  ;;  %v3336_v44 = vsel %vm1191_vm4, %v3328_v54, %v13101_v36  ;;  %13103 = vst [vmem:[#allocation412_spill] sm:$0xff] %v10449_v5  ;;  %v13104_v48 = vld [vmem:[#allocation129_spill] sm:$0xff]  ;;  %v10461_v56 = vpop.permute.xlu0 %4245  ;;  %v13110_v54 = vld [vmem:[#allocation136_spill] sm:$0xff] }
 0x536   : > { %v1904_v55 = vsel %vm1182_vm3, %v1896_v62, %v13099_v27  ;;  %v13102_v12 = vld [vmem:[#allocation406_spill] sm:$0xff]  ;;  %v3344_v62 = vsel %vm1200_vm5, %v3336_v44, %v13106_v28  ;;  %13109 = vst [vmem:[#allocation355_spill] sm:$0xff] %v10461_v56  ;;  %v13126_v5 = vld [vmem:[#allocation324_spill] sm:$0xff]  ;;  %v13226_v10 = vld [vmem:[#allocation141_spill] sm:$0xff] }
 0x537   : > { %v3367_v35 = vsel %vm1227_vm8, %v3359_v30, %v13102_v12  ;;  %v1912_v29 = vsel %vm1191_vm4, %v1904_v55, %v13104_v48  ;;  %v13105_v2 = vld [vmem:[#allocation342_spill] sm:$0xff]  ;;  %v13111_v12 = vld [vmem:[#allocation305_spill] sm:$0xff] }
 0x538   : > { %v3012_v20 = vsel %vm1227_vm8, %v3004_v24, %v13105_v2  ;;  %v13107_v27 = vld [vmem:[#allocation414_spill] sm:$0xff]  ;;  %v1920_v30 = vsel %vm1200_vm5, %v1912_v29, %v13110_v54  ;;  %v13112_v55 = vld [vmem:[#allocation349_spill] sm:$0xff]  ;;  %v13117_v54 = vld [vmem:[#allocation311_spill] sm:$0xff] }
 0x539   : > { %v10459_v47 = vsel %vm1236_vm9, %v3367_v35, %v13107_v27  ;;  %v6288_v36 = vld [vmem:[%s8184_s25 + $0x40] sm:$0xff]  ;;  %v10470_v48 = vsel %vm1236_vm9, %v3012_v20, %v13112_v55  ;;  %v13114_v24 = vld [vmem:[#allocation389_spill] sm:$0xff]  ;;  %v13116_v27 = vld [vmem:[#allocation144_spill] sm:$0xff] }
 0x53a   : > { %13108 = vst [vmem:[#allocation150_spill] sm:$0xff] %v10459_v47  ;;  %v2965_v63 = vsel %vm1173_vm2, %v6288_v36, %v13111_v12  ;;  %13113 = vst [vmem:[#allocation158_spill] sm:$0xff] %v10470_v48  ;;  %v3352_v28 = vsel %vm1209_vm6, %v3344_v62, %v13114_v24  ;;  %4849 = vrot.lane.b32.xlu1 %v10459_v47, %s6385_s26  ;;  %v6289_v44 = vld [vmem:[%s6685_s22 + $0x40] sm:$0xff]  ;;  %v13115_v35 = vld [vmem:[#allocation69_spill] sm:$0xff]  ;;  %v1928_v29 = vsel %vm1209_vm6, %v1920_v30, %v13116_v27 }
 0x53b   : > { %v1541_v2 = vsel %vm1173_vm2, %v6289_v44, %v13115_v35  ;;  %v2973_v36 = vsel %vm1182_vm3, %v2965_v63, %v13117_v54  ;;  %v13118_v12 = vld [vmem:[#allocation397_spill] sm:$0xff]  ;;  %4819 = vrot.lane.b32.xlu0 %v10470_v48, %s6384_s2  ;;  %v13119_v62 = vld [vmem:[#allocation75_spill] sm:$0xff]  ;;  %v13120_v24 = vld [vmem:[#allocation152_spill] sm:$0xff]  ;;  %v10495_v63 = vpop.permute.xlu1 %4251 }
 0x53c   : > { %v3360_v20 = vsel %vm1218_vm7, %v3352_v28, %v13118_v12  ;;  %v1549_v55 = vsel %vm1182_vm3, %v1541_v2, %v13119_v62  ;;  %v1936_v44 = vsel %vm1218_vm7, %v1928_v29, %v13120_v24  ;;  %v13121_v35 = vld [vmem:[#allocation317_spill] sm:$0xff]  ;;  %13123 = vst [vmem:[#allocation363_spill] sm:$0xff] %v10495_v63  ;;  %v13125_v12 = vld [vmem:[#allocation160_spill] sm:$0xff]  ;;  %v10507_v24 = vpop.permute.xlu0 %4249  ;;  %v13206_v48 = vld [vmem:[#allocation326_spill] sm:$0xff] }
 0x53d   : > { %v2981_v3 = vsel %vm1191_vm4, %v2973_v36, %v13121_v35  ;;  %v13122_v30 = vld [vmem:[#allocation405_spill] sm:$0xff]  ;;  %v1944_v1 = vsel %vm1227_vm8, %v1936_v44, %v13125_v12  ;;  %13129 = vst [vmem:[#allocation371_spill] sm:$0xff] %v10507_v24  ;;  %v13130_v36 = vld [vmem:[#allocation87_spill] sm:$0xff]  ;;  %v6290_v35 = vld [vmem:[%s7059_s16 + $0x40] sm:$0xff] }
 0x53e   : > { %v3368_v27 = vsel %vm1227_vm8, %v3360_v20, %v13122_v30  ;;  %v13124_v54 = vld [vmem:[#allocation81_spill] sm:$0xff]  ;;  %v2989_v2 = vsel %vm1200_vm5, %v2981_v3, %v13126_v5  ;;  %v13131_v30 = vld [vmem:[#allocation118_spill] sm:$0xff]  ;;  %v13134_v44 = vld [vmem:[#allocation331_spill] sm:$0xff] }
 0x53f   : > { %v1557_v28 = vsel %vm1191_vm4, %v1549_v55, %v13124_v54  ;;  %v13127_v62 = vld [vmem:[#allocation413_spill] sm:$0xff]  ;;  %v1897_v63 = vsel %vm1173_vm2, %v6290_v35, %v13131_v30  ;;  %v13132_v55 = vld [vmem:[#allocation168_spill] sm:$0xff]  ;;  %v2997_v3 = vsel %vm1209_vm6, %v2989_v2, %v13134_v44  ;;  %v13138_v30 = vld [vmem:[#allocation338_spill] sm:$0xff] }
 0x540   : > { %v10505_v29 = vsel %vm1236_vm9, %v3368_v27, %v13127_v62  ;;  %v1565_v20 = vsel %vm1200_vm5, %v1557_v28, %v13130_v36  ;;  %v10516_v54 = vsel %vm1236_vm9, %v1944_v1, %v13132_v55  ;;  %v6291_v5 = vld [vmem:[%s6685_s22 + $0x50] sm:$0xff]  ;;  %v13136_v62 = vld [vmem:[#allocation93_spill] sm:$0xff]  ;;  %v3005_v1 = vsel %vm1218_vm7, %v2997_v3, %v13138_v30  ;;  %v13139_v2 = vld [vmem:[#allocation74_spill] sm:$0xff] }
 0x541   : > { %13128 = vst [vmem:[#allocation166_spill] sm:$0xff] %v10505_v29  ;;  %13133 = vst [vmem:[#allocation67_spill] sm:$0xff] %v10516_v54  ;;  %4851 = vrot.lane.b32.xlu1 %v10505_v29, %s6385_s26  ;;  %v13135_v27 = vld [vmem:[#allocation68_spill] sm:$0xff]  ;;  %v1573_v28 = vsel %vm1209_vm6, %v1565_v20, %v13136_v62  ;;  %v13137_v36 = vld [vmem:[#allocation125_spill] sm:$0xff]  ;;  %4495 = vrot.lane.b32.xlu0 %v10516_v54, %s6385_s26  ;;  %v10541_v62 = vpop.permute.xlu1 %4255 }
 0x542   : > { %v1542_v12 = vsel %vm1173_vm2, %v6291_v5, %v13135_v27  ;;  %v1905_v35 = vsel %vm1182_vm3, %v1897_v63, %v13137_v36  ;;  %v13140_v44 = vld [vmem:[#allocation99_spill] sm:$0xff]  ;;  %v13141_v5 = vld [vmem:[#allocation132_spill] sm:$0xff]  ;;  %v13142_v20 = vld [vmem:[#allocation345_spill] sm:$0xff]  ;;  %13143 = vst [vmem:[#allocation303_spill] sm:$0xff] %v10541_v62 }
 0x543   : > { %v1550_v55 = vsel %vm1182_vm3, %v1542_v12, %v13139_v2  ;;  %v1581_v24 = vsel %vm1218_vm7, %v1573_v28, %v13140_v44  ;;  %v1913_v27 = vsel %vm1191_vm4, %v1905_v35, %v13141_v5  ;;  %v3013_v63 = vsel %vm1227_vm8, %v3005_v1, %v13142_v20  ;;  %v13144_v36 = vld [vmem:[#allocation80_spill] sm:$0xff]  ;;  %v13145_v30 = vld [vmem:[#allocation105_spill] sm:$0xff]  ;;  %v10553_v35 = vpop.permute.xlu0 %4253  ;;  %v13150_v44 = vld [vmem:[#allocation86_spill] sm:$0xff] }
 0x544   : > { %v1558_v3 = vsel %vm1191_vm4, %v1550_v55, %v13144_v36  ;;  %v1589_v18 = vsel %vm1227_vm8, %v1581_v24, %v13145_v30  ;;  %v1921_v12 = vsel %vm1200_vm5, %v1913_v27, %v13146_v9  ;;  %v13147_v2 = vld [vmem:[#allocation352_spill] sm:$0xff]  ;;  %13149 = vst [vmem:[#allocation309_spill] sm:$0xff] %v10553_v35  ;;  %v13151_v5 = vld [vmem:[#allocation111_spill] sm:$0xff]  ;;  %v6292_v24 = vld [vmem:[%s8559_s3 + $0x40] sm:$0xff] }
 0x545   : > { %v10551_v28 = vsel %vm1236_vm9, %v3013_v63, %v13147_v2  ;;  %v1566_v1 = vsel %vm1200_vm5, %v1558_v3, %v13150_v44  ;;  %v10559_v20 = vsel %vm1236_vm9, %v1589_v18, %v13151_v5  ;;  %v13153_v55 = vld [vmem:[#allocation147_spill] sm:$0xff]  ;;  %v13154_v30 = vld [vmem:[#allocation360_spill] sm:$0xff]  ;;  %v13261_v41 = vld [vmem:[#allocation377_spill] sm:$0xff] }
 0x546   : > { %13148 = vst [vmem:[#allocation379_spill] sm:$0xff] %v10551_v28  ;;  %13152 = vst [vmem:[#allocation387_spill] sm:$0xff] %v10559_v20  ;;  %v1929_v36 = vsel %vm1209_vm6, %v1921_v12, %v13153_v55  ;;  %v3321_v9 = vsel %vm1173_vm2, %v6292_v24, %v13154_v30  ;;  %4821 = vrot.lane.b32.xlu1 %v10551_v28, %s6384_s2  ;;  %v13155_v27 = vld [vmem:[#allocation92_spill] sm:$0xff]  ;;  %v13156_v2 = vld [vmem:[#allocation155_spill] sm:$0xff]  ;;  %4465 = vrot.lane.b32.xlu0 %v10559_v20, %s6384_s2 }
 0x547   : > { %v1574_v63 = vsel %vm1209_vm6, %v1566_v1, %v13155_v27  ;;  %v1937_v3 = vsel %vm1218_vm7, %v1929_v36, %v13156_v2  ;;  %v6293_v44 = vld [vmem:[%s8184_s25 + $0x50] sm:$0xff]  ;;  %v13159_v55 = vld [vmem:[#allocation98_spill] sm:$0xff]  ;;  %v13160_v30 = vld [vmem:[#allocation163_spill] sm:$0xff] }
 0x548   : > { %v13157_v62 = vld [vmem:[#allocation304_spill] sm:$0xff]  ;;  %v1582_v24 = vsel %vm1218_vm7, %v1574_v63, %v13159_v55  ;;  %v1945_v1 = vsel %vm1227_vm8, %v1937_v3, %v13160_v30  ;;  %v13161_v27 = vld [vmem:[#allocation310_spill] sm:$0xff]  ;;  %v10599_v30 = vpop.permute.xlu0 %4265 }
 0x549   : > { %v2966_v18 = vsel %vm1173_vm2, %v6293_v44, %v13157_v62  ;;  %v13158_v5 = vld [vmem:[#allocation368_spill] sm:$0xff]  ;;  %v10587_v62 = vpop.permute.xlu1 %4267  ;;  %13169 = vst [vmem:[#allocation395_spill] sm:$0xff] %v10599_v30 }
 0x54a   : > { %v3329_v12 = vsel %vm1182_vm3, %v3321_v9, %v13158_v5  ;;  %v2974_v36 = vsel %vm1182_vm3, %v2966_v18, %v13161_v27  ;;  %v13162_v2 = vld [vmem:[#allocation376_spill] sm:$0xff]  ;;  %13163 = vst [vmem:[#allocation73_spill] sm:$0xff] %v10587_v62  ;;  %v13165_v5 = vld [vmem:[#allocation171_spill] sm:$0xff]  ;;  %v13170_v18 = vld [vmem:[#allocation110_spill] sm:$0xff] }
 0x54b   : > { %v3337_v35 = vsel %vm1191_vm4, %v3329_v12, %v13162_v2  ;;  %v13164_v44 = vld [vmem:[#allocation104_spill] sm:$0xff]  ;;  %v10593_v28 = vsel %vm1236_vm9, %v1945_v1, %v13165_v5  ;;  %v13172_v27 = vld [vmem:[#allocation323_spill] sm:$0xff] }
 0x54c   : > { %v1590_v9 = vsel %vm1227_vm8, %v1582_v24, %v13164_v44  ;;  %13166 = vst [vmem:[#allocation315_spill] sm:$0xff] %v10593_v28  ;;  %v13167_v63 = vld [vmem:[#allocation316_spill] sm:$0xff]  ;;  %v13173_v44 = vld [vmem:[#allocation359_spill] sm:$0xff]  ;;  %4497 = vrot.lane.b32.xlu1 %v10593_v28, %s6385_s26 }
 0x54d   : > { %v2982_v55 = vsel %vm1191_vm4, %v2974_v36, %v13167_v63  ;;  %v13168_v20 = vld [vmem:[#allocation384_spill] sm:$0xff]  ;;  %v10603_v12 = vsel %vm1236_vm9, %v1590_v9, %v13170_v18  ;;  %v13176_v63 = vld [vmem:[#allocation330_spill] sm:$0xff]  ;;  %v13177_v18 = vld [vmem:[#allocation367_spill] sm:$0xff] }
 0x54e   : > { %v3345_v3 = vsel %vm1200_vm5, %v3337_v35, %v13168_v20  ;;  %13171 = vst [vmem:[#allocation79_spill] sm:$0xff] %v10603_v12  ;;  %v2990_v2 = vsel %vm1200_vm5, %v2982_v55, %v13172_v27  ;;  %v6294_v24 = vld [vmem:[%s8559_s3 + $0x50] sm:$0xff]  ;;  %v13175_v20 = vld [vmem:[#allocation117_spill] sm:$0xff]  ;;  %4467 = vrot.lane.b32.xlu0 %v10603_v12, %s6384_s2 }
 0x54f   : > { %v3322_v1 = vsel %vm1173_vm2, %v6294_v24, %v13173_v44  ;;  %v13174_v5 = vld [vmem:[#allocation392_spill] sm:$0xff]  ;;  %v2998_v9 = vsel %vm1209_vm6, %v2990_v2, %v13176_v63 }
 0x550   : > { %v3353_v56 = vsel %vm1209_vm6, %v3345_v3, %v13174_v5  ;;  %v6295_v35 = vld [vmem:[%s7059_s16 + $0x50] sm:$0xff]  ;;  %v3330_v55 = vsel %vm1182_vm3, %v3322_v1, %v13177_v18  ;;  %v13180_v5 = vld [vmem:[#allocation337_spill] sm:$0xff]  ;;  %v10633_v1 = vpop.permute.xlu1 %4289  ;;  %v13184_v18 = vld [vmem:[#allocation131_spill] sm:$0xff] }
 0x551   : > { %v1898_v36 = vsel %vm1173_vm2, %v6295_v35, %v13175_v20  ;;  %v13178_v27 = vld [vmem:[#allocation400_spill] sm:$0xff]  ;;  %v3006_v35 = vsel %vm1218_vm7, %v2998_v9, %v13180_v5  ;;  %v13181_v20 = vld [vmem:[#allocation375_spill] sm:$0xff]  ;;  %13183 = vst [vmem:[#allocation322_spill] sm:$0xff] %v10633_v1  ;;  %v10645_v5 = vpop.permute.xlu0 %4269  ;;  %v13417_v1 = vld [vmem:[#allocation234_spill] sm:$0xff] }
 0x552   : > { %v3361_v24 = vsel %vm1218_vm7, %v3353_v56, %v13178_v27  ;;  %v13179_v3 = vld [vmem:[#allocation124_spill] sm:$0xff]  ;;  %v3338_v19 = vsel %vm1191_vm4, %v3330_v55, %v13181_v20  ;;  %13189 = vst [vmem:[#allocation85_spill] sm:$0xff] %v10645_v5  ;;  %v13190_v55 = vld [vmem:[#allocation138_spill] sm:$0xff] }
 0x553   : > { %v1906_v44 = vsel %vm1182_vm3, %v1898_v36, %v13179_v3  ;;  %v13182_v2 = vld [vmem:[#allocation408_spill] sm:$0xff]  ;;  %v3346_v36 = vsel %vm1200_vm5, %v3338_v19, %v13186_v13  ;;  %v6296_v20 = vld [vmem:[%s8184_s25 + $0x60] sm:$0xff] }
 0x554   : > { %v3369_v63 = vsel %vm1227_vm8, %v3361_v24, %v13182_v2  ;;  %v1914_v56 = vsel %vm1191_vm4, %v1906_v44, %v13184_v18  ;;  %v13185_v27 = vld [vmem:[#allocation344_spill] sm:$0xff]  ;;  %v13191_v2 = vld [vmem:[#allocation307_spill] sm:$0xff]  ;;  %v6297_v19 = vld [vmem:[%s6685_s22 + $0x60] sm:$0xff] }
 0x555   : > { %v3014_v12 = vsel %vm1227_vm8, %v3006_v35, %v13185_v27  ;;  %v13187_v3 = vld [vmem:[#allocation416_spill] sm:$0xff]  ;;  %v1922_v24 = vsel %vm1200_vm5, %v1914_v56, %v13190_v55  ;;  %v2967_v6 = vsel %vm1173_vm2, %v6296_v20, %v13191_v2  ;;  %v13192_v44 = vld [vmem:[#allocation351_spill] sm:$0xff]  ;;  %v13197_v55 = vld [vmem:[#allocation313_spill] sm:$0xff] }
 0x556   : > { %v10643_v9 = vsel %vm1236_vm9, %v3369_v63, %v13187_v3  ;;  %v10654_v18 = vsel %vm1236_vm9, %v3014_v12, %v13192_v44  ;;  %v13194_v35 = vld [vmem:[#allocation391_spill] sm:$0xff]  ;;  %v13196_v3 = vld [vmem:[#allocation146_spill] sm:$0xff]  ;;  %v2975_v20 = vsel %vm1182_vm3, %v2967_v6, %v13197_v55  ;;  %v10679_v6 = vpop.permute.xlu1 %4313 }
 0x557   : > { %13188 = vst [vmem:[#allocation403_spill] sm:$0xff] %v10643_v9  ;;  %13193 = vst [vmem:[#allocation116_spill] sm:$0xff] %v10654_v18  ;;  %v3354_v13 = vsel %vm1209_vm6, %v3346_v36, %v13194_v35  ;;  %4853 = vrot.lane.b32.xlu1 %v10643_v9, %s6385_s26  ;;  %v13195_v63 = vld [vmem:[#allocation71_spill] sm:$0xff]  ;;  %v1930_v56 = vsel %vm1209_vm6, %v1922_v24, %v13196_v3  ;;  %4823 = vrot.lane.b32.xlu0 %v10654_v18, %s6384_s2  ;;  %v13199_v36 = vld [vmem:[#allocation77_spill] sm:$0xff] }
 0x558   : > { %v1543_v27 = vsel %vm1173_vm2, %v6297_v19, %v13195_v63  ;;  %v13198_v2 = vld [vmem:[#allocation399_spill] sm:$0xff]  ;;  %v13200_v35 = vld [vmem:[#allocation154_spill] sm:$0xff]  ;;  %13203 = vst [vmem:[#allocation329_spill] sm:$0xff] %v10679_v6 }
 0x559   : > { %v3362_v12 = vsel %vm1218_vm7, %v3354_v13, %v13198_v2  ;;  %v1551_v44 = vsel %vm1182_vm3, %v1543_v27, %v13199_v36  ;;  %v1938_v19 = vsel %vm1218_vm7, %v1930_v56, %v13200_v35  ;;  %v13201_v63 = vld [vmem:[#allocation319_spill] sm:$0xff]  ;;  %v13205_v2 = vld [vmem:[#allocation162_spill] sm:$0xff]  ;;  %v10691_v35 = vpop.permute.xlu0 %4291 }
 0x55a   : > { %v2983_v5 = vsel %vm1191_vm4, %v2975_v20, %v13201_v63  ;;  %v13202_v24 = vld [vmem:[#allocation407_spill] sm:$0xff]  ;;  %v1946_v18 = vsel %vm1227_vm8, %v1938_v19, %v13205_v2  ;;  %13209 = vst [vmem:[#allocation66_spill] sm:$0xff] %v10691_v35  ;;  %v13210_v20 = vld [vmem:[#allocation89_spill] sm:$0xff]  ;;  %v6298_v63 = vld [vmem:[%s7059_s16 + $0x60] sm:$0xff] }
 0x55b   : > { %v3370_v3 = vsel %vm1227_vm8, %v3362_v12, %v13202_v24  ;;  %v13204_v55 = vld [vmem:[#allocation83_spill] sm:$0xff]  ;;  %v2991_v27 = vsel %vm1200_vm5, %v2983_v5, %v13206_v48  ;;  %v13211_v24 = vld [vmem:[#allocation120_spill] sm:$0xff]  ;;  %v13214_v19 = vld [vmem:[#allocation333_spill] sm:$0xff] }
 0x55c   : > { %v1559_v13 = vsel %vm1191_vm4, %v1551_v44, %v13204_v55  ;;  %v13207_v36 = vld [vmem:[#allocation415_spill] sm:$0xff]  ;;  %v1899_v53 = vsel %vm1173_vm2, %v6298_v63, %v13211_v24  ;;  %v13212_v44 = vld [vmem:[#allocation170_spill] sm:$0xff]  ;;  %v2999_v48 = vsel %vm1209_vm6, %v2991_v27, %v13214_v19  ;;  %v6299_v5 = vld [vmem:[%s6685_s22 + $0x70] sm:$0xff] }
 0x55d   : > { %v10689_v56 = vsel %vm1236_vm9, %v3370_v3, %v13207_v36  ;;  %v1567_v12 = vsel %vm1200_vm5, %v1559_v13, %v13210_v20  ;;  %v10700_v55 = vsel %vm1236_vm9, %v1946_v18, %v13212_v44  ;;  %v13215_v3 = vld [vmem:[#allocation70_spill] sm:$0xff]  ;;  %v13216_v36 = vld [vmem:[#allocation95_spill] sm:$0xff]  ;;  %v13218_v24 = vld [vmem:[#allocation340_spill] sm:$0xff] }
 0x55e   : > { %13208 = vst [vmem:[#allocation411_spill] sm:$0xff] %v10689_v56  ;;  %13213 = vst [vmem:[#allocation91_spill] sm:$0xff] %v10700_v55  ;;  %4855 = vrot.lane.b32.xlu1 %v10689_v56, %s6385_s26  ;;  %v1544_v2 = vsel %vm1173_vm2, %v6299_v5, %v13215_v3  ;;  %v1575_v13 = vsel %vm1209_vm6, %v1567_v12, %v13216_v36  ;;  %v13217_v20 = vld [vmem:[#allocation127_spill] sm:$0xff]  ;;  %v3007_v18 = vsel %vm1218_vm7, %v2999_v48, %v13218_v24  ;;  %v13219_v27 = vld [vmem:[#allocation76_spill] sm:$0xff]  ;;  %v10725_v36 = vpop.permute.xlu1 %4337 }
 0x55f   : > { %v1907_v63 = vsel %vm1182_vm3, %v1899_v53, %v13217_v20  ;;  %4499 = vrot.lane.b32.xlu0 %v10700_v55, %s6385_s26  ;;  %v1552_v44 = vsel %vm1182_vm3, %v1544_v2, %v13219_v27  ;;  %v13220_v19 = vld [vmem:[#allocation101_spill] sm:$0xff]  ;;  %v13221_v5 = vld [vmem:[#allocation134_spill] sm:$0xff]  ;;  %v13222_v12 = vld [vmem:[#allocation347_spill] sm:$0xff]  ;;  %13223 = vst [vmem:[#allocation123_spill] sm:$0xff] %v10725_v36 }
 0x560   : > { %v1583_v35 = vsel %vm1218_vm7, %v1575_v13, %v13220_v19  ;;  %v1915_v3 = vsel %vm1191_vm4, %v1907_v63, %v13221_v5  ;;  %v3015_v53 = vsel %vm1227_vm8, %v3007_v18, %v13222_v12  ;;  %v13224_v20 = vld [vmem:[#allocation82_spill] sm:$0xff]  ;;  %v13225_v24 = vld [vmem:[#allocation107_spill] sm:$0xff]  ;;  %v10737_v63 = vpop.permute.xlu0 %4315  ;;  %v13230_v19 = vld [vmem:[#allocation88_spill] sm:$0xff] }
 0x561   : > { %v1560_v48 = vsel %vm1191_vm4, %v1552_v44, %v13224_v20  ;;  %v1591_v62 = vsel %vm1227_vm8, %v1583_v35, %v13225_v24  ;;  %v1923_v2 = vsel %vm1200_vm5, %v1915_v3, %v13226_v10  ;;  %v13227_v27 = vld [vmem:[#allocation354_spill] sm:$0xff]  ;;  %13229 = vst [vmem:[#allocation72_spill] sm:$0xff] %v10737_v63  ;;  %v13231_v5 = vld [vmem:[#allocation113_spill] sm:$0xff] }
 0x562   : > { %v10735_v13 = vsel %vm1236_vm9, %v3015_v53, %v13227_v27  ;;  %v1568_v18 = vsel %vm1200_vm5, %v1560_v48, %v13230_v19  ;;  %v10743_v12 = vsel %vm1236_vm9, %v1591_v62, %v13231_v5  ;;  %v13233_v44 = vld [vmem:[#allocation149_spill] sm:$0xff]  ;;  %v6300_v35 = vld [vmem:[%s8559_s3 + $0x60] sm:$0xff]  ;;  %v6301_v19 = vld [vmem:[%s8184_s25 + $0x70] sm:$0xff] }
 0x563   : > { %13228 = vst [vmem:[#allocation336_spill] sm:$0xff] %v10735_v13  ;;  %13232 = vst [vmem:[#allocation97_spill] sm:$0xff] %v10743_v12  ;;  %v1931_v20 = vsel %vm1209_vm6, %v1923_v2, %v13233_v44  ;;  %v13234_v24 = vld [vmem:[#allocation362_spill] sm:$0xff]  ;;  %4825 = vrot.lane.b32.xlu1 %v10735_v13, %s6384_s2  ;;  %v13236_v27 = vld [vmem:[#allocation157_spill] sm:$0xff]  ;;  %4469 = vrot.lane.b32.xlu0 %v10743_v12, %s6384_s2 }
 0x564   : > { %v3323_v10 = vsel %vm1173_vm2, %v6300_v35, %v13234_v24  ;;  %v13235_v3 = vld [vmem:[#allocation94_spill] sm:$0xff]  ;;  %v1939_v48 = vsel %vm1218_vm7, %v1931_v20, %v13236_v27  ;;  %v13239_v44 = vld [vmem:[#allocation100_spill] sm:$0xff]  ;;  %v13240_v24 = vld [vmem:[#allocation165_spill] sm:$0xff] }
 0x565   : > { %v1576_v53 = vsel %vm1209_vm6, %v1568_v18, %v13235_v3  ;;  %v13237_v63 = vld [vmem:[#allocation306_spill] sm:$0xff]  ;;  %v1947_v18 = vsel %vm1227_vm8, %v1939_v48, %v13240_v24  ;;  %v13241_v3 = vld [vmem:[#allocation312_spill] sm:$0xff]  ;;  %v10783_v24 = vpop.permute.xlu0 %4339 }
 0x566   : > { %v2968_v62 = vsel %vm1173_vm2, %v6301_v19, %v13237_v63  ;;  %v13238_v5 = vld [vmem:[#allocation370_spill] sm:$0xff]  ;;  %v1584_v35 = vsel %vm1218_vm7, %v1576_v53, %v13239_v44  ;;  %v10771_v63 = vpop.permute.xlu1 %4361  ;;  %13249 = vst [vmem:[#allocation78_spill] sm:$0xff] %v10783_v24 }
 0x567   : > { %v3331_v2 = vsel %vm1182_vm3, %v3323_v10, %v13238_v5  ;;  %v2976_v20 = vsel %vm1182_vm3, %v2968_v62, %v13241_v3  ;;  %v13242_v27 = vld [vmem:[#allocation378_spill] sm:$0xff]  ;;  %13243 = vst [vmem:[#allocation130_spill] sm:$0xff] %v10771_v63  ;;  %v13245_v5 = vld [vmem:[#allocation173_spill] sm:$0xff]  ;;  %v13250_v62 = vld [vmem:[#allocation112_spill] sm:$0xff] }
 0x568   : > { %v3339_v13 = vsel %vm1191_vm4, %v3331_v2, %v13242_v27  ;;  %v13244_v19 = vld [vmem:[#allocation106_spill] sm:$0xff]  ;;  %v10777_v12 = vsel %vm1236_vm9, %v1947_v18, %v13245_v5  ;;  %v13252_v3 = vld [vmem:[#allocation325_spill] sm:$0xff] }
 0x569   : > { %v1592_v10 = vsel %vm1227_vm8, %v1584_v35, %v13244_v19  ;;  %13246 = vst [vmem:[#allocation343_spill] sm:$0xff] %v10777_v12  ;;  %v13247_v53 = vld [vmem:[#allocation318_spill] sm:$0xff]  ;;  %v6302_v35 = vld [vmem:[%s8559_s3 + $0x70] sm:$0xff]  ;;  %v13253_v19 = vld [vmem:[#allocation361_spill] sm:$0xff]  ;;  %4501 = vrot.lane.b32.xlu1 %v10777_v12, %s6385_s26  ;;  %s5994_s3 = sshll.u32 %s13704_s17, 9 }
 0x56a   : > { %v2984_v44 = vsel %vm1191_vm4, %v2976_v20, %v13247_v53  ;;  %v13248_v36 = vld [vmem:[#allocation386_spill] sm:$0xff]  ;;  %v10787_v2 = vsel %vm1236_vm9, %v1592_v10, %v13250_v62  ;;  %v3324_v18 = vsel %vm1173_vm2, %v6302_v35, %v13253_v19  ;;  %v13256_v53 = vld [vmem:[#allocation332_spill] sm:$0xff]  ;;  %v13257_v62 = vld [vmem:[#allocation369_spill] sm:$0xff] }
 0x56b   : > { %v3347_v48 = vsel %vm1200_vm5, %v3339_v13, %v13248_v36  ;;  %13251 = vst [vmem:[#allocation103_spill] sm:$0xff] %v10787_v2  ;;  %v2992_v27 = vsel %vm1200_vm5, %v2984_v44, %v13252_v3  ;;  %v13254_v5 = vld [vmem:[#allocation394_spill] sm:$0xff]  ;;  %v6303_v36 = vld [vmem:[%s7059_s16 + $0x70] sm:$0xff]  ;;  %v13255_v13 = vld [vmem:[#allocation119_spill] sm:$0xff]  ;;  %v3332_v44 = vsel %vm1182_vm3, %v3324_v18, %v13257_v62  ;;  %4471 = vrot.lane.b32.xlu0 %v10787_v2, %s6384_s2 }
 0x56c   : > { %v3355_v63 = vsel %vm1209_vm6, %v3347_v48, %v13254_v5  ;;  %v1900_v20 = vsel %vm1173_vm2, %v6303_v36, %v13255_v13  ;;  %v3000_v10 = vsel %vm1209_vm6, %v2992_v27, %v13256_v53  ;;  %v13258_v3 = vld [vmem:[#allocation402_spill] sm:$0xff]  ;;  %v13260_v19 = vld [vmem:[#allocation339_spill] sm:$0xff]  ;;  %v3340_v36 = vsel %vm1191_vm4, %v3332_v44, %v13261_v41  ;;  %v10817_v53 = vpop.permute.xlu1 %4293  ;;  %v13264_v18 = vld [vmem:[#allocation133_spill] sm:$0xff]  ;;  %v10829_v41 = vpop.permute.xlu0 %4271 }
 0x56d   : > { %v3363_v24 = vsel %vm1218_vm7, %v3355_v63, %v13258_v3  ;;  %v13259_v48 = vld [vmem:[#allocation126_spill] sm:$0xff]  ;;  %v3008_v5 = vsel %vm1218_vm7, %v3000_v10, %v13260_v19  ;;  %13263 = vst [vmem:[#allocation137_spill] sm:$0xff] %v10817_v53  ;;  %v13266_v2 = vld [vmem:[#allocation385_spill] sm:$0xff]  ;;  %13269 = vst [vmem:[#allocation84_spill] sm:$0xff] %v10829_v41 }
 0x56e   : > { %v1908_v35 = vsel %vm1182_vm3, %v1900_v20, %v13259_v48  ;;  %v13262_v13 = vld [vmem:[#allocation410_spill] sm:$0xff]  ;;  %v3348_v20 = vsel %vm1200_vm5, %v3340_v36, %v13266_v2  ;;  %v13270_v44 = vld [vmem:[#allocation140_spill] sm:$0xff]  ;;  %v13271_v19 = vld [vmem:[#allocation353_spill] sm:$0xff] }
 0x56f   : > { %v3371_v27 = vsel %vm1227_vm8, %v3363_v24, %v13262_v13  ;;  %v1916_v63 = vsel %vm1191_vm4, %v1908_v35, %v13264_v18  ;;  %v13265_v62 = vld [vmem:[#allocation346_spill] sm:$0xff]  ;;  %v13273_v35 = vld [vmem:[#allocation393_spill] sm:$0xff]  ;;  %v13274_v2 = vld [vmem:[#allocation148_spill] sm:$0xff] }
 0x570   : > { %v3016_v3 = vsel %vm1227_vm8, %v3008_v5, %v13265_v62  ;;  %v13267_v48 = vld [vmem:[#allocation418_spill] sm:$0xff]  ;;  %v1924_v24 = vsel %vm1200_vm5, %v1916_v63, %v13270_v44  ;;  %v3356_v5 = vsel %vm1209_vm6, %v3348_v20, %v13273_v35  ;;  %v13276_v63 = vld [vmem:[#allocation156_spill] sm:$0xff]  ;;  %v10851_v20 = vpop.permute.xlu1 %4295  ;;  %v13280_v35 = vld [vmem:[#allocation417_spill] sm:$0xff] }
 0x571   : > { %v10827_v10 = vsel %vm1236_vm9, %v3371_v27, %v13267_v48  ;;  %v10835_v13 = vsel %vm1236_vm9, %v3016_v3, %v13271_v19  ;;  %v1932_v36 = vsel %vm1209_vm6, %v1924_v24, %v13274_v2  ;;  %v13275_v27 = vld [vmem:[#allocation401_spill] sm:$0xff]  ;;  %13278 = vst [vmem:[#allocation145_spill] sm:$0xff] %v10851_v20  ;;  %v13279_v44 = vld [vmem:[#allocation164_spill] sm:$0xff]  ;;  %v6305_v20 = vld [vmem:[%s8934_s4] sm:$0xff] }
 0x572   : > { %13268 = vst [vmem:[#allocation350_spill] sm:$0xff] %v10827_v10  ;;  %13272 = vst [vmem:[#allocation109_spill] sm:$0xff] %v10835_v13  ;;  %4857 = vrot.lane.b32.xlu1 %v10827_v10, %s6385_s26  ;;  %v3364_v18 = vsel %vm1218_vm7, %v3356_v5, %v13275_v27  ;;  %4827 = vrot.lane.b32.xlu0 %v10835_v13, %s6384_s2  ;;  %v1940_v62 = vsel %vm1218_vm7, %v1932_v36, %v13276_v63  ;;  %v13277_v3 = vld [vmem:[#allocation409_spill] sm:$0xff]  ;;  %v10859_v5 = vpop.permute.xlu0 %4363  ;;  %v13283_v2 = vld [vmem:[#allocation172_spill] sm:$0xff] }
 0x573   : > { %v3372_v48 = vsel %vm1227_vm8, %v3364_v18, %v13277_v3  ;;  %v1948_v19 = vsel %vm1227_vm8, %v1940_v62, %v13279_v44  ;;  %13282 = vst [vmem:[#allocation90_spill] sm:$0xff] %v10859_v5  ;;  %v6304_v36 = vld [vmem:[%s7434_s30] sm:$0xff]  ;;  %v13285_v63 = vld [vmem:[#allocation175_spill] sm:$0xff]  ;;  %v13292_v41 = vld [vmem:[#allocation420_spill] sm:$0xff] }
 0x574   : > { %v10857_v24 = vsel %vm1236_vm9, %v3372_v48, %v13280_v35  ;;  %v10863_v27 = vsel %vm1236_vm9, %v1948_v19, %v13283_v2  ;;  %v2249_v18 = vsel %vm1173_vm2, %v6304_v36, %v13285_v63  ;;  %v13286_v3 = vld [vmem:[#allocation183_spill] sm:$0xff]  ;;  %v10876_v35 = vpop.permute.xlu1 %4319  ;;  %v13303_v53 = vld [vmem:[#allocation452_spill] sm:$0xff] }
 0x575   : > { %13281 = vst [vmem:[#allocation358_spill] sm:$0xff] %v10857_v24  ;;  %13284 = vst [vmem:[#allocation153_spill] sm:$0xff] %v10863_v27  ;;  %v2257_v62 = vsel %vm1182_vm3, %v2249_v18, %v13286_v3  ;;  %v13287_v48 = vld [vmem:[#allocation191_spill] sm:$0xff]  ;;  %v3673_v18 = vsel %vm1173_vm2, %v6305_v20, %v13292_v41 }
 0x576   : > { %4859 = vrot.lane.b32.xlu1 %v10857_v24, %s6385_s26  ;;  %4503 = vrot.lane.b32.xlu0 %v10863_v27, %s6385_s26  ;;  %v2265_v44 = vsel %vm1191_vm4, %v2257_v62, %v13287_v48  ;;  %13288 = vst [vmem:[#allocation302_spill] sm:$0xff] %v10876_v35  ;;  %v13289_v19 = vld [vmem:[#allocation199_spill] sm:$0xff]  ;;  %v10880_v13 = vpop.permute.xlu0 %4317  ;;  %v13294_v48 = vld [vmem:[#allocation428_spill] sm:$0xff] }
 0x577   : > { %v2273_v2 = vsel %vm1200_vm5, %v2265_v44, %v13289_v19  ;;  %13290 = vst [vmem:[#allocation366_spill] sm:$0xff] %v10880_v13  ;;  %v13291_v36 = vld [vmem:[#allocation207_spill] sm:$0xff]  ;;  %v3681_v35 = vsel %vm1182_vm3, %v3673_v18, %v13294_v48  ;;  %v6306_v18 = vld [vmem:[%s8934_s4 + $0x10] sm:$0xff] }
 0x578   : > { %v2281_v63 = vsel %vm1209_vm6, %v2273_v2, %v13291_v36  ;;  %v13293_v3 = vld [vmem:[#allocation215_spill] sm:$0xff]  ;;  %v13296_v2 = vld [vmem:[#allocation436_spill] sm:$0xff]  ;;  %v10899_v13 = vpop.permute.xlu1 %4273 }
 0x579   : > { %v2289_v62 = vsel %vm1218_vm7, %v2281_v63, %v13293_v3  ;;  %v13295_v44 = vld [vmem:[#allocation223_spill] sm:$0xff]  ;;  %v3689_v36 = vsel %vm1191_vm4, %v3681_v35, %v13296_v2  ;;  %13297 = vst [vmem:[#allocation96_spill] sm:$0xff] %v10899_v13  ;;  %v6307_v35 = vld [vmem:[%s7434_s30 + $0x10] sm:$0xff] }
 0x57a   : > { %4901 = vrot.lane.b32.xlu1 %v10267_v45, %s6384_s2  ;;  %4549 = vrot.lane.b32.xlu0 %v10235_v0, %s6384_s2  ;;  %v2297_v19 = vsel %vm1227_vm8, %v2289_v62, %v13295_v44  ;;  %v13298_v41 = vld [vmem:[#allocation231_spill] sm:$0xff]  ;;  %v13300_v45 = vld [vmem:[#allocation444_spill] sm:$0xff]  ;;  %v10907_v3 = vpop.permute.xlu0 %4341  ;;  %v13304_v44 = vld [vmem:[#allocation174_spill] sm:$0xff] }
 0x57b   : > { %v10903_v20 = vsel %vm1236_vm9, %v2297_v19, %v13298_v41  ;;  %v3697_v63 = vsel %vm1200_vm5, %v3689_v36, %v13300_v45  ;;  %13301 = vst [vmem:[#allocation308_spill] sm:$0xff] %v10907_v3  ;;  %v13302_v48 = vld [vmem:[#allocation419_spill] sm:$0xff]  ;;  %v2250_v19 = vsel %vm1173_vm2, %v6307_v35, %v13304_v44  ;;  %v13306_v45 = vld [vmem:[#allocation460_spill] sm:$0xff]  ;;  %v13311_v35 = vld [vmem:[#allocation190_spill] sm:$0xff] }
 0x57c   : > { %13299 = vst [vmem:[#allocation161_spill] sm:$0xff] %v10903_v20  ;;  %v3674_v0 = vsel %vm1173_vm2, %v6306_v18, %v13302_v48  ;;  %v3705_v62 = vsel %vm1209_vm6, %v3697_v63, %v13303_v53  ;;  %v13305_v2 = vld [vmem:[#allocation427_spill] sm:$0xff]  ;;  %v13307_v18 = vld [vmem:[#allocation182_spill] sm:$0xff]  ;;  %v13309_v13 = vld [vmem:[#allocation468_spill] sm:$0xff]  ;;  %v10931_v5 = vpop.permute.xlu1 %4365 }
 0x57d   : > { %v3682_v41 = vsel %vm1182_vm3, %v3674_v0, %v13305_v2  ;;  %v3713_v36 = vsel %vm1218_vm7, %v3705_v62, %v13306_v45  ;;  %v2258_v48 = vsel %vm1182_vm3, %v2250_v19, %v13307_v18  ;;  %v13308_v53 = vld [vmem:[#allocation435_spill] sm:$0xff]  ;;  %13310 = vst [vmem:[#allocation374_spill] sm:$0xff] %v10931_v5  ;;  %v13313_v2 = vld [vmem:[#allocation476_spill] sm:$0xff]  ;;  %v13316_v18 = vld [vmem:[#allocation198_spill] sm:$0xff] }
 0x57e   : > { %4581 = vrot.lane.b32.xlu1 %v10903_v20, %s6385_s26  ;;  %4551 = vrot.lane.b32.xlu0 %v10287_v7, %s6384_s2  ;;  %v3690_v63 = vsel %vm1191_vm4, %v3682_v41, %v13308_v53  ;;  %v3721_v3 = vsel %vm1227_vm8, %v3713_v36, %v13309_v13  ;;  %v2266_v0 = vsel %vm1191_vm4, %v2258_v48, %v13311_v35  ;;  %v13312_v44 = vld [vmem:[#allocation443_spill] sm:$0xff]  ;;  %v10941_v19 = vpop.permute.xlu0 %4343  ;;  %v13318_v36 = vld [vmem:[#allocation206_spill] sm:$0xff] }
 0x57f   : > { %v3698_v62 = vsel %vm1200_vm5, %v3690_v63, %v13312_v44  ;;  %v10939_v45 = vsel %vm1236_vm9, %v3721_v3, %v13313_v2  ;;  %13315 = vst [vmem:[#allocation169_spill] sm:$0xff] %v10941_v19  ;;  %v2274_v41 = vsel %vm1200_vm5, %v2266_v0, %v13316_v18  ;;  %v13317_v53 = vld [vmem:[#allocation451_spill] sm:$0xff]  ;;  %v13320_v3 = vld [vmem:[#allocation214_spill] sm:$0xff] }
 0x580   : > { %13314 = vst [vmem:[#allocation102_spill] sm:$0xff] %v10939_v45  ;;  %v3706_v13 = vsel %vm1209_vm6, %v3698_v62, %v13317_v53  ;;  %v2282_v48 = vsel %vm1209_vm6, %v2274_v41, %v13318_v36  ;;  %v13319_v35 = vld [vmem:[#allocation459_spill] sm:$0xff]  ;;  %v10959_v62 = vpop.permute.xlu1 %4297  ;;  %v13323_v18 = vld [vmem:[#allocation222_spill] sm:$0xff] }
 0x581   : > { %v3714_v63 = vsel %vm1218_vm7, %v3706_v13, %v13319_v35  ;;  %v2290_v44 = vsel %vm1218_vm7, %v2282_v48, %v13320_v3  ;;  %v13321_v2 = vld [vmem:[#allocation467_spill] sm:$0xff]  ;;  %13322 = vst [vmem:[#allocation314_spill] sm:$0xff] %v10959_v62  ;;  %v6308_v36 = vld [vmem:[%s7434_s30 + $0x20] sm:$0xff]  ;;  %v13326_v35 = vld [vmem:[#allocation177_spill] sm:$0xff] }
 0x582   : > { %4933 = vrot.lane.b32.xlu1 %v10939_v45, %s6385_s26  ;;  %4903 = vrot.lane.b32.xlu0 %v10335_v57, %s6384_s2  ;;  %v3722_v0 = vsel %vm1227_vm8, %v3714_v63, %v13321_v2  ;;  %v2298_v53 = vsel %vm1227_vm8, %v2290_v44, %v13323_v18  ;;  %v13324_v7 = vld [vmem:[#allocation475_spill] sm:$0xff]  ;;  %v10967_v13 = vpop.permute.xlu0 %4275  ;;  %v2251_v57 = vsel %vm1173_vm2, %v6308_v36, %v13326_v35  ;;  %v13327_v48 = vld [vmem:[#allocation230_spill] sm:$0xff]  ;;  %v13328_v63 = vld [vmem:[#allocation185_spill] sm:$0xff] }
 0x583   : > { %v10965_v41 = vsel %vm1236_vm9, %v3722_v0, %v13324_v7  ;;  %13325 = vst [vmem:[#allocation382_spill] sm:$0xff] %v10967_v13  ;;  %v10974_v3 = vsel %vm1236_vm9, %v2298_v53, %v13327_v48  ;;  %v2259_v44 = vsel %vm1182_vm3, %v2251_v57, %v13328_v63  ;;  %v13329_v7 = vld [vmem:[#allocation193_spill] sm:$0xff]  ;;  %v6309_v13 = vld [vmem:[%s8934_s4 + $0x20] sm:$0xff] }
 0x584   : > { %v2267_v2 = vsel %vm1191_vm4, %v2259_v44, %v13329_v7  ;;  %v10984_v0 = vpop.permute.xlu1 %4299  ;;  %v13331_v18 = vld [vmem:[#allocation201_spill] sm:$0xff]  ;;  %v13334_v62 = vld [vmem:[#allocation422_spill] sm:$0xff] }
 0x585   : > { %13330 = vst [vmem:[#allocation108_spill] sm:$0xff] %v10984_v0  ;;  %v2275_v36 = vsel %vm1200_vm5, %v2267_v2, %v13331_v18  ;;  %v13333_v35 = vld [vmem:[#allocation209_spill] sm:$0xff]  ;;  %v3675_v57 = vsel %vm1173_vm2, %v6309_v13, %v13334_v62  ;;  %v13336_v7 = vld [vmem:[#allocation430_spill] sm:$0xff] }
 0x586   : > { %4935 = vrot.lane.b32.xlu1 %v10965_v41, %s6385_s26  ;;  %4583 = vrot.lane.b32.xlu0 %v10974_v3, %s6385_s26  ;;  %v10988_v53 = vpop.permute.xlu0 %4367  ;;  %v2283_v48 = vsel %vm1209_vm6, %v2275_v36, %v13333_v35  ;;  %v13335_v63 = vld [vmem:[#allocation217_spill] sm:$0xff]  ;;  %v3683_v0 = vsel %vm1182_vm3, %v3675_v57, %v13336_v7  ;;  %v13338_v36 = vld [vmem:[#allocation438_spill] sm:$0xff]  ;;  %v6310_v57 = vld [vmem:[%s8934_s4 + $0x30] sm:$0xff] }
 0x587   : > { %13332 = vst [vmem:[#allocation321_spill] sm:$0xff] %v10988_v53  ;;  %v2291_v44 = vsel %vm1218_vm7, %v2283_v48, %v13335_v63  ;;  %v13337_v2 = vld [vmem:[#allocation225_spill] sm:$0xff]  ;;  %v3691_v35 = vsel %vm1191_vm4, %v3683_v0, %v13338_v36  ;;  %v13344_v19 = vld [vmem:[#allocation454_spill] sm:$0xff]  ;;  %v6311_v0 = vld [vmem:[%s7434_s30 + $0x30] sm:$0xff] }
 0x588   : > { %v2299_v18 = vsel %vm1227_vm8, %v2291_v44, %v13337_v2  ;;  %v11007_v53 = vpop.permute.xlu1 %4323  ;;  %v13340_v62 = vld [vmem:[#allocation233_spill] sm:$0xff]  ;;  %v13345_v2 = vld [vmem:[#allocation176_spill] sm:$0xff] }
 0x589   : > { %13339 = vst [vmem:[#allocation357_spill] sm:$0xff] %v11007_v53  ;;  %v11011_v13 = vsel %vm1236_vm9, %v2299_v18, %v13340_v62  ;;  %v13343_v7 = vld [vmem:[#allocation421_spill] sm:$0xff]  ;;  %v2252_v18 = vsel %vm1173_vm2, %v6311_v0, %v13345_v2  ;;  %v13350_v53 = vld [vmem:[#allocation470_spill] sm:$0xff]  ;;  %v13352_v0 = vld [vmem:[#allocation192_spill] sm:$0xff] }
 0x58a   : > { %4905 = vrot.lane.b32.xlu1 %v10459_v47, %s6384_s2  ;;  %4553 = vrot.lane.b32.xlu0 %v10409_v50, %s6384_s2  ;;  %v13341_v47 = vld [vmem:[#allocation446_spill] sm:$0xff]  ;;  %v11015_v63 = vpop.permute.xlu0 %4321  ;;  %v3676_v50 = vsel %vm1173_vm2, %v6310_v57, %v13343_v7  ;;  %v13346_v36 = vld [vmem:[#allocation429_spill] sm:$0xff]  ;;  %v13348_v57 = vld [vmem:[#allocation184_spill] sm:$0xff] }
 0x58b   : > { %v3699_v48 = vsel %vm1200_vm5, %v3691_v35, %v13341_v47  ;;  %13342 = vst [vmem:[#allocation390_spill] sm:$0xff] %v11015_v63  ;;  %v3684_v62 = vsel %vm1182_vm3, %v3676_v50, %v13346_v36  ;;  %v13347_v47 = vld [vmem:[#allocation462_spill] sm:$0xff]  ;;  %v2260_v7 = vsel %vm1182_vm3, %v2252_v18, %v13348_v57  ;;  %v13353_v2 = vld [vmem:[#allocation445_spill] sm:$0xff]  ;;  %v13356_v57 = vld [vmem:[#allocation200_spill] sm:$0xff] }
 0x58c   : > { %v3707_v44 = vsel %vm1209_vm6, %v3699_v48, %v13344_v19  ;;  %v13349_v19 = vld [vmem:[#allocation437_spill] sm:$0xff]  ;;  %v11039_v5 = vpop.permute.xlu1 %4277  ;;  %v2268_v50 = vsel %vm1191_vm4, %v2260_v7, %v13352_v0  ;;  %v13354_v36 = vld [vmem:[#allocation478_spill] sm:$0xff] }
 0x58d   : > { %v3715_v35 = vsel %vm1218_vm7, %v3707_v44, %v13347_v47  ;;  %v3692_v48 = vsel %vm1191_vm4, %v3684_v62, %v13349_v19  ;;  %13351 = vst [vmem:[#allocation115_spill] sm:$0xff] %v11039_v5  ;;  %v2276_v62 = vsel %vm1200_vm5, %v2268_v50, %v13356_v57  ;;  %v13357_v19 = vld [vmem:[#allocation453_spill] sm:$0xff]  ;;  %v13363_v57 = vld [vmem:[#allocation224_spill] sm:$0xff]  ;;  %v6313_v5 = vld [vmem:[%s8934_s4 + $0x40] sm:$0xff] }
 0x58e   : > { %4585 = vrot.lane.b32.xlu1 %v11011_v13, %s6385_s26  ;;  %4555 = vrot.lane.b32.xlu0 %v10516_v54, %s6384_s2  ;;  %v3723_v63 = vsel %vm1227_vm8, %v3715_v35, %v13350_v53  ;;  %v3700_v44 = vsel %vm1200_vm5, %v3692_v48, %v13353_v2  ;;  %v11049_v18 = vpop.permute.xlu0 %4345  ;;  %v13358_v35 = vld [vmem:[#allocation208_spill] sm:$0xff]  ;;  %v13359_v0 = vld [vmem:[#allocation461_spill] sm:$0xff] }
 0x58f   : > { %v11047_v47 = vsel %vm1236_vm9, %v3723_v63, %v13354_v36  ;;  %13355 = vst [vmem:[#allocation328_spill] sm:$0xff] %v11049_v18  ;;  %v3708_v53 = vsel %vm1209_vm6, %v3700_v44, %v13357_v19  ;;  %v2284_v7 = vsel %vm1209_vm6, %v2276_v62, %v13358_v35  ;;  %v13360_v63 = vld [vmem:[#allocation216_spill] sm:$0xff]  ;;  %v13361_v36 = vld [vmem:[#allocation469_spill] sm:$0xff]  ;;  %v6312_v35 = vld [vmem:[%s7434_s30 + $0x40] sm:$0xff] }
 0x590   : > { %v3716_v48 = vsel %vm1218_vm7, %v3708_v53, %v13359_v0  ;;  %v2292_v2 = vsel %vm1218_vm7, %v2284_v7, %v13360_v63  ;;  %v11067_v44 = vpop.permute.xlu1 %4369  ;;  %v13364_v54 = vld [vmem:[#allocation477_spill] sm:$0xff]  ;;  %v13366_v0 = vld [vmem:[#allocation179_spill] sm:$0xff]  ;;  %v13367_v7 = vld [vmem:[#allocation232_spill] sm:$0xff] }
 0x591   : > { %v3724_v50 = vsel %vm1227_vm8, %v3716_v48, %v13361_v36  ;;  %13362 = vst [vmem:[#allocation365_spill] sm:$0xff] %v11067_v44  ;;  %v2300_v19 = vsel %vm1227_vm8, %v2292_v2, %v13363_v57  ;;  %v13368_v48 = vld [vmem:[#allocation187_spill] sm:$0xff] }
 0x592   : > { %4937 = vrot.lane.b32.xlu1 %v11047_v47, %s6385_s26  ;;  %4907 = vrot.lane.b32.xlu0 %v10505_v29, %s6384_s2  ;;  %v11073_v62 = vsel %vm1236_vm9, %v3724_v50, %v13364_v54  ;;  %v11075_v53 = vpop.permute.xlu0 %4347  ;;  %v2253_v29 = vsel %vm1173_vm2, %v6312_v35, %v13366_v0  ;;  %v11082_v63 = vsel %vm1236_vm9, %v2300_v19, %v13367_v7  ;;  %v13369_v54 = vld [vmem:[#allocation195_spill] sm:$0xff] }
 0x593   : > { %13365 = vst [vmem:[#allocation398_spill] sm:$0xff] %v11075_v53  ;;  %v2261_v2 = vsel %vm1182_vm3, %v2253_v29, %v13368_v48  ;;  %v13371_v57 = vld [vmem:[#allocation203_spill] sm:$0xff]  ;;  %v13374_v53 = vld [vmem:[#allocation424_spill] sm:$0xff] }
 0x594   : > { %v2269_v36 = vsel %vm1191_vm4, %v2261_v2, %v13369_v54  ;;  %v11092_v50 = vpop.permute.xlu1 %4301  ;;  %v13373_v0 = vld [vmem:[#allocation211_spill] sm:$0xff]  ;;  %v3677_v29 = vsel %vm1173_vm2, %v6313_v5, %v13374_v53  ;;  %v13376_v54 = vld [vmem:[#allocation432_spill] sm:$0xff] }
 0x595   : > { %13370 = vst [vmem:[#allocation122_spill] sm:$0xff] %v11092_v50  ;;  %v2277_v35 = vsel %vm1200_vm5, %v2269_v36, %v13371_v57  ;;  %v13375_v48 = vld [vmem:[#allocation219_spill] sm:$0xff]  ;;  %v3685_v50 = vsel %vm1182_vm3, %v3677_v29, %v13376_v54  ;;  %v6314_v54 = vld [vmem:[%s8934_s4 + $0x50] sm:$0xff] }
 0x596   : > { %4939 = vrot.lane.b32.xlu1 %v11073_v62, %s6385_s26  ;;  %4587 = vrot.lane.b32.xlu0 %v11082_v63, %s6385_s26  ;;  %v11096_v19 = vpop.permute.xlu0 %4279  ;;  %v2285_v7 = vsel %vm1209_vm6, %v2277_v35, %v13373_v0  ;;  %v13377_v36 = vld [vmem:[#allocation227_spill] sm:$0xff]  ;;  %v13378_v35 = vld [vmem:[#allocation440_spill] sm:$0xff] }
 0x597   : > { %13372 = vst [vmem:[#allocation335_spill] sm:$0xff] %v11096_v19  ;;  %v2293_v2 = vsel %vm1218_vm7, %v2285_v7, %v13375_v48  ;;  %v3693_v0 = vsel %vm1191_vm4, %v3685_v50, %v13378_v35  ;;  %v13380_v53 = vld [vmem:[#allocation235_spill] sm:$0xff]  ;;  %v13381_v7 = vld [vmem:[#allocation448_spill] sm:$0xff]  ;;  %v13385_v35 = vld [vmem:[#allocation178_spill] sm:$0xff] }
 0x598   : > { %v2301_v57 = vsel %vm1227_vm8, %v2293_v2, %v13377_v36  ;;  %v11115_v5 = vpop.permute.xlu1 %4303  ;;  %v3701_v48 = vsel %vm1200_vm5, %v3693_v0, %v13381_v7  ;;  %v13384_v2 = vld [vmem:[#allocation456_spill] sm:$0xff]  ;;  %v13390_v44 = vld [vmem:[#allocation439_spill] sm:$0xff] }
 0x599   : > { %13379 = vst [vmem:[#allocation373_spill] sm:$0xff] %v11115_v5  ;;  %v3709_v36 = vsel %vm1209_vm6, %v3701_v48, %v13384_v2  ;;  %v6315_v50 = vld [vmem:[%s7434_s30 + $0x50] sm:$0xff]  ;;  %v13389_v2 = vld [vmem:[#allocation186_spill] sm:$0xff] }
 0x59a   : > { %4909 = vrot.lane.b32.xlu1 %v10643_v9, %s6384_s2  ;;  %4557 = vrot.lane.b32.xlu0 %v10593_v28, %s6384_s2  ;;  %v11119_v9 = vsel %vm1236_vm9, %v2301_v57, %v13380_v53  ;;  %v11123_v29 = vpop.permute.xlu0 %4371  ;;  %v13383_v28 = vld [vmem:[#allocation423_spill] sm:$0xff]  ;;  %v2254_v57 = vsel %vm1173_vm2, %v6315_v50, %v13385_v35  ;;  %v13387_v7 = vld [vmem:[#allocation464_spill] sm:$0xff] }
 0x59b   : > { %13382 = vst [vmem:[#allocation406_spill] sm:$0xff] %v11123_v29  ;;  %v3678_v19 = vsel %vm1173_vm2, %v6314_v54, %v13383_v28  ;;  %v13386_v53 = vld [vmem:[#allocation431_spill] sm:$0xff]  ;;  %v3717_v5 = vsel %vm1218_vm7, %v3709_v36, %v13387_v7  ;;  %v6316_v28 = vld [vmem:[%s6473_s24] sm:$0xff]  ;;  %v2262_v29 = vsel %vm1182_vm3, %v2254_v57, %v13389_v2  ;;  %v13391_v50 = vld [vmem:[#allocation472_spill] sm:$0xff] }
 0x59c   : > { %v3686_v0 = vsel %vm1182_vm3, %v3678_v19, %v13386_v53  ;;  %v13388_v54 = vld [vmem:[#allocation3_spill] sm:$0xff]  ;;  %v3725_v35 = vsel %vm1227_vm8, %v3717_v5, %v13391_v50  ;;  %v11150_v19 = vpop.permute.xlu1 %4457  ;;  %v6317_v53 = vld [vmem:[%s6473_s24 + $0x10] sm:$0xff]  ;;  %v13392_v36 = vld [vmem:[#allocation5_spill] sm:$0xff] }
 0x59d   : > { %v1174_v48 = vsel %vm1173_vm2, %v6316_v28, %v13388_v54  ;;  %v3694_v18 = vsel %vm1191_vm4, %v3686_v0, %v13390_v44  ;;  %v1175_v7 = vsel %vm1173_vm2, %v6317_v53, %v13392_v36  ;;  %v13395_v54 = vld [vmem:[#allocation480_spill] sm:$0xff]  ;;  %v13397_v0 = vld [vmem:[#allocation10_spill] sm:$0xff]  ;;  %v13398_v2 = vld [vmem:[#allocation11_spill] sm:$0xff] }
 0x59e   : > { %4589 = vrot.lane.b32.xlu1 %v11119_v9, %s6385_s26  ;;  %4559 = vrot.lane.b32.xlu0 %v10700_v55, %s6384_s2  ;;  %v13393_v55 = vld [vmem:[#allocation194_spill] sm:$0xff]  ;;  %v3702_v28 = vsel %vm1200_vm5, %v3694_v18, %v13394_v40  ;;  %v11161_v57 = vsel %vm1236_vm9, %v3725_v35, %v13395_v54  ;;  %v11163_v44 = vpop.permute.xlu0 %4325  ;;  %v1184_v5 = vsel %vm1182_vm3, %v1175_v7, %v13397_v0  ;;  %v13402_v35 = vld [vmem:[#allocation19_spill] sm:$0xff] }
 0x59f   : > { %v2270_v6 = vsel %vm1191_vm4, %v2262_v29, %v13393_v55  ;;  %13396 = vst [vmem:[#allocation129_spill] sm:$0xff] %v11163_v44  ;;  %v1183_v50 = vsel %vm1182_vm3, %v1174_v48, %v13398_v2  ;;  %v13399_v53 = vld [vmem:[#allocation202_spill] sm:$0xff]  ;;  %v13400_v55 = vld [vmem:[#allocation455_spill] sm:$0xff] }
 0x5a0   : > { %v2278_v36 = vsel %vm1200_vm5, %v2270_v6, %v13399_v53  ;;  %v3710_v29 = vsel %vm1209_vm6, %v3702_v28, %v13400_v55  ;;  %v13401_v40 = vld [vmem:[#allocation18_spill] sm:$0xff]  ;;  %v1192_v54 = vsel %vm1191_vm4, %v1183_v50, %v13402_v35  ;;  %v13404_v44 = vld [vmem:[#allocation463_spill] sm:$0xff]  ;;  %v11193_v35 = vpop.permute.xlu1 %4327 }
 0x5a1   : > { %v1193_v18 = vsel %vm1191_vm4, %v1184_v5, %v13401_v40  ;;  %v13403_v7 = vld [vmem:[#allocation210_spill] sm:$0xff]  ;;  %v3718_v48 = vsel %vm1218_vm7, %v3710_v29, %v13404_v44  ;;  %v13406_v2 = vld [vmem:[#allocation27_spill] sm:$0xff]  ;;  %13409 = vst [vmem:[#allocation342_spill] sm:$0xff] %v11193_v35 }
 0x5a2   : > { %4941 = vrot.lane.b32.xlu1 %v11161_v57, %s6385_s26  ;;  %v2286_v0 = vsel %vm1209_vm6, %v2278_v36, %v13403_v7  ;;  %4911 = vrot.lane.b32.xlu0 %v10689_v56, %s6384_s2  ;;  %v13405_v6 = vld [vmem:[#allocation26_spill] sm:$0xff]  ;;  %v1201_v53 = vsel %vm1200_vm5, %v1192_v54, %v13406_v2  ;;  %v13408_v40 = vld [vmem:[#allocation471_spill] sm:$0xff]  ;;  %v13411_v7 = vld [vmem:[#allocation181_spill] sm:$0xff] }
 0x5a3   : > { %v1202_v28 = vsel %vm1200_vm5, %v1193_v18, %v13405_v6  ;;  %v13407_v55 = vld [vmem:[#allocation218_spill] sm:$0xff]  ;;  %v3726_v50 = vsel %vm1227_vm8, %v3718_v48, %v13408_v40  ;;  %v13413_v54 = vld [vmem:[#allocation479_spill] sm:$0xff] }
 0x5a4   : > { %v2294_v5 = vsel %vm1218_vm7, %v2286_v0, %v13407_v55  ;;  %v13410_v36 = vld [vmem:[#allocation34_spill] sm:$0xff]  ;;  %v11204_v2 = vsel %vm1236_vm9, %v3726_v50, %v13413_v54  ;;  %v11206_v0 = vpop.permute.xlu0 %4813  ;;  %v13414_v48 = vld [vmem:[#allocation35_spill] sm:$0xff] }
 0x5a5   : > { %v1211_v44 = vsel %vm1209_vm6, %v1202_v28, %v13410_v36  ;;  %v6318_v29 = vld [vmem:[%s7434_s30 + $0x60] sm:$0xff]  ;;  %v1210_v55 = vsel %vm1209_vm6, %v1201_v53, %v13414_v48  ;;  %v13416_v36 = vld [vmem:[#allocation189_spill] sm:$0xff]  ;;  %v6319_v48 = vld [vmem:[%s7434_s30 + $0x70] sm:$0xff] }
 0x5a6   : > { %v2255_v56 = vsel %vm1173_vm2, %v6318_v29, %v13411_v7  ;;  %v13412_v18 = vld [vmem:[#allocation226_spill] sm:$0xff]  ;;  %4943 = vrot.lane.b32.xlu1 %v11204_v2, %s6385_s26 }
 0x5a7   : > { %v2302_v6 = vsel %vm1227_vm8, %v2294_v5, %v13412_v18  ;;  %v13415_v40 = vld [vmem:[#allocation42_spill] sm:$0xff]  ;;  %v2263_v35 = vsel %vm1182_vm3, %v2255_v56, %v13416_v36  ;;  %v13418_v5 = vld [vmem:[#allocation43_spill] sm:$0xff]  ;;  %v13420_v18 = vld [vmem:[#allocation197_spill] sm:$0xff] }
 0x5a8   : > { %v1220_v28 = vsel %vm1218_vm7, %v1211_v44, %v13415_v40  ;;  %v11216_v29 = vsel %vm1236_vm9, %v2302_v6, %v13417_v1  ;;  %v1219_v50 = vsel %vm1218_vm7, %v1210_v55, %v13418_v5  ;;  %v13419_v7 = vld [vmem:[#allocation50_spill] sm:$0xff]  ;;  %v2271_v44 = vsel %vm1191_vm4, %v2263_v35, %v13420_v18  ;;  %v13421_v56 = vld [vmem:[#allocation51_spill] sm:$0xff]  ;;  %v13423_v40 = vld [vmem:[#allocation180_spill] sm:$0xff]  ;;  %v11239_v5 = vpop.permute.xlu1 %4459  ;;  %v11250_v52 = vpop.permute.xlu0 %4349 }
 0x5a9   : > { %v1229_v53 = vsel %vm1227_vm8, %v1220_v28, %v13419_v7  ;;  %4591 = vrot.lane.b32.xlu0 %v11216_v29, %s6385_s26  ;;  %v1228_v1 = vsel %vm1227_vm8, %v1219_v50, %v13421_v56  ;;  %v13422_v6 = vld [vmem:[#allocation58_spill] sm:$0xff]  ;;  %v2256_v55 = vsel %vm1173_vm2, %v6319_v48, %v13423_v40  ;;  %v13424_v36 = vld [vmem:[#allocation205_spill] sm:$0xff]  ;;  %v13425_v35 = vld [vmem:[#allocation59_spill] sm:$0xff] }
 0x5aa   : > { %v11232_v54 = vsel %vm1236_vm9, %v1229_v53, %v13422_v6  ;;  %v2279_v28 = vsel %vm1200_vm5, %v2271_v44, %v13424_v36  ;;  %v1237_v7 = vsel %vm1236_vm9, %v1228_v1, %v13425_v35  ;;  %v13426_v18 = vld [vmem:[#allocation188_spill] sm:$0xff]  ;;  %v13427_v50 = vld [vmem:[#allocation213_spill] sm:$0xff]  ;;  %v6320_v53 = vld [vmem:[%s7809_s28] sm:$0xff]  ;;  %4913 = vrot.lane.b32.xlu1 %v10827_v10, %s6384_s2 }
 0x5ab   : > { %v2264_v15 = vsel %vm1182_vm3, %v2256_v55, %v13426_v18  ;;  %v2287_v56 = vsel %vm1209_vm6, %v2279_v28, %v13427_v50  ;;  %v13428_v6 = vld [vmem:[#allocation239_spill] sm:$0xff]  ;;  %v13429_v48 = vld [vmem:[#allocation221_spill] sm:$0xff]  ;;  %v13431_v1 = vld [vmem:[#allocation426_spill] sm:$0xff] }
 0x5ac   : > { %v2605_v30 = vsel %vm1173_vm2, %v6320_v53, %v13428_v6  ;;  %v2295_v44 = vsel %vm1218_vm7, %v2287_v56, %v13429_v48  ;;  %v13430_v40 = vld [vmem:[#allocation247_spill] sm:$0xff]  ;;  %v3679_v35 = vsel %vm1173_vm2, %v6321_v16, %v13431_v1  ;;  %v13432_v55 = vld [vmem:[#allocation229_spill] sm:$0xff]  ;;  %v13434_v53 = vld [vmem:[#allocation434_spill] sm:$0xff]  ;;  %v11277_v1 = vpop.permute.xlu1 %4815 }
 0x5ad   : > { %v2613_v36 = vsel %vm1182_vm3, %v2605_v30, %v13430_v40  ;;  %v2303_v28 = vsel %vm1227_vm8, %v2295_v44, %v13432_v55  ;;  %v13433_v18 = vld [vmem:[#allocation255_spill] sm:$0xff]  ;;  %v3687_v56 = vsel %vm1182_vm3, %v3679_v35, %v13434_v53  ;;  %4561 = vrot.lane.b32.xlu0 %v10777_v12, %s6384_s2  ;;  %v13435_v30 = vld [vmem:[#allocation237_spill] sm:$0xff]  ;;  %v13437_v40 = vld [vmem:[#allocation442_spill] sm:$0xff]  ;;  %v4514_v53 = vsel %vm4513_vm10, %v1237_v7, %v11150_v19 }
 0x5ae   : > { %v2621_v50 = vsel %vm1191_vm4, %v2613_v36, %v13433_v18  ;;  %v11271_v16 = vsel %vm1236_vm9, %v2303_v28, %v13435_v30  ;;  %v13436_v6 = vld [vmem:[#allocation263_spill] sm:$0xff]  ;;  %v3695_v44 = vsel %vm1191_vm4, %v3687_v56, %v13437_v40  ;;  %v13439_v55 = vld [vmem:[#allocation450_spill] sm:$0xff]  ;;  %v4490_v28 = vpop.permute.xlu0 %4489  ;;  %v13441_v10 = vld [vmem:[#allocation425_spill] sm:$0xff] }
 0x5af   : > { %v2629_v48 = vsel %vm1200_vm5, %v2621_v50, %v13436_v6  ;;  %v13438_v36 = vld [vmem:[#allocation271_spill] sm:$0xff]  ;;  %v3703_v18 = vsel %vm1200_vm5, %v3695_v44, %v13439_v55  ;;  %v6322_v6 = vld [vmem:[%s8934_s4 + $0x70] sm:$0xff]  ;;  %v13442_v40 = vld [vmem:[#allocation458_spill] sm:$0xff]  ;;  %4593 = vrot.lane.b32.xlu1 %v11271_v16, %s6385_s26 }
 0x5b0   : > { %v2637_v35 = vsel %vm1209_vm6, %v2629_v48, %v13438_v36  ;;  %v13440_v30 = vld [vmem:[#allocation279_spill] sm:$0xff]  ;;  %v3680_v56 = vsel %vm1173_vm2, %v6322_v6, %v13441_v10  ;;  %v3711_v12 = vsel %vm1209_vm6, %v3703_v18, %v13442_v40  ;;  %v4523_v48 = vsel %vm4522_vm11, %v4514_v53, %v4490_v28  ;;  %v13444_v7 = vld [vmem:[#allocation433_spill] sm:$0xff]  ;;  %v13446_v18 = vld [vmem:[#allocation196_spill] sm:$0xff] }
 0x5b1   : > { %v2645_v50 = vsel %vm1218_vm7, %v2637_v35, %v13440_v30  ;;  %v13443_v44 = vld [vmem:[#allocation287_spill] sm:$0xff]  ;;  %v3688_v36 = vsel %vm1182_vm3, %v3680_v56, %v13444_v7  ;;  %v13445_v35 = vld [vmem:[#allocation466_spill] sm:$0xff]  ;;  %4563 = vrot.lane.b32.xlu0 %v10863_v27, %s6384_s2  ;;  %v4532_v10 = vsel %vm4531_vm12, %v4523_v48, 1.0  ;;  %v2272_v30 = vsel %vm1191_vm4, %v2264_v15, %v13446_v18  ;;  %v13448_v28 = vld [vmem:[#allocation441_spill] sm:$0xff] }
 0x5b2   : > { %v2653_v19 = vsel %vm1227_vm8, %v2645_v50, %v13443_v44  ;;  %v3719_v55 = vsel %vm1218_vm7, %v3711_v12, %v13445_v35  ;;  %v13447_v6 = vld [vmem:[#allocation295_spill] sm:$0xff]  ;;  %v3696_v50 = vsel %vm1191_vm4, %v3688_v36, %v13448_v28  ;;  %v13449_v40 = vld [vmem:[#allocation474_spill] sm:$0xff]  ;;  %6107 = vmatprep.mubr.msk.f32.mxu0 %vm4540_vm13, %v4532_v10  ;;  %v11315_v12 = vpop.permute.xlu1 %4351  ;;  %v6323_v44 = vld [vmem:[%s7809_s28 + $0x10] sm:$0xff] }
 0x5b3   : > { %v11308_v53 = vsel %vm1236_vm9, %v2653_v19, %v13447_v6  ;;  %v3727_v56 = vsel %vm1227_vm8, %v3719_v55, %v13449_v40  ;;  %v13450_v7 = vld [vmem:[#allocation238_spill] sm:$0xff]  ;;  %v13451_v35 = vld [vmem:[#allocation449_spill] sm:$0xff]  ;;  %v4846_v55 = vpop.permute.xlu0 %4845  ;;  %v13453_v6 = vld [vmem:[#allocation204_spill] sm:$0xff] }
 0x5b4   : > { %v2606_v48 = vsel %vm1173_vm2, %v6323_v44, %v13450_v7  ;;  %v3704_v15 = vsel %vm1200_vm5, %v3696_v50, %v13451_v35  ;;  %v13452_v18 = vld [vmem:[#allocation482_spill] sm:$0xff]  ;;  %v4869_v36 = vsel %vm4513_vm10, %v11308_v53, %v11206_v0  ;;  %v2280_v10 = vsel %vm1200_vm5, %v2272_v30, %v13453_v6  ;;  %v13455_v27 = vld [vmem:[#allocation457_spill] sm:$0xff] }
 0x5b5   : > { %v11324_v19 = vsel %vm1236_vm9, %v3727_v56, %v13452_v18  ;;  %v13454_v28 = vld [vmem:[#allocation246_spill] sm:$0xff]  ;;  %v3712_v44 = vsel %vm1209_vm6, %v3704_v15, %v13455_v27  ;;  %v4877_v50 = vsel %vm4522_vm11, %v4869_v36, %v4846_v55  ;;  %v13456_v56 = vld [vmem:[#allocation212_spill] sm:$0xff]  ;;  %v13458_v18 = vld [vmem:[#allocation465_spill] sm:$0xff]  ;;  %4915 = vrot.lane.b32.xlu0 %v10857_v24, %s6384_s2 }
 0x5b6   : > { %v2614_v40 = vsel %vm1182_vm3, %v2606_v48, %v13454_v28  ;;  %4945 = vrot.lane.b32.xlu1 %v11324_v19, %s6385_s26  ;;  %v2288_v7 = vsel %vm1209_vm6, %v2280_v10, %v13456_v56  ;;  %v13457_v35 = vld [vmem:[#allocation254_spill] sm:$0xff]  ;;  %v3720_v30 = vsel %vm1218_vm7, %v3712_v44, %v13458_v18  ;;  %v4885_v27 = vsel %vm4531_vm12, %v4877_v50, 1.0  ;;  %v13459_v48 = vld [vmem:[#allocation220_spill] sm:$0xff]  ;;  %v13461_v55 = vld [vmem:[#allocation473_spill] sm:$0xff] }
 0x5b7   : > { %v2622_v0 = vsel %vm1191_vm4, %v2614_v40, %v13457_v35  ;;  %v2296_v15 = vsel %vm1218_vm7, %v2288_v7, %v13459_v48  ;;  %v13460_v6 = vld [vmem:[#allocation262_spill] sm:$0xff]  ;;  %v3728_v10 = vsel %vm1227_vm8, %v3720_v30, %v13461_v55  ;;  %v4515_v28 = vsel %vm4513_vm10, %v11232_v54, %v11239_v5  ;;  %6155 = vmatprep.mubr.msk.f32.mxu1 %vm4540_vm13, %v4885_v27  ;;  %v4492_v40 = vpop.permute.xlu1 %4491  ;;  %v13462_v44 = vld [vmem:[#allocation228_spill] sm:$0xff]  ;;  %v13464_v7 = vld [vmem:[#allocation481_spill] sm:$0xff]  ;;  %v11366_v30 = vpop.permute.xlu0 %4373 }
 0x5b8   : > { %v2630_v36 = vsel %vm1200_vm5, %v2622_v0, %v13460_v6  ;;  %v2304_v56 = vsel %vm1227_vm8, %v2296_v15, %v13462_v44  ;;  %v13463_v50 = vld [vmem:[#allocation270_spill] sm:$0xff]  ;;  %v11363_v18 = vsel %vm1236_vm9, %v3728_v10, %v13464_v7  ;;  %v4524_v0 = vsel %vm4522_vm11, %v4515_v28, %v4492_v40  ;;  %v13466_v5 = vld [vmem:[#allocation236_spill] sm:$0xff]  ;;  %v13468_v10 = vld [vmem:[#allocation13_spill] sm:$0xff] }
 0x5b9   : > { %v2638_v35 = vsel %vm1209_vm6, %v2630_v36, %v13463_v50  ;;  %v6324_v48 = vld [vmem:[%s6473_s24 + $0x20] sm:$0xff]  ;;  %v11373_v27 = vsel %vm1236_vm9, %v2304_v56, %v13466_v5  ;;  %v4533_v55 = vsel %vm4531_vm12, %v4524_v0, 1.0  ;;  %v13470_v56 = vld [vmem:[#allocation21_spill] sm:$0xff]  ;;  %v6329_v24 = vld [vmem:[%s9309_s5 + $0x10] sm:$0xff] }
 0x5ba   : > { %v13465_v6 = vld [vmem:[#allocation2_spill] sm:$0xff]  ;;  %4947 = vrot.lane.b32.xlu1 %v11363_v18, %s6385_s26  ;;  %4595 = vrot.lane.b32.xlu0 %v11373_v27, %s6385_s26 }
 0x5bb   : > { %v1176_v54 = vsel %vm1173_vm2, %v6324_v48, %v13465_v6  ;;  %v13467_v15 = vld [vmem:[#allocation278_spill] sm:$0xff]  ;;  %6108 = vmatmul.mubr.msk.f32.vlgmr.msra.gmra.mxu0 %vm4540_vm13, %v4533_v55  ;;  %v11393_v0 = vpop.permute.xlu1 %4375  ;;  %v13473_v48 = vld [vmem:[#allocation29_spill] sm:$0xff]  ;;  %v4848_v5 = vpop.permute.xlu0 %4847 }
 0x5bc   : > { %v2646_v36 = vsel %vm1218_vm7, %v2638_v35, %v13467_v15  ;;  %v1185_v28 = vsel %vm1182_vm3, %v1176_v54, %v13468_v10  ;;  %v13469_v40 = vld [vmem:[#allocation286_spill] sm:$0xff]  ;;  %13472 = vst [vmem:[#allocation381_spill] sm:$0xff] %v11393_v0  ;;  %v13474_v15 = vld [vmem:[#allocation37_spill] sm:$0xff]  ;;  %v13475_v10 = vld [vmem:[#allocation484_spill] sm:$0xff] }
 0x5bd   : > { %v2654_v44 = vsel %vm1227_vm8, %v2646_v36, %v13469_v40  ;;  %v1194_v50 = vsel %vm1191_vm4, %v1185_v28, %v13470_v56  ;;  %v13471_v35 = vld [vmem:[#allocation294_spill] sm:$0xff]  ;;  %v13476_v56 = vld [vmem:[#allocation4_spill] sm:$0xff]  ;;  %v13487_v0 = vld [vmem:[#allocation483_spill] sm:$0xff] }
 0x5be   : > { %v11391_v7 = vsel %vm1236_vm9, %v2654_v44, %v13471_v35  ;;  %v1203_v6 = vsel %vm1200_vm5, %v1194_v50, %v13473_v48  ;;  %v6325_v55 = vld [vmem:[%s9309_s5] sm:$0xff]  ;;  %4989 = vrot.lane.b32.xlu1 %v10939_v45, %s6384_s2  ;;  %v6326_v44 = vld [vmem:[%s6473_s24 + $0x30] sm:$0xff]  ;;  %v13477_v35 = vld [vmem:[#allocation45_spill] sm:$0xff]  ;;  %4637 = vrot.lane.b32.xlu0 %v10903_v20, %s6384_s2 }
 0x5bf   : > { %v4870_v54 = vsel %vm4513_vm10, %v11391_v7, %v11277_v1  ;;  %v1212_v36 = vsel %vm1209_vm6, %v1203_v6, %v13474_v15  ;;  %v4029_v28 = vsel %vm1173_vm2, %v6325_v55, %v13475_v10  ;;  %v1177_v50 = vsel %vm1173_vm2, %v6326_v44, %v13476_v56  ;;  %v13478_v48 = vld [vmem:[#allocation492_spill] sm:$0xff]  ;;  %v13480_v55 = vld [vmem:[#allocation53_spill] sm:$0xff]  ;;  %v6327_v44 = vld [vmem:[%s7809_s28 + $0x20] sm:$0xff] }
 0x5c0   : > { %v4878_v40 = vsel %vm4522_vm11, %v4870_v54, %v4848_v5  ;;  %v1221_v1 = vsel %vm1218_vm7, %v1212_v36, %v13477_v35  ;;  %v4037_v6 = vsel %vm1182_vm3, %v4029_v28, %v13478_v48  ;;  %v13479_v54 = vld [vmem:[#allocation12_spill] sm:$0xff]  ;;  %v13481_v56 = vld [vmem:[#allocation241_spill] sm:$0xff]  ;;  %v4818_v28 = vpop.permute.xlu1 %4817 }
 0x5c1   : > { %v4886_v15 = vsel %vm4531_vm12, %v4878_v40, 1.0  ;;  %v1186_v5 = vsel %vm1182_vm3, %v1177_v50, %v13479_v54  ;;  %v1230_v10 = vsel %vm1227_vm8, %v1221_v1, %v13480_v55  ;;  %v2607_v36 = vsel %vm1173_vm2, %v6327_v44, %v13481_v56  ;;  %v13482_v40 = vld [vmem:[#allocation20_spill] sm:$0xff]  ;;  %v13483_v45 = vld [vmem:[#allocation61_spill] sm:$0xff]  ;;  %v4462_v55 = vpop.permute.xlu0 %4461 }
 0x5c2   : > { %v4045_v35 = vsel %vm1191_vm4, %v4037_v6, %v9839_v46  ;;  %6156 = vmatmul.mubr.msk.f32.vlgmr.msra.gmra.mxu1 %vm4540_vm13, %v4886_v15  ;;  %v1195_v48 = vsel %vm1191_vm4, %v1186_v5, %v13482_v40  ;;  %v1239_v20 = vsel %vm1236_vm9, %v1230_v10, %v13483_v45  ;;  %v13484_v50 = vld [vmem:[#allocation249_spill] sm:$0xff]  ;;  %v6328_v44 = vld [vmem:[%s7809_s28 + $0x30] sm:$0xff]  ;;  %v4030_v5 = vsel %vm1173_vm2, %v6329_v24, %v13487_v0  ;;  %v13490_v40 = vld [vmem:[#allocation491_spill] sm:$0xff] }
 0x5c3   : > { %v2615_v54 = vsel %vm1182_vm3, %v2607_v36, %v13484_v50  ;;  %v4053_v1 = vsel %vm1200_vm5, %v4045_v35, %v9884_v4  ;;  %v13485_v56 = vld [vmem:[#allocation240_spill] sm:$0xff]  ;;  %v13486_v6 = vld [vmem:[#allocation257_spill] sm:$0xff]  ;;  %4669 = vrot.lane.b32.xlu1 %v11308_v53, %s6385_s26  ;;  %v4038_v50 = vsel %vm1182_vm3, %v4030_v5, %v13490_v40  ;;  %4639 = vrot.lane.b32.xlu0 %v10974_v3, %s6384_s2 }
 0x5c4   : > { %v2608_v46 = vsel %vm1173_vm2, %v6328_v44, %v13485_v56  ;;  %v2623_v15 = vsel %vm1191_vm4, %v2615_v54, %v13486_v6  ;;  %v4061_v45 = vsel %vm1209_vm6, %v4053_v1, %v9919_v59  ;;  %v13488_v10 = vld [vmem:[#allocation248_spill] sm:$0xff]  ;;  %v13489_v36 = vld [vmem:[#allocation265_spill] sm:$0xff]  ;;  %v4046_v0 = vsel %vm1191_vm4, %v4038_v50, %v9834_v34  ;;  %v4494_v56 = vpop.permute.xlu1 %4493 }
 0x5c5   : > { %v2616_v4 = vsel %vm1182_vm3, %v2608_v46, %v13488_v10  ;;  %v2631_v35 = vsel %vm1200_vm5, %v2623_v15, %v13489_v36  ;;  %v4069_v54 = vsel %vm1218_vm7, %v4061_v45, %v9948_v49  ;;  %v13491_v24 = vld [vmem:[#allocation273_spill] sm:$0xff]  ;;  %v4516_v44 = vsel %vm4513_vm10, %v1239_v20, %v4462_v55  ;;  %v4464_v45 = vpop.permute.xlu0 %4463  ;;  %v13493_v34 = vld [vmem:[#allocation256_spill] sm:$0xff] }
 0x5c6   : > { %v2639_v59 = vsel %vm1209_vm6, %v2631_v35, %v13491_v24  ;;  %v4077_v1 = vsel %vm1227_vm8, %v4069_v54, %v9980_v43  ;;  %v13492_v46 = vld [vmem:[#allocation281_spill] sm:$0xff]  ;;  %v4054_v49 = vsel %vm1200_vm5, %v4046_v0, %v9882_v22  ;;  %v4525_v5 = vsel %vm4522_vm11, %v4516_v44, %v4494_v56  ;;  %v13495_v22 = vld [vmem:[#allocation264_spill] sm:$0xff] }
 0x5c7   : > { %v2647_v6 = vsel %vm1218_vm7, %v2639_v59, %v13492_v46  ;;  %v11471_v15 = vsel %vm1236_vm9, %v4077_v1, %v10021_v23  ;;  %v2624_v10 = vsel %vm1191_vm4, %v2616_v4, %v13493_v34  ;;  %v13494_v43 = vld [vmem:[#allocation289_spill] sm:$0xff]  ;;  %v4062_v55 = vsel %vm1209_vm6, %v4054_v49, %v9917_v26  ;;  %4991 = vrot.lane.b32.xlu0 %v10965_v41, %s6384_s2  ;;  %v13497_v26 = vld [vmem:[#allocation28_spill] sm:$0xff]  ;;  %v13501_v34 = vld [vmem:[#allocation7_spill] sm:$0xff] }
 0x5c8   : > { %v2655_v20 = vsel %vm1227_vm8, %v2647_v6, %v13494_v43  ;;  %v4534_v36 = vsel %vm4531_vm12, %v4525_v5, 1.0  ;;  %5021 = vrot.lane.b32.xlu1 %v11471_v15, %s6385_s26  ;;  %v2632_v23 = vsel %vm1200_vm5, %v2624_v10, %v13495_v22  ;;  %v13496_v35 = vld [vmem:[#allocation297_spill] sm:$0xff]  ;;  %v4070_v4 = vsel %vm1218_vm7, %v4062_v55, %v9946_v60  ;;  %v13498_v54 = vld [vmem:[#allocation272_spill] sm:$0xff]  ;;  %v4850_v1 = vpop.permute.xlu1 %4849  ;;  %v6330_v5 = vld [vmem:[%s6473_s24 + $0x40] sm:$0xff] }
 0x5c9   : > { %v11487_v40 = vsel %vm1236_vm9, %v2655_v20, %v13496_v35  ;;  %6110 = vmatprep.mubr.msk.f32.mxu0 %vm4540_vm13, %v4534_v36  ;;  %v1204_v50 = vsel %vm1200_vm5, %v1195_v48, %v13497_v26  ;;  %v2640_v24 = vsel %vm1209_vm6, %v2632_v23, %v13498_v54  ;;  %v4078_v59 = vsel %vm1227_vm8, %v4070_v4, %v9978_v37  ;;  %v13499_v44 = vld [vmem:[#allocation36_spill] sm:$0xff]  ;;  %v4820_v49 = vpop.permute.xlu0 %4819  ;;  %v13507_v26 = vld [vmem:[#allocation23_spill] sm:$0xff] }
 0x5ca   : > { %v4871_v0 = vsel %vm4513_vm10, %v11487_v40, %v4818_v28  ;;  %v1213_v60 = vsel %vm1209_vm6, %v1204_v50, %v13499_v44  ;;  %v13500_v56 = vld [vmem:[#allocation280_spill] sm:$0xff]  ;;  %v11508_v6 = vsel %vm1236_vm9, %v4078_v59, %v10019_v21  ;;  %v1178_v37 = vsel %vm1173_vm2, %v6330_v5, %v13501_v34  ;;  %v13504_v21 = vld [vmem:[#allocation15_spill] sm:$0xff]  ;;  %v6331_v34 = vld [vmem:[%s9309_s5 + $0x20] sm:$0xff] }
 0x5cb   : > { %v2648_v46 = vsel %vm1218_vm7, %v2640_v24, %v13500_v56  ;;  %v4879_v48 = vsel %vm4522_vm11, %v4871_v0, %v4850_v1  ;;  %v13502_v10 = vld [vmem:[#allocation44_spill] sm:$0xff]  ;;  %v1187_v36 = vsel %vm1182_vm3, %v1178_v37, %v13504_v21  ;;  %4671 = vrot.lane.b32.xlu0 %v11391_v7, %s6385_s26  ;;  %v13509_v1 = vld [vmem:[#allocation31_spill] sm:$0xff]  ;;  %v13511_v37 = vld [vmem:[#allocation486_spill] sm:$0xff] }
 0x5cc   : > { %v1222_v28 = vsel %vm1218_vm7, %v1213_v60, %v13502_v10  ;;  %v13503_v43 = vld [vmem:[#allocation288_spill] sm:$0xff]  ;;  %v4887_v55 = vsel %vm4531_vm12, %v4879_v48, 1.0  ;;  %5023 = vrot.lane.b32.xlu1 %v11508_v6, %s6385_s26  ;;  %v1196_v50 = vsel %vm1191_vm4, %v1187_v36, %v13507_v26  ;;  %v4852_v0 = vpop.permute.xlu1 %4851  ;;  %v13510_v48 = vld [vmem:[#allocation39_spill] sm:$0xff]  ;;  %v4031_v10 = vsel %vm1173_vm2, %v6331_v34, %v13511_v37  ;;  %v13514_v36 = vld [vmem:[#allocation494_spill] sm:$0xff] }
 0x5cd   : > { %v2656_v20 = vsel %vm1227_vm8, %v2648_v46, %v13503_v43  ;;  %v13505_v22 = vld [vmem:[#allocation52_spill] sm:$0xff]  ;;  %6158 = vmatprep.mubr.msk.f32.mxu1 %vm4540_vm13, %v4887_v55  ;;  %v1205_v44 = vsel %vm1200_vm5, %v1196_v50, %v13509_v1  ;;  %v4496_v46 = vpop.permute.xlu0 %4495  ;;  %v13513_v55 = vld [vmem:[#allocation47_spill] sm:$0xff] }
 0x5ce   : > { %v1231_v23 = vsel %vm1227_vm8, %v1222_v28, %v13505_v22  ;;  %v13506_v35 = vld [vmem:[#allocation296_spill] sm:$0xff]  ;;  %v1214_v5 = vsel %vm1209_vm6, %v1205_v44, %v13510_v48  ;;  %v4039_v22 = vsel %vm1182_vm3, %v4031_v10, %v13514_v36  ;;  %v13516_v50 = vld [vmem:[#allocation55_spill] sm:$0xff] }
 0x5cf   : > { %v11527_v4 = vsel %vm1236_vm9, %v2656_v20, %v13506_v35  ;;  %v13508_v54 = vld [vmem:[#allocation60_spill] sm:$0xff]  ;;  %v1223_v21 = vsel %vm1218_vm7, %v1214_v5, %v13513_v55  ;;  %4641 = vrot.lane.b32.xlu0 %v11011_v13, %s6384_s2  ;;  %v13515_v35 = vld [vmem:[#allocation14_spill] sm:$0xff]  ;;  %v4047_v1 = vsel %vm1191_vm4, %v4039_v22, %v9854_v33  ;;  %v13520_v5 = vld [vmem:[#allocation251_spill] sm:$0xff] }
 0x5d0   : > { %v1240_v24 = vsel %vm1236_vm9, %v1231_v23, %v13508_v54  ;;  %v4872_v59 = vsel %vm4513_vm10, %v11527_v4, %v4820_v49  ;;  %4993 = vrot.lane.b32.xlu1 %v11047_v47, %s6384_s2  ;;  %v6332_v43 = vld [vmem:[%s6473_s24 + $0x50] sm:$0xff]  ;;  %v1232_v54 = vsel %vm1227_vm8, %v1223_v21, %v13516_v50  ;;  %v4822_v44 = vpop.permute.xlu1 %4821  ;;  %v4055_v37 = vsel %vm1200_vm5, %v4047_v1, %v9892_v42  ;;  %v13523_v55 = vld [vmem:[#allocation485_spill] sm:$0xff]  ;;  %v13524_v22 = vld [vmem:[#allocation250_spill] sm:$0xff] }
 0x5d1   : > { %v4517_v60 = vsel %vm4513_vm10, %v1240_v24, %v4464_v45  ;;  %v4880_v56 = vsel %vm4522_vm11, %v4872_v59, %v4852_v0  ;;  %v13512_v45 = vld [vmem:[#allocation6_spill] sm:$0xff]  ;;  %v13517_v59 = vld [vmem:[#allocation243_spill] sm:$0xff]  ;;  %v4466_v10 = vpop.permute.xlu0 %4465  ;;  %v4063_v36 = vsel %vm1209_vm6, %v4055_v37, %v9926_v32 }
 0x5d2   : > { %v4888_v28 = vsel %vm4531_vm12, %v4880_v56, 1.0  ;;  %v4526_v49 = vsel %vm4522_vm11, %v4517_v60, %v4496_v46  ;;  %v1179_v20 = vsel %vm1173_vm2, %v6332_v43, %v13512_v45  ;;  %v6333_v24 = vld [vmem:[%s7809_s28 + $0x40] sm:$0xff]  ;;  %v13519_v46 = vld [vmem:[#allocation63_spill] sm:$0xff] }
 0x5d3   : > { %v4535_v23 = vsel %vm4531_vm12, %v4526_v49, 1.0  ;;  %6159 = vmatmul.mubr.msk.f32.gmra.mxu1 %vm4540_vm13, %v4888_v28  ;;  %v1188_v26 = vsel %vm1182_vm3, %v1179_v20, %v13515_v35  ;;  %v2609_v0 = vsel %vm1173_vm2, %v6333_v24, %v13517_v59  ;;  %v13518_v60 = vld [vmem:[#allocation22_spill] sm:$0xff]  ;;  %v1241_v48 = vsel %vm1236_vm9, %v1232_v54, %v13519_v46  ;;  %v6334_v28 = vld [vmem:[%s7809_s28 + $0x50] sm:$0xff]  ;;  %v13522_v43 = vld [vmem:[#allocation259_spill] sm:$0xff]  ;;  %4643 = vrot.lane.b32.xlu0 %v11082_v63, %s6384_s2 }
 0x5d4   : > { %6111 = vmatmul.mubr.msk.f32.gmra.mxu0 %vm4540_vm13, %v4535_v23  ;;  %v1197_v56 = vsel %vm1191_vm4, %v1188_v26, %v13518_v60  ;;  %v2617_v34 = vsel %vm1182_vm3, %v2609_v0, %v13520_v5  ;;  %v13521_v49 = vld [vmem:[#allocation242_spill] sm:$0xff]  ;;  %v6335_v20 = vld [vmem:[%s9309_s5 + $0x30] sm:$0xff]  ;;  %4673 = vrot.lane.b32.xlu1 %v11487_v40, %s6385_s26  ;;  %v13525_v23 = vld [vmem:[#allocation267_spill] sm:$0xff]  ;;  %v4071_v54 = vsel %vm1218_vm7, %v4063_v36, %v9956_v39  ;;  %v4498_v46 = vpop.permute.xlu1 %4497 }
 0x5d5   : > { %v2610_v33 = vsel %vm1173_vm2, %v6334_v28, %v13521_v49  ;;  %v2625_v45 = vsel %vm1191_vm4, %v2617_v34, %v13522_v43  ;;  %v4032_v21 = vsel %vm1173_vm2, %v6335_v20, %v13523_v55  ;;  %v13526_v26 = vld [vmem:[#allocation493_spill] sm:$0xff]  ;;  %v13527_v24 = vld [vmem:[#allocation275_spill] sm:$0xff]  ;;  %v4518_v60 = vsel %vm4513_vm10, %v1241_v48, %v4466_v10  ;;  %v4468_v43 = vpop.permute.xlu0 %4467  ;;  %v13534_v10 = vld [vmem:[#allocation508_spill] sm:$0xff] }
 0x5d6   : > { %v2618_v42 = vsel %vm1182_vm3, %v2610_v33, %v13524_v22  ;;  %v2633_v35 = vsel %vm1200_vm5, %v2625_v45, %v13525_v23  ;;  %v4040_v50 = vsel %vm1182_vm3, %v4032_v21, %v13526_v26  ;;  %v13528_v0 = vld [vmem:[#allocation519_spill] sm:$0xff]  ;;  %v13531_v28 = vld [vmem:[#allocation525_spill] sm:$0xff]  ;;  %v4527_v33 = vsel %vm4522_vm11, %v4518_v60, %v4498_v46  ;;  %v13535_v36 = vld [vmem:[#allocation266_spill] sm:$0xff] }
 0x5d7   : > { %v2641_v32 = vsel %vm1209_vm6, %v2633_v35, %v13527_v24  ;;  %v4048_v59 = vsel %vm1191_vm4, %v4040_v50, %v9848_v17  ;;  %v4079_v1 = vsel %vm1227_vm8, %v4071_v54, %v13528_v0  ;;  %v13529_v5 = vld [vmem:[#allocation283_spill] sm:$0xff]  ;;  %v13532_v17 = vld [vmem:[#allocation258_spill] sm:$0xff]  ;;  %v4536_v21 = vsel %vm4531_vm12, %v4527_v33, 1.0  ;;  %4995 = vrot.lane.b32.xlu0 %v11073_v62, %s6384_s2 }
 0x5d8   : > { %v2649_v34 = vsel %vm1218_vm7, %v2641_v32, %v13529_v5  ;;  %v13530_v37 = vld [vmem:[#allocation503_spill] sm:$0xff]  ;;  %v11615_v49 = vsel %vm1236_vm9, %v4079_v1, %v13531_v28  ;;  %v2626_v45 = vsel %vm1191_vm4, %v2618_v42, %v13532_v17  ;;  %v13537_v42 = vld [vmem:[#allocation513_spill] sm:$0xff]  ;;  %6113 = vmatprep.mubr.msk.f32.mxu0 %vm4540_vm13, %v4536_v21  ;;  %v13538_v50 = vld [vmem:[#allocation30_spill] sm:$0xff]  ;;  %v4854_v60 = vpop.permute.xlu1 %4853 }
 0x5d9   : > { %v4056_v39 = vsel %vm1200_vm5, %v4048_v59, %v13530_v37  ;;  %v13533_v20 = vld [vmem:[#allocation291_spill] sm:$0xff]  ;;  %5025 = vrot.lane.b32.xlu1 %v11615_v49, %s6385_s26  ;;  %v2634_v22 = vsel %vm1200_vm5, %v2626_v45, %v13535_v36  ;;  %v1206_v54 = vsel %vm1200_vm5, %v1197_v56, %v13538_v50  ;;  %v13539_v24 = vld [vmem:[#allocation274_spill] sm:$0xff]  ;;  %v4824_v33 = vpop.permute.xlu0 %4823  ;;  %v13544_v45 = vld [vmem:[#allocation9_spill] sm:$0xff] }
 0x5da   : > { %v2657_v48 = vsel %vm1227_vm8, %v2649_v34, %v13533_v20  ;;  %v4064_v55 = vsel %vm1209_vm6, %v4056_v39, %v13534_v10  ;;  %v13536_v23 = vld [vmem:[#allocation299_spill] sm:$0xff]  ;;  %v2642_v32 = vsel %vm1209_vm6, %v2634_v22, %v13539_v24  ;;  %v13540_v59 = vld [vmem:[#allocation518_spill] sm:$0xff]  ;;  %v13543_v39 = vld [vmem:[#allocation524_spill] sm:$0xff] }
 0x5db   : > { %v11631_v35 = vsel %vm1236_vm9, %v2657_v48, %v13536_v23  ;;  %v4072_v26 = vsel %vm1218_vm7, %v4064_v55, %v13537_v42  ;;  %v13541_v46 = vld [vmem:[#allocation38_spill] sm:$0xff]  ;;  %v13547_v36 = vld [vmem:[#allocation17_spill] sm:$0xff]  ;;  %4675 = vrot.lane.b32.xlu0 %v11527_v4, %s6385_s26 }
 0x5dc   : > { %v4080_v0 = vsel %vm1227_vm8, %v4072_v26, %v13540_v59  ;;  %v4873_v1 = vsel %vm4513_vm10, %v11631_v35, %v4822_v44  ;;  %v1215_v5 = vsel %vm1209_vm6, %v1206_v54, %v13541_v46  ;;  %v13542_v34 = vld [vmem:[#allocation282_spill] sm:$0xff]  ;;  %v13550_v54 = vld [vmem:[#allocation25_spill] sm:$0xff] }
 0x5dd   : > { %v2650_v37 = vsel %vm1218_vm7, %v2642_v32, %v13542_v34  ;;  %v11652_v28 = vsel %vm1236_vm9, %v4080_v0, %v13543_v39  ;;  %v4881_v56 = vsel %vm4522_vm11, %v4873_v1, %v4854_v60  ;;  %v6336_v17 = vld [vmem:[%s6473_s24 + $0x60] sm:$0xff]  ;;  %v4856_v1 = vpop.permute.xlu1 %4855  ;;  %v13552_v60 = vld [vmem:[#allocation33_spill] sm:$0xff] }
 0x5de   : > { %v1180_v20 = vsel %vm1173_vm2, %v6336_v17, %v13544_v45  ;;  %v13545_v48 = vld [vmem:[#allocation46_spill] sm:$0xff]  ;;  %v4889_v21 = vsel %vm4531_vm12, %v4881_v56, 1.0  ;;  %5027 = vrot.lane.b32.xlu1 %v11652_v28, %s6385_s26  ;;  %v13553_v39 = vld [vmem:[#allocation41_spill] sm:$0xff]  ;;  %v13554_v45 = vld [vmem:[#allocation488_spill] sm:$0xff] }
 0x5df   : > { %v1224_v44 = vsel %vm1218_vm7, %v1215_v5, %v13545_v48  ;;  %v13546_v10 = vld [vmem:[#allocation290_spill] sm:$0xff]  ;;  %v1189_v22 = vsel %vm1182_vm3, %v1180_v20, %v13547_v36  ;;  %6161 = vmatprep.mubr.msk.f32.mxu1 %vm4540_vm13, %v4889_v21  ;;  %v13557_v36 = vld [vmem:[#allocation496_spill] sm:$0xff]  ;;  %4645 = vrot.lane.b32.xlu0 %v11119_v9, %s6384_s2 }
 0x5e0   : > { %v2658_v55 = vsel %vm1227_vm8, %v2650_v37, %v13546_v10  ;;  %v13548_v23 = vld [vmem:[#allocation54_spill] sm:$0xff]  ;;  %v1198_v24 = vsel %vm1191_vm4, %v1189_v22, %v13550_v54  ;;  %v4500_v37 = vpop.permute.xlu0 %4499  ;;  %v13559_v54 = vld [vmem:[#allocation57_spill] sm:$0xff] }
 0x5e1   : > { %v1233_v42 = vsel %vm1227_vm8, %v1224_v44, %v13548_v23  ;;  %v13549_v26 = vld [vmem:[#allocation298_spill] sm:$0xff]  ;;  %v1207_v46 = vsel %vm1200_vm5, %v1198_v24, %v13552_v60  ;;  %v6338_v44 = vld [vmem:[%s6473_s24 + $0x70] sm:$0xff] }
 0x5e2   : > { %v11671_v50 = vsel %vm1236_vm9, %v2658_v55, %v13549_v26  ;;  %v13551_v32 = vld [vmem:[#allocation62_spill] sm:$0xff]  ;;  %v1216_v56 = vsel %vm1209_vm6, %v1207_v46, %v13553_v39  ;;  %4997 = vrot.lane.b32.xlu1 %v11161_v57, %s6384_s2  ;;  %v13556_v55 = vld [vmem:[#allocation49_spill] sm:$0xff]  ;;  %v4826_v46 = vpop.permute.xlu1 %4825 }
 0x5e3   : > { %v1242_v59 = vsel %vm1236_vm9, %v1233_v42, %v13551_v32  ;;  %v4874_v0 = vsel %vm4513_vm10, %v11671_v50, %v4824_v33  ;;  %v6337_v17 = vld [vmem:[%s9309_s5 + $0x40] sm:$0xff]  ;;  %v1225_v21 = vsel %vm1218_vm7, %v1216_v56, %v13556_v55  ;;  %v13558_v42 = vld [vmem:[#allocation16_spill] sm:$0xff]  ;;  %v13564_v56 = vld [vmem:[#allocation253_spill] sm:$0xff]  ;;  %4647 = vrot.lane.b32.xlu0 %v11216_v29, %s6384_s2 }
 0x5e4   : > { %v4519_v5 = vsel %vm4513_vm10, %v1242_v59, %v4468_v43  ;;  %v4882_v34 = vsel %vm4522_vm11, %v4874_v0, %v4856_v1  ;;  %v4033_v20 = vsel %vm1173_vm2, %v6337_v17, %v13554_v45  ;;  %v13555_v43 = vld [vmem:[#allocation8_spill] sm:$0xff]  ;;  %v1234_v24 = vsel %vm1227_vm8, %v1225_v21, %v13559_v54  ;;  %v6339_v32 = vld [vmem:[%s7809_s28 + $0x60] sm:$0xff]  ;;  %v13560_v59 = vld [vmem:[#allocation245_spill] sm:$0xff] }
 0x5e5   : > { %v4890_v48 = vsel %vm4531_vm12, %v4882_v34, 1.0  ;;  %v4528_v33 = vsel %vm4522_vm11, %v4519_v5, %v4500_v37  ;;  %v1181_v10 = vsel %vm1173_vm2, %v6338_v44, %v13555_v43  ;;  %v4041_v22 = vsel %vm1182_vm3, %v4033_v20, %v13557_v36  ;;  %v13561_v1 = vld [vmem:[#allocation500_spill] sm:$0xff]  ;;  %v13563_v37 = vld [vmem:[#allocation65_spill] sm:$0xff]  ;;  %v13568_v36 = vld [vmem:[#allocation487_spill] sm:$0xff] }
 0x5e6   : > { %v4537_v23 = vsel %vm4531_vm12, %v4528_v33, 1.0  ;;  %6162 = vmatmul.mubr.msk.f32.gmra.mxu1 %vm4540_vm13, %v4890_v48  ;;  %v1190_v26 = vsel %vm1182_vm3, %v1181_v10, %v13558_v42  ;;  %v2611_v0 = vsel %vm1173_vm2, %v6339_v32, %v13560_v59  ;;  %v4049_v60 = vsel %vm1191_vm4, %v4041_v22, %v13561_v1  ;;  %v13562_v5 = vld [vmem:[#allocation24_spill] sm:$0xff]  ;;  %v13565_v45 = vld [vmem:[#allocation505_spill] sm:$0xff]  ;;  %v4470_v48 = vpop.permute.xlu0 %4469  ;;  %4677 = vrot.lane.b32.xlu1 %v11631_v35, %s6385_s26  ;;  %v13572_v59 = vld [vmem:[#allocation495_spill] sm:$0xff] }
 0x5e7   : > { %6114 = vmatmul.mubr.msk.f32.gmra.mxu0 %vm4540_vm13, %v4537_v23  ;;  %v1199_v34 = vsel %vm1191_vm4, %v1190_v26, %v13562_v5  ;;  %v1243_v39 = vsel %vm1236_vm9, %v1234_v24, %v13563_v37  ;;  %v2619_v17 = vsel %vm1182_vm3, %v2611_v0, %v13564_v56  ;;  %v4057_v20 = vsel %vm1200_vm5, %v4049_v60, %v13565_v45  ;;  %v6340_v33 = vld [vmem:[%s7809_s28 + $0x70] sm:$0xff]  ;;  %v13567_v10 = vld [vmem:[#allocation261_spill] sm:$0xff]  ;;  %v13569_v23 = vld [vmem:[#allocation510_spill] sm:$0xff] }
 0x5e8   : > { %v13566_v44 = vld [vmem:[#allocation244_spill] sm:$0xff]  ;;  %v2627_v55 = vsel %vm1191_vm4, %v2619_v17, %v13567_v10  ;;  %v4065_v42 = vsel %vm1209_vm6, %v4057_v20, %v13569_v23  ;;  %v13571_v24 = vld [vmem:[#allocation269_spill] sm:$0xff]  ;;  %v13573_v1 = vld [vmem:[#allocation515_spill] sm:$0xff]  ;;  %4999 = vrot.lane.b32.xlu0 %v11204_v2, %s6384_s2 }
 0x5e9   : > { %v2612_v43 = vsel %vm1173_vm2, %v6340_v33, %v13566_v44  ;;  %v6341_v21 = vld [vmem:[%s9309_s5 + $0x50] sm:$0xff]  ;;  %v2635_v32 = vsel %vm1200_vm5, %v2627_v55, %v13571_v24  ;;  %v4073_v60 = vsel %vm1218_vm7, %v4065_v42, %v13573_v1  ;;  %v13574_v5 = vld [vmem:[#allocation277_spill] sm:$0xff]  ;;  %v13575_v56 = vld [vmem:[#allocation499_spill] sm:$0xff]  ;;  %v4520_v33 = vsel %vm4513_vm10, %v1243_v39, %v4470_v48  ;;  %v4502_v44 = vpop.permute.xlu1 %4501 }
 0x5ea   : > { %v4034_v22 = vsel %vm1173_vm2, %v6341_v21, %v13568_v36  ;;  %v13570_v26 = vld [vmem:[#allocation252_spill] sm:$0xff]  ;;  %v2643_v37 = vsel %vm1209_vm6, %v2635_v32, %v13574_v5  ;;  %v13576_v45 = vld [vmem:[#allocation521_spill] sm:$0xff]  ;;  %v4472_v23 = vpop.permute.xlu0 %4471  ;;  %v13584_v5 = vld [vmem:[#allocation514_spill] sm:$0xff] }
 0x5eb   : > { %v2620_v54 = vsel %vm1182_vm3, %v2612_v43, %v13570_v26  ;;  %v4042_v0 = vsel %vm1182_vm3, %v4034_v22, %v13572_v59  ;;  %v4081_v20 = vsel %vm1227_vm8, %v4073_v60, %v13576_v45  ;;  %v13577_v43 = vld [vmem:[#allocation285_spill] sm:$0xff]  ;;  %v13578_v55 = vld [vmem:[#allocation504_spill] sm:$0xff]  ;;  %v4529_v22 = vsel %vm4522_vm11, %v4520_v33, %v4502_v44 }
 0x5ec   : > { %v4050_v17 = vsel %vm1191_vm4, %v4042_v0, %v13575_v56  ;;  %v2651_v10 = vsel %vm1218_vm7, %v2643_v37, %v13577_v43  ;;  %v11759_v36 = vsel %vm1236_vm9, %v4081_v20, %v10055_v51  ;;  %v13579_v42 = vld [vmem:[#allocation260_spill] sm:$0xff]  ;;  %v13580_v24 = vld [vmem:[#allocation293_spill] sm:$0xff]  ;;  %v4538_v59 = vsel %vm4531_vm12, %v4529_v22, 1.0  ;;  %4679 = vrot.lane.b32.xlu0 %v11671_v50, %s6385_s26 }
 0x5ed   : > { %v4058_v21 = vsel %vm1200_vm5, %v4050_v17, %v13578_v55  ;;  %v2628_v26 = vsel %vm1191_vm4, %v2620_v54, %v13579_v42  ;;  %v2659_v39 = vsel %vm1227_vm8, %v2651_v10, %v13580_v24  ;;  %v13581_v48 = vld [vmem:[#allocation509_spill] sm:$0xff]  ;;  %5029 = vrot.lane.b32.xlu1 %v11759_v36, %s6385_s26  ;;  %v13582_v0 = vld [vmem:[#allocation268_spill] sm:$0xff]  ;;  %6116 = vmatprep.mubr.msk.f32.mxu0 %vm4540_vm13, %v4538_v59  ;;  %v4858_v43 = vpop.permute.xlu1 %4857 }
 0x5ee   : > { %v4066_v32 = vsel %vm1209_vm6, %v4058_v21, %v13581_v48  ;;  %v2636_v51 = vsel %vm1200_vm5, %v2628_v26, %v13582_v0  ;;  %v13583_v1 = vld [vmem:[#allocation301_spill] sm:$0xff]  ;;  %v13585_v37 = vld [vmem:[#allocation32_spill] sm:$0xff]  ;;  %v4828_v26 = vpop.permute.xlu0 %4827 }
 0x5ef   : > { %v11775_v60 = vsel %vm1236_vm9, %v2659_v39, %v13583_v1  ;;  %v4074_v54 = vsel %vm1218_vm7, %v4066_v32, %v13584_v5  ;;  %v1208_v56 = vsel %vm1200_vm5, %v1199_v34, %v13585_v37  ;;  %v13586_v17 = vld [vmem:[#allocation276_spill] sm:$0xff] }
 0x5f0   : > { %v2644_v45 = vsel %vm1209_vm6, %v2636_v51, %v13586_v17  ;;  %v13587_v20 = vld [vmem:[#allocation520_spill] sm:$0xff]  ;;  %v4875_v44 = vsel %vm4513_vm10, %v11775_v60, %v4826_v46  ;;  %4649 = vrot.lane.b32.xlu0 %v11271_v16, %s6384_s2 }
 0x5f1   : > { %v4082_v33 = vsel %vm1227_vm8, %v4074_v54, %v13587_v20  ;;  %v13588_v10 = vld [vmem:[#allocation40_spill] sm:$0xff]  ;;  %v4883_v34 = vsel %vm4522_vm11, %v4875_v44, %v4858_v43  ;;  %v4860_v37 = vpop.permute.xlu1 %4859  ;;  %v6342_v20 = vld [vmem:[%s9309_s5 + $0x60] sm:$0xff] }
 0x5f2   : > { %v1217_v55 = vsel %vm1209_vm6, %v1208_v56, %v13588_v10  ;;  %v13589_v21 = vld [vmem:[#allocation284_spill] sm:$0xff]  ;;  %v11796_v42 = vsel %vm1236_vm9, %v4082_v33, %v10050_v25  ;;  %v4891_v32 = vsel %vm4531_vm12, %v4883_v34, 1.0  ;;  %v13595_v33 = vld [vmem:[#allocation490_spill] sm:$0xff] }
 0x5f3   : > { %v2652_v22 = vsel %vm1218_vm7, %v2644_v45, %v13589_v21  ;;  %v13590_v24 = vld [vmem:[#allocation48_spill] sm:$0xff]  ;;  %5031 = vrot.lane.b32.xlu1 %v11796_v42, %s6385_s26  ;;  %6164 = vmatprep.mubr.msk.f32.mxu1 %vm4540_vm13, %v4891_v32  ;;  %v4504_v45 = vpop.permute.xlu0 %4503  ;;  %v4035_v44 = vsel %vm1173_vm2, %v6342_v20, %v13595_v33  ;;  %v13599_v32 = vld [vmem:[#allocation489_spill] sm:$0xff] }
 0x5f4   : > { %v1226_v39 = vsel %vm1218_vm7, %v1217_v55, %v13590_v24  ;;  %v13591_v48 = vld [vmem:[#allocation292_spill] sm:$0xff]  ;;  %v13596_v55 = vld [vmem:[#allocation498_spill] sm:$0xff]  ;;  %v13598_v24 = vld [vmem:[#allocation507_spill] sm:$0xff]  ;;  %4651 = vrot.lane.b32.xlu0 %v11373_v27, %s6384_s2 }
 0x5f5   : > { %v2660_v46 = vsel %vm1227_vm8, %v2652_v22, %v13591_v48  ;;  %v13592_v59 = vld [vmem:[#allocation56_spill] sm:$0xff]  ;;  %v4043_v21 = vsel %vm1182_vm3, %v4035_v44, %v13596_v55  ;;  %v13597_v22 = vld [vmem:[#allocation502_spill] sm:$0xff] }
 0x5f6   : > { %v1235_v0 = vsel %vm1227_vm8, %v1226_v39, %v13592_v59  ;;  %v13593_v25 = vld [vmem:[#allocation300_spill] sm:$0xff]  ;;  %v4051_v34 = vsel %vm1191_vm4, %v4043_v21, %v13597_v22  ;;  %v13606_v22 = vld [vmem:[#allocation511_spill] sm:$0xff] }
 0x5f7   : > { %v11810_v51 = vsel %vm1236_vm9, %v2660_v46, %v13593_v25  ;;  %v13594_v1 = vld [vmem:[#allocation64_spill] sm:$0xff]  ;;  %5001 = vrot.lane.b32.xlu1 %v11324_v19, %s6384_s2  ;;  %v4059_v39 = vsel %vm1200_vm5, %v4051_v34, %v13598_v24  ;;  %v4550_v48 = vpop.permute.xlu0 %4549 }
 0x5f8   : > { %v1244_v5 = vsel %vm1236_vm9, %v1235_v0, %v13594_v1  ;;  %v4876_v54 = vsel %vm4513_vm10, %v11810_v51, %v4828_v26  ;;  %v4902_v26 = vpop.permute.xlu1 %4901  ;;  %v6343_v46 = vld [vmem:[%s9309_s5 + $0x70] sm:$0xff]  ;;  %v13601_v1 = vld [vmem:[#allocation497_spill] sm:$0xff]  ;;  %v4605_v33 = vsel %vm4513_vm10, %v10108_v38, %v4550_v48  ;;  %5003 = vrot.lane.b32.xlu0 %v11363_v18, %s6384_s2 }
 0x5f9   : > { %v4521_v56 = vsel %vm4513_vm10, %v1244_v5, %v4472_v23  ;;  %v4884_v17 = vsel %vm4522_vm11, %v4876_v54, %v4860_v37  ;;  %v4036_v59 = vsel %vm1173_vm2, %v6343_v46, %v13599_v32  ;;  %v13600_v0 = vld [vmem:[#allocation512_spill] sm:$0xff]  ;;  %v13602_v54 = vld [vmem:[#allocation517_spill] sm:$0xff]  ;;  %v4957_v46 = vsel %vm4513_vm10, %v10155_v31, %v4902_v26 }
 0x5fa   : > { %v4892_v43 = vsel %vm4531_vm12, %v4884_v17, 1.0  ;;  %v4530_v10 = vsel %vm4522_vm11, %v4521_v56, %v4504_v45  ;;  %v4067_v25 = vsel %vm1209_vm6, %v4059_v39, %v13600_v0  ;;  %v4044_v5 = vsel %vm1182_vm3, %v4036_v59, %v13601_v1  ;;  %v13603_v56 = vld [vmem:[#allocation501_spill] sm:$0xff]  ;;  %v13604_v45 = vld [vmem:[#allocation523_spill] sm:$0xff]  ;;  %v13607_v38 = vld [vmem:[#allocation516_spill] sm:$0xff] }
 0x5fb   : > { %v4539_v23 = vsel %vm4531_vm12, %v4530_v10, 1.0  ;;  %6165 = vmatmul.mubr.msk.f32.gmra.mxu1 %vm4540_vm13, %v4892_v43  ;;  %4681 = vrot.lane.b32.xlu1 %v11775_v60, %s6385_s26  ;;  %v4075_v37 = vsel %vm1218_vm7, %v4067_v25, %v13602_v54  ;;  %v4052_v17 = vsel %vm1191_vm4, %v4044_v5, %v13603_v56  ;;  %v13605_v43 = vld [vmem:[#allocation506_spill] sm:$0xff] }
 0x5fc   : > { %6117 = vmatmul.mubr.msk.f32.gmra.mxu0 %vm4540_vm13, %v4539_v23  ;;  %v4083_v20 = vsel %vm1227_vm8, %v4075_v37, %v13604_v45  ;;  %v4582_v44 = vpop.permute.xlu1 %4581  ;;  %v4060_v10 = vsel %vm1200_vm5, %v4052_v17, %v13605_v43  ;;  %v4552_v23 = vpop.permute.xlu0 %4551  ;;  %4683 = vrot.lane.b32.xlu0 %v11810_v51, %s6385_s26  ;;  %v6344_v56 = vld [vmem:[%s9684_s6] sm:$0xff]  ;;  %v13610_v43 = vld [vmem:[#allocation404_spill] sm:$0xff] }
 0x5fd   : > { %v11862_v55 = vsel %vm1236_vm9, %v4083_v20, %v10081_v58  ;;  %v4613_v21 = vsel %vm4522_vm11, %v4605_v33, %v4582_v44  ;;  %v4068_v34 = vsel %vm1209_vm6, %v4060_v10, %v13606_v22  ;;  %v13608_v58 = vld [vmem:[#allocation522_spill] sm:$0xff]  ;;  %v4385_v17 = vsel %vm1173_vm2, %v6344_v56, %v10112_v11  ;;  %v13609_v33 = vld [vmem:[#allocation151_spill] sm:$0xff]  ;;  %v6345_v22 = vld [vmem:[%s9684_s6 + $0x10] sm:$0xff] }
 0x5fe   : > { %v4621_v24 = vsel %vm4531_vm12, %v4613_v21, 1.0  ;;  %v4076_v39 = vsel %vm1218_vm7, %v4068_v34, %v13607_v38  ;;  %v4393_v44 = vsel %vm1182_vm3, %v4385_v17, %v13609_v33  ;;  %v13611_v21 = vld [vmem:[#allocation395_spill] sm:$0xff]  ;;  %v13612_v34 = vld [vmem:[#allocation526_spill] sm:$0xff] }
 0x5ff   : > { %5033 = vrot.lane.b32.xlu1 %v11862_v55, %s6385_s26  ;;  %6119 = vmatprep.mubr.msk.f32.mxu0 %vm4540_vm13, %v4621_v24  ;;  %v4084_v48 = vsel %vm1227_vm8, %v4076_v39, %v13608_v58  ;;  %v4401_v11 = vsel %vm1191_vm4, %v4393_v44, %v13610_v43  ;;  %v4386_v24 = vsel %vm1173_vm2, %v6345_v22, %v13612_v34  ;;  %v13613_v38 = vld [vmem:[#allocation322_spill] sm:$0xff]  ;;  %v13622_v44 = vld [vmem:[#allocation72_spill] sm:$0xff] }
 0x600   : > { %v4934_v32 = vpop.permute.xlu1 %4933  ;;  %v11881_v59 = vsel %vm1236_vm9, %v4084_v48, %v10074_v8  ;;  %v4904_v25 = vpop.permute.xlu0 %4903  ;;  %v4606_v8 = vsel %vm4513_vm10, %v10183_v61, %v4552_v23  ;;  %4725 = vrot.lane.b32.xlu0 %v11308_v53, %s6384_s2  ;;  %v4409_v23 = vsel %vm1200_vm5, %v4401_v11, %v13611_v21  ;;  %v13614_v53 = vld [vmem:[#allocation356_spill] sm:$0xff]  ;;  %v13615_v48 = vld [vmem:[#allocation329_spill] sm:$0xff]  ;;  %v13623_v43 = vld [vmem:[#allocation78_spill] sm:$0xff] }
 0x601   : > { %v4965_v0 = vsel %vm4522_vm11, %v4957_v46, %v4934_v32  ;;  %v4958_v26 = vsel %vm4513_vm10, %v10224_v14, %v4904_v25  ;;  %v4417_v39 = vsel %vm1209_vm6, %v4409_v23, %v13613_v38  ;;  %v4394_v58 = vsel %vm1182_vm3, %v4386_v24, %v13614_v53  ;;  %v13616_v32 = vld [vmem:[#allocation396_spill] sm:$0xff]  ;;  %v13617_v25 = vld [vmem:[#allocation123_spill] sm:$0xff]  ;;  %v13624_v21 = vld [vmem:[#allocation121_spill] sm:$0xff] }
 0x602   : > { %v4973_v1 = vsel %vm4531_vm12, %v4965_v0, 1.0  ;;  %v4425_v46 = vsel %vm1218_vm7, %v4417_v39, %v13615_v48  ;;  %v4402_v0 = vsel %vm1191_vm4, %v4394_v58, %v13616_v32  ;;  %v13625_v22 = vld [vmem:[#allocation90_spill] sm:$0xff] }
 0x603   : > { %5035 = vrot.lane.b32.xlu1 %v11881_v59, %s6385_s26  ;;  %6167 = vmatprep.mubr.msk.f32.mxu1 %vm4540_vm13, %v4973_v1  ;;  %v4433_v1 = vsel %vm1227_vm8, %v4425_v46, %v13617_v25  ;;  %v13627_v58 = vld [vmem:[#allocation142_spill] sm:$0xff]  ;;  %v13628_v25 = vld [vmem:[#allocation528_spill] sm:$0xff] }
 0x604   : > { %v4936_v5 = vpop.permute.xlu1 %4935  ;;  %v4584_v37 = vpop.permute.xlu0 %4583  ;;  %4727 = vrot.lane.b32.xlu0 %v11391_v7, %s6384_s2  ;;  %v13621_v7 = vld [vmem:[#allocation66_spill] sm:$0xff] }
 0x605   : > { %v4966_v54 = vsel %vm4522_vm11, %v4958_v26, %v4936_v5  ;;  %v4614_v20 = vsel %vm4522_vm11, %v4606_v8, %v4584_v37  ;;  %v13618_v26 = vld [vmem:[#allocation128_spill] sm:$0xff]  ;;  %v13620_v37 = vld [vmem:[#allocation130_spill] sm:$0xff] }
 0x606   : > { %v4974_v45 = vsel %vm4531_vm12, %v4966_v54, 1.0  ;;  %v4622_v61 = vsel %vm4531_vm12, %v4614_v20, 1.0  ;;  %v4441_v56 = vsel %vm1236_vm9, %v4433_v1, %v13620_v37 }
 0x607   : > { %5077 = vrot.lane.b32.xlu1 %v11471_v15, %s6384_s2  ;;  %6168 = vmatmul.mubr.msk.f32.gmra.mxu1 %vm4540_vm13, %v4974_v45 }
 0x608   : > { %6120 = vmatmul.mubr.msk.f32.gmra.mxu0 %vm4540_vm13, %v4622_v61  ;;  %v4906_v10 = vpop.permute.xlu1 %4905  ;;  %v4554_v15 = vpop.permute.xlu0 %4553  ;;  %5079 = vrot.lane.b32.xlu0 %v11508_v6, %s6384_s2  ;;  %v13626_v6 = vld [vmem:[#allocation158_spill] sm:$0xff] }
 0x609   : > { %v4607_v5 = vsel %vm4513_vm10, %v13618_v26, %v4554_v15  ;;  %v4959_v23 = vsel %vm4513_vm10, %v13624_v21, %v4906_v10 }
 0x60b   : > { %4757 = vrot.lane.b32.xlu1 %v10155_v31, %s6385_s26  ;;  %v13619_v31 = vld [vmem:[#allocation73_spill] sm:$0xff] }
 0x60c   : > { %v4586_v8 = vpop.permute.xlu1 %4585  ;;  %v4410_v54 = vsel %vm1200_vm5, %v4402_v0, %v13619_v31  ;;  %v4556_v45 = vpop.permute.xlu0 %4555  ;;  %4759 = vrot.lane.b32.xlu0 %v10224_v14, %s6385_s26  ;;  %v6346_v0 = vld [vmem:[%s9684_s6 + $0x20] sm:$0xff] }
 0x60d   : > { %v4615_v17 = vsel %vm4522_vm11, %v4607_v5, %v4586_v8  ;;  %v4418_v20 = vsel %vm1209_vm6, %v4410_v54, %v13621_v7  ;;  %v4608_v48 = vsel %vm4513_vm10, %v13627_v58, %v4556_v45  ;;  %v4387_v1 = vsel %vm1173_vm2, %v6346_v0, %v13628_v25  ;;  %v13629_v5 = vld [vmem:[#allocation348_spill] sm:$0xff]  ;;  %v13630_v54 = vld [vmem:[#allocation355_spill] sm:$0xff]  ;;  %v13640_v58 = vld [vmem:[#allocation374_spill] sm:$0xff] }
 0x60e   : > { %v4623_v33 = vsel %vm4531_vm12, %v4615_v17, 1.0  ;;  %v4426_v61 = vsel %vm1218_vm7, %v4418_v20, %v13622_v44  ;;  %v4395_v8 = vsel %vm1182_vm3, %v4387_v1, %v13629_v5  ;;  %v13631_v17 = vld [vmem:[#allocation85_spill] sm:$0xff]  ;;  %v6347_v7 = vld [vmem:[%s9684_s6 + $0x30] sm:$0xff]  ;;  %v13632_v20 = vld [vmem:[#allocation527_spill] sm:$0xff] }
 0x60f   : > { %5109 = vrot.lane.b32.xlu1 %v4441_v56, %s6385_s26  ;;  %6122 = vmatprep.mubr.msk.f32.mxu0 %vm4540_vm13, %v4623_v33  ;;  %v4434_v11 = vsel %vm1227_vm8, %v4426_v61, %v13623_v43  ;;  %v4403_v37 = vsel %vm1191_vm4, %v4395_v8, %v13630_v54  ;;  %v4388_v33 = vsel %vm1173_vm2, %v6347_v7, %v13632_v20  ;;  %v13633_v44 = vld [vmem:[#allocation137_spill] sm:$0xff]  ;;  %v13642_v1 = vld [vmem:[#allocation302_spill] sm:$0xff]  ;;  %v13644_v8 = vld [vmem:[#allocation379_spill] sm:$0xff] }
 0x610   : > { %v4938_v15 = vpop.permute.xlu1 %4937  ;;  %v4442_v34 = vsel %vm1236_vm9, %v4434_v11, %v13625_v22  ;;  %v4908_v38 = vpop.permute.xlu0 %4907  ;;  %4729 = vrot.lane.b32.xlu0 %v11487_v40, %s6384_s2  ;;  %v4411_v45 = vsel %vm1200_vm5, %v4403_v37, %v13631_v17  ;;  %v13634_v40 = vld [vmem:[#allocation364_spill] sm:$0xff]  ;;  %v13635_v11 = vld [vmem:[#allocation366_spill] sm:$0xff]  ;;  %v13645_v37 = vld [vmem:[#allocation321_spill] sm:$0xff] }
 0x611   : > { %v4967_v24 = vsel %vm4522_vm11, %v4959_v23, %v4938_v15  ;;  %v4960_v53 = vsel %vm4513_vm10, %v13626_v6, %v4908_v38  ;;  %v4419_v61 = vsel %vm1209_vm6, %v4411_v45, %v13633_v44  ;;  %v4396_v43 = vsel %vm1182_vm3, %v4388_v33, %v13634_v40  ;;  %v13636_v15 = vld [vmem:[#allocation412_spill] sm:$0xff]  ;;  %v13638_v38 = vld [vmem:[#allocation387_spill] sm:$0xff] }
 0x612   : > { %v4975_v39 = vsel %vm4531_vm12, %v4967_v24, 1.0  ;;  %v4427_v23 = vsel %vm1218_vm7, %v4419_v61, %v13635_v11  ;;  %v4404_v22 = vsel %vm1191_vm4, %v4396_v43, %v13636_v15  ;;  %v13647_v33 = vld [vmem:[#allocation79_spill] sm:$0xff]  ;;  %v6348_v43 = vld [vmem:[%s9684_s6 + $0x40] sm:$0xff]  ;;  %v13648_v11 = vld [vmem:[#allocation320_spill] sm:$0xff] }
 0x613   : > { %5111 = vrot.lane.b32.xlu1 %v4442_v34, %s6385_s26  ;;  %6170 = vmatprep.mubr.msk.f32.mxu1 %vm4540_vm13, %v4975_v39  ;;  %v13637_v34 = vld [vmem:[#allocation308_spill] sm:$0xff] }
 0x614   : > { %v4940_v10 = vpop.permute.xlu1 %4939  ;;  %v4588_v32 = vpop.permute.xlu0 %4587  ;;  %4731 = vrot.lane.b32.xlu0 %v11527_v4, %s6384_s2  ;;  %v4435_v24 = vsel %vm1227_vm8, %v4427_v23, %v13637_v34  ;;  %v13641_v4 = vld [vmem:[#allocation145_spill] sm:$0xff]  ;;  %v4389_v23 = vsel %vm1173_vm2, %v6348_v43, %v13648_v11  ;;  %v13663_v43 = vld [vmem:[#allocation398_spill] sm:$0xff] }
 0x615   : > { %v4968_v46 = vsel %vm4522_vm11, %v4960_v53, %v4940_v10  ;;  %v4616_v14 = vsel %vm4522_vm11, %v4608_v48, %v4588_v32  ;;  %v4443_v48 = vsel %vm1236_vm9, %v4435_v24, %v13640_v58  ;;  %v6349_v58 = vld [vmem:[%s9684_s6 + $0x50] sm:$0xff] }
 0x616   : > { %v4976_v26 = vsel %vm4531_vm12, %v4968_v46, 1.0  ;;  %v4624_v31 = vsel %vm4531_vm12, %v4616_v14, 1.0  ;;  %v13643_v14 = vld [vmem:[#allocation169_spill] sm:$0xff] }
 0x617   : > { %5081 = vrot.lane.b32.xlu1 %v11615_v49, %s6384_s2  ;;  %6171 = vmatmul.mubr.msk.f32.gmra.mxu1 %vm4540_vm13, %v4976_v26 }
 0x618   : > { %6123 = vmatmul.mubr.msk.f32.gmra.mxu0 %vm4540_vm13, %v4624_v31  ;;  %v4910_v56 = vpop.permute.xlu1 %4909  ;;  %v4558_v49 = vpop.permute.xlu0 %4557  ;;  %5083 = vrot.lane.b32.xlu0 %v11652_v28, %s6384_s2  ;;  %v13646_v28 = vld [vmem:[#allocation116_spill] sm:$0xff] }
 0x619   : > { %v4609_v39 = vsel %vm4513_vm10, %v13638_v38, %v4558_v49  ;;  %v4961_v31 = vsel %vm4513_vm10, %v13644_v8, %v4910_v56  ;;  %v13650_v38 = vld [vmem:[#allocation371_spill] sm:$0xff] }
 0x61b   : > { %4761 = vrot.lane.b32.xlu1 %v13624_v21, %s6385_s26  ;;  %v13639_v21 = vld [vmem:[#allocation84_spill] sm:$0xff] }
 0x61c   : > { %v4590_v53 = vpop.permute.xlu1 %4589  ;;  %v4412_v10 = vsel %vm1200_vm5, %v4404_v22, %v13639_v21  ;;  %v4560_v32 = vpop.permute.xlu0 %4559  ;;  %4763 = vrot.lane.b32.xlu0 %v13626_v6, %s6385_s26  ;;  %v13649_v22 = vld [vmem:[#allocation114_spill] sm:$0xff]  ;;  %v13651_v21 = vld [vmem:[#allocation96_spill] sm:$0xff] }
 0x61d   : > { %v4617_v46 = vsel %vm4522_vm11, %v4609_v39, %v4590_v53  ;;  %v4420_v0 = vsel %vm1209_vm6, %v4412_v10, %v13641_v4  ;;  %v4610_v44 = vsel %vm4513_vm10, %v13647_v33, %v4560_v32  ;;  %v4397_v34 = vsel %vm1182_vm3, %v4389_v23, %v13649_v22  ;;  %v13653_v32 = vld [vmem:[#allocation314_spill] sm:$0xff]  ;;  %v13664_v23 = vld [vmem:[#allocation336_spill] sm:$0xff] }
 0x61e   : > { %v4625_v25 = vsel %vm4531_vm12, %v4617_v46, 1.0  ;;  %v4428_v26 = vsel %vm1218_vm7, %v4420_v0, %v13642_v1  ;;  %v4405_v39 = vsel %vm1191_vm4, %v4397_v34, %v13650_v38  ;;  %v13665_v22 = vld [vmem:[#allocation406_spill] sm:$0xff] }
 0x61f   : > { %5113 = vrot.lane.b32.xlu1 %v4443_v48, %s6385_s26  ;;  %6125 = vmatprep.mubr.msk.f32.mxu0 %vm4540_vm13, %v4625_v25  ;;  %v4436_v5 = vsel %vm1227_vm8, %v4428_v26, %v13643_v14  ;;  %v4413_v10 = vsel %vm1200_vm5, %v4405_v39, %v13651_v21  ;;  %v13652_v48 = vld [vmem:[#allocation529_spill] sm:$0xff]  ;;  %v13655_v25 = vld [vmem:[#allocation390_spill] sm:$0xff]  ;;  %v13656_v26 = vld [vmem:[#allocation363_spill] sm:$0xff] }
 0x620   : > { %v4942_v54 = vpop.permute.xlu1 %4941  ;;  %v4444_v17 = vsel %vm1236_vm9, %v4436_v5, %v13645_v37  ;;  %v4912_v49 = vpop.permute.xlu0 %4911  ;;  %4733 = vrot.lane.b32.xlu0 %v11631_v35, %s6384_s2  ;;  %v4390_v46 = vsel %vm1173_vm2, %v6349_v58, %v13652_v48  ;;  %v4421_v4 = vsel %vm1209_vm6, %v4413_v10, %v13653_v32  ;;  %v13654_v35 = vld [vmem:[#allocation372_spill] sm:$0xff]  ;;  %v13667_v10 = vld [vmem:[#allocation103_spill] sm:$0xff] }
 0x621   : > { %v4969_v45 = vsel %vm4522_vm11, %v4961_v31, %v4942_v54  ;;  %v4962_v20 = vsel %vm4513_vm10, %v13646_v28, %v4912_v49  ;;  %v4398_v0 = vsel %vm1182_vm3, %v4390_v46, %v13654_v35  ;;  %v4429_v1 = vsel %vm1218_vm7, %v4421_v4, %v13655_v25  ;;  %v13657_v5 = vld [vmem:[#allocation328_spill] sm:$0xff]  ;;  %v13658_v54 = vld [vmem:[#allocation97_spill] sm:$0xff]  ;;  %v6350_v46 = vld [vmem:[%s9684_s6 + $0x60] sm:$0xff] }
 0x622   : > { %v4977_v7 = vsel %vm4531_vm12, %v4969_v45, 1.0  ;;  %v4406_v14 = vsel %vm1191_vm4, %v4398_v0, %v13656_v26  ;;  %v4437_v31 = vsel %vm1227_vm8, %v4429_v1, %v13657_v5  ;;  %v13660_v49 = vld [vmem:[#allocation365_spill] sm:$0xff]  ;;  %v13668_v32 = vld [vmem:[#allocation327_spill] sm:$0xff]  ;;  %v13669_v0 = vld [vmem:[#allocation388_spill] sm:$0xff] }
 0x623   : > { %5115 = vrot.lane.b32.xlu1 %v4444_v17, %s6385_s26  ;;  %6173 = vmatprep.mubr.msk.f32.mxu1 %vm4540_vm13, %v4977_v7  ;;  %v4445_v7 = vsel %vm1236_vm9, %v4437_v31, %v13660_v49  ;;  %v4391_v4 = vsel %vm1173_vm2, %v6350_v46, %v13668_v32  ;;  %v13670_v26 = vld [vmem:[#allocation309_spill] sm:$0xff]  ;;  %v13671_v31 = vld [vmem:[#allocation115_spill] sm:$0xff] }
 0x624   : > { %v4944_v56 = vpop.permute.xlu1 %4943  ;;  %v4592_v40 = vpop.permute.xlu0 %4591  ;;  %4735 = vrot.lane.b32.xlu0 %v11671_v50, %s6384_s2  ;;  %v13661_v50 = vld [vmem:[#allocation108_spill] sm:$0xff]  ;;  %v4399_v25 = vsel %vm1182_vm3, %v4391_v4, %v13669_v0  ;;  %v13684_v4 = vld [vmem:[#allocation159_spill] sm:$0xff] }
 0x625   : > { %v4970_v61 = vsel %vm4522_vm11, %v4962_v20, %v4944_v56  ;;  %v4618_v6 = vsel %vm4522_vm11, %v4610_v44, %v4592_v40 }
 0x626   : > { %v4978_v15 = vsel %vm4531_vm12, %v4970_v61, 1.0  ;;  %v4626_v24 = vsel %vm4531_vm12, %v4618_v6, 1.0  ;;  %v13662_v61 = vld [vmem:[#allocation357_spill] sm:$0xff] }
 0x627   : > { %5085 = vrot.lane.b32.xlu1 %v11759_v36, %s6384_s2  ;;  %6174 = vmatmul.mubr.msk.f32.gmra.mxu1 %vm4540_vm13, %v4978_v15 }
 0x628   : > { %6126 = vmatmul.mubr.msk.f32.gmra.mxu0 %vm4540_vm13, %v4626_v24  ;;  %v4914_v53 = vpop.permute.xlu1 %4913  ;;  %v4562_v36 = vpop.permute.xlu0 %4561  ;;  %5087 = vrot.lane.b32.xlu0 %v11796_v42, %s6384_s2  ;;  %v13666_v42 = vld [vmem:[#allocation109_spill] sm:$0xff] }
 0x629   : > { %v4611_v37 = vsel %vm4513_vm10, %v13658_v54, %v4562_v36  ;;  %v4963_v15 = vsel %vm4513_vm10, %v13664_v23, %v4914_v53 }
 0x62b   : > { %4765 = vrot.lane.b32.xlu1 %v13644_v8, %s6385_s26  ;;  %v13659_v8 = vld [vmem:[#allocation382_spill] sm:$0xff] }
 0x62c   : > { %v4594_v17 = vpop.permute.xlu1 %4593  ;;  %v4414_v45 = vsel %vm1200_vm5, %v4406_v14, %v13659_v8  ;;  %v4564_v56 = vpop.permute.xlu0 %4563  ;;  %4767 = vrot.lane.b32.xlu0 %v13646_v28, %s6385_s26  ;;  %v4407_v14 = vsel %vm1191_vm4, %v4399_v25, %v13670_v26 }
 0x62d   : > { %v4619_v20 = vsel %vm4522_vm11, %v4611_v37, %v4594_v17  ;;  %v4422_v33 = vsel %vm1209_vm6, %v4414_v45, %v13661_v50  ;;  %v4612_v36 = vsel %vm4513_vm10, %v13667_v10, %v4564_v56  ;;  %v4415_v54 = vsel %vm1200_vm5, %v4407_v14, %v13671_v31  ;;  %v6351_v37 = vld [vmem:[%s9684_s6 + $0x70] sm:$0xff]  ;;  %v13672_v17 = vld [vmem:[#allocation143_spill] sm:$0xff]  ;;  %v13673_v45 = vld [vmem:[#allocation122_spill] sm:$0xff]  ;;  %s12243_s6 = scalar_lea.vmem %s12402_s11, %s5994_s3 }
 0x62e   : > { %v4627_v44 = vsel %vm4531_vm12, %v4619_v20, 1.0  ;;  %v4430_v40 = vsel %vm1218_vm7, %v4422_v33, %v13662_v61  ;;  %v4392_v8 = vsel %vm1173_vm2, %v6351_v37, %v13672_v17  ;;  %v4423_v49 = vsel %vm1209_vm6, %v4415_v54, %v13673_v45  ;;  %v13675_v20 = vld [vmem:[#allocation129_spill] sm:$0xff]  ;;  %v13676_v50 = vld [vmem:[#allocation303_spill] sm:$0xff]  ;;  %v13677_v61 = vld [vmem:[#allocation334_spill] sm:$0xff] }
 0x62f   : > { %5117 = vrot.lane.b32.xlu1 %v4445_v7, %s6385_s26  ;;  %6128 = vmatprep.mubr.msk.f32.mxu0 %vm4540_vm13, %v4627_v44  ;;  %v4438_v11 = vsel %vm1227_vm8, %v4430_v40, %v13663_v43  ;;  %v4431_v56 = vsel %vm1218_vm7, %v4423_v49, %v13675_v20  ;;  %v13682_v10 = vld [vmem:[#allocation381_spill] sm:$0xff] }
 0x630   : > { %v4946_v6 = vpop.permute.xlu1 %4945  ;;  %v4446_v34 = vsel %vm1236_vm9, %v4438_v11, %v13665_v22  ;;  %v4916_v38 = vpop.permute.xlu0 %4915  ;;  %4737 = vrot.lane.b32.xlu0 %v11775_v60, %s6384_s2  ;;  %v13674_v60 = vld [vmem:[#allocation380_spill] sm:$0xff]  ;;  %v4439_v44 = vsel %vm1227_vm8, %v4431_v56, %v11250_v52  ;;  %v13678_v11 = vld [vmem:[#allocation335_spill] sm:$0xff]  ;;  %v13680_v52 = vld [vmem:[#allocation342_spill] sm:$0xff] }
 0x631   : > { %v4971_v24 = vsel %vm4522_vm11, %v4963_v15, %v4946_v6  ;;  %v4964_v21 = vsel %vm4513_vm10, %v13666_v42, %v4916_v38  ;;  %v4400_v7 = vsel %vm1182_vm3, %v4392_v8, %v13674_v60  ;;  %v4447_v15 = vsel %vm1236_vm9, %v4439_v44, %v11366_v30  ;;  %v13686_v8 = vld [vmem:[#allocation150_spill] sm:$0xff]  ;;  %v13688_v44 = vld [vmem:[#allocation67_spill] sm:$0xff] }
 0x632   : > { %v4979_v39 = vsel %vm4531_vm12, %v4971_v24, 1.0  ;;  %v4408_v33 = vsel %vm1191_vm4, %v4400_v7, %v13676_v50  ;;  %v13687_v56 = vld [vmem:[#allocation166_spill] sm:$0xff] }
 0x633   : > { %5119 = vrot.lane.b32.xlu1 %v4446_v34, %s6385_s26  ;;  %6176 = vmatprep.mubr.msk.f32.mxu1 %vm4540_vm13, %v4979_v39  ;;  %v13681_v39 = vld [vmem:[#allocation341_spill] sm:$0xff] }
 0x634   : > { %v4948_v53 = vpop.permute.xlu1 %4947  ;;  %v4596_v48 = vpop.permute.xlu0 %4595  ;;  %4739 = vrot.lane.b32.xlu0 %v11810_v51, %s6384_s2  ;;  %v13679_v51 = vld [vmem:[#allocation373_spill] sm:$0xff] }
 0x635   : > { %v4972_v58 = vsel %vm4522_vm11, %v4964_v21, %v4948_v53  ;;  %v4620_v28 = vsel %vm4522_vm11, %v4612_v36, %v4596_v48 }
 0x636   : > { %v4980_v35 = vsel %vm4531_vm12, %v4972_v58, 1.0  ;;  %v4628_v1 = vsel %vm4531_vm12, %v4620_v28, 1.0 }
 0x637   : > { %5089 = vrot.lane.b32.xlu1 %v11862_v55, %s6384_s2  ;;  %6177 = vmatmul.mubr.msk.f32.gmra.mxu1 %vm4540_vm13, %v4980_v35 }
 0x638   : > { %6129 = vmatmul.mubr.msk.f32.gmra.mxu0 %vm4540_vm13, %v4628_v1  ;;  %v4990_v5 = vpop.permute.xlu1 %4989  ;;  %v4638_v55 = vpop.permute.xlu0 %4637  ;;  %5091 = vrot.lane.b32.xlu0 %v11881_v59, %s6384_s2 }
 0x639   : > { %v4693_v40 = vsel %vm4513_vm10, %v13677_v61, %v4638_v55  ;;  %v5045_v21 = vsel %vm4513_vm10, %v13681_v39, %v4990_v5  ;;  %v13685_v5 = vld [vmem:[#allocation135_spill] sm:$0xff] }
 0x63a   : > { %v13690_v39 = vld [vmem:[#allocation403_spill] sm:$0xff] }
 0x63b   : > { %4769 = vrot.lane.b32.xlu1 %v13664_v23, %s6385_s26  ;;  %v4416_v23 = vsel %vm1200_vm5, %v4408_v33, %v13678_v11 }
 0x63c   : > { %v4670_v43 = vpop.permute.xlu1 %4669  ;;  %v4640_v22 = vpop.permute.xlu0 %4639  ;;  %v4424_v34 = vsel %vm1209_vm6, %v4416_v23, %v13679_v51  ;;  %4771 = vrot.lane.b32.xlu0 %v13666_v42, %s6385_s26  ;;  %v13689_v51 = vld [vmem:[#allocation315_spill] sm:$0xff] }
 0x63d   : > { %v4701_v6 = vsel %vm4522_vm11, %v4693_v40, %v4670_v43  ;;  %v4432_v38 = vsel %vm1218_vm7, %v4424_v34, %v13680_v52  ;;  %v4694_v35 = vsel %vm4513_vm10, %v13684_v4, %v4640_v22 }
 0x63e   : > { %v4709_v24 = vsel %vm4531_vm12, %v4701_v6, 1.0  ;;  %v4440_v30 = vsel %vm1227_vm8, %v4432_v38, %v11315_v12  ;;  %v13683_v12 = vld [vmem:[#allocation167_spill] sm:$0xff] }
 0x63f   : > { %5121 = vrot.lane.b32.xlu1 %v4447_v15, %s6385_s26  ;;  %6131 = vmatprep.mubr.msk.f32.mxu0 %vm4540_vm13, %v4709_v24  ;;  %v4448_v36 = vsel %vm1236_vm9, %v4440_v30, %v13682_v10 }
 0x640   : > { %v5022_v53 = vpop.permute.xlu1 %5021  ;;  %v4992_v48 = vpop.permute.xlu0 %4991 }
 0x641   : > { %v5053_v58 = vsel %vm4522_vm11, %v5045_v21, %v5022_v53  ;;  %v5046_v59 = vsel %vm4513_vm10, %v13683_v12, %v4992_v48  ;;  %v13691_v48 = vld [vmem:[#allocation411_spill] sm:$0xff] }
 0x642   : > { %v5061_v46 = vsel %vm4531_vm12, %v5053_v58, 1.0 }
 0x643   : > { %5123 = vrot.lane.b32.xlu1 %v4448_v36, %s6385_s26  ;;  %6179 = vmatprep.mubr.msk.f32.mxu1 %vm4540_vm13, %v5061_v46 }
 0x644   : > { %v5024_v32 = vpop.permute.xlu1 %5023  ;;  %v4672_v0 = vpop.permute.xlu0 %4671 }
 0x645   : > { %v5054_v28 = vsel %vm4522_vm11, %v5046_v59, %v5024_v32  ;;  %v4702_v1 = vsel %vm4522_vm11, %v4694_v35, %v4672_v0  ;;  %v13692_v59 = vld [vmem:[#allocation91_spill] sm:$0xff] }
 0x646   : > { %v5062_v25 = vsel %vm4531_vm12, %v5054_v28, 1.0  ;;  %v4710_v26 = vsel %vm4531_vm12, %v4702_v1, 1.0 }
 0x647   : > { %6180 = vmatmul.mubr.msk.f32.gmra.mxu1 %vm4540_vm13, %v5062_v25  ;;  %6132 = vmatmul.mubr.msk.f32.gmra.mxu0 %vm4540_vm13, %v4710_v26 }
 0x648   : > { %v4994_v42 = vpop.permute.xlu1 %4993  ;;  %v4642_v14 = vpop.permute.xlu0 %4641 }
 0x649   : > { %v4695_v31 = vsel %vm4513_vm10, %v13685_v5, %v4642_v14  ;;  %v5047_v45 = vsel %vm4513_vm10, %v13686_v8, %v4994_v42  ;;  %v13693_v42 = vld [vmem:[#allocation343_spill] sm:$0xff] }
 0x64c   : > { %v4674_v54 = vpop.permute.xlu1 %4673  ;;  %v4644_v37 = vpop.permute.xlu0 %4643 }
 0x64d   : > { %v4703_v55 = vsel %vm4522_vm11, %v4695_v31, %v4674_v54  ;;  %v4696_v61 = vsel %vm4513_vm10, %v13688_v44, %v4644_v37  ;;  %v13694_v37 = vld [vmem:[#allocation350_spill] sm:$0xff] }
 0x64e   : > { %v4711_v17 = vsel %vm4531_vm12, %v4703_v55, 1.0 }
 0x64f   : > { %6134 = vmatprep.mubr.msk.f32.mxu0 %vm4540_vm13, %v4711_v17 }
 0x650   : > { %v5026_v49 = vpop.permute.xlu1 %5025  ;;  %v4996_v7 = vpop.permute.xlu0 %4995 }
 0x651   : > { %v5055_v60 = vsel %vm4522_vm11, %v5047_v45, %v5026_v49  ;;  %v5048_v50 = vsel %vm4513_vm10, %v13687_v56, %v4996_v7  ;;  %v13695_v7 = vld [vmem:[#allocation358_spill] sm:$0xff] }
 0x652   : > { %v5063_v20 = vsel %vm4531_vm12, %v5055_v60, 1.0 }
 0x653   : > { %6182 = vmatprep.mubr.msk.f32.mxu1 %vm4540_vm13, %v5063_v20 }
 0x654   : > { %v5028_v33 = vpop.permute.xlu1 %5027  ;;  %v4676_v43 = vpop.permute.xlu0 %4675 }
 0x655   : > { %v5056_v40 = vsel %vm4522_vm11, %v5048_v50, %v5028_v33  ;;  %v4704_v23 = vsel %vm4522_vm11, %v4696_v61, %v4676_v43  ;;  %v13696_v50 = vld [vmem:[#allocation153_spill] sm:$0xff] }
 0x656   : > { %v5064_v11 = vsel %vm4531_vm12, %v5056_v40, 1.0  ;;  %v4712_v15 = vsel %vm4531_vm12, %v4704_v23, 1.0 }
 0x657   : > { %6183 = vmatmul.mubr.msk.f32.gmra.mxu1 %vm4540_vm13, %v5064_v11  ;;  %6135 = vmatmul.mubr.msk.f32.gmra.mxu0 %vm4540_vm13, %v4712_v15 }
 0x658   : > { %v4998_v6 = vpop.permute.xlu1 %4997  ;;  %v4646_v22 = vpop.permute.xlu0 %4645 }
 0x659   : > { %v4697_v34 = vsel %vm4513_vm10, %v13689_v51, %v4646_v22  ;;  %v5049_v21 = vsel %vm4513_vm10, %v13690_v39, %v4998_v6  ;;  %v13697_v6 = vld [vmem:[#allocation161_spill] sm:$0xff] }
 0x65c   : > { %v4678_v24 = vpop.permute.xlu1 %4677  ;;  %v4648_v38 = vpop.permute.xlu0 %4647 }
 0x65d   : > { %v4705_v52 = vsel %vm4522_vm11, %v4697_v34, %v4678_v24  ;;  %v4698_v32 = vsel %vm4513_vm10, %v13692_v59, %v4648_v38  ;;  %v13698_v38 = vld [vmem:[#allocation102_spill] sm:$0xff] }
 0x65e   : > { %v4713_v30 = vsel %vm4531_vm12, %v4705_v52, 1.0 }
 0x65f   : > { %6137 = vmatprep.mubr.msk.f32.mxu0 %vm4540_vm13, %v4713_v30 }
 0x660   : > { %v5030_v53 = vpop.permute.xlu1 %5029  ;;  %v5000_v36 = vpop.permute.xlu0 %4999 }
 0x661   : > { %v5057_v10 = vsel %vm4522_vm11, %v5049_v21, %v5030_v53  ;;  %v5050_v46 = vsel %vm4513_vm10, %v13691_v48, %v5000_v36 }
 0x662   : > { %v5065_v58 = vsel %vm4531_vm12, %v5057_v10, 1.0 }
 0x663   : > { %6185 = vmatprep.mubr.msk.f32.mxu1 %vm4540_vm13, %v5065_v58 }
 0x664   : > { %v4680_v35 = vpop.permute.xlu0 %4679 }
 0x665   : > { %v5032_v12 = vpop.permute.xlu1 %5031  ;;  %v4706_v0 = vsel %vm4522_vm11, %v4698_v32, %v4680_v35 }
 0x666   : > { %v5058_v4 = vsel %vm4522_vm11, %v5050_v46, %v5032_v12  ;;  %v4714_v25 = vsel %vm4531_vm12, %v4706_v0, 1.0 }
 0x667   : > { %v5066_v28 = vsel %vm4531_vm12, %v5058_v4, 1.0  ;;  %6138 = vmatmul.mubr.msk.f32.gmra.mxu0 %vm4540_vm13, %v4714_v25 }
 0x668   : > { %6186 = vmatmul.mubr.msk.f32.gmra.mxu1 %vm4540_vm13, %v5066_v28  ;;  %v4650_v26 = vpop.permute.xlu0 %4649 }
 0x669   : > { %v5002_v1 = vpop.permute.xlu1 %5001  ;;  %v4699_v14 = vsel %vm4513_vm10, %v13693_v42, %v4650_v26 }
 0x66a   : > { %v5051_v17 = vsel %vm4513_vm10, %v13694_v37, %v5002_v1 }
 0x66c   : > { %v4652_v54 = vpop.permute.xlu0 %4651 }
 0x66d   : > { %v4682_v5 = vpop.permute.xlu1 %4681  ;;  %v4700_v33 = vsel %vm4513_vm10, %v13696_v50, %v4652_v54 }
 0x66e   : > { %v4707_v31 = vsel %vm4522_vm11, %v4699_v14, %v4682_v5 }
 0x66f   : > { %v4715_v55 = vsel %vm4531_vm12, %v4707_v31, 1.0 }
 0x670   : > { %6140 = vmatprep.mubr.msk.f32.mxu0 %vm4540_vm13, %v4715_v55  ;;  %v5004_v49 = vpop.permute.xlu0 %5003 }
 0x671   : > { %v5034_v8 = vpop.permute.xlu1 %5033  ;;  %v5052_v20 = vsel %vm4513_vm10, %v13695_v7, %v5004_v49 }
 0x672   : > { %v5059_v45 = vsel %vm4522_vm11, %v5051_v17, %v5034_v8 }
 0x673   : > { %v5067_v60 = vsel %vm4531_vm12, %v5059_v45, 1.0 }
 0x674   : > { %6188 = vmatprep.mubr.msk.f32.mxu1 %vm4540_vm13, %v5067_v60  ;;  %v4684_v61 = vpop.permute.xlu0 %4683 }
 0x675   : > { %v5036_v56 = vpop.permute.xlu1 %5035  ;;  %v4708_v43 = vsel %vm4522_vm11, %v4700_v33, %v4684_v61 }
 0x676   : > { %v5060_v44 = vsel %vm4522_vm11, %v5052_v20, %v5036_v56  ;;  %v4716_v11 = vsel %vm4531_vm12, %v4708_v43, 1.0 }
 0x677   : > { %v5068_v40 = vsel %vm4531_vm12, %v5060_v44, 1.0  ;;  %6141 = vmatmul.mubr.msk.f32.gmra.mxu0 %vm4540_vm13, %v4716_v11 }
 0x678   : > { %6189 = vmatmul.mubr.msk.f32.gmra.mxu1 %vm4540_vm13, %v5068_v40  ;;  %v4726_v15 = vpop.permute.xlu0 %4725 }
 0x679   : > { %v5078_v23 = vpop.permute.xlu1 %5077  ;;  %v4781_v22 = vsel %vm4513_vm10, %v13697_v6, %v4726_v15 }
 0x67a   : > { %v5133_v30 = vsel %vm4513_vm10, %v13698_v38, %v5078_v23 }
 0x67b   : > { %v6109_v36 = vpop.f32.mrf.mxu0 }
 0x67c   : > { %v4728_v24 = vpop.permute.xlu0 %4727  ;;  %5551 = vst [vmem:[%s12243_s6 + $0x8] sm:$0xff] %v6109_v36 }
 0x67d   : > { %v4758_v51 = vpop.permute.xlu1 %4757  ;;  %v4782_v46 = vsel %vm4513_vm10, %v10974_v3, %v4728_v24  ;;  %v5231_v32 = vpop.f32.mrf.mxu0 }
 0x67e   : > { %v4789_v34 = vsel %vm4522_vm11, %v4781_v22, %v4758_v51  ;;  %5550 = vst [vmem:[%s12243_s6] sm:$0xff] %v5231_v32 }
 0x67f   : > { %v4797_v52 = vsel %vm4531_vm12, %v4789_v34, 1.0 }
 0x680   : > { %6143 = vmatprep.mubr.msk.f32.mxu0 %vm4540_vm13, %v4797_v52  ;;  %v5080_v53 = vpop.permute.xlu0 %5079 }
 0x681   : > { %v5110_v39 = vpop.permute.xlu1 %5109  ;;  %v5134_v58 = vsel %vm4513_vm10, %v10965_v41, %v5080_v53 }
 0x682   : > { %v5141_v21 = vsel %vm4522_vm11, %v5133_v30, %v5110_v39  ;;  %v6157_v41 = vpop.f32.mrf.mxu1 }
 0x683   : > { %v5149_v10 = vsel %vm4531_vm12, %v5141_v21, 1.0  ;;  %5583 = vst [vmem:[%s12243_s6 + $0x108] sm:$0xff] %v6157_v41 }
 0x684   : > { %6191 = vmatprep.mubr.msk.f32.mxu1 %vm4540_vm13, %v5149_v10  ;;  %v4760_v59 = vpop.permute.xlu0 %4759  ;;  %v5391_v3 = vpop.f32.mrf.mxu1 }
 0x685   : > { %v5112_v48 = vpop.permute.xlu1 %5111  ;;  %v4790_v35 = vsel %vm4522_vm11, %v4782_v46, %v4760_v59  ;;  %5582 = vst [vmem:[%s12243_s6 + $0x100] sm:$0xff] %v5391_v3 }
 0x686   : > { %v5142_v12 = vsel %vm4522_vm11, %v5134_v58, %v5112_v48  ;;  %v4798_v28 = vsel %vm4531_vm12, %v4790_v35, 1.0 }
 0x687   : > { %v5150_v4 = vsel %vm4531_vm12, %v5142_v12, 1.0  ;;  %6144 = vmatmul.mubr.msk.f32.gmra.mxu0 %vm4540_vm13, %v4798_v28 }
 0x688   : > { %6192 = vmatmul.mubr.msk.f32.gmra.mxu1 %vm4540_vm13, %v5150_v4  ;;  %v4730_v25 = vpop.permute.xlu0 %4729 }
 0x689   : > { %v5082_v0 = vpop.permute.xlu1 %5081  ;;  %v4783_v1 = vsel %vm4513_vm10, %v11011_v13, %v4730_v25 }
 0x68a   : > { %v5135_v31 = vsel %vm4513_vm10, %v11047_v47, %v5082_v0 }
 0x68c   : > { %v4732_v14 = vpop.permute.xlu0 %4731 }
 0x68d   : > { %v4762_v26 = vpop.permute.xlu1 %4761  ;;  %v4784_v45 = vsel %vm4513_vm10, %v11082_v63, %v4732_v14 }
 0x68e   : > { %v4791_v42 = vsel %vm4522_vm11, %v4783_v1, %v4762_v26 }
 0x68f   : > { %v4799_v5 = vsel %vm4531_vm12, %v4791_v42, 1.0 }
 0x690   : > { %6146 = vmatprep.mubr.msk.f32.mxu0 %vm4540_vm13, %v4799_v5  ;;  %v5084_v37 = vpop.permute.xlu0 %5083 }
 0x691   : > { %v5114_v54 = vpop.permute.xlu1 %5113  ;;  %v5136_v13 = vsel %vm4513_vm10, %v11073_v62, %v5084_v37 }
 0x692   : > { %v5143_v55 = vsel %vm4522_vm11, %v5135_v31, %v5114_v54 }
 0x693   : > { %v5151_v17 = vsel %vm4531_vm12, %v5143_v55, 1.0  ;;  %v6160_v56 = vpop.f32.mrf.mxu1 }
 0x694   : > { %6194 = vmatprep.mubr.msk.f32.mxu1 %vm4540_vm13, %v5151_v17  ;;  %v4764_v49 = vpop.permute.xlu0 %4763  ;;  %v6112_v50 = vpop.f32.mrf.mxu0  ;;  %5585 = vst [vmem:[%s12243_s6 + $0x118] sm:$0xff] %v6160_v56 }
 0x695   : > { %v5116_v8 = vpop.permute.xlu1 %5115  ;;  %v4792_v7 = vsel %vm4522_vm11, %v4784_v45, %v4764_v49  ;;  %5553 = vst [vmem:[%s12243_s6 + $0x18] sm:$0xff] %v6112_v50  ;;  %v5401_v33 = vpop.f32.mrf.mxu1 }
 0x696   : > { %v5144_v47 = vsel %vm4522_vm11, %v5136_v13, %v5116_v8  ;;  %v4800_v20 = vsel %vm4531_vm12, %v4792_v7, 1.0  ;;  %v5241_v44 = vpop.f32.mrf.mxu0  ;;  %5584 = vst [vmem:[%s12243_s6 + $0x110] sm:$0xff] %v5401_v33 }
 0x697   : > { %v5152_v60 = vsel %vm4531_vm12, %v5144_v47, 1.0  ;;  %6147 = vmatmul.mubr.msk.f32.gmra.mxu0 %vm4540_vm13, %v4800_v20  ;;  %5552 = vst [vmem:[%s12243_s6 + $0x10] sm:$0xff] %v5241_v44 }
 0x698   : > { %6195 = vmatmul.mubr.msk.f32.gmra.mxu1 %vm4540_vm13, %v5152_v60  ;;  %v4734_v63 = vpop.permute.xlu0 %4733 }
 0x699   : > { %v5086_v62 = vpop.permute.xlu1 %5085  ;;  %v4785_v61 = vsel %vm4513_vm10, %v11119_v9, %v4734_v63 }
 0x69a   : > { %v5137_v15 = vsel %vm4513_vm10, %v11161_v57, %v5086_v62 }
 0x69c   : > { %v4736_v11 = vpop.permute.xlu0 %4735 }
 0x69d   : > { %v4766_v40 = vpop.permute.xlu1 %4765  ;;  %v4786_v52 = vsel %vm4513_vm10, %v11216_v29, %v4736_v11 }
 0x69e   : > { %v4793_v43 = vsel %vm4522_vm11, %v4785_v61, %v4766_v40 }
 0x69f   : > { %v4801_v23 = vsel %vm4531_vm12, %v4793_v43, 1.0 }
 0x6a0   : > { %6149 = vmatprep.mubr.msk.f32.mxu0 %vm4540_vm13, %v4801_v23  ;;  %v5088_v51 = vpop.permute.xlu0 %5087 }
 0x6a1   : > { %v5118_v6 = vpop.permute.xlu1 %5117  ;;  %v5138_v9 = vsel %vm4513_vm10, %v11204_v2, %v5088_v51 }
 0x6a2   : > { %v5145_v22 = vsel %vm4522_vm11, %v5137_v15, %v5118_v6 }
 0x6a3   : > { %v5153_v34 = vsel %vm4531_vm12, %v5145_v22, 1.0 }
 0x6a4   : > { %6197 = vmatprep.mubr.msk.f32.mxu1 %vm4540_vm13, %v5153_v34  ;;  %v4768_v38 = vpop.permute.xlu0 %4767 }
 0x6a5   : > { %v5120_v24 = vpop.permute.xlu1 %5119  ;;  %v4794_v39 = vsel %vm4522_vm11, %v4786_v52, %v4768_v38 }
 0x6a6   : > { %v5146_v57 = vsel %vm4522_vm11, %v5138_v9, %v5120_v24  ;;  %v4802_v21 = vsel %vm4531_vm12, %v4794_v39, 1.0  ;;  %v6163_v53 = vpop.f32.mrf.mxu1 }
 0x6a7   : > { %v5154_v30 = vsel %vm4531_vm12, %v5146_v57, 1.0  ;;  %v6115_v10 = vpop.f32.mrf.mxu0  ;;  %6150 = vmatmul.mubr.msk.f32.gmra.mxu0 %vm4540_vm13, %v4802_v21  ;;  %5587 = vst [vmem:[%s12243_s6 + $0x128] sm:$0xff] %v6163_v53 }
 0x6a8   : > { %6198 = vmatmul.mubr.msk.f32.gmra.mxu1 %vm4540_vm13, %v5154_v30  ;;  %5555 = vst [vmem:[%s12243_s6 + $0x28] sm:$0xff] %v6115_v10  ;;  %v4738_v29 = vpop.permute.xlu0 %4737  ;;  %v5411_v36 = vpop.f32.mrf.mxu1 }
 0x6a9   : > { %v5090_v2 = vpop.permute.xlu1 %5089  ;;  %v5251_v58 = vpop.f32.mrf.mxu0  ;;  %5586 = vst [vmem:[%s12243_s6 + $0x120] sm:$0xff] %v5411_v36  ;;  %v4787_v48 = vsel %vm4513_vm10, %v11271_v16, %v4738_v29 }
 0x6aa   : > { %5554 = vst [vmem:[%s12243_s6 + $0x20] sm:$0xff] %v5251_v58  ;;  %v5139_v4 = vsel %vm4513_vm10, %v11324_v19, %v5090_v2 }
 0x6ac   : > { %v4740_v59 = vpop.permute.xlu0 %4739 }
 0x6ad   : > { %v4770_v46 = vpop.permute.xlu1 %4769  ;;  %v4788_v3 = vsel %vm4513_vm10, %v11373_v27, %v4740_v59 }
 0x6ae   : > { %v4795_v12 = vsel %vm4522_vm11, %v4787_v48, %v4770_v46 }
 0x6af   : > { %v4803_v32 = vsel %vm4531_vm12, %v4795_v12, 1.0 }
 0x6b0   : > { %6152 = vmatprep.mubr.msk.f32.mxu0 %vm4540_vm13, %v4803_v32  ;;  %v5092_v41 = vpop.permute.xlu0 %5091 }
 0x6b1   : > { %v5122_v35 = vpop.permute.xlu1 %5121  ;;  %v5140_v16 = vsel %vm4513_vm10, %v11363_v18, %v5092_v41 }
 0x6b2   : > { %v5147_v28 = vsel %vm4522_vm11, %v5139_v4, %v5122_v35 }
 0x6b3   : > { %v5155_v0 = vsel %vm4531_vm12, %v5147_v28, 1.0 }
 0x6b4   : > { %6200 = vmatprep.mubr.msk.f32.mxu1 %vm4540_vm13, %v5155_v0  ;;  %v4772_v1 = vpop.permute.xlu0 %4771 }
 0x6b5   : > { %v5124_v25 = vpop.permute.xlu1 %5123  ;;  %v4796_v42 = vsel %vm4522_vm11, %v4788_v3, %v4772_v1 }
 0x6b6   : > { %v5148_v19 = vsel %vm4522_vm11, %v5140_v16, %v5124_v25  ;;  %v4804_v14 = vsel %vm4531_vm12, %v4796_v42, 1.0 }
 0x6b7   : > { %v5156_v26 = vsel %vm4531_vm12, %v5148_v19, 1.0  ;;  %6153 = vmatmul.mubr.msk.f32.gmra.mxu0 %vm4540_vm13, %v4804_v14 }
 0x6b8   : > { %6201 = vmatmul.mubr.msk.f32.gmra.mxu1 %vm4540_vm13, %v5156_v26 }
 0x6bb   : > { %v6166_v5 = vpop.f32.mrf.mxu1 }
 0x6bc   : > { %v6118_v18 = vpop.f32.mrf.mxu0  ;;  %5589 = vst [vmem:[%s12243_s6 + $0x138] sm:$0xff] %v6166_v5 }
 0x6bd   : > { %5557 = vst [vmem:[%s12243_s6 + $0x38] sm:$0xff] %v6118_v18  ;;  %v5421_v27 = vpop.f32.mrf.mxu1 }
 0x6be   : > { %v5261_v31 = vpop.f32.mrf.mxu0  ;;  %5588 = vst [vmem:[%s12243_s6 + $0x130] sm:$0xff] %v5421_v27 }
 0x6bf   : > { %5556 = vst [vmem:[%s12243_s6 + $0x30] sm:$0xff] %v5261_v31 }
 0x6c7   : > { %v6169_v54 = vpop.f32.mrf.mxu1 }
 0x6c8   : > { %v6121_v55 = vpop.f32.mrf.mxu0  ;;  %5591 = vst [vmem:[%s12243_s6 + $0x148] sm:$0xff] %v6169_v54 }
 0x6c9   : > { %5559 = vst [vmem:[%s12243_s6 + $0x48] sm:$0xff] %v6121_v55  ;;  %v5431_v37 = vpop.f32.mrf.mxu1 }
 0x6ca   : > { %v5271_v17 = vpop.f32.mrf.mxu0  ;;  %5590 = vst [vmem:[%s12243_s6 + $0x140] sm:$0xff] %v5431_v37 }
 0x6cb   : > { %5558 = vst [vmem:[%s12243_s6 + $0x40] sm:$0xff] %v5271_v17 }
 0x6d7   : > { %v6172_v13 = vpop.f32.mrf.mxu1 }
 0x6d8   : > { %v6124_v8 = vpop.f32.mrf.mxu0  ;;  %5593 = vst [vmem:[%s12243_s6 + $0x158] sm:$0xff] %v6172_v13 }
 0x6d9   : > { %5561 = vst [vmem:[%s12243_s6 + $0x58] sm:$0xff] %v6124_v8  ;;  %v5441_v45 = vpop.f32.mrf.mxu1 }
 0x6da   : > { %v5281_v47 = vpop.f32.mrf.mxu0  ;;  %5592 = vst [vmem:[%s12243_s6 + $0x150] sm:$0xff] %v5441_v45 }
 0x6db   : > { %5560 = vst [vmem:[%s12243_s6 + $0x50] sm:$0xff] %v5281_v47 }
 0x6e7   : > { %v6175_v49 = vpop.f32.mrf.mxu1 }
 0x6e8   : > { %v6127_v60 = vpop.f32.mrf.mxu0  ;;  %5595 = vst [vmem:[%s12243_s6 + $0x168] sm:$0xff] %v6175_v49 }
 0x6e9   : > { %5563 = vst [vmem:[%s12243_s6 + $0x68] sm:$0xff] %v6127_v60  ;;  %v5451_v7 = vpop.f32.mrf.mxu1 }
 0x6ea   : > { %v5291_v20 = vpop.f32.mrf.mxu0  ;;  %5594 = vst [vmem:[%s12243_s6 + $0x160] sm:$0xff] %v5451_v7 }
 0x6eb   : > { %5562 = vst [vmem:[%s12243_s6 + $0x60] sm:$0xff] %v5291_v20 }
 0x6f7   : > { %v6178_v56 = vpop.f32.mrf.mxu1 }
 0x6f8   : > { %v6130_v50 = vpop.f32.mrf.mxu0  ;;  %5597 = vst [vmem:[%s12243_s6 + $0x178] sm:$0xff] %v6178_v56 }
 0x6f9   : > { %5565 = vst [vmem:[%s12243_s6 + $0x78] sm:$0xff] %v6130_v50  ;;  %v5461_v62 = vpop.f32.mrf.mxu1 }
 0x6fa   : > { %v5301_v63 = vpop.f32.mrf.mxu0  ;;  %5596 = vst [vmem:[%s12243_s6 + $0x170] sm:$0xff] %v5461_v62 }
 0x6fb   : > { %5564 = vst [vmem:[%s12243_s6 + $0x70] sm:$0xff] %v5301_v63 }
 0x707   : > { %v6181_v33 = vpop.f32.mrf.mxu1  ;;  %v6133_v44 = vpop.f32.mrf.mxu0 }
 0x708   : > { %5599 = vst [vmem:[%s12243_s6 + $0x188] sm:$0xff] %v6181_v33  ;;  %5567 = vst [vmem:[%s12243_s6 + $0x88] sm:$0xff] %v6133_v44 }
 0x709   : > { %v5471_v61 = vpop.f32.mrf.mxu1  ;;  %v5311_v40 = vpop.f32.mrf.mxu0 }
 0x70a   : > { %5598 = vst [vmem:[%s12243_s6 + $0x180] sm:$0xff] %v5471_v61  ;;  %5566 = vst [vmem:[%s12243_s6 + $0x80] sm:$0xff] %v5311_v40 }
 0x717   : > { %v6184_v43 = vpop.f32.mrf.mxu1  ;;  %v6136_v11 = vpop.f32.mrf.mxu0 }
 0x718   : > { %5601 = vst [vmem:[%s12243_s6 + $0x198] sm:$0xff] %v6184_v43  ;;  %5569 = vst [vmem:[%s12243_s6 + $0x98] sm:$0xff] %v6136_v11 }
 0x719   : > { %v5481_v23 = vpop.f32.mrf.mxu1  ;;  %v5321_v15 = vpop.f32.mrf.mxu0 }
 0x71a   : > { %5600 = vst [vmem:[%s12243_s6 + $0x190] sm:$0xff] %v5481_v23  ;;  %5568 = vst [vmem:[%s12243_s6 + $0x90] sm:$0xff] %v5321_v15 }
 0x727   : > { %v6139_v22 = vpop.f32.mrf.mxu0 }
 0x728   : > { %v6187_v6 = vpop.f32.mrf.mxu1  ;;  %5571 = vst [vmem:[%s12243_s6 + $0xa8] sm:$0xff] %v6139_v22 }
 0x729   : > { %5603 = vst [vmem:[%s12243_s6 + $0x1a8] sm:$0xff] %v6187_v6  ;;  %v5331_v34 = vpop.f32.mrf.mxu0 }
 0x72a   : > { %v5491_v51 = vpop.f32.mrf.mxu1  ;;  %5570 = vst [vmem:[%s12243_s6 + $0xa0] sm:$0xff] %v5331_v34 }
 0x72b   : > { %5602 = vst [vmem:[%s12243_s6 + $0x1a0] sm:$0xff] %v5491_v51 }
 0x737   : > { %v6142_v24 = vpop.f32.mrf.mxu0 }
 0x738   : > { %v6190_v9 = vpop.f32.mrf.mxu1  ;;  %5573 = vst [vmem:[%s12243_s6 + $0xb8] sm:$0xff] %v6142_v24 }
 0x739   : > { %5605 = vst [vmem:[%s12243_s6 + $0x1b8] sm:$0xff] %v6190_v9  ;;  %v5341_v57 = vpop.f32.mrf.mxu0 }
 0x73a   : > { %v5501_v52 = vpop.f32.mrf.mxu1  ;;  %5572 = vst [vmem:[%s12243_s6 + $0xb0] sm:$0xff] %v5341_v57 }
 0x73b   : > { %5604 = vst [vmem:[%s12243_s6 + $0x1b0] sm:$0xff] %v5501_v52 }
 0x747   : > { %v6145_v30 = vpop.f32.mrf.mxu0 }
 0x748   : > { %v6193_v38 = vpop.f32.mrf.mxu1  ;;  %5575 = vst [vmem:[%s12243_s6 + $0xc8] sm:$0xff] %v6145_v30 }
 0x749   : > { %5607 = vst [vmem:[%s12243_s6 + $0x1c8] sm:$0xff] %v6193_v38  ;;  %v5351_v21 = vpop.f32.mrf.mxu0 }
 0x74a   : > { %v5511_v39 = vpop.f32.mrf.mxu1  ;;  %5574 = vst [vmem:[%s12243_s6 + $0xc0] sm:$0xff] %v5351_v21 }
 0x74b   : > { %5606 = vst [vmem:[%s12243_s6 + $0x1c0] sm:$0xff] %v5511_v39 }
 0x757   : > { %v6148_v10 = vpop.f32.mrf.mxu0 }
 0x758   : > { %v6196_v53 = vpop.f32.mrf.mxu1  ;;  %5577 = vst [vmem:[%s12243_s6 + $0xd8] sm:$0xff] %v6148_v10 }
 0x759   : > { %5609 = vst [vmem:[%s12243_s6 + $0x1d8] sm:$0xff] %v6196_v53  ;;  %v5361_v29 = vpop.f32.mrf.mxu0 }
 0x75a   : > { %v5521_v2 = vpop.f32.mrf.mxu1  ;;  %5576 = vst [vmem:[%s12243_s6 + $0xd0] sm:$0xff] %v5361_v29 }
 0x75b   : > { %5608 = vst [vmem:[%s12243_s6 + $0x1d0] sm:$0xff] %v5521_v2 }
 0x767   : > { %v6151_v58 = vpop.f32.mrf.mxu0 }
 0x768   : > { %v6199_v36 = vpop.f32.mrf.mxu1  ;;  %5579 = vst [vmem:[%s12243_s6 + $0xe8] sm:$0xff] %v6151_v58 }
 0x769   : > { %5611 = vst [vmem:[%s12243_s6 + $0x1e8] sm:$0xff] %v6199_v36  ;;  %v5371_v46 = vpop.f32.mrf.mxu0 }
 0x76a   : > { %v5531_v48 = vpop.f32.mrf.mxu1  ;;  %5578 = vst [vmem:[%s12243_s6 + $0xe0] sm:$0xff] %v5371_v46 }
 0x76b   : > { %5610 = vst [vmem:[%s12243_s6 + $0x1e0] sm:$0xff] %v5531_v48 }
 0x777   : > { %v6154_v59 = vpop.f32.mrf.mxu0 }
 0x778   : > { %v6202_v12 = vpop.f32.mrf.mxu1  ;;  %5581 = vst [vmem:[%s12243_s6 + $0xf8] sm:$0xff] %v6154_v59 }
 0x779   : > { %5613 = vst [vmem:[%s12243_s6 + $0x1f8] sm:$0xff] %v6202_v12  ;;  %v5381_v4 = vpop.f32.mrf.mxu0 }
 0x77a   : > { %v5541_v32 = vpop.f32.mrf.mxu1  ;;  %5580 = vst [vmem:[%s12243_s6 + $0xf0] sm:$0xff] %v5381_v4 }
 0x77b   : > { %5612 = vst [vmem:[%s12243_s6 + $0x1f0] sm:$0xff] %v5541_v32 }
 0x77c PF: > { %s21_s19 = sadd.s32 1, %s6374_s19   ;;  %s13699_s17 = smov %s6370_s18 }
 0x77d   : > { %p18_p5 = scmp.ge.s32.totalorder %s21_s19, 4   ;;  %s13700_s18 = smov %s13702_s20 }
 0x77f   :  { %20 = sbr.rel (!%p18_p5) target bundleno = 8 (0x8), region = 121 }

</bundles_post_ra>
